<compile_context>
chip_gen: v5e
topology: v5e:2x2
jax: 0.10.0
libtpu: 0.0.40
codegen_flags: <defaults>
</compile_context>

<pallas_src>
import functools

import numpy as np
import jax
import jax.numpy as jnp
from jax.experimental import pallas as pl
from jax.experimental.pallas import tpu as pltpu

LRELU_SLOPE = 0.1
_ALIGN = 16  # sublane alignment safe for both f32 (8,128) and bf16 (16,128) tiles


def get_padding(kernel_size, dilation=1):
    return int((kernel_size * dilation - dilation) / 2)


def _ru(v, m):
    return ((v + m - 1) // m) * m


# ----------------------------------------------------------------------------
# Generic Pallas conv kernel (phased, per-tap matmul accumulation, fused epilogue)
# ----------------------------------------------------------------------------
def _conv_kernel(*refs, K, dilation, phase_offs, pre_slope, post_tanh, post_scale,
                 has_halo, has_res, has_res2):
    # refs: x0 (1, T_tile, Cin), [x_halo (1, halo_pad, Cin)], w (P, K, Cin, Cout),
    #       bias (1, Cout) f32, [res (1, T_tile, P*Cout)], [res2 (...)],
    #       out (1, T_tile, P*Cout)
    idx = 0
    x_ref = refs[idx]; idx += 1
    xh_ref = None
    if has_halo:
        xh_ref = refs[idx]; idx += 1
    w_ref = refs[idx]; idx += 1
    b_ref = refs[idx]; idx += 1
    res_ref = None
    if has_res:
        res_ref = refs[idx]; idx += 1
    res2_ref = None
    if has_res2:
        res2_ref = refs[idx]; idx += 1
    o_ref = refs[idx]

    T_tile = o_ref.shape[1]
    P = len(phase_offs)
    Cin = x_ref.shape[2]
    Cout = w_ref.shape[3]

    x = x_ref[0].astype(jnp.float32)                         # (T_tile, Cin)
    if has_halo:                                             # small halo slab only
        x = jnp.concatenate([x, xh_ref[0].astype(jnp.float32)], axis=0)
    if pre_slope is not None:                                # fused LeakyReLU (VPU)
        x = jnp.where(x >= 0, x, jnp.float32(pre_slope) * x)

    use_mxu = (Cin > 1) and (Cout > 1)
    x_src = x.astype(jnp.bfloat16) if use_mxu else x         # bf16 only feeds the MXU
    bias = b_ref[...]                                        # (1, Cout) f32

    for p in range(P):
        off = phase_offs[p]
        acc = None
        for k in range(K):                                   # K accumulated matmuls,
            s = off + k * dilation                           # no lane-axis im2col concat
            xk = x_src[s:s + T_tile, :]
            wk = w_ref[p, k]                                 # (Cin, Cout)
            if use_mxu:
                part = jnp.dot(xk, wk, preferred_element_type=jnp.float32)
            elif Cin == 1:                                   # Conv1d(1 -> Cout)
                part = xk * wk.astype(jnp.float32)
            else:                                            # Cout == 1: lane reduce
                part = jnp.sum(xk * wk[:, 0].astype(jnp.float32)[None, :],
                               axis=-1, keepdims=True)
            acc = part if acc is None else acc + part
        y = acc + bias
        if has_res:
            r = res_ref[0] if P == 1 else res_ref[0, :, p * Cout:(p + 1) * Cout]
            y = y + r.astype(jnp.float32)                    # fused residual add
        if post_scale != 1.0:
            y = y * jnp.float32(post_scale)                  # fused 1 / num_kernels
        if has_res2:
            r2 = res2_ref[0] if P == 1 else res2_ref[0, :, p * Cout:(p + 1) * Cout]
            y = y + r2.astype(jnp.float32)                   # fused running-xs add
        if post_tanh:
            y = jnp.tanh(y)
        if P == 1:
            o_ref[0] = y.astype(o_ref.dtype)
        else:                                                # phase -> static lane slice
            o_ref[0, :, p * Cout:(p + 1) * Cout] = y.astype(o_ref.dtype)


def conv_general(x, w_pkc, bias, *, K, dilation=1, phase_offs=(0,), pre_slope=None,
                 post_tanh=False, post_scale=1.0, res=None, res2=None,
                 out_dtype=jnp.bfloat16, t_tile=1024):
    """x: (B, T_in, Cin) already padded so output row t of phase p reads
    x[t + phase_offs[p] + k*dilation].  w_pkc: (P, K, Cin, Cout) prepared at
    build time.  Returns (B, T_out, P*Cout) with T_out = T_in - halo."""
    B, T_in, Cin = x.shape
    P, Kw, Cin_w, Cout = w_pkc.shape
    assert Kw == K and Cin_w == Cin, (w_pkc.shape, K, Cin)
    halo = max(phase_offs) + (K - 1) * dilation
    T_out = T_in - halo
    assert T_out > 0

    has_halo = halo > 0
    halo_pad = _ru(halo, _ALIGN) if has_halo else 0
    t_eff = max(min(t_tile, _ru(T_out, _ALIGN)), _ALIGN)
    if has_halo:
        t_eff = _ru(t_eff, halo_pad)                 # keep t_eff a multiple of halo_pad
    n_t = -(-T_out // t_eff)
    T_out_pad = n_t * t_eff
    T_in_pad = T_out_pad + halo_pad                  # last tile's halo fetch stays in bounds

    if T_in_pad != T_in:
        # TODO(synk): this pad (and the per-conv boundary pad in the wrappers) is
        # still one XLA pass per conv; it could be folded into the kernel with
        # first/last-tile masking.
        x = jnp.pad(x, ((0, 0), (0, T_in_pad - T_in), (0, 0)))

    Cout_t = P * Cout
    in_arrays = [x]
    in_specs = [pl.BlockSpec((1, t_eff, Cin), lambda b, t: (b, t, 0))]
    if has_halo:
        ratio = t_eff // halo_pad
        in_arrays.append(x)                          # small halo slab, not a full tile
        in_specs.append(pl.BlockSpec((1, halo_pad, Cin),
                                     lambda b, t, r=ratio: (b, (t + 1) * r, 0)))
    in_arrays += [w_pkc, bias]
    in_specs += [pl.BlockSpec((P, K, Cin, Cout), lambda b, t: (0, 0, 0, 0)),
                 pl.BlockSpec((1, Cout), lambda b, t: (0, 0))]

    def _pad_time(a):
        if a.shape[1] != T_out_pad:
            a = jnp.pad(a, ((0, 0), (0, T_out_pad - a.shape[1]), (0, 0)))
        return a

    has_res, has_res2 = res is not None, res2 is not None
    for r in (res, res2):
        if r is not None:
            in_arrays.append(_pad_time(r))
            in_specs.append(pl.BlockSpec((1, t_eff, Cout_t), lambda b, t: (b, t, 0)))

    kern = functools.partial(
        _conv_kernel, K=K, dilation=dilation, phase_offs=tuple(phase_offs),
        pre_slope=pre_slope, post_tanh=post_tanh, post_scale=float(post_scale),
        has_halo=has_halo, has_res=has_res, has_res2=has_res2)

    y = pl.pallas_call(
        kern,
        out_shape=jax.ShapeDtypeStruct((B, T_out_pad, Cout_t), out_dtype),
        grid=(B, n_t),
        in_specs=in_specs,
        out_specs=pl.BlockSpec((1, t_eff, Cout_t), lambda b, t: (b, t, 0)),
        compiler_params=pltpu.CompilerParams(
            dimension_semantics=("parallel", "parallel"),
            vmem_limit_bytes=32 * 1024 * 1024),
    )(*in_arrays)
    return y[:, :T_out, :] if T_out_pad != T_out else y


# ----------------------------------------------------------------------------
# Conv wrappers (glue is plain JAX; all heavy math goes through the kernel)
# ----------------------------------------------------------------------------
def conv1d_p(x, prm, *, dilation=1, pre_slope=None, post_tanh=False, post_scale=1.0,
             res=None, res2=None, out_dtype=jnp.bfloat16, t_tile=1024):
    w, b = prm["w"], prm["b"]
    K = w.shape[1]
    pad = get_padding(K, dilation)
    xp = jnp.pad(x, ((0, 0), (pad, pad), (0, 0))) if pad else x
    return conv_general(xp, w, b, K=K, dilation=dilation, pre_slope=pre_slope,
                        post_tanh=post_tanh, post_scale=post_scale, res=res,
                        res2=res2, out_dtype=out_dtype, t_tile=t_tile)


def conv_transpose1d_p(x, prm, *, stride, padding, pre_slope=None,
                       out_dtype=jnp.bfloat16, t_tile=1024):
    """Polyphase ConvTranspose1d.  prm['w']: (u, M, Cin, Cout) prepared taps."""
    w, b = prm["w"], prm["b"]
    u, M, Cin, Cout = w.shape
    assert u == stride
    dq = [(r + padding) // u for r in range(u)]
    Lpad = max(max(M - 1 - q, 0) for q in dq)
    Rpad = max(max(q, 0) for q in dq)
    phase_offs = tuple(q - (M - 1) + Lpad for q in dq)
    xp = jnp.pad(x, ((0, 0), (Lpad, Rpad), (0, 0)))
    B, T = x.shape[0], x.shape[1]
    y = conv_general(xp, w, b, K=M, dilation=1, phase_offs=phase_offs,
                     pre_slope=pre_slope, out_dtype=out_dtype, t_tile=t_tile)
    # out[:, t*u + r, :] = y[:, t, r*Cout:(r+1)*Cout]  (free reshape interleave)
    return y.reshape(B, T, u, Cout).reshape(B, T * u, Cout)


def noise_conv_p(har, prm, *, stride, res, out_dtype=jnp.bfloat16, t_tile=1024):
    """Strided Conv1d(1 -> Cout) on the harmonic source, computed directly (only
    every stride-th output); the upsampled activation `res` is fused as a residual."""
    w, b = prm["w"], prm["b"]
    Cin_w = w.shape[2]
    B, L, _ = har.shape
    if Cin_w == 1:                                           # kernel_size == 1 case
        return conv_general(har, w, b, K=1, res=res, out_dtype=out_dtype,
                            t_tile=t_tile)
    s = stride
    K = Cin_w
    assert K == 2 * s, "HiFiGAN noise conv has kernel_size == 2 * stride"
    pad = s // 2
    hp = jnp.pad(har[:, :, 0], ((0, 0), (pad, pad)))
    T_out = (L + 2 * pad - K) // s + 1
    cols = [hp[:, j * s: j * s + T_out * s].reshape(B, T_out, s) for j in range(2)]
    col = jnp.concatenate(cols, axis=-1)                     # (B, T_out, K) windows
    return conv_general(col, w, b, K=1, res=res, out_dtype=out_dtype, t_tile=t_tile)


# ----------------------------------------------------------------------------
# Model pieces
# ----------------------------------------------------------------------------
def resblock1_forward(x, rbp, dilations, scale, xs_prev, t_tile):
    n = len(dilations)
    for idx, d in enumerate(dilations):
        last = idx == n - 1
        xt = conv1d_p(x, rbp["convs1"][idx], dilation=d, pre_slope=LRELU_SLOPE,
                      t_tile=t_tile)
        # residual add, 1/num_kernels scale and the running xs accumulation are all
        # fused into the epilogue of the last conv2 of the block.
        x = conv1d_p(xt, rbp["convs2"][idx], dilation=1, pre_slope=LRELU_SLOPE,
                     res=x, post_scale=(scale if last else 1.0),
                     res2=(xs_prev if last else None), t_tile=t_tile)
    return x


def source_module(f0, sp, sample_rate, up_total, harmonic_num=8, sine_amp=0.1,
                  t_tile=1024):
    """Deterministic NSF harmonic source. f0: (B, T_frames, 1) -> (B, T_up, 1)."""
    # TODO(synk): SineGen's stochastic initial phase and voiced/unvoiced additive
    # noise are omitted (SourceModuleHnNSF was not part of the provided spec).
    B, Tf, _ = f0.shape
    H = harmonic_num + 1
    harm = jnp.arange(1, H + 1, dtype=jnp.float32)
    rad = f0 * harm[None, None, :] / sample_rate             # per-sample increment, (B,Tf,H)
    rad = rad - jnp.floor(rad)
    # f0 is nearest-neighbour upsampled, so phase(t*up+s) = sum_{t'<t} up*rad[t'] + (s+1)*rad[t]
    step = rad * jnp.float32(up_total)
    cum = jnp.cumsum(step, axis=1) - step                    # frame-rate exclusive prefix
    cum = cum - jnp.floor(cum)                               # wrap per frame (f32 safety)
    offs = jnp.arange(1, up_total + 1, dtype=jnp.float32)[None, None, :, None]
    phase = cum[:, :, None, :] + offs * rad[:, :, None, :]   # (B, Tf, up, H)
    phase = phase - jnp.floor(phase)
    uv = (f0 > 0.0).astype(jnp.float32)[:, :, None, :]
    sines = jnp.sin(2.0 * np.pi * phase) * jnp.float32(sine_amp) * uv
    sines = sines.reshape(B, Tf * up_total, H)
    return conv_general(sines, sp["w"], sp["b"], K=1, post_tanh=True,
                        out_dtype=jnp.float32, t_tile=t_tile)


def generator_forward(params, x_ncw, cfg):
    """x_ncw: (B, cin_channels, T) -> (B, out_channels, T * prod(upsample_rates))."""
    tt = cfg.get("time_tile", 1024)
    x = jnp.transpose(x_ncw, (0, 2, 1)).astype(jnp.float32)  # (B, T, cin) channel-last
    i_lf0, i_vuv = cfg["out_lf0_idx"], cfg["out_vuv_idx"]
    lf0 = x[:, :, i_lf0:i_lf0 + 1] * cfg["out_lf0_scale"] + cfg["out_lf0_mean"]
    vuv = x[:, :, i_vuv:i_vuv + 1] * cfg["out_vuv_scale"] + cfg["out_vuv_mean"]
    f0 = jnp.where(vuv < cfg["vuv_threshold"], 0.0, jnp.exp(lf0))
    ur, uk = cfg["upsample_rates"], cfg["upsample_kernel_sizes"]
    up_total = int(np.prod(ur))
    if cfg["drop_melf0vuv"]:
        x = x[:, :, :i_lf0]

    har = source_module(f0, params["source"], cfg["sample_rate"], up_total, t_tile=tt)

    x = conv1d_p(x, params["conv_pre"], t_tile=tt)

    nk = len(cfg["resblock_kernel_sizes"])
    for i, u in enumerate(ur):
        x_up = conv_transpose1d_p(x, params["ups"][i], stride=u,
                                  padding=(uk[i] - u) // 2,
                                  pre_slope=LRELU_SLOPE, t_tile=tt)
        n_stride = int(np.prod(ur[i + 1:])) if i + 1 < len(ur) else 1  # static config
        # x = ups_out + noise_conv(har): residual fused into the noise-conv epilogue
        x = noise_conv_p(har, params["noise_convs"][i], stride=n_stride,
                         res=x_up, t_tile=tt)
        xs = None
        for j in range(nk):  # xs accumulation fused into each resblock's final conv
            xs = resblock1_forward(x, params["resblocks"][i * nk + j],
                                   cfg["resblock_dilation_sizes"][j],
                                   scale=1.0 / nk, xs_prev=xs, t_tile=tt)
        x = xs

    # final F.leaky_relu uses default slope 0.01; fused with conv_post + tanh
    x = conv1d_p(x, params["conv_post"], pre_slope=0.01, post_tanh=True,
                 out_dtype=jnp.float32, t_tile=tt)
    # TODO(synk): the Cout=1 stages (conv_post, source linear) still issue lane-sparse
    # width-1 stores; a time-on-lanes layout for those two convs would make them dense.
    return jnp.transpose(x, (0, 2, 1))                       # back to (B, out_ch, T_out)


# ----------------------------------------------------------------------------
# Parameter construction + one-time kernel-layout preparation
# (weight_norm is identity at init; params contain ONLY arrays — all strides /
#  paddings / dilations stay as static Python config.)
# ----------------------------------------------------------------------------
def _init_conv(key, cout, cin, k, std=0.01):
    kw, kb = jax.random.split(key)
    w = jax.random.normal(kw, (cout, cin, k), jnp.float32) * std
    bound = 1.0 / np.sqrt(cin * k)
    b = jax.random.uniform(kb, (cout,), jnp.float32, -bound, bound)
    return w, b


def _prep_conv(w_oik, b):
    """torch Conv1d (Cout, Cin, K) -> kernel layout (1, K, Cin, Cout)."""
    cout, cin, _ = w_oik.shape
    w = jnp.transpose(w_oik, (2, 1, 0))[None]
    dt = jnp.bfloat16 if (cin > 1 and cout > 1) else jnp.float32
    return {"w": w.astype(dt), "b": b.reshape(1, cout).astype(jnp.float32)}


def _prep_conv_transpose(w_iok, b, stride, padding):
    """torch ConvTranspose1d (Cin, Cout, K) -> polyphase taps (u, M, Cin, Cout)."""
    cin, cout, K = w_iok.shape
    u = stride
    assert K % u == 0, "polyphase path requires kernel_size % stride == 0"
    M = K // u
    k0 = [(r + padding) % u for r in range(u)]
    phases = [jnp.stack([w_iok[:, :, k0[r] + (M - 1 - m) * u] for m in range(M)],
                        axis=0) for r in range(u)]            # each (M, Cin, Cout)
    w = jnp.stack(phases, axis=0)                             # (u, M, Cin, Cout)
    return {"w": w.astype(jnp.bfloat16), "b": b.reshape(1, cout).astype(jnp.float32)}


def _prep_noise_conv(w_oik, b):
    """Conv1d(1, Cout, K): fold the K taps into the contraction dim (im2col)."""
    cout, _, K = w_oik.shape
    w = jnp.transpose(w_oik[:, 0, :]).reshape(1, 1, K, cout)
    dt = jnp.bfloat16 if (K > 1 and cout > 1) else jnp.float32
    return {"w": w.astype(dt), "b": b.reshape(1, cout).astype(jnp.float32)}


def build_params(key, cfg):
    keys = iter(jax.random.split(key, 256))
    uic = cfg["upsample_initial_channel"]
    ur, uk = cfg["upsample_rates"], cfg["upsample_kernel_sizes"]
    p = {}
    p["conv_pre"] = _prep_conv(*_init_conv(next(keys), uic, cfg["cin_channels"], 7))

    p["ups"], p["noise_convs"] = [], []
    ch = uic
    for i, (u, k) in enumerate(zip(ur, uk)):
        c_cur = uic // 2 ** (i + 1)
        kw, kb = jax.random.split(next(keys))
        w = jax.random.normal(kw, (c_cur * 2, c_cur, k), jnp.float32) * 0.01  # (Cin,Cout,K)
        bound = 1.0 / np.sqrt(c_cur * 2 * k)
        b = jax.random.uniform(kb, (c_cur,), jnp.float32, -bound, bound)
        p["ups"].append(_prep_conv_transpose(w, b, stride=u, padding=(k - u) // 2))
        if i + 1 < len(ur):
            s = int(np.prod(ur[i + 1:]))
            nw, nb = _init_conv(next(keys), c_cur, 1, s * 2)
        else:
            nw, nb = _init_conv(next(keys), c_cur, 1, 1)
        p["noise_convs"].append(_prep_noise_conv(nw, nb))
        ch = c_cur

    p["resblocks"] = []
    for i in range(len(ur)):
        ch_i = uic // 2 ** (i + 1)
        for k, dils in zip(cfg["resblock_kernel_sizes"],
                           cfg["resblock_dilation_sizes"]):
            p["resblocks"].append({
                "convs1": [_prep_conv(*_init_conv(next(keys), ch_i, ch_i, k))
                           for _ in dils],
                "convs2": [_prep_conv(*_init_conv(next(keys), ch_i, ch_i, k))
                           for _ in dils],
            })

    p["conv_post"] = _prep_conv(*_init_conv(next(keys), cfg["out_channels"], ch, 7))

    H = 9  # harmonic_num + 1
    kw, kb = jax.random.split(next(keys))
    lw = jax.random.uniform(kw, (1, H), jnp.float32, -1.0 / np.sqrt(H), 1.0 / np.sqrt(H))
    lb = jax.random.uniform(kb, (1,), jnp.float32, -1.0 / np.sqrt(H), 1.0 / np.sqrt(H))
    p["source"] = {"w": lw.T.reshape(1, 1, H, 1).astype(jnp.float32),
                   "b": lb.reshape(1, 1).astype(jnp.float32)}
    return p


# ----------------------------------------------------------------------------
# Small, self-consistent config (scaled-down HnSincHifiGan)
# ----------------------------------------------------------------------------
CFG = dict(
    cin_channels=8,
    out_channels=1,
    sample_rate=24000,
    out_lf0_idx=4,
    out_lf0_mean=5.953093881972361,
    out_lf0_scale=0.23435173188961034,
    out_vuv_idx=5,
    out_vuv_mean=0.8027627522670242,
    out_vuv_scale=0.39791295007789834,
    vuv_threshold=0.3,
    resblock_kernel_sizes=[3],
    resblock_dilation_sizes=[[1, 3, 5]],
    upsample_rates=[4, 2],
    upsample_kernel_sizes=[8, 4],
    upsample_initial_channel=32,
    drop_melf0vuv=False,  # keep conv_pre in-channels == cin_channels (consistent config)
    time_tile=1024,       # time rows per kernel tile (raise to 2048+ for long audio)
)


if __name__ == "__main__":
    key = jax.random.PRNGKey(0)
    k_param, k_x = jax.random.split(key)
    params = build_params(k_param, CFG)

    B, Cin, T = 2, CFG["cin_channels"], 16
    x = jax.random.normal(k_x, (B, Cin, T), jnp.float32)  # PyTorch NCW input

    fwd = jax.jit(lambda p, xx: generator_forward(p, xx, CFG))
    y = jax.block_until_ready(fwd(params, x))

    expected_T = T * int(np.prod(CFG["upsample_rates"]))
    assert y.shape == (B, CFG["out_channels"], expected_T), y.shape
    assert bool(jnp.all(jnp.isfinite(y)))
    print("KERNEL_OK")
</pallas_src>

<mosaic_0001>
module attributes {stable_mosaic.version = 11 : i64} {
  func.func @_conv_kernel(%arg0: i32, %arg1: i32, %arg2: memref<1x128x9xf32, #tpu.memory_space<vmem>>, %arg3: memref<1x1x9x1xf32, #tpu.memory_space<vmem>>, %arg4: memref<1x1xf32, #tpu.memory_space<vmem>>, %arg5: memref<1x128x1xf32, #tpu.memory_space<vmem>>) attributes {dimension_semantics = [#tpu.dimension_semantics<parallel>, #tpu.dimension_semantics<parallel>], iteration_bounds = array<i64: 2, 1>, scalar_prefetch = 0 : i64, scratch_operands = 0 : i64, tpu.core_type = #tpu.core_type<tc>, window_params = [{transform_indices = @transform_0, window_bounds = array<i64: 1, 128, 9>}, {pipeline_mode = #tpu.pipeline_mode<synchronous>, transform_indices = @transform_1, window_bounds = array<i64: 1, 1, 9, 1>}, {pipeline_mode = #tpu.pipeline_mode<synchronous>, transform_indices = @transform_2, window_bounds = array<i64: 1, 1>}, {transform_indices = @transform_3, window_bounds = array<i64: 1, 128, 1>}]} {
    %c0 = arith.constant 0 : index
    %c0_0 = arith.constant 0 : index
    %c0_1 = arith.constant 0 : index
    %0 = vector.load %arg2[%c0, %c0_0, %c0_1] : memref<1x128x9xf32, #tpu.memory_space<vmem>>, vector<1x128x9xf32>
    %1 = vector.shape_cast %0 : vector<1x128x9xf32> to vector<128x9xf32>
    %c0_2 = arith.constant 0 : index
    %c0_3 = arith.constant 0 : index
    %2 = vector.load %arg4[%c0_2, %c0_3] : memref<1x1xf32, #tpu.memory_space<vmem>>, vector<1x1xf32>
    %c0_4 = arith.constant 0 : index
    %c0_5 = arith.constant 0 : index
    %c0_6 = arith.constant 0 : index
    %c0_7 = arith.constant 0 : index
    %3 = vector.load %arg3[%c0_4, %c0_5, %c0_6, %c0_7] : memref<1x1x9x1xf32, #tpu.memory_space<vmem>>, vector<1x1x9x1xf32>
    %4 = vector.shape_cast %3 : vector<1x1x9x1xf32> to vector<9x1xf32>
    %5 = vector.shape_cast %4 : vector<9x1xf32> to vector<9xf32>
    %6 = vector.shape_cast %5 : vector<9xf32> to vector<1x9xf32>
    %7 = vector.broadcast %6 : vector<1x9xf32> to vector<128x9xf32>
    %8 = arith.mulf %1, %7 : vector<128x9xf32>
    %cst = arith.constant dense<0.000000e+00> : vector<128xf32>
    %9 = vector.multi_reduction <add>, %8, %cst [1] : vector<128x9xf32> to vector<128xf32>
    %10 = vector.shape_cast %9 : vector<128xf32> to vector<128x1xf32>
    %11 = vector.broadcast %2 : vector<1x1xf32> to vector<128x1xf32>
    %12 = arith.addf %10, %11 : vector<128x1xf32>
    %13 = math.tanh %12 : vector<128x1xf32>
    %c0_8 = arith.constant 0 : index
    %c0_9 = arith.constant 0 : index
    %c0_10 = arith.constant 0 : index
    %14 = vector.load %arg5[%c0_8, %c0_9, %c0_10] : memref<1x128x1xf32, #tpu.memory_space<vmem>>, vector<1x128x1xf32>
    %15 = vector.shape_cast %14 : vector<1x128x1xf32> to vector<128x1xf32>
    %16 = vector.shape_cast %13 : vector<128x1xf32> to vector<1x128x1xf32>
    tpu.vector_store %arg5[%c0_8, %c0_9, %c0_10], %16 {strides = array<i32>} : memref<1x128x1xf32, #tpu.memory_space<vmem>>, vector<1x128x1xf32>,
    return
  }
  func.func @transform_0(%arg0: i32, %arg1: i32) -> (i32, i32, i32) {
    %c0_i32 = arith.constant 0 : i32
    %c0_i32_0 = arith.constant 0 : i32
    return %arg0, %arg1, %c0_i32 : i32, i32, i32
  }
  func.func @transform_1(%arg0: i32, %arg1: i32) -> (i32, i32, i32, i32) {
    %c0_i32 = arith.constant 0 : i32
    %c0_i32_0 = arith.constant 0 : i32
    %c0_i32_1 = arith.constant 0 : i32
    %c0_i32_2 = arith.constant 0 : i32
    %c0_i32_3 = arith.constant 0 : i32
    return %c0_i32, %c0_i32_0, %c0_i32_1, %c0_i32_2 : i32, i32, i32, i32
  }
  func.func @transform_2(%arg0: i32, %arg1: i32) -> (i32, i32) {
    %c0_i32 = arith.constant 0 : i32
    %c0_i32_0 = arith.constant 0 : i32
    %c0_i32_1 = arith.constant 0 : i32
    return %c0_i32, %c0_i32_0 : i32, i32
  }
  func.func @transform_3(%arg0: i32, %arg1: i32) -> (i32, i32, i32) {
    %c0_i32 = arith.constant 0 : i32
    %c0_i32_0 = arith.constant 0 : i32
    return %arg0, %arg1, %c0_i32 : i32, i32, i32
  }
}

module attributes {stable_mosaic.version = 11 : i64} {
  func.func @_conv_kernel(%arg0: i32, %arg1: i32, %arg2: memref<1x16x8xf32, #tpu.memory_space<vmem>>, %arg3: memref<1x16x8xf32, #tpu.memory_space<vmem>>, %arg4: memref<1x7x8x32xbf16, #tpu.memory_space<vmem>>, %arg5: memref<1x32xf32, #tpu.memory_space<vmem>>, %arg6: memref<1x16x32xbf16, #tpu.memory_space<vmem>>) attributes {dimension_semantics = [#tpu.dimension_semantics<parallel>, #tpu.dimension_semantics<parallel>], iteration_bounds = array<i64: 2, 1>, scalar_prefetch = 0 : i64, scratch_operands = 0 : i64, tpu.core_type = #tpu.core_type<tc>, window_params = [{transform_indices = @transform_0, window_bounds = array<i64: 1, 16, 8>}, {transform_indices = @transform_1, window_bounds = array<i64: 1, 16, 8>}, {pipeline_mode = #tpu.pipeline_mode<synchronous>, transform_indices = @transform_2, window_bounds = array<i64: 1, 7, 8, 32>}, {pipeline_mode = #tpu.pipeline_mode<synchronous>, transform_indices = @transform_3, window_bounds = array<i64: 1, 32>}, {transform_indices = @transform_4, window_bounds = array<i64: 1, 16, 32>}]} {
    %c0 = arith.constant 0 : index
    %c0_0 = arith.constant 0 : index
    %c0_1 = arith.constant 0 : index
    %0 = vector.load %arg2[%c0, %c0_0, %c0_1] : memref<1x16x8xf32, #tpu.memory_space<vmem>>, vector<1x16x8xf32>
    %1 = vector.shape_cast %0 : vector<1x16x8xf32> to vector<16x8xf32>
    %c0_2 = arith.constant 0 : index
    %c0_3 = arith.constant 0 : index
    %c0_4 = arith.constant 0 : index
    %2 = vector.load %arg3[%c0_2, %c0_3, %c0_4] : memref<1x16x8xf32, #tpu.memory_space<vmem>>, vector<1x16x8xf32>
    %3 = vector.shape_cast %2 : vector<1x16x8xf32> to vector<16x8xf32>
    %4 = tpu.concatenate %1, %3 in 0 : vector<16x8xf32>, vector<16x8xf32> -> vector<32x8xf32>
    %5 = arith.truncf %4 : vector<32x8xf32> to vector<32x8xbf16>
    %c0_5 = arith.constant 0 : index
    %c0_6 = arith.constant 0 : index
    %6 = vector.load %arg5[%c0_5, %c0_6] : memref<1x32xf32, #tpu.memory_space<vmem>>, vector<1x32xf32>
    %7 = vector.extract_strided_slice %5 {offsets = [0, 0], sizes = [16, 8], strides = [1, 1]} : vector<32x8xbf16> to vector<16x8xbf16>
    %c0_7 = arith.constant 0 : index
    %c0_8 = arith.constant 0 : index
    %c0_9 = arith.constant 0 : index
    %c0_10 = arith.constant 0 : index
    %8 = vector.load %arg4[%c0_7, %c0_8, %c0_9, %c0_10] : memref<1x7x8x32xbf16, #tpu.memory_space<vmem>>, vector<1x1x8x32xbf16>
    %9 = vector.shape_cast %8 : vector<1x1x8x32xbf16> to vector<8x32xbf16>
    %cst = arith.constant dense<0.000000e+00> : vector<16x32xf32>
    %10 = tpu.matmul %7, %9, %cst {dimension_numbers = #tpu.dot_dimension_numbers<[1], [0], [0], [1], [0, 0, 1, 1], [], []>} : vector<16x8xbf16>, vector<8x32xbf16>, vector<16x32xf32> -> vector<16x32xf32>
    %11 = vector.extract_strided_slice %5 {offsets = [1, 0], sizes = [16, 8], strides = [1, 1]} : vector<32x8xbf16> to vector<16x8xbf16>
    %c0_11 = arith.constant 0 : index
    %c1 = arith.constant 1 : index
    %c0_12 = arith.constant 0 : index
    %c0_13 = arith.constant 0 : index
    %12 = vector.load %arg4[%c0_11, %c1, %c0_12, %c0_13] : memref<1x7x8x32xbf16, #tpu.memory_space<vmem>>, vector<1x1x8x32xbf16>
    %13 = vector.shape_cast %12 : vector<1x1x8x32xbf16> to vector<8x32xbf16>
    %cst_14 = arith.constant dense<0.000000e+00> : vector<16x32xf32>
    %14 = tpu.matmul %11, %13, %cst_14 {dimension_numbers = #tpu.dot_dimension_numbers<[1], [0], [0], [1], [0, 0, 1, 1], [], []>} : vector<16x8xbf16>, vector<8x32xbf16>, vector<16x32xf32> -> vector<16x32xf32>
    %15 = arith.addf %10, %14 : vector<16x32xf32>
    %16 = vector.extract_strided_slice %5 {offsets = [2, 0], sizes = [16, 8], strides = [1, 1]} : vector<32x8xbf16> to vector<16x8xbf16>
    %c0_15 = arith.constant 0 : index
    %c2 = arith.constant 2 : index
    %c0_16 = arith.constant 0 : index
    %c0_17 = arith.constant 0 : index
    %17 = vector.load %arg4[%c0_15, %c2, %c0_16, %c0_17] : memref<1x7x8x32xbf16, #tpu.memory_space<vmem>>, vector<1x1x8x32xbf16>
    %18 = vector.shape_cast %17 : vector<1x1x8x32xbf16> to vector<8x32xbf16>
    %cst_18 = arith.constant dense<0.000000e+00> : vector<16x32xf32>
    %19 = tpu.matmul %16, %18, %cst_18 {dimension_numbers = #tpu.dot_dimension_numbers<[1], [0], [0], [1], [0, 0, 1, 1], [], []>} : vector<16x8xbf16>, vector<8x32xbf16>, vector<16x32xf32> -> vector<16x32xf32>
    %20 = arith.addf %15, %19 : vector<16x32xf32>
    %21 = vector.extract_strided_slice %5 {offsets = [3, 0], sizes = [16, 8], strides = [1, 1]} : vector<32x8xbf16> to vector<16x8xbf16>
    %c0_19 = arith.constant 0 : index
    %c3 = arith.constant 3 : index
    %c0_20 = arith.constant 0 : index
    %c0_21 = arith.constant 0 : index
    %22 = vector.load %arg4[%c0_19, %c3, %c0_20, %c0_21] : memref<1x7x8x32xbf16, #tpu.memory_space<vmem>>, vector<1x1x8x32xbf16>
    %23 = vector.shape_cast %22 : vector<1x1x8x32xbf16> to vector<8x32xbf16>
    %cst_22 = arith.constant dense<0.000000e+00> : vector<16x32xf32>
    %24 = tpu.matmul %21, %23, %cst_22 {dimension_numbers = #tpu.dot_dimension_numbers<[1], [0], [0], [1], [0, 0, 1, 1], [], []>} : vector<16x8xbf16>, vector<8x32xbf16>, vector<16x32xf32> -> vector<16x32xf32>
    %25 = arith.addf %20, %24 : vector<16x32xf32>
    %26 = vector.extract_strided_slice %5 {offsets = [4, 0], sizes = [16, 8], strides = [1, 1]} : vector<32x8xbf16> to vector<16x8xbf16>
    %c0_23 = arith.constant 0 : index
    %c4 = arith.constant 4 : index
    %c0_24 = arith.constant 0 : index
    %c0_25 = arith.constant 0 : index
    %27 = vector.load %arg4[%c0_23, %c4, %c0_24, %c0_25] : memref<1x7x8x32xbf16, #tpu.memory_space<vmem>>, vector<1x1x8x32xbf16>
    %28 = vector.shape_cast %27 : vector<1x1x8x32xbf16> to vector<8x32xbf16>
    %cst_26 = arith.constant dense<0.000000e+00> : vector<16x32xf32>
    %29 = tpu.matmul %26, %28, %cst_26 {dimension_numbers = #tpu.dot_dimension_numbers<[1], [0], [0], [1], [0, 0, 1, 1], [], []>} : vector<16x8xbf16>, vector<8x32xbf16>, vector<16x32xf32> -> vector<16x32xf32>
    %30 = arith.addf %25, %29 : vector<16x32xf32>
    %31 = vector.extract_strided_slice %5 {offsets = [5, 0], sizes = [16, 8], strides = [1, 1]} : vector<32x8xbf16> to vector<16x8xbf16>
    %c0_27 = arith.constant 0 : index
    %c5 = arith.constant 5 : index
    %c0_28 = arith.constant 0 : index
    %c0_29 = arith.constant 0 : index
    %32 = vector.load %arg4[%c0_27, %c5, %c0_28, %c0_29] : memref<1x7x8x32xbf16, #tpu.memory_space<vmem>>, vector<1x1x8x32xbf16>
    %33 = vector.shape_cast %32 : vector<1x1x8x32xbf16> to vector<8x32xbf16>
    %cst_30 = arith.constant dense<0.000000e+00> : vector<16x32xf32>
    %34 = tpu.matmul %31, %33, %cst_30 {dimension_numbers = #tpu.dot_dimension_numbers<[1], [0], [0], [1], [0, 0, 1, 1], [], []>} : vector<16x8xbf16>, vector<8x32xbf16>, vector<16x32xf32> -> vector<16x32xf32>
    %35 = arith.addf %30, %34 : vector<16x32xf32>
    %36 = vector.extract_strided_slice %5 {offsets = [6, 0], sizes = [16, 8], strides = [1, 1]} : vector<32x8xbf16> to vector<16x8xbf16>
    %c0_31 = arith.constant 0 : index
    %c6 = arith.constant 6 : index
    %c0_32 = arith.constant 0 : index
    %c0_33 = arith.constant 0 : index
    %37 = vector.load %arg4[%c0_31, %c6, %c0_32, %c0_33] : memref<1x7x8x32xbf16, #tpu.memory_space<vmem>>, vector<1x1x8x32xbf16>
    %38 = vector.shape_cast %37 : vector<1x1x8x32xbf16> to vector<8x32xbf16>
    %cst_34 = arith.constant dense<0.000000e+00> : vector<16x32xf32>
    %39 = tpu.matmul %36, %38, %cst_34 {dimension_numbers = #tpu.dot_dimension_numbers<[1], [0], [0], [1], [0, 0, 1, 1], [], []>} : vector<16x8xbf16>, vector<8x32xbf16>, vector<16x32xf32> -> vector<16x32xf32>
    %40 = arith.addf %35, %39 : vector<16x32xf32>
    %41 = vector.broadcast %6 : vector<1x32xf32> to vector<16x32xf32>
    %42 = arith.addf %40, %41 : vector<16x32xf32>
    %43 = arith.truncf %42 : vector<16x32xf32> to vector<16x32xbf16>
    %c0_35 = arith.constant 0 : index
    %c0_36 = arith.constant 0 : index
    %c0_37 = arith.constant 0 : index
    %44 = vector.load %arg6[%c0_35, %c0_36, %c0_37] : memref<1x16x32xbf16, #tpu.memory_space<vmem>>, vector<1x16x32xbf16>
    %45 = vector.shape_cast %44 : vector<1x16x32xbf16> to vector<16x32xbf16>
    %46 = vector.shape_cast %43 : vector<16x32xbf16> to vector<1x16x32xbf16>
    tpu.vector_store %arg6[%c0_35, %c0_36, %c0_37], %46 {strides = array<i32>} : memref<1x16x32xbf16, #tpu.memory_space<vmem>>, vector<1x16x32xbf16>,
    return
  }
  func.func @transform_0(%arg0: i32, %arg1: i32) -> (i32, i32, i32) {
    %c0_i32 = arith.constant 0 : i32
    %c0_i32_0 = arith.constant 0 : i32
    return %arg0, %arg1, %c0_i32 : i32, i32, i32
  }
  func.func @transform_1(%arg0: i32, %arg1: i32) -> (i32, i32, i32) {
    %c1_i32 = arith.constant 1 : i32
    %0 = arith.addi %arg1, %c1_i32 : i32
    %c1_i32_0 = arith.constant 1 : i32
    %1 = arith.muli %0, %c1_i32_0 : i32
    %c0_i32 = arith.constant 0 : i32
    %c0_i32_1 = arith.constant 0 : i32
    return %arg0, %1, %c0_i32 : i32, i32, i32
  }
  func.func @transform_2(%arg0: i32, %arg1: i32) -> (i32, i32, i32, i32) {
    %c0_i32 = arith.constant 0 : i32
    %c0_i32_0 = arith.constant 0 : i32
    %c0_i32_1 = arith.constant 0 : i32
    %c0_i32_2 = arith.constant 0 : i32
    %c0_i32_3 = arith.constant 0 : i32
    return %c0_i32, %c0_i32_0, %c0_i32_1, %c0_i32_2 : i32, i32, i32, i32
  }
  func.func @transform_3(%arg0: i32, %arg1: i32) -> (i32, i32) {
    %c0_i32 = arith.constant 0 : i32
    %c0_i32_0 = arith.constant 0 : i32
    %c0_i32_1 = arith.constant 0 : i32
    return %c0_i32, %c0_i32_0 : i32, i32
  }
  func.func @transform_4(%arg0: i32, %arg1: i32) -> (i32, i32, i32) {
    %c0_i32 = arith.constant 0 : i32
    %c0_i32_0 = arith.constant 0 : i32
    return %arg0, %arg1, %c0_i32 : i32, i32, i32
  }
}

module attributes {stable_mosaic.version = 11 : i64} {
  func.func @_conv_kernel(%arg0: i32, %arg1: i32, %arg2: memref<1x16x32xbf16, #tpu.memory_space<vmem>>, %arg3: memref<1x16x32xbf16, #tpu.memory_space<vmem>>, %arg4: memref<4x2x32x16xbf16, #tpu.memory_space<vmem>>, %arg5: memref<1x16xf32, #tpu.memory_space<vmem>>, %arg6: memref<1x16x64xbf16, #tpu.memory_space<vmem>>) attributes {dimension_semantics = [#tpu.dimension_semantics<parallel>, #tpu.dimension_semantics<parallel>], iteration_bounds = array<i64: 2, 1>, scalar_prefetch = 0 : i64, scratch_operands = 0 : i64, tpu.core_type = #tpu.core_type<tc>, window_params = [{transform_indices = @transform_0, window_bounds = array<i64: 1, 16, 32>}, {transform_indices = @transform_1, window_bounds = array<i64: 1, 16, 32>}, {pipeline_mode = #tpu.pipeline_mode<synchronous>, transform_indices = @transform_2, window_bounds = array<i64: 4, 2, 32, 16>}, {pipeline_mode = #tpu.pipeline_mode<synchronous>, transform_indices = @transform_3, window_bounds = array<i64: 1, 16>}, {transform_indices = @transform_4, window_bounds = array<i64: 1, 16, 64>}]} {
    %c0 = arith.constant 0 : index
    %c0_0 = arith.constant 0 : index
    %c0_1 = arith.constant 0 : index
    %0 = vector.load %arg2[%c0, %c0_0, %c0_1] : memref<1x16x32xbf16, #tpu.memory_space<vmem>>, vector<1x16x32xbf16>
    %1 = vector.shape_cast %0 : vector<1x16x32xbf16> to vector<16x32xbf16>
    %2 = arith.extf %1 : vector<16x32xbf16> to vector<16x32xf32>
    %c0_2 = arith.constant 0 : index
    %c0_3 = arith.constant 0 : index
    %c0_4 = arith.constant 0 : index
    %3 = vector.load %arg3[%c0_2, %c0_3, %c0_4] : memref<1x16x32xbf16, #tpu.memory_space<vmem>>, vector<1x16x32xbf16>
    %4 = vector.shape_cast %3 : vector<1x16x32xbf16> to vector<16x32xbf16>
    %5 = arith.extf %4 : vector<16x32xbf16> to vector<16x32xf32>
    %6 = tpu.concatenate %2, %5 in 0 : vector<16x32xf32>, vector<16x32xf32> -> vector<32x32xf32>
    %cst = arith.constant 0.000000e+00 : f32
    %7 = vector.broadcast %cst : f32 to vector<32x32xf32>
    %8 = arith.cmpf oge, %6, %7 : vector<32x32xf32>
    %cst_5 = arith.constant 1.000000e-01 : f32
    %9 = vector.broadcast %cst_5 : f32 to vector<32x32xf32>
    %10 = arith.mulf %9, %6 : vector<32x32xf32>
    %11 = arith.select %8, %6, %10 : vector<32x32xi1>, vector<32x32xf32>
    %12 = arith.truncf %11 : vector<32x32xf32> to vector<32x32xbf16>
    %c0_6 = arith.constant 0 : index
    %c0_7 = arith.constant 0 : index
    %13 = vector.load %arg5[%c0_6, %c0_7] : memref<1x16xf32, #tpu.memory_space<vmem>>, vector<1x16xf32>
    %14 = vector.extract_strided_slice %12 {offsets = [0, 0], sizes = [16, 32], strides = [1, 1]} : vector<32x32xbf16> to vector<16x32xbf16>
    %c0_8 = arith.constant 0 : index
    %c0_9 = arith.constant 0 : index
    %c0_10 = arith.constant 0 : index
    %c0_11 = arith.constant 0 : index
    %15 = vector.load %arg4[%c0_8, %c0_9, %c0_10, %c0_11] : memref<4x2x32x16xbf16, #tpu.memory_space<vmem>>, vector<1x1x32x16xbf16>
    %16 = vector.shape_cast %15 : vector<1x1x32x16xbf16> to vector<32x16xbf16>
    %cst_12 = arith.constant dense<0.000000e+00> : vector<16x16xf32>
    %17 = tpu.matmul %14, %16, %cst_12 {dimension_numbers = #tpu.dot_dimension_numbers<[1], [0], [0], [1], [0, 0, 1, 1], [], []>} : vector<16x32xbf16>, vector<32x16xbf16>, vector<16x16xf32> -> vector<16x16xf32>
    %18 = vector.extract_strided_slice %12 {offsets = [1, 0], sizes = [16, 32], strides = [1, 1]} : vector<32x32xbf16> to vector<16x32xbf16>
    %c0_13 = arith.constant 0 : index
    %c1 = arith.constant 1 : index
    %c0_14 = arith.constant 0 : index
    %c0_15 = arith.constant 0 : index
    %19 = vector.load %arg4[%c0_13, %c1, %c0_14, %c0_15] : memref<4x2x32x16xbf16, #tpu.memory_space<vmem>>, vector<1x1x32x16xbf16>
    %20 = vector.shape_cast %19 : vector<1x1x32x16xbf16> to vector<32x16xbf16>
    %cst_16 = arith.constant dense<0.000000e+00> : vector<16x16xf32>
    %21 = tpu.matmul %18, %20, %cst_16 {dimension_numbers = #tpu.dot_dimension_numbers<[1], [0], [0], [1], [0, 0, 1, 1], [], []>} : vector<16x32xbf16>, vector<32x16xbf16>, vector<16x16xf32> -> vector<16x16xf32>
    %22 = arith.addf %17, %21 : vector<16x16xf32>
    %23 = vector.broadcast %13 : vector<1x16xf32> to vector<16x16xf32>
    %24 = arith.addf %22, %23 : vector<16x16xf32>
    %25 = arith.truncf %24 : vector<16x16xf32> to vector<16x16xbf16>
    %c0_17 = arith.constant 0 : index
    %c0_18 = arith.constant 0 : index
    %c0_19 = arith.constant 0 : index
    %26 = vector.load %arg6[%c0_17, %c0_18, %c0_19] : memref<1x16x64xbf16, #tpu.memory_space<vmem>>, vector<1x16x16xbf16>
    %27 = vector.shape_cast %26 : vector<1x16x16xbf16> to vector<16x16xbf16>
    %28 = vector.shape_cast %25 : vector<16x16xbf16> to vector<1x16x16xbf16>
    tpu.vector_store %arg6[%c0_17, %c0_18, %c0_19], %28 {strides = array<i32>} : memref<1x16x64xbf16, #tpu.memory_space<vmem>>, vector<1x16x16xbf16>,
    %29 = vector.extract_strided_slice %12 {offsets = [0, 0], sizes = [16, 32], strides = [1, 1]} : vector<32x32xbf16> to vector<16x32xbf16>
    %c1_20 = arith.constant 1 : index
    %c0_21 = arith.constant 0 : index
    %c0_22 = arith.constant 0 : index
    %c0_23 = arith.constant 0 : index
    %30 = vector.load %arg4[%c1_20, %c0_21, %c0_22, %c0_23] : memref<4x2x32x16xbf16, #tpu.memory_space<vmem>>, vector<1x1x32x16xbf16>
    %31 = vector.shape_cast %30 : vector<1x1x32x16xbf16> to vector<32x16xbf16>
    %cst_24 = arith.constant dense<0.000000e+00> : vector<16x16xf32>
    %32 = tpu.matmul %29, %31, %cst_24 {dimension_numbers = #tpu.dot_dimension_numbers<[1], [0], [0], [1], [0, 0, 1, 1], [], []>} : vector<16x32xbf16>, vector<32x16xbf16>, vector<16x16xf32> -> vector<16x16xf32>
    %33 = vector.extract_strided_slice %12 {offsets = [1, 0], sizes = [16, 32], strides = [1, 1]} : vector<32x32xbf16> to vector<16x32xbf16>
    %c1_25 = arith.constant 1 : index
    %c1_26 = arith.constant 1 : index
    %c0_27 = arith.constant 0 : index
    %c0_28 = arith.constant 0 : index
    %34 = vector.load %arg4[%c1_25, %c1_26, %c0_27, %c0_28] : memref<4x2x32x16xbf16, #tpu.memory_space<vmem>>, vector<1x1x32x16xbf16>
    %35 = vector.shape_cast %34 : vector<1x1x32x16xbf16> to vector<32x16xbf16>
    %cst_29 = arith.constant dense<0.000000e+00> : vector<16x16xf32>
    %36 = tpu.matmul %33, %35, %cst_29 {dimension_numbers = #tpu.dot_dimension_numbers<[1], [0], [0], [1], [0, 0, 1, 1], [], []>} : vector<16x32xbf16>, vector<32x16xbf16>, vector<16x16xf32> -> vector<16x16xf32>
    %37 = arith.addf %32, %36 : vector<16x16xf32>
    %38 = vector.broadcast %13 : vector<1x16xf32> to vector<16x16xf32>
    %39 = arith.addf %37, %38 : vector<16x16xf32>
    %40 = arith.truncf %39 : vector<16x16xf32> to vector<16x16xbf16>
    %c0_30 = arith.constant 0 : index
    %c0_31 = arith.constant 0 : index
    %c16 = arith.constant 16 : index
    %41 = vector.load %arg6[%c0_30, %c0_31, %c16] : memref<1x16x64xbf16, #tpu.memory_space<vmem>>, vector<1x16x16xbf16>
    %42 = vector.shape_cast %41 : vector<1x16x16xbf16> to vector<16x16xbf16>
    %43 = vector.shape_cast %40 : vector<16x16xbf16> to vector<1x16x16xbf16>
    tpu.vector_store %arg6[%c0_30, %c0_31, %c16], %43 {strides = array<i32>} : memref<1x16x64xbf16, #tpu.memory_space<vmem>>, vector<1x16x16xbf16>,
    %44 = vector.extract_strided_slice %12 {offsets = [1, 0], sizes = [16, 32], strides = [1, 1]} : vector<32x32xbf16> to vector<16x32xbf16>
    %c2 = arith.constant 2 : index
    %c0_32 = arith.constant 0 : index
    %c0_33 = arith.constant 0 : index
    %c0_34 = arith.constant 0 : index
    %45 = vector.load %arg4[%c2, %c0_32, %c0_33, %c0_34] : memref<4x2x32x16xbf16, #tpu.memory_space<vmem>>, vector<1x1x32x16xbf16>
    %46 = vector.shape_cast %45 : vector<1x1x32x16xbf16> to vector<32x16xbf16>
    %cst_35 = arith.constant dense<0.000000e+00> : vector<16x16xf32>
    %47 = tpu.matmul %44, %46, %cst_35 {dimension_numbers = #tpu.dot_dimension_numbers<[1], [0], [0], [1], [0, 0, 1, 1], [], []>} : vector<16x32xbf16>, vector<32x16xbf16>, vector<16x16xf32> -> vector<16x16xf32>
    %48 = vector.extract_strided_slice %12 {offsets = [2, 0], sizes = [16, 32], strides = [1, 1]} : vector<32x32xbf16> to vector<16x32xbf16>
    %c2_36 = arith.constant 2 : index
    %c1_37 = arith.constant 1 : index
    %c0_38 = arith.constant 0 : index
    %c0_39 = arith.constant 0 : index
    %49 = vector.load %arg4[%c2_36, %c1_37, %c0_38, %c0_39] : memref<4x2x32x16xbf16, #tpu.memory_space<vmem>>, vector<1x1x32x16xbf16>
    %50 = vector.shape_cast %49 : vector<1x1x32x16xbf16> to vector<32x16xbf16>
    %cst_40 = arith.constant dense<0.000000e+00> : vector<16x16xf32>
    %51 = tpu.matmul %48, %50, %cst_40 {dimension_numbers = #tpu.dot_dimension_numbers<[1], [0], [0], [1], [0, 0, 1, 1], [], []>} : vector<16x32xbf16>, vector<32x16xbf16>, vector<16x16xf32> -> vector<16x16xf32>
    %52 = arith.addf %47, %51 : vector<16x16xf32>
    %53 = vector.broadcast %13 : vector<1x16xf32> to vector<16x16xf32>
    %54 = arith.addf %52, %53 : vector<16x16xf32>
    %55 = arith.truncf %54 : vector<16x16xf32> to vector<16x16xbf16>
    %c0_41 = arith.constant 0 : index
    %c0_42 = arith.constant 0 : index
    %c32 = arith.constant 32 : index
    %56 = vector.load %arg6[%c0_41, %c0_42, %c32] : memref<1x16x64xbf16, #tpu.memory_space<vmem>>, vector<1x16x16xbf16>
    %57 = vector.shape_cast %56 : vector<1x16x16xbf16> to vector<16x16xbf16>
    %58 = vector.shape_cast %55 : vector<16x16xbf16> to vector<1x16x16xbf16>
    tpu.vector_store %arg6[%c0_41, %c0_42, %c32], %58 {strides = array<i32>} : memref<1x16x64xbf16, #tpu.memory_space<vmem>>, vector<1x16x16xbf16>,
    %59 = vector.extract_strided_slice %12 {offsets = [1, 0], sizes = [16, 32], strides = [1, 1]} : vector<32x32xbf16> to vector<16x32xbf16>
    %c3 = arith.constant 3 : index
    %c0_43 = arith.constant 0 : index
    %c0_44 = arith.constant 0 : index
    %c0_45 = arith.constant 0 : index
    %60 = vector.load %arg4[%c3, %c0_43, %c0_44, %c0_45] : memref<4x2x32x16xbf16, #tpu.memory_space<vmem>>, vector<1x1x32x16xbf16>
    %61 = vector.shape_cast %60 : vector<1x1x32x16xbf16> to vector<32x16xbf16>
    %cst_46 = arith.constant dense<0.000000e+00> : vector<16x16xf32>
    %62 = tpu.matmul %59, %61, %cst_46 {dimension_numbers = #tpu.dot_dimension_numbers<[1], [0], [0], [1], [0, 0, 1, 1], [], []>} : vector<16x32xbf16>, vector<32x16xbf16>, vector<16x16xf32> -> vector<16x16xf32>
    %63 = vector.extract_strided_slice %12 {offsets = [2, 0], sizes = [16, 32], strides = [1, 1]} : vector<32x32xbf16> to vector<16x32xbf16>
    %c3_47 = arith.constant 3 : index
    %c1_48 = arith.constant 1 : index
    %c0_49 = arith.constant 0 : index
    %c0_50 = arith.constant 0 : index
    %64 = vector.load %arg4[%c3_47, %c1_48, %c0_49, %c0_50] : memref<4x2x32x16xbf16, #tpu.memory_space<vmem>>, vector<1x1x32x16xbf16>
    %65 = vector.shape_cast %64 : vector<1x1x32x16xbf16> to vector<32x16xbf16>
    %cst_51 = arith.constant dense<0.000000e+00> : vector<16x16xf32>
    %66 = tpu.matmul %63, %65, %cst_51 {dimension_numbers = #tpu.dot_dimension_numbers<[1], [0], [0], [1], [0, 0, 1, 1], [], []>} : vector<16x32xbf16>, vector<32x16xbf16>, vector<16x16xf32> -> vector<16x16xf32>
    %67 = arith.addf %62, %66 : vector<16x16xf32>
    %68 = vector.broadcast %13 : vector<1x16xf32> to vector<16x16xf32>
    %69 = arith.addf %67, %68 : vector<16x16xf32>
    %70 = arith.truncf %69 : vector<16x16xf32> to vector<16x16xbf16>
    %c0_52 = arith.constant 0 : index
    %c0_53 = arith.constant 0 : index
    %c48 = arith.constant 48 : index
    %71 = vector.load %arg6[%c0_52, %c0_53, %c48] : memref<1x16x64xbf16, #tpu.memory_space<vmem>>, vector<1x16x16xbf16>
    %72 = vector.shape_cast %71 : vector<1x16x16xbf16> to vector<16x16xbf16>
    %73 = vector.shape_cast %70 : vector<16x16xbf16> to vector<1x16x16xbf16>
    tpu.vector_store %arg6[%c0_52, %c0_53, %c48], %73 {strides = array<i32>} : memref<1x16x64xbf16, #tpu.memory_space<vmem>>, vector<1x16x16xbf16>,
    return
  }
  func.func @transform_0(%arg0: i32, %arg1: i32) -> (i32, i32, i32) {
    %c0_i32 = arith.constant 0 : i32
    %c0_i32_0 = arith.constant 0 : i32
    return %arg0, %arg1, %c0_i32 : i32, i32, i32
  }
  func.func @transform_1(%arg0: i32, %arg1: i32) -> (i32, i32, i32) {
    %c1_i32 = arith.constant 1 : i32
    %0 = arith.addi %arg1, %c1_i32 : i32
    %c1_i32_0 = arith.constant 1 : i32
    %1 = arith.muli %0, %c1_i32_0 : i32
    %c0_i32 = arith.constant 0 : i32
    %c0_i32_1 = arith.constant 0 : i32
    return %arg0, %1, %c0_i32 : i32, i32, i32
  }
  func.func @transform_2(%arg0: i32, %arg1: i32) -> (i32, i32, i32, i32) {
    %c0_i32 = arith.constant 0 : i32
    %c0_i32_0 = arith.constant 0 : i32
    %c0_i32_1 = arith.constant 0 : i32
    %c0_i32_2 = arith.constant 0 : i32
    %c0_i32_3 = arith.constant 0 : i32
    return %c0_i32, %c0_i32_0, %c0_i32_1, %c0_i32_2 : i32, i32, i32, i32
  }
  func.func @transform_3(%arg0: i32, %arg1: i32) -> (i32, i32) {
    %c0_i32 = arith.constant 0 : i32
    %c0_i32_0 = arith.constant 0 : i32
    %c0_i32_1 = arith.constant 0 : i32
    return %c0_i32, %c0_i32_0 : i32, i32
  }
  func.func @transform_4(%arg0: i32, %arg1: i32) -> (i32, i32, i32) {
    %c0_i32 = arith.constant 0 : i32
    %c0_i32_0 = arith.constant 0 : i32
    return %arg0, %arg1, %c0_i32 : i32, i32, i32
  }
}

module attributes {stable_mosaic.version = 11 : i64} {
  func.func @_conv_kernel(%arg0: i32, %arg1: i32, %arg2: memref<1x64x4xf32, #tpu.memory_space<vmem>>, %arg3: memref<1x1x4x16xbf16, #tpu.memory_space<vmem>>, %arg4: memref<1x16xf32, #tpu.memory_space<vmem>>, %arg5: memref<1x64x16xbf16, #tpu.memory_space<vmem>>, %arg6: memref<1x64x16xbf16, #tpu.memory_space<vmem>>) attributes {dimension_semantics = [#tpu.dimension_semantics<parallel>, #tpu.dimension_semantics<parallel>], iteration_bounds = array<i64: 2, 1>, scalar_prefetch = 0 : i64, scratch_operands = 0 : i64, tpu.core_type = #tpu.core_type<tc>, window_params = [{transform_indices = @transform_0, window_bounds = array<i64: 1, 64, 4>}, {pipeline_mode = #tpu.pipeline_mode<synchronous>, transform_indices = @transform_1, window_bounds = array<i64: 1, 1, 4, 16>}, {pipeline_mode = #tpu.pipeline_mode<synchronous>, transform_indices = @transform_2, window_bounds = array<i64: 1, 16>}, {transform_indices = @transform_3, window_bounds = array<i64: 1, 64, 16>}, {transform_indices = @transform_4, window_bounds = array<i64: 1, 64, 16>}]} {
    %c0 = arith.constant 0 : index
    %c0_0 = arith.constant 0 : index
    %c0_1 = arith.constant 0 : index
    %0 = vector.load %arg2[%c0, %c0_0, %c0_1] : memref<1x64x4xf32, #tpu.memory_space<vmem>>, vector<1x64x4xf32>
    %1 = vector.shape_cast %0 : vector<1x64x4xf32> to vector<64x4xf32>
    %2 = arith.truncf %1 : vector<64x4xf32> to vector<64x4xbf16>
    %c0_2 = arith.constant 0 : index
    %c0_3 = arith.constant 0 : index
    %3 = vector.load %arg4[%c0_2, %c0_3] : memref<1x16xf32, #tpu.memory_space<vmem>>, vector<1x16xf32>
    %c0_4 = arith.constant 0 : index
    %c0_5 = arith.constant 0 : index
    %c0_6 = arith.constant 0 : index
    %c0_7 = arith.constant 0 : index
    %4 = vector.load %arg3[%c0_4, %c0_5, %c0_6, %c0_7] : memref<1x1x4x16xbf16, #tpu.memory_space<vmem>>, vector<1x1x4x16xbf16>
    %5 = vector.shape_cast %4 : vector<1x1x4x16xbf16> to vector<4x16xbf16>
    %cst = arith.constant dense<0.000000e+00> : vector<64x16xf32>
    %6 = tpu.matmul %2, %5, %cst {dimension_numbers = #tpu.dot_dimension_numbers<[1], [0], [0], [1], [0, 0, 1, 1], [], []>} : vector<64x4xbf16>, vector<4x16xbf16>, vector<64x16xf32> -> vector<64x16xf32>
    %7 = vector.broadcast %3 : vector<1x16xf32> to vector<64x16xf32>
    %8 = arith.addf %6, %7 : vector<64x16xf32>
    %c0_8 = arith.constant 0 : index
    %c0_9 = arith.constant 0 : index
    %c0_10 = arith.constant 0 : index
    %9 = vector.load %arg5[%c0_8, %c0_9, %c0_10] : memref<1x64x16xbf16, #tpu.memory_space<vmem>>, vector<1x64x16xbf16>
    %10 = vector.shape_cast %9 : vector<1x64x16xbf16> to vector<64x16xbf16>
    %11 = arith.extf %10 : vector<64x16xbf16> to vector<64x16xf32>
    %12 = arith.addf %8, %11 : vector<64x16xf32>
    %13 = arith.truncf %12 : vector<64x16xf32> to vector<64x16xbf16>
    %c0_11 = arith.constant 0 : index
    %c0_12 = arith.constant 0 : index
    %c0_13 = arith.constant 0 : index
    %14 = vector.load %arg6[%c0_11, %c0_12, %c0_13] : memref<1x64x16xbf16, #tpu.memory_space<vmem>>, vector<1x64x16xbf16>
    %15 = vector.shape_cast %14 : vector<1x64x16xbf16> to vector<64x16xbf16>
    %16 = vector.shape_cast %13 : vector<64x16xbf16> to vector<1x64x16xbf16>
    tpu.vector_store %arg6[%c0_11, %c0_12, %c0_13], %16 {strides = array<i32>} : memref<1x64x16xbf16, #tpu.memory_space<vmem>>, vector<1x64x16xbf16>,
    return
  }
  func.func @transform_0(%arg0: i32, %arg1: i32) -> (i32, i32, i32) {
    %c0_i32 = arith.constant 0 : i32
    %c0_i32_0 = arith.constant 0 : i32
    return %arg0, %arg1, %c0_i32 : i32, i32, i32
  }
  func.func @transform_1(%arg0: i32, %arg1: i32) -> (i32, i32, i32, i32) {
    %c0_i32 = arith.constant 0 : i32
    %c0_i32_0 = arith.constant 0 : i32
    %c0_i32_1 = arith.constant 0 : i32
    %c0_i32_2 = arith.constant 0 : i32
    %c0_i32_3 = arith.constant 0 : i32
    return %c0_i32, %c0_i32_0, %c0_i32_1, %c0_i32_2 : i32, i32, i32, i32
  }
  func.func @transform_2(%arg0: i32, %arg1: i32) -> (i32, i32) {
    %c0_i32 = arith.constant 0 : i32
    %c0_i32_0 = arith.constant 0 : i32
    %c0_i32_1 = arith.constant 0 : i32
    return %c0_i32, %c0_i32_0 : i32, i32
  }
  func.func @transform_3(%arg0: i32, %arg1: i32) -> (i32, i32, i32) {
    %c0_i32 = arith.constant 0 : i32
    %c0_i32_0 = arith.constant 0 : i32
    return %arg0, %arg1, %c0_i32 : i32, i32, i32
  }
  func.func @transform_4(%arg0: i32, %arg1: i32) -> (i32, i32, i32) {
    %c0_i32 = arith.constant 0 : i32
    %c0_i32_0 = arith.constant 0 : i32
    return %arg0, %arg1, %c0_i32 : i32, i32, i32
  }
}

module attributes {stable_mosaic.version = 11 : i64} {
  func.func @_conv_kernel(%arg0: i32, %arg1: i32, %arg2: memref<1x64x16xbf16, #tpu.memory_space<vmem>>, %arg3: memref<1x16x16xbf16, #tpu.memory_space<vmem>>, %arg4: memref<1x3x16x16xbf16, #tpu.memory_space<vmem>>, %arg5: memref<1x16xf32, #tpu.memory_space<vmem>>, %arg6: memref<1x64x16xbf16, #tpu.memory_space<vmem>>) attributes {dimension_semantics = [#tpu.dimension_semantics<parallel>, #tpu.dimension_semantics<parallel>], iteration_bounds = array<i64: 2, 1>, scalar_prefetch = 0 : i64, scratch_operands = 0 : i64, tpu.core_type = #tpu.core_type<tc>, window_params = [{transform_indices = @transform_0, window_bounds = array<i64: 1, 64, 16>}, {transform_indices = @transform_1, window_bounds = array<i64: 1, 16, 16>}, {pipeline_mode = #tpu.pipeline_mode<synchronous>, transform_indices = @transform_2, window_bounds = array<i64: 1, 3, 16, 16>}, {pipeline_mode = #tpu.pipeline_mode<synchronous>, transform_indices = @transform_3, window_bounds = array<i64: 1, 16>}, {transform_indices = @transform_4, window_bounds = array<i64: 1, 64, 16>}]} {
    %c0 = arith.constant 0 : index
    %c0_0 = arith.constant 0 : index
    %c0_1 = arith.constant 0 : index
    %0 = vector.load %arg2[%c0, %c0_0, %c0_1] : memref<1x64x16xbf16, #tpu.memory_space<vmem>>, vector<1x64x16xbf16>
    %1 = vector.shape_cast %0 : vector<1x64x16xbf16> to vector<64x16xbf16>
    %2 = arith.extf %1 : vector<64x16xbf16> to vector<64x16xf32>
    %c0_2 = arith.constant 0 : index
    %c0_3 = arith.constant 0 : index
    %c0_4 = arith.constant 0 : index
    %3 = vector.load %arg3[%c0_2, %c0_3, %c0_4] : memref<1x16x16xbf16, #tpu.memory_space<vmem>>, vector<1x16x16xbf16>
    %4 = vector.shape_cast %3 : vector<1x16x16xbf16> to vector<16x16xbf16>
    %5 = arith.extf %4 : vector<16x16xbf16> to vector<16x16xf32>
    %6 = tpu.concatenate %2, %5 in 0 : vector<64x16xf32>, vector<16x16xf32> -> vector<80x16xf32>
    %cst = arith.constant 0.000000e+00 : f32
    %7 = vector.broadcast %cst : f32 to vector<80x16xf32>
    %8 = arith.cmpf oge, %6, %7 : vector<80x16xf32>
    %cst_5 = arith.constant 1.000000e-01 : f32
    %9 = vector.broadcast %cst_5 : f32 to vector<80x16xf32>
    %10 = arith.mulf %9, %6 : vector<80x16xf32>
    %11 = arith.select %8, %6, %10 : vector<80x16xi1>, vector<80x16xf32>
    %12 = arith.truncf %11 : vector<80x16xf32> to vector<80x16xbf16>
    %c0_6 = arith.constant 0 : index
    %c0_7 = arith.constant 0 : index
    %13 = vector.load %arg5[%c0_6, %c0_7] : memref<1x16xf32, #tpu.memory_space<vmem>>, vector<1x16xf32>
    %14 = vector.extract_strided_slice %12 {offsets = [0, 0], sizes = [64, 16], strides = [1, 1]} : vector<80x16xbf16> to vector<64x16xbf16>
    %c0_8 = arith.constant 0 : index
    %c0_9 = arith.constant 0 : index
    %c0_10 = arith.constant 0 : index
    %c0_11 = arith.constant 0 : index
    %15 = vector.load %arg4[%c0_8, %c0_9, %c0_10, %c0_11] : memref<1x3x16x16xbf16, #tpu.memory_space<vmem>>, vector<1x1x16x16xbf16>
    %16 = vector.shape_cast %15 : vector<1x1x16x16xbf16> to vector<16x16xbf16>
    %cst_12 = arith.constant dense<0.000000e+00> : vector<64x16xf32>
    %17 = tpu.matmul %14, %16, %cst_12 {dimension_numbers = #tpu.dot_dimension_numbers<[1], [0], [0], [1], [0, 0, 1, 1], [], []>} : vector<64x16xbf16>, vector<16x16xbf16>, vector<64x16xf32> -> vector<64x16xf32>
    %18 = vector.extract_strided_slice %12 {offsets = [1, 0], sizes = [64, 16], strides = [1, 1]} : vector<80x16xbf16> to vector<64x16xbf16>
    %c0_13 = arith.constant 0 : index
    %c1 = arith.constant 1 : index
    %c0_14 = arith.constant 0 : index
    %c0_15 = arith.constant 0 : index
    %19 = vector.load %arg4[%c0_13, %c1, %c0_14, %c0_15] : memref<1x3x16x16xbf16, #tpu.memory_space<vmem>>, vector<1x1x16x16xbf16>
    %20 = vector.shape_cast %19 : vector<1x1x16x16xbf16> to vector<16x16xbf16>
    %cst_16 = arith.constant dense<0.000000e+00> : vector<64x16xf32>
    %21 = tpu.matmul %18, %20, %cst_16 {dimension_numbers = #tpu.dot_dimension_numbers<[1], [0], [0], [1], [0, 0, 1, 1], [], []>} : vector<64x16xbf16>, vector<16x16xbf16>, vector<64x16xf32> -> vector<64x16xf32>
    %22 = arith.addf %17, %21 : vector<64x16xf32>
    %23 = vector.extract_strided_slice %12 {offsets = [2, 0], sizes = [64, 16], strides = [1, 1]} : vector<80x16xbf16> to vector<64x16xbf16>
    %c0_17 = arith.constant 0 : index
    %c2 = arith.constant 2 : index
    %c0_18 = arith.constant 0 : index
    %c0_19 = arith.constant 0 : index
    %24 = vector.load %arg4[%c0_17, %c2, %c0_18, %c0_19] : memref<1x3x16x16xbf16, #tpu.memory_space<vmem>>, vector<1x1x16x16xbf16>
    %25 = vector.shape_cast %24 : vector<1x1x16x16xbf16> to vector<16x16xbf16>
    %cst_20 = arith.constant dense<0.000000e+00> : vector<64x16xf32>
    %26 = tpu.matmul %23, %25, %cst_20 {dimension_numbers = #tpu.dot_dimension_numbers<[1], [0], [0], [1], [0, 0, 1, 1], [], []>} : vector<64x16xbf16>, vector<16x16xbf16>, vector<64x16xf32> -> vector<64x16xf32>
    %27 = arith.addf %22, %26 : vector<64x16xf32>
    %28 = vector.broadcast %13 : vector<1x16xf32> to vector<64x16xf32>
    %29 = arith.addf %27, %28 : vector<64x16xf32>
    %30 = arith.truncf %29 : vector<64x16xf32> to vector<64x16xbf16>
    %c0_21 = arith.constant 0 : index
    %c0_22 = arith.constant 0 : index
    %c0_23 = arith.constant 0 : index
    %31 = vector.load %arg6[%c0_21, %c0_22, %c0_23] : memref<1x64x16xbf16, #tpu.memory_space<vmem>>, vector<1x64x16xbf16>
    %32 = vector.shape_cast %31 : vector<1x64x16xbf16> to vector<64x16xbf16>
    %33 = vector.shape_cast %30 : vector<64x16xbf16> to vector<1x64x16xbf16>
    tpu.vector_store %arg6[%c0_21, %c0_22, %c0_23], %33 {strides = array<i32>} : memref<1x64x16xbf16, #tpu.memory_space<vmem>>, vector<1x64x16xbf16>,
    return
  }
  func.func @transform_0(%arg0: i32, %arg1: i32) -> (i32, i32, i32) {
    %c0_i32 = arith.constant 0 : i32
    %c0_i32_0 = arith.constant 0 : i32
    return %arg0, %arg1, %c0_i32 : i32, i32, i32
  }
  func.func @transform_1(%arg0: i32, %arg1: i32) -> (i32, i32, i32) {
    %c1_i32 = arith.constant 1 : i32
    %0 = arith.addi %arg1, %c1_i32 : i32
    %c4_i32 = arith.constant 4 : i32
    %1 = arith.muli %0, %c4_i32 : i32
    %c0_i32 = arith.constant 0 : i32
    %c0_i32_0 = arith.constant 0 : i32
    return %arg0, %1, %c0_i32 : i32, i32, i32
  }
  func.func @transform_2(%arg0: i32, %arg1: i32) -> (i32, i32, i32, i32) {
    %c0_i32 = arith.constant 0 : i32
    %c0_i32_0 = arith.constant 0 : i32
    %c0_i32_1 = arith.constant 0 : i32
    %c0_i32_2 = arith.constant 0 : i32
    %c0_i32_3 = arith.constant 0 : i32
    return %c0_i32, %c0_i32_0, %c0_i32_1, %c0_i32_2 : i32, i32, i32, i32
  }
  func.func @transform_3(%arg0: i32, %arg1: i32) -> (i32, i32) {
    %c0_i32 = arith.constant 0 : i32
    %c0_i32_0 = arith.constant 0 : i32
    %c0_i32_1 = arith.constant 0 : i32
    return %c0_i32, %c0_i32_0 : i32, i32
  }
  func.func @transform_4(%arg0: i32, %arg1: i32) -> (i32, i32, i32) {
    %c0_i32 = arith.constant 0 : i32
    %c0_i32_0 = arith.constant 0 : i32
    return %arg0, %arg1, %c0_i32 : i32, i32, i32
  }
}

module attributes {stable_mosaic.version = 11 : i64} {
  func.func @_conv_kernel(%arg0: i32, %arg1: i32, %arg2: memref<1x64x16xbf16, #tpu.memory_space<vmem>>, %arg3: memref<1x16x16xbf16, #tpu.memory_space<vmem>>, %arg4: memref<1x3x16x16xbf16, #tpu.memory_space<vmem>>, %arg5: memref<1x16xf32, #tpu.memory_space<vmem>>, %arg6: memref<1x64x16xbf16, #tpu.memory_space<vmem>>, %arg7: memref<1x64x16xbf16, #tpu.memory_space<vmem>>) attributes {dimension_semantics = [#tpu.dimension_semantics<parallel>, #tpu.dimension_semantics<parallel>], iteration_bounds = array<i64: 2, 1>, scalar_prefetch = 0 : i64, scratch_operands = 0 : i64, tpu.core_type = #tpu.core_type<tc>, window_params = [{transform_indices = @transform_0, window_bounds = array<i64: 1, 64, 16>}, {transform_indices = @transform_1, window_bounds = array<i64: 1, 16, 16>}, {pipeline_mode = #tpu.pipeline_mode<synchronous>, transform_indices = @transform_2, window_bounds = array<i64: 1, 3, 16, 16>}, {pipeline_mode = #tpu.pipeline_mode<synchronous>, transform_indices = @transform_3, window_bounds = array<i64: 1, 16>}, {transform_indices = @transform_4, window_bounds = array<i64: 1, 64, 16>}, {transform_indices = @transform_5, window_bounds = array<i64: 1, 64, 16>}]} {
    %c0 = arith.constant 0 : index
    %c0_0 = arith.constant 0 : index
    %c0_1 = arith.constant 0 : index
    %0 = vector.load %arg2[%c0, %c0_0, %c0_1] : memref<1x64x16xbf16, #tpu.memory_space<vmem>>, vector<1x64x16xbf16>
    %1 = vector.shape_cast %0 : vector<1x64x16xbf16> to vector<64x16xbf16>
    %2 = arith.extf %1 : vector<64x16xbf16> to vector<64x16xf32>
    %c0_2 = arith.constant 0 : index
    %c0_3 = arith.constant 0 : index
    %c0_4 = arith.constant 0 : index
    %3 = vector.load %arg3[%c0_2, %c0_3, %c0_4] : memref<1x16x16xbf16, #tpu.memory_space<vmem>>, vector<1x16x16xbf16>
    %4 = vector.shape_cast %3 : vector<1x16x16xbf16> to vector<16x16xbf16>
    %5 = arith.extf %4 : vector<16x16xbf16> to vector<16x16xf32>
    %6 = tpu.concatenate %2, %5 in 0 : vector<64x16xf32>, vector<16x16xf32> -> vector<80x16xf32>
    %cst = arith.constant 0.000000e+00 : f32
    %7 = vector.broadcast %cst : f32 to vector<80x16xf32>
    %8 = arith.cmpf oge, %6, %7 : vector<80x16xf32>
    %cst_5 = arith.constant 1.000000e-01 : f32
    %9 = vector.broadcast %cst_5 : f32 to vector<80x16xf32>
    %10 = arith.mulf %9, %6 : vector<80x16xf32>
    %11 = arith.select %8, %6, %10 : vector<80x16xi1>, vector<80x16xf32>
    %12 = arith.truncf %11 : vector<80x16xf32> to vector<80x16xbf16>
    %c0_6 = arith.constant 0 : index
    %c0_7 = arith.constant 0 : index
    %13 = vector.load %arg5[%c0_6, %c0_7] : memref<1x16xf32, #tpu.memory_space<vmem>>, vector<1x16xf32>
    %14 = vector.extract_strided_slice %12 {offsets = [0, 0], sizes = [64, 16], strides = [1, 1]} : vector<80x16xbf16> to vector<64x16xbf16>
    %c0_8 = arith.constant 0 : index
    %c0_9 = arith.constant 0 : index
    %c0_10 = arith.constant 0 : index
    %c0_11 = arith.constant 0 : index
    %15 = vector.load %arg4[%c0_8, %c0_9, %c0_10, %c0_11] : memref<1x3x16x16xbf16, #tpu.memory_space<vmem>>, vector<1x1x16x16xbf16>
    %16 = vector.shape_cast %15 : vector<1x1x16x16xbf16> to vector<16x16xbf16>
    %cst_12 = arith.constant dense<0.000000e+00> : vector<64x16xf32>
    %17 = tpu.matmul %14, %16, %cst_12 {dimension_numbers = #tpu.dot_dimension_numbers<[1], [0], [0], [1], [0, 0, 1, 1], [], []>} : vector<64x16xbf16>, vector<16x16xbf16>, vector<64x16xf32> -> vector<64x16xf32>
    %18 = vector.extract_strided_slice %12 {offsets = [1, 0], sizes = [64, 16], strides = [1, 1]} : vector<80x16xbf16> to vector<64x16xbf16>
    %c0_13 = arith.constant 0 : index
    %c1 = arith.constant 1 : index
    %c0_14 = arith.constant 0 : index
    %c0_15 = arith.constant 0 : index
    %19 = vector.load %arg4[%c0_13, %c1, %c0_14, %c0_15] : memref<1x3x16x16xbf16, #tpu.memory_space<vmem>>, vector<1x1x16x16xbf16>
    %20 = vector.shape_cast %19 : vector<1x1x16x16xbf16> to vector<16x16xbf16>
    %cst_16 = arith.constant dense<0.000000e+00> : vector<64x16xf32>
    %21 = tpu.matmul %18, %20, %cst_16 {dimension_numbers = #tpu.dot_dimension_numbers<[1], [0], [0], [1], [0, 0, 1, 1], [], []>} : vector<64x16xbf16>, vector<16x16xbf16>, vector<64x16xf32> -> vector<64x16xf32>
    %22 = arith.addf %17, %21 : vector<64x16xf32>
    %23 = vector.extract_strided_slice %12 {offsets = [2, 0], sizes = [64, 16], strides = [1, 1]} : vector<80x16xbf16> to vector<64x16xbf16>
    %c0_17 = arith.constant 0 : index
    %c2 = arith.constant 2 : index
    %c0_18 = arith.constant 0 : index
    %c0_19 = arith.constant 0 : index
    %24 = vector.load %arg4[%c0_17, %c2, %c0_18, %c0_19] : memref<1x3x16x16xbf16, #tpu.memory_space<vmem>>, vector<1x1x16x16xbf16>
    %25 = vector.shape_cast %24 : vector<1x1x16x16xbf16> to vector<16x16xbf16>
    %cst_20 = arith.constant dense<0.000000e+00> : vector<64x16xf32>
    %26 = tpu.matmul %23, %25, %cst_20 {dimension_numbers = #tpu.dot_dimension_numbers<[1], [0], [0], [1], [0, 0, 1, 1], [], []>} : vector<64x16xbf16>, vector<16x16xbf16>, vector<64x16xf32> -> vector<64x16xf32>
    %27 = arith.addf %22, %26 : vector<64x16xf32>
    %28 = vector.broadcast %13 : vector<1x16xf32> to vector<64x16xf32>
    %29 = arith.addf %27, %28 : vector<64x16xf32>
    %c0_21 = arith.constant 0 : index
    %c0_22 = arith.constant 0 : index
    %c0_23 = arith.constant 0 : index
    %30 = vector.load %arg6[%c0_21, %c0_22, %c0_23] : memref<1x64x16xbf16, #tpu.memory_space<vmem>>, vector<1x64x16xbf16>
    %31 = vector.shape_cast %30 : vector<1x64x16xbf16> to vector<64x16xbf16>
    %32 = arith.extf %31 : vector<64x16xbf16> to vector<64x16xf32>
    %33 = arith.addf %29, %32 : vector<64x16xf32>
    %34 = arith.truncf %33 : vector<64x16xf32> to vector<64x16xbf16>
    %c0_24 = arith.constant 0 : index
    %c0_25 = arith.constant 0 : index
    %c0_26 = arith.constant 0 : index
    %35 = vector.load %arg7[%c0_24, %c0_25, %c0_26] : memref<1x64x16xbf16, #tpu.memory_space<vmem>>, vector<1x64x16xbf16>
    %36 = vector.shape_cast %35 : vector<1x64x16xbf16> to vector<64x16xbf16>
    %37 = vector.shape_cast %34 : vector<64x16xbf16> to vector<1x64x16xbf16>
    tpu.vector_store %arg7[%c0_24, %c0_25, %c0_26], %37 {strides = array<i32>} : memref<1x64x16xbf16, #tpu.memory_space<vmem>>, vector<1x64x16xbf16>,
    return
  }
  func.func @transform_0(%arg0: i32, %arg1: i32) -> (i32, i32, i32) {
    %c0_i32 = arith.constant 0 : i32
    %c0_i32_0 = arith.constant 0 : i32
    return %arg0, %arg1, %c0_i32 : i32, i32, i32
  }
  func.func @transform_1(%arg0: i32, %arg1: i32) -> (i32, i32, i32) {
    %c1_i32 = arith.constant 1 : i32
    %0 = arith.addi %arg1, %c1_i32 : i32
    %c4_i32 = arith.constant 4 : i32
    %1 = arith.muli %0, %c4_i32 : i32
    %c0_i32 = arith.constant 0 : i32
    %c0_i32_0 = arith.constant 0 : i32
    return %arg0, %1, %c0_i32 : i32, i32, i32
  }
  func.func @transform_2(%arg0: i32, %arg1: i32) -> (i32, i32, i32, i32) {
    %c0_i32 = arith.constant 0 : i32
    %c0_i32_0 = arith.constant 0 : i32
    %c0_i32_1 = arith.constant 0 : i32
    %c0_i32_2 = arith.constant 0 : i32
    %c0_i32_3 = arith.constant 0 : i32
    return %c0_i32, %c0_i32_0, %c0_i32_1, %c0_i32_2 : i32, i32, i32, i32
  }
  func.func @transform_3(%arg0: i32, %arg1: i32) -> (i32, i32) {
    %c0_i32 = arith.constant 0 : i32
    %c0_i32_0 = arith.constant 0 : i32
    %c0_i32_1 = arith.constant 0 : i32
    return %c0_i32, %c0_i32_0 : i32, i32
  }
  func.func @transform_4(%arg0: i32, %arg1: i32) -> (i32, i32, i32) {
    %c0_i32 = arith.constant 0 : i32
    %c0_i32_0 = arith.constant 0 : i32
    return %arg0, %arg1, %c0_i32 : i32, i32, i32
  }
  func.func @transform_5(%arg0: i32, %arg1: i32) -> (i32, i32, i32) {
    %c0_i32 = arith.constant 0 : i32
    %c0_i32_0 = arith.constant 0 : i32
    return %arg0, %arg1, %c0_i32 : i32, i32, i32
  }
}

module attributes {stable_mosaic.version = 11 : i64} {
  func.func @_conv_kernel(%arg0: i32, %arg1: i32, %arg2: memref<1x64x16xbf16, #tpu.memory_space<vmem>>, %arg3: memref<1x16x16xbf16, #tpu.memory_space<vmem>>, %arg4: memref<1x3x16x16xbf16, #tpu.memory_space<vmem>>, %arg5: memref<1x16xf32, #tpu.memory_space<vmem>>, %arg6: memref<1x64x16xbf16, #tpu.memory_space<vmem>>) attributes {dimension_semantics = [#tpu.dimension_semantics<parallel>, #tpu.dimension_semantics<parallel>], iteration_bounds = array<i64: 2, 1>, scalar_prefetch = 0 : i64, scratch_operands = 0 : i64, tpu.core_type = #tpu.core_type<tc>, window_params = [{transform_indices = @transform_0, window_bounds = array<i64: 1, 64, 16>}, {transform_indices = @transform_1, window_bounds = array<i64: 1, 16, 16>}, {pipeline_mode = #tpu.pipeline_mode<synchronous>, transform_indices = @transform_2, window_bounds = array<i64: 1, 3, 16, 16>}, {pipeline_mode = #tpu.pipeline_mode<synchronous>, transform_indices = @transform_3, window_bounds = array<i64: 1, 16>}, {transform_indices = @transform_4, window_bounds = array<i64: 1, 64, 16>}]} {
    %c0 = arith.constant 0 : index
    %c0_0 = arith.constant 0 : index
    %c0_1 = arith.constant 0 : index
    %0 = vector.load %arg2[%c0, %c0_0, %c0_1] : memref<1x64x16xbf16, #tpu.memory_space<vmem>>, vector<1x64x16xbf16>
    %1 = vector.shape_cast %0 : vector<1x64x16xbf16> to vector<64x16xbf16>
    %2 = arith.extf %1 : vector<64x16xbf16> to vector<64x16xf32>
    %c0_2 = arith.constant 0 : index
    %c0_3 = arith.constant 0 : index
    %c0_4 = arith.constant 0 : index
    %3 = vector.load %arg3[%c0_2, %c0_3, %c0_4] : memref<1x16x16xbf16, #tpu.memory_space<vmem>>, vector<1x16x16xbf16>
    %4 = vector.shape_cast %3 : vector<1x16x16xbf16> to vector<16x16xbf16>
    %5 = arith.extf %4 : vector<16x16xbf16> to vector<16x16xf32>
    %6 = tpu.concatenate %2, %5 in 0 : vector<64x16xf32>, vector<16x16xf32> -> vector<80x16xf32>
    %cst = arith.constant 0.000000e+00 : f32
    %7 = vector.broadcast %cst : f32 to vector<80x16xf32>
    %8 = arith.cmpf oge, %6, %7 : vector<80x16xf32>
    %cst_5 = arith.constant 1.000000e-01 : f32
    %9 = vector.broadcast %cst_5 : f32 to vector<80x16xf32>
    %10 = arith.mulf %9, %6 : vector<80x16xf32>
    %11 = arith.select %8, %6, %10 : vector<80x16xi1>, vector<80x16xf32>
    %12 = arith.truncf %11 : vector<80x16xf32> to vector<80x16xbf16>
    %c0_6 = arith.constant 0 : index
    %c0_7 = arith.constant 0 : index
    %13 = vector.load %arg5[%c0_6, %c0_7] : memref<1x16xf32, #tpu.memory_space<vmem>>, vector<1x16xf32>
    %14 = vector.extract_strided_slice %12 {offsets = [0, 0], sizes = [64, 16], strides = [1, 1]} : vector<80x16xbf16> to vector<64x16xbf16>
    %c0_8 = arith.constant 0 : index
    %c0_9 = arith.constant 0 : index
    %c0_10 = arith.constant 0 : index
    %c0_11 = arith.constant 0 : index
    %15 = vector.load %arg4[%c0_8, %c0_9, %c0_10, %c0_11] : memref<1x3x16x16xbf16, #tpu.memory_space<vmem>>, vector<1x1x16x16xbf16>
    %16 = vector.shape_cast %15 : vector<1x1x16x16xbf16> to vector<16x16xbf16>
    %cst_12 = arith.constant dense<0.000000e+00> : vector<64x16xf32>
    %17 = tpu.matmul %14, %16, %cst_12 {dimension_numbers = #tpu.dot_dimension_numbers<[1], [0], [0], [1], [0, 0, 1, 1], [], []>} : vector<64x16xbf16>, vector<16x16xbf16>, vector<64x16xf32> -> vector<64x16xf32>
    %18 = vector.extract_strided_slice %12 {offsets = [3, 0], sizes = [64, 16], strides = [1, 1]} : vector<80x16xbf16> to vector<64x16xbf16>
    %c0_13 = arith.constant 0 : index
    %c1 = arith.constant 1 : index
    %c0_14 = arith.constant 0 : index
    %c0_15 = arith.constant 0 : index
    %19 = vector.load %arg4[%c0_13, %c1, %c0_14, %c0_15] : memref<1x3x16x16xbf16, #tpu.memory_space<vmem>>, vector<1x1x16x16xbf16>
    %20 = vector.shape_cast %19 : vector<1x1x16x16xbf16> to vector<16x16xbf16>
    %cst_16 = arith.constant dense<0.000000e+00> : vector<64x16xf32>
    %21 = tpu.matmul %18, %20, %cst_16 {dimension_numbers = #tpu.dot_dimension_numbers<[1], [0], [0], [1], [0, 0, 1, 1], [], []>} : vector<64x16xbf16>, vector<16x16xbf16>, vector<64x16xf32> -> vector<64x16xf32>
    %22 = arith.addf %17, %21 : vector<64x16xf32>
    %23 = vector.extract_strided_slice %12 {offsets = [6, 0], sizes = [64, 16], strides = [1, 1]} : vector<80x16xbf16> to vector<64x16xbf16>
    %c0_17 = arith.constant 0 : index
    %c2 = arith.constant 2 : index
    %c0_18 = arith.constant 0 : index
    %c0_19 = arith.constant 0 : index
    %24 = vector.load %arg4[%c0_17, %c2, %c0_18, %c0_19] : memref<1x3x16x16xbf16, #tpu.memory_space<vmem>>, vector<1x1x16x16xbf16>
    %25 = vector.shape_cast %24 : vector<1x1x16x16xbf16> to vector<16x16xbf16>
    %cst_20 = arith.constant dense<0.000000e+00> : vector<64x16xf32>
    %26 = tpu.matmul %23, %25, %cst_20 {dimension_numbers = #tpu.dot_dimension_numbers<[1], [0], [0], [1], [0, 0, 1, 1], [], []>} : vector<64x16xbf16>, vector<16x16xbf16>, vector<64x16xf32> -> vector<64x16xf32>
    %27 = arith.addf %22, %26 : vector<64x16xf32>
    %28 = vector.broadcast %13 : vector<1x16xf32> to vector<64x16xf32>
    %29 = arith.addf %27, %28 : vector<64x16xf32>
    %30 = arith.truncf %29 : vector<64x16xf32> to vector<64x16xbf16>
    %c0_21 = arith.constant 0 : index
    %c0_22 = arith.constant 0 : index
    %c0_23 = arith.constant 0 : index
    %31 = vector.load %arg6[%c0_21, %c0_22, %c0_23] : memref<1x64x16xbf16, #tpu.memory_space<vmem>>, vector<1x64x16xbf16>
    %32 = vector.shape_cast %31 : vector<1x64x16xbf16> to vector<64x16xbf16>
    %33 = vector.shape_cast %30 : vector<64x16xbf16> to vector<1x64x16xbf16>
    tpu.vector_store %arg6[%c0_21, %c0_22, %c0_23], %33 {strides = array<i32>} : memref<1x64x16xbf16, #tpu.memory_space<vmem>>, vector<1x64x16xbf16>,
    return
  }
  func.func @transform_0(%arg0: i32, %arg1: i32) -> (i32, i32, i32) {
    %c0_i32 = arith.constant 0 : i32
    %c0_i32_0 = arith.constant 0 : i32
    return %arg0, %arg1, %c0_i32 : i32, i32, i32
  }
  func.func @transform_1(%arg0: i32, %arg1: i32) -> (i32, i32, i32) {
    %c1_i32 = arith.constant 1 : i32
    %0 = arith.addi %arg1, %c1_i32 : i32
    %c4_i32 = arith.constant 4 : i32
    %1 = arith.muli %0, %c4_i32 : i32
    %c0_i32 = arith.constant 0 : i32
    %c0_i32_0 = arith.constant 0 : i32
    return %arg0, %1, %c0_i32 : i32, i32, i32
  }
  func.func @transform_2(%arg0: i32, %arg1: i32) -> (i32, i32, i32, i32) {
    %c0_i32 = arith.constant 0 : i32
    %c0_i32_0 = arith.constant 0 : i32
    %c0_i32_1 = arith.constant 0 : i32
    %c0_i32_2 = arith.constant 0 : i32
    %c0_i32_3 = arith.constant 0 : i32
    return %c0_i32, %c0_i32_0, %c0_i32_1, %c0_i32_2 : i32, i32, i32, i32
  }
  func.func @transform_3(%arg0: i32, %arg1: i32) -> (i32, i32) {
    %c0_i32 = arith.constant 0 : i32
    %c0_i32_0 = arith.constant 0 : i32
    %c0_i32_1 = arith.constant 0 : i32
    return %c0_i32, %c0_i32_0 : i32, i32
  }
  func.func @transform_4(%arg0: i32, %arg1: i32) -> (i32, i32, i32) {
    %c0_i32 = arith.constant 0 : i32
    %c0_i32_0 = arith.constant 0 : i32
    return %arg0, %arg1, %c0_i32 : i32, i32, i32
  }
}

module attributes {stable_mosaic.version = 11 : i64} {
  func.func @_conv_kernel(%arg0: i32, %arg1: i32, %arg2: memref<1x64x16xbf16, #tpu.memory_space<vmem>>, %arg3: memref<1x16x16xbf16, #tpu.memory_space<vmem>>, %arg4: memref<1x3x16x16xbf16, #tpu.memory_space<vmem>>, %arg5: memref<1x16xf32, #tpu.memory_space<vmem>>, %arg6: memref<1x64x16xbf16, #tpu.memory_space<vmem>>) attributes {dimension_semantics = [#tpu.dimension_semantics<parallel>, #tpu.dimension_semantics<parallel>], iteration_bounds = array<i64: 2, 1>, scalar_prefetch = 0 : i64, scratch_operands = 0 : i64, tpu.core_type = #tpu.core_type<tc>, window_params = [{transform_indices = @transform_0, window_bounds = array<i64: 1, 64, 16>}, {transform_indices = @transform_1, window_bounds = array<i64: 1, 16, 16>}, {pipeline_mode = #tpu.pipeline_mode<synchronous>, transform_indices = @transform_2, window_bounds = array<i64: 1, 3, 16, 16>}, {pipeline_mode = #tpu.pipeline_mode<synchronous>, transform_indices = @transform_3, window_bounds = array<i64: 1, 16>}, {transform_indices = @transform_4, window_bounds = array<i64: 1, 64, 16>}]} {
    %c0 = arith.constant 0 : index
    %c0_0 = arith.constant 0 : index
    %c0_1 = arith.constant 0 : index
    %0 = vector.load %arg2[%c0, %c0_0, %c0_1] : memref<1x64x16xbf16, #tpu.memory_space<vmem>>, vector<1x64x16xbf16>
    %1 = vector.shape_cast %0 : vector<1x64x16xbf16> to vector<64x16xbf16>
    %2 = arith.extf %1 : vector<64x16xbf16> to vector<64x16xf32>
    %c0_2 = arith.constant 0 : index
    %c0_3 = arith.constant 0 : index
    %c0_4 = arith.constant 0 : index
    %3 = vector.load %arg3[%c0_2, %c0_3, %c0_4] : memref<1x16x16xbf16, #tpu.memory_space<vmem>>, vector<1x16x16xbf16>
    %4 = vector.shape_cast %3 : vector<1x16x16xbf16> to vector<16x16xbf16>
    %5 = arith.extf %4 : vector<16x16xbf16> to vector<16x16xf32>
    %6 = tpu.concatenate %2, %5 in 0 : vector<64x16xf32>, vector<16x16xf32> -> vector<80x16xf32>
    %cst = arith.constant 0.000000e+00 : f32
    %7 = vector.broadcast %cst : f32 to vector<80x16xf32>
    %8 = arith.cmpf oge, %6, %7 : vector<80x16xf32>
    %cst_5 = arith.constant 1.000000e-01 : f32
    %9 = vector.broadcast %cst_5 : f32 to vector<80x16xf32>
    %10 = arith.mulf %9, %6 : vector<80x16xf32>
    %11 = arith.select %8, %6, %10 : vector<80x16xi1>, vector<80x16xf32>
    %12 = arith.truncf %11 : vector<80x16xf32> to vector<80x16xbf16>
    %c0_6 = arith.constant 0 : index
    %c0_7 = arith.constant 0 : index
    %13 = vector.load %arg5[%c0_6, %c0_7] : memref<1x16xf32, #tpu.memory_space<vmem>>, vector<1x16xf32>
    %14 = vector.extract_strided_slice %12 {offsets = [0, 0], sizes = [64, 16], strides = [1, 1]} : vector<80x16xbf16> to vector<64x16xbf16>
    %c0_8 = arith.constant 0 : index
    %c0_9 = arith.constant 0 : index
    %c0_10 = arith.constant 0 : index
    %c0_11 = arith.constant 0 : index
    %15 = vector.load %arg4[%c0_8, %c0_9, %c0_10, %c0_11] : memref<1x3x16x16xbf16, #tpu.memory_space<vmem>>, vector<1x1x16x16xbf16>
    %16 = vector.shape_cast %15 : vector<1x1x16x16xbf16> to vector<16x16xbf16>
    %cst_12 = arith.constant dense<0.000000e+00> : vector<64x16xf32>
    %17 = tpu.matmul %14, %16, %cst_12 {dimension_numbers = #tpu.dot_dimension_numbers<[1], [0], [0], [1], [0, 0, 1, 1], [], []>} : vector<64x16xbf16>, vector<16x16xbf16>, vector<64x16xf32> -> vector<64x16xf32>
    %18 = vector.extract_strided_slice %12 {offsets = [5, 0], sizes = [64, 16], strides = [1, 1]} : vector<80x16xbf16> to vector<64x16xbf16>
    %c0_13 = arith.constant 0 : index
    %c1 = arith.constant 1 : index
    %c0_14 = arith.constant 0 : index
    %c0_15 = arith.constant 0 : index
    %19 = vector.load %arg4[%c0_13, %c1, %c0_14, %c0_15] : memref<1x3x16x16xbf16, #tpu.memory_space<vmem>>, vector<1x1x16x16xbf16>
    %20 = vector.shape_cast %19 : vector<1x1x16x16xbf16> to vector<16x16xbf16>
    %cst_16 = arith.constant dense<0.000000e+00> : vector<64x16xf32>
    %21 = tpu.matmul %18, %20, %cst_16 {dimension_numbers = #tpu.dot_dimension_numbers<[1], [0], [0], [1], [0, 0, 1, 1], [], []>} : vector<64x16xbf16>, vector<16x16xbf16>, vector<64x16xf32> -> vector<64x16xf32>
    %22 = arith.addf %17, %21 : vector<64x16xf32>
    %23 = vector.extract_strided_slice %12 {offsets = [10, 0], sizes = [64, 16], strides = [1, 1]} : vector<80x16xbf16> to vector<64x16xbf16>
    %c0_17 = arith.constant 0 : index
    %c2 = arith.constant 2 : index
    %c0_18 = arith.constant 0 : index
    %c0_19 = arith.constant 0 : index
    %24 = vector.load %arg4[%c0_17, %c2, %c0_18, %c0_19] : memref<1x3x16x16xbf16, #tpu.memory_space<vmem>>, vector<1x1x16x16xbf16>
    %25 = vector.shape_cast %24 : vector<1x1x16x16xbf16> to vector<16x16xbf16>
    %cst_20 = arith.constant dense<0.000000e+00> : vector<64x16xf32>
    %26 = tpu.matmul %23, %25, %cst_20 {dimension_numbers = #tpu.dot_dimension_numbers<[1], [0], [0], [1], [0, 0, 1, 1], [], []>} : vector<64x16xbf16>, vector<16x16xbf16>, vector<64x16xf32> -> vector<64x16xf32>
    %27 = arith.addf %22, %26 : vector<64x16xf32>
    %28 = vector.broadcast %13 : vector<1x16xf32> to vector<64x16xf32>
    %29 = arith.addf %27, %28 : vector<64x16xf32>
    %30 = arith.truncf %29 : vector<64x16xf32> to vector<64x16xbf16>
    %c0_21 = arith.constant 0 : index
    %c0_22 = arith.constant 0 : index
    %c0_23 = arith.constant 0 : index
    %31 = vector.load %arg6[%c0_21, %c0_22, %c0_23] : memref<1x64x16xbf16, #tpu.memory_space<vmem>>, vector<1x64x16xbf16>
    %32 = vector.shape_cast %31 : vector<1x64x16xbf16> to vector<64x16xbf16>
    %33 = vector.shape_cast %30 : vector<64x16xbf16> to vector<1x64x16xbf16>
    tpu.vector_store %arg6[%c0_21, %c0_22, %c0_23], %33 {strides = array<i32>} : memref<1x64x16xbf16, #tpu.memory_space<vmem>>, vector<1x64x16xbf16>,
    return
  }
  func.func @transform_0(%arg0: i32, %arg1: i32) -> (i32, i32, i32) {
    %c0_i32 = arith.constant 0 : i32
    %c0_i32_0 = arith.constant 0 : i32
    return %arg0, %arg1, %c0_i32 : i32, i32, i32
  }
  func.func @transform_1(%arg0: i32, %arg1: i32) -> (i32, i32, i32) {
    %c1_i32 = arith.constant 1 : i32
    %0 = arith.addi %arg1, %c1_i32 : i32
    %c4_i32 = arith.constant 4 : i32
    %1 = arith.muli %0, %c4_i32 : i32
    %c0_i32 = arith.constant 0 : i32
    %c0_i32_0 = arith.constant 0 : i32
    return %arg0, %1, %c0_i32 : i32, i32, i32
  }
  func.func @transform_2(%arg0: i32, %arg1: i32) -> (i32, i32, i32, i32) {
    %c0_i32 = arith.constant 0 : i32
    %c0_i32_0 = arith.constant 0 : i32
    %c0_i32_1 = arith.constant 0 : i32
    %c0_i32_2 = arith.constant 0 : i32
    %c0_i32_3 = arith.constant 0 : i32
    return %c0_i32, %c0_i32_0, %c0_i32_1, %c0_i32_2 : i32, i32, i32, i32
  }
  func.func @transform_3(%arg0: i32, %arg1: i32) -> (i32, i32) {
    %c0_i32 = arith.constant 0 : i32
    %c0_i32_0 = arith.constant 0 : i32
    %c0_i32_1 = arith.constant 0 : i32
    return %c0_i32, %c0_i32_0 : i32, i32
  }
  func.func @transform_4(%arg0: i32, %arg1: i32) -> (i32, i32, i32) {
    %c0_i32 = arith.constant 0 : i32
    %c0_i32_0 = arith.constant 0 : i32
    return %arg0, %arg1, %c0_i32 : i32, i32, i32
  }
}

module attributes {stable_mosaic.version = 11 : i64} {
  func.func @_conv_kernel(%arg0: i32, %arg1: i32, %arg2: memref<1x64x16xbf16, #tpu.memory_space<vmem>>, %arg3: memref<1x16x16xbf16, #tpu.memory_space<vmem>>, %arg4: memref<2x2x16x8xbf16, #tpu.memory_space<vmem>>, %arg5: memref<1x8xf32, #tpu.memory_space<vmem>>, %arg6: memref<1x64x16xbf16, #tpu.memory_space<vmem>>) attributes {dimension_semantics = [#tpu.dimension_semantics<parallel>, #tpu.dimension_semantics<parallel>], iteration_bounds = array<i64: 2, 1>, scalar_prefetch = 0 : i64, scratch_operands = 0 : i64, tpu.core_type = #tpu.core_type<tc>, window_params = [{transform_indices = @transform_0, window_bounds = array<i64: 1, 64, 16>}, {transform_indices = @transform_1, window_bounds = array<i64: 1, 16, 16>}, {pipeline_mode = #tpu.pipeline_mode<synchronous>, transform_indices = @transform_2, window_bounds = array<i64: 2, 2, 16, 8>}, {pipeline_mode = #tpu.pipeline_mode<synchronous>, transform_indices = @transform_3, window_bounds = array<i64: 1, 8>}, {transform_indices = @transform_4, window_bounds = array<i64: 1, 64, 16>}]} {
    %c0 = arith.constant 0 : index
    %c0_0 = arith.constant 0 : index
    %c0_1 = arith.constant 0 : index
    %0 = vector.load %arg2[%c0, %c0_0, %c0_1] : memref<1x64x16xbf16, #tpu.memory_space<vmem>>, vector<1x64x16xbf16>
    %1 = vector.shape_cast %0 : vector<1x64x16xbf16> to vector<64x16xbf16>
    %2 = arith.extf %1 : vector<64x16xbf16> to vector<64x16xf32>
    %c0_2 = arith.constant 0 : index
    %c0_3 = arith.constant 0 : index
    %c0_4 = arith.constant 0 : index
    %3 = vector.load %arg3[%c0_2, %c0_3, %c0_4] : memref<1x16x16xbf16, #tpu.memory_space<vmem>>, vector<1x16x16xbf16>
    %4 = vector.shape_cast %3 : vector<1x16x16xbf16> to vector<16x16xbf16>
    %5 = arith.extf %4 : vector<16x16xbf16> to vector<16x16xf32>
    %6 = tpu.concatenate %2, %5 in 0 : vector<64x16xf32>, vector<16x16xf32> -> vector<80x16xf32>
    %cst = arith.constant 0.000000e+00 : f32
    %7 = vector.broadcast %cst : f32 to vector<80x16xf32>
    %8 = arith.cmpf oge, %6, %7 : vector<80x16xf32>
    %cst_5 = arith.constant 1.000000e-01 : f32
    %9 = vector.broadcast %cst_5 : f32 to vector<80x16xf32>
    %10 = arith.mulf %9, %6 : vector<80x16xf32>
    %11 = arith.select %8, %6, %10 : vector<80x16xi1>, vector<80x16xf32>
    %12 = arith.truncf %11 : vector<80x16xf32> to vector<80x16xbf16>
    %c0_6 = arith.constant 0 : index
    %c0_7 = arith.constant 0 : index
    %13 = vector.load %arg5[%c0_6, %c0_7] : memref<1x8xf32, #tpu.memory_space<vmem>>, vector<1x8xf32>
    %14 = vector.extract_strided_slice %12 {offsets = [0, 0], sizes = [64, 16], strides = [1, 1]} : vector<80x16xbf16> to vector<64x16xbf16>
    %c0_8 = arith.constant 0 : index
    %c0_9 = arith.constant 0 : index
    %c0_10 = arith.constant 0 : index
    %c0_11 = arith.constant 0 : index
    %15 = vector.load %arg4[%c0_8, %c0_9, %c0_10, %c0_11] : memref<2x2x16x8xbf16, #tpu.memory_space<vmem>>, vector<1x1x16x8xbf16>
    %16 = vector.shape_cast %15 : vector<1x1x16x8xbf16> to vector<16x8xbf16>
    %cst_12 = arith.constant dense<0.000000e+00> : vector<64x8xf32>
    %17 = tpu.matmul %14, %16, %cst_12 {dimension_numbers = #tpu.dot_dimension_numbers<[1], [0], [0], [1], [0, 0, 1, 1], [], []>} : vector<64x16xbf16>, vector<16x8xbf16>, vector<64x8xf32> -> vector<64x8xf32>
    %18 = vector.extract_strided_slice %12 {offsets = [1, 0], sizes = [64, 16], strides = [1, 1]} : vector<80x16xbf16> to vector<64x16xbf16>
    %c0_13 = arith.constant 0 : index
    %c1 = arith.constant 1 : index
    %c0_14 = arith.constant 0 : index
    %c0_15 = arith.constant 0 : index
    %19 = vector.load %arg4[%c0_13, %c1, %c0_14, %c0_15] : memref<2x2x16x8xbf16, #tpu.memory_space<vmem>>, vector<1x1x16x8xbf16>
    %20 = vector.shape_cast %19 : vector<1x1x16x8xbf16> to vector<16x8xbf16>
    %cst_16 = arith.constant dense<0.000000e+00> : vector<64x8xf32>
    %21 = tpu.matmul %18, %20, %cst_16 {dimension_numbers = #tpu.dot_dimension_numbers<[1], [0], [0], [1], [0, 0, 1, 1], [], []>} : vector<64x16xbf16>, vector<16x8xbf16>, vector<64x8xf32> -> vector<64x8xf32>
    %22 = arith.addf %17, %21 : vector<64x8xf32>
    %23 = vector.broadcast %13 : vector<1x8xf32> to vector<64x8xf32>
    %24 = arith.addf %22, %23 : vector<64x8xf32>
    %25 = arith.truncf %24 : vector<64x8xf32> to vector<64x8xbf16>
    %c0_17 = arith.constant 0 : index
    %c0_18 = arith.constant 0 : index
    %c0_19 = arith.constant 0 : index
    %26 = vector.load %arg6[%c0_17, %c0_18, %c0_19] : memref<1x64x16xbf16, #tpu.memory_space<vmem>>, vector<1x64x8xbf16>
    %27 = vector.shape_cast %26 : vector<1x64x8xbf16> to vector<64x8xbf16>
    %28 = vector.shape_cast %25 : vector<64x8xbf16> to vector<1x64x8xbf16>
    tpu.vector_store %arg6[%c0_17, %c0_18, %c0_19], %28 {strides = array<i32>} : memref<1x64x16xbf16, #tpu.memory_space<vmem>>, vector<1x64x8xbf16>,
    %29 = vector.extract_strided_slice %12 {offsets = [1, 0], sizes = [64, 16], strides = [1, 1]} : vector<80x16xbf16> to vector<64x16xbf16>
    %c1_20 = arith.constant 1 : index
    %c0_21 = arith.constant 0 : index
    %c0_22 = arith.constant 0 : index
    %c0_23 = arith.constant 0 : index
    %30 = vector.load %arg4[%c1_20, %c0_21, %c0_22, %c0_23] : memref<2x2x16x8xbf16, #tpu.memory_space<vmem>>, vector<1x1x16x8xbf16>
    %31 = vector.shape_cast %30 : vector<1x1x16x8xbf16> to vector<16x8xbf16>
    %cst_24 = arith.constant dense<0.000000e+00> : vector<64x8xf32>
    %32 = tpu.matmul %29, %31, %cst_24 {dimension_numbers = #tpu.dot_dimension_numbers<[1], [0], [0], [1], [0, 0, 1, 1], [], []>} : vector<64x16xbf16>, vector<16x8xbf16>, vector<64x8xf32> -> vector<64x8xf32>
    %33 = vector.extract_strided_slice %12 {offsets = [2, 0], sizes = [64, 16], strides = [1, 1]} : vector<80x16xbf16> to vector<64x16xbf16>
    %c1_25 = arith.constant 1 : index
    %c1_26 = arith.constant 1 : index
    %c0_27 = arith.constant 0 : index
    %c0_28 = arith.constant 0 : index
    %34 = vector.load %arg4[%c1_25, %c1_26, %c0_27, %c0_28] : memref<2x2x16x8xbf16, #tpu.memory_space<vmem>>, vector<1x1x16x8xbf16>
    %35 = vector.shape_cast %34 : vector<1x1x16x8xbf16> to vector<16x8xbf16>
    %cst_29 = arith.constant dense<0.000000e+00> : vector<64x8xf32>
    %36 = tpu.matmul %33, %35, %cst_29 {dimension_numbers = #tpu.dot_dimension_numbers<[1], [0], [0], [1], [0, 0, 1, 1], [], []>} : vector<64x16xbf16>, vector<16x8xbf16>, vector<64x8xf32> -> vector<64x8xf32>
    %37 = arith.addf %32, %36 : vector<64x8xf32>
    %38 = vector.broadcast %13 : vector<1x8xf32> to vector<64x8xf32>
    %39 = arith.addf %37, %38 : vector<64x8xf32>
    %40 = arith.truncf %39 : vector<64x8xf32> to vector<64x8xbf16>
    %c0_30 = arith.constant 0 : index
    %c0_31 = arith.constant 0 : index
    %c8 = arith.constant 8 : index
    %41 = vector.load %arg6[%c0_30, %c0_31, %c8] : memref<1x64x16xbf16, #tpu.memory_space<vmem>>, vector<1x64x8xbf16>
    %42 = vector.shape_cast %41 : vector<1x64x8xbf16> to vector<64x8xbf16>
    %43 = vector.shape_cast %40 : vector<64x8xbf16> to vector<1x64x8xbf16>
    tpu.vector_store %arg6[%c0_30, %c0_31, %c8], %43 {strides = array<i32>} : memref<1x64x16xbf16, #tpu.memory_space<vmem>>, vector<1x64x8xbf16>,
    return
  }
  func.func @transform_0(%arg0: i32, %arg1: i32) -> (i32, i32, i32) {
    %c0_i32 = arith.constant 0 : i32
    %c0_i32_0 = arith.constant 0 : i32
    return %arg0, %arg1, %c0_i32 : i32, i32, i32
  }
  func.func @transform_1(%arg0: i32, %arg1: i32) -> (i32, i32, i32) {
    %c1_i32 = arith.constant 1 : i32
    %0 = arith.addi %arg1, %c1_i32 : i32
    %c4_i32 = arith.constant 4 : i32
    %1 = arith.muli %0, %c4_i32 : i32
    %c0_i32 = arith.constant 0 : i32
    %c0_i32_0 = arith.constant 0 : i32
    return %arg0, %1, %c0_i32 : i32, i32, i32
  }
  func.func @transform_2(%arg0: i32, %arg1: i32) -> (i32, i32, i32, i32) {
    %c0_i32 = arith.constant 0 : i32
    %c0_i32_0 = arith.constant 0 : i32
    %c0_i32_1 = arith.constant 0 : i32
    %c0_i32_2 = arith.constant 0 : i32
    %c0_i32_3 = arith.constant 0 : i32
    return %c0_i32, %c0_i32_0, %c0_i32_1, %c0_i32_2 : i32, i32, i32, i32
  }
  func.func @transform_3(%arg0: i32, %arg1: i32) -> (i32, i32) {
    %c0_i32 = arith.constant 0 : i32
    %c0_i32_0 = arith.constant 0 : i32
    %c0_i32_1 = arith.constant 0 : i32
    return %c0_i32, %c0_i32_0 : i32, i32
  }
  func.func @transform_4(%arg0: i32, %arg1: i32) -> (i32, i32, i32) {
    %c0_i32 = arith.constant 0 : i32
    %c0_i32_0 = arith.constant 0 : i32
    return %arg0, %arg1, %c0_i32 : i32, i32, i32
  }
}

module attributes {stable_mosaic.version = 11 : i64} {
  func.func @_conv_kernel(%arg0: i32, %arg1: i32, %arg2: memref<1x128x1xf32, #tpu.memory_space<vmem>>, %arg3: memref<1x1x1x8xf32, #tpu.memory_space<vmem>>, %arg4: memref<1x8xf32, #tpu.memory_space<vmem>>, %arg5: memref<1x128x8xbf16, #tpu.memory_space<vmem>>, %arg6: memref<1x128x8xbf16, #tpu.memory_space<vmem>>) attributes {dimension_semantics = [#tpu.dimension_semantics<parallel>, #tpu.dimension_semantics<parallel>], iteration_bounds = array<i64: 2, 1>, scalar_prefetch = 0 : i64, scratch_operands = 0 : i64, tpu.core_type = #tpu.core_type<tc>, window_params = [{transform_indices = @transform_0, window_bounds = array<i64: 1, 128, 1>}, {pipeline_mode = #tpu.pipeline_mode<synchronous>, transform_indices = @transform_1, window_bounds = array<i64: 1, 1, 1, 8>}, {pipeline_mode = #tpu.pipeline_mode<synchronous>, transform_indices = @transform_2, window_bounds = array<i64: 1, 8>}, {transform_indices = @transform_3, window_bounds = array<i64: 1, 128, 8>}, {transform_indices = @transform_4, window_bounds = array<i64: 1, 128, 8>}]} {
    %c0 = arith.constant 0 : index
    %c0_0 = arith.constant 0 : index
    %c0_1 = arith.constant 0 : index
    %0 = vector.load %arg2[%c0, %c0_0, %c0_1] : memref<1x128x1xf32, #tpu.memory_space<vmem>>, vector<1x128x1xf32>
    %1 = vector.shape_cast %0 : vector<1x128x1xf32> to vector<128x1xf32>
    %c0_2 = arith.constant 0 : index
    %c0_3 = arith.constant 0 : index
    %2 = vector.load %arg4[%c0_2, %c0_3] : memref<1x8xf32, #tpu.memory_space<vmem>>, vector<1x8xf32>
    %c0_4 = arith.constant 0 : index
    %c0_5 = arith.constant 0 : index
    %c0_6 = arith.constant 0 : index
    %c0_7 = arith.constant 0 : index
    %3 = vector.load %arg3[%c0_4, %c0_5, %c0_6, %c0_7] : memref<1x1x1x8xf32, #tpu.memory_space<vmem>>, vector<1x1x1x8xf32>
    %4 = vector.shape_cast %3 : vector<1x1x1x8xf32> to vector<1x8xf32>
    %5 = vector.broadcast %1 : vector<128x1xf32> to vector<128x8xf32>
    %6 = vector.broadcast %4 : vector<1x8xf32> to vector<128x8xf32>
    %7 = arith.mulf %5, %6 : vector<128x8xf32>
    %8 = vector.broadcast %2 : vector<1x8xf32> to vector<128x8xf32>
    %9 = arith.addf %7, %8 : vector<128x8xf32>
    %c0_8 = arith.constant 0 : index
    %c0_9 = arith.constant 0 : index
    %c0_10 = arith.constant 0 : index
    %10 = vector.load %arg5[%c0_8, %c0_9, %c0_10] : memref<1x128x8xbf16, #tpu.memory_space<vmem>>, vector<1x128x8xbf16>
    %11 = vector.shape_cast %10 : vector<1x128x8xbf16> to vector<128x8xbf16>
    %12 = arith.extf %11 : vector<128x8xbf16> to vector<128x8xf32>
    %13 = arith.addf %9, %12 : vector<128x8xf32>
    %14 = arith.truncf %13 : vector<128x8xf32> to vector<128x8xbf16>
    %c0_11 = arith.constant 0 : index
    %c0_12 = arith.constant 0 : index
    %c0_13 = arith.constant 0 : index
    %15 = vector.load %arg6[%c0_11, %c0_12, %c0_13] : memref<1x128x8xbf16, #tpu.memory_space<vmem>>, vector<1x128x8xbf16>
    %16 = vector.shape_cast %15 : vector<1x128x8xbf16> to vector<128x8xbf16>
    %17 = vector.shape_cast %14 : vector<128x8xbf16> to vector<1x128x8xbf16>
    tpu.vector_store %arg6[%c0_11, %c0_12, %c0_13], %17 {strides = array<i32>} : memref<1x128x8xbf16, #tpu.memory_space<vmem>>, vector<1x128x8xbf16>,
    return
  }
  func.func @transform_0(%arg0: i32, %arg1: i32) -> (i32, i32, i32) {
    %c0_i32 = arith.constant 0 : i32
    %c0_i32_0 = arith.constant 0 : i32
    return %arg0, %arg1, %c0_i32 : i32, i32, i32
  }
  func.func @transform_1(%arg0: i32, %arg1: i32) -> (i32, i32, i32, i32) {
    %c0_i32 = arith.constant 0 : i32
    %c0_i32_0 = arith.constant 0 : i32
    %c0_i32_1 = arith.constant 0 : i32
    %c0_i32_2 = arith.constant 0 : i32
    %c0_i32_3 = arith.constant 0 : i32
    return %c0_i32, %c0_i32_0, %c0_i32_1, %c0_i32_2 : i32, i32, i32, i32
  }
  func.func @transform_2(%arg0: i32, %arg1: i32) -> (i32, i32) {
    %c0_i32 = arith.constant 0 : i32
    %c0_i32_0 = arith.constant 0 : i32
    %c0_i32_1 = arith.constant 0 : i32
    return %c0_i32, %c0_i32_0 : i32, i32
  }
  func.func @transform_3(%arg0: i32, %arg1: i32) -> (i32, i32, i32) {
    %c0_i32 = arith.constant 0 : i32
    %c0_i32_0 = arith.constant 0 : i32
    return %arg0, %arg1, %c0_i32 : i32, i32, i32
  }
  func.func @transform_4(%arg0: i32, %arg1: i32) -> (i32, i32, i32) {
    %c0_i32 = arith.constant 0 : i32
    %c0_i32_0 = arith.constant 0 : i32
    return %arg0, %arg1, %c0_i32 : i32, i32, i32
  }
}

module attributes {stable_mosaic.version = 11 : i64} {
  func.func @_conv_kernel(%arg0: i32, %arg1: i32, %arg2: memref<1x128x8xbf16, #tpu.memory_space<vmem>>, %arg3: memref<1x16x8xbf16, #tpu.memory_space<vmem>>, %arg4: memref<1x3x8x8xbf16, #tpu.memory_space<vmem>>, %arg5: memref<1x8xf32, #tpu.memory_space<vmem>>, %arg6: memref<1x128x8xbf16, #tpu.memory_space<vmem>>) attributes {dimension_semantics = [#tpu.dimension_semantics<parallel>, #tpu.dimension_semantics<parallel>], iteration_bounds = array<i64: 2, 1>, scalar_prefetch = 0 : i64, scratch_operands = 0 : i64, tpu.core_type = #tpu.core_type<tc>, window_params = [{transform_indices = @transform_0, window_bounds = array<i64: 1, 128, 8>}, {transform_indices = @transform_1, window_bounds = array<i64: 1, 16, 8>}, {pipeline_mode = #tpu.pipeline_mode<synchronous>, transform_indices = @transform_2, window_bounds = array<i64: 1, 3, 8, 8>}, {pipeline_mode = #tpu.pipeline_mode<synchronous>, transform_indices = @transform_3, window_bounds = array<i64: 1, 8>}, {transform_indices = @transform_4, window_bounds = array<i64: 1, 128, 8>}]} {
    %c0 = arith.constant 0 : index
    %c0_0 = arith.constant 0 : index
    %c0_1 = arith.constant 0 : index
    %0 = vector.load %arg2[%c0, %c0_0, %c0_1] : memref<1x128x8xbf16, #tpu.memory_space<vmem>>, vector<1x128x8xbf16>
    %1 = vector.shape_cast %0 : vector<1x128x8xbf16> to vector<128x8xbf16>
    %2 = arith.extf %1 : vector<128x8xbf16> to vector<128x8xf32>
    %c0_2 = arith.constant 0 : index
    %c0_3 = arith.constant 0 : index
    %c0_4 = arith.constant 0 : index
    %3 = vector.load %arg3[%c0_2, %c0_3, %c0_4] : memref<1x16x8xbf16, #tpu.memory_space<vmem>>, vector<1x16x8xbf16>
    %4 = vector.shape_cast %3 : vector<1x16x8xbf16> to vector<16x8xbf16>
    %5 = arith.extf %4 : vector<16x8xbf16> to vector<16x8xf32>
    %6 = tpu.concatenate %2, %5 in 0 : vector<128x8xf32>, vector<16x8xf32> -> vector<144x8xf32>
    %cst = arith.constant 0.000000e+00 : f32
    %7 = vector.broadcast %cst : f32 to vector<144x8xf32>
    %8 = arith.cmpf oge, %6, %7 : vector<144x8xf32>
    %cst_5 = arith.constant 1.000000e-01 : f32
    %9 = vector.broadcast %cst_5 : f32 to vector<144x8xf32>
    %10 = arith.mulf %9, %6 : vector<144x8xf32>
    %11 = arith.select %8, %6, %10 : vector<144x8xi1>, vector<144x8xf32>
    %12 = arith.truncf %11 : vector<144x8xf32> to vector<144x8xbf16>
    %c0_6 = arith.constant 0 : index
    %c0_7 = arith.constant 0 : index
    %13 = vector.load %arg5[%c0_6, %c0_7] : memref<1x8xf32, #tpu.memory_space<vmem>>, vector<1x8xf32>
    %14 = vector.extract_strided_slice %12 {offsets = [0, 0], sizes = [128, 8], strides = [1, 1]} : vector<144x8xbf16> to vector<128x8xbf16>
    %c0_8 = arith.constant 0 : index
    %c0_9 = arith.constant 0 : index
    %c0_10 = arith.constant 0 : index
    %c0_11 = arith.constant 0 : index
    %15 = vector.load %arg4[%c0_8, %c0_9, %c0_10, %c0_11] : memref<1x3x8x8xbf16, #tpu.memory_space<vmem>>, vector<1x1x8x8xbf16>
    %16 = vector.shape_cast %15 : vector<1x1x8x8xbf16> to vector<8x8xbf16>
    %cst_12 = arith.constant dense<0.000000e+00> : vector<128x8xf32>
    %17 = tpu.matmul %14, %16, %cst_12 {dimension_numbers = #tpu.dot_dimension_numbers<[1], [0], [0], [1], [0, 0, 1, 1], [], []>} : vector<128x8xbf16>, vector<8x8xbf16>, vector<128x8xf32> -> vector<128x8xf32>
    %18 = vector.extract_strided_slice %12 {offsets = [1, 0], sizes = [128, 8], strides = [1, 1]} : vector<144x8xbf16> to vector<128x8xbf16>
    %c0_13 = arith.constant 0 : index
    %c1 = arith.constant 1 : index
    %c0_14 = arith.constant 0 : index
    %c0_15 = arith.constant 0 : index
    %19 = vector.load %arg4[%c0_13, %c1, %c0_14, %c0_15] : memref<1x3x8x8xbf16, #tpu.memory_space<vmem>>, vector<1x1x8x8xbf16>
    %20 = vector.shape_cast %19 : vector<1x1x8x8xbf16> to vector<8x8xbf16>
    %cst_16 = arith.constant dense<0.000000e+00> : vector<128x8xf32>
    %21 = tpu.matmul %18, %20, %cst_16 {dimension_numbers = #tpu.dot_dimension_numbers<[1], [0], [0], [1], [0, 0, 1, 1], [], []>} : vector<128x8xbf16>, vector<8x8xbf16>, vector<128x8xf32> -> vector<128x8xf32>
    %22 = arith.addf %17, %21 : vector<128x8xf32>
    %23 = vector.extract_strided_slice %12 {offsets = [2, 0], sizes = [128, 8], strides = [1, 1]} : vector<144x8xbf16> to vector<128x8xbf16>
    %c0_17 = arith.constant 0 : index
    %c2 = arith.constant 2 : index
    %c0_18 = arith.constant 0 : index
    %c0_19 = arith.constant 0 : index
    %24 = vector.load %arg4[%c0_17, %c2, %c0_18, %c0_19] : memref<1x3x8x8xbf16, #tpu.memory_space<vmem>>, vector<1x1x8x8xbf16>
    %25 = vector.shape_cast %24 : vector<1x1x8x8xbf16> to vector<8x8xbf16>
    %cst_20 = arith.constant dense<0.000000e+00> : vector<128x8xf32>
    %26 = tpu.matmul %23, %25, %cst_20 {dimension_numbers = #tpu.dot_dimension_numbers<[1], [0], [0], [1], [0, 0, 1, 1], [], []>} : vector<128x8xbf16>, vector<8x8xbf16>, vector<128x8xf32> -> vector<128x8xf32>
    %27 = arith.addf %22, %26 : vector<128x8xf32>
    %28 = vector.broadcast %13 : vector<1x8xf32> to vector<128x8xf32>
    %29 = arith.addf %27, %28 : vector<128x8xf32>
    %30 = arith.truncf %29 : vector<128x8xf32> to vector<128x8xbf16>
    %c0_21 = arith.constant 0 : index
    %c0_22 = arith.constant 0 : index
    %c0_23 = arith.constant 0 : index
    %31 = vector.load %arg6[%c0_21, %c0_22, %c0_23] : memref<1x128x8xbf16, #tpu.memory_space<vmem>>, vector<1x128x8xbf16>
    %32 = vector.shape_cast %31 : vector<1x128x8xbf16> to vector<128x8xbf16>
    %33 = vector.shape_cast %30 : vector<128x8xbf16> to vector<1x128x8xbf16>
    tpu.vector_store %arg6[%c0_21, %c0_22, %c0_23], %33 {strides = array<i32>} : memref<1x128x8xbf16, #tpu.memory_space<vmem>>, vector<1x128x8xbf16>,
    return
  }
  func.func @transform_0(%arg0: i32, %arg1: i32) -> (i32, i32, i32) {
    %c0_i32 = arith.constant 0 : i32
    %c0_i32_0 = arith.constant 0 : i32
    return %arg0, %arg1, %c0_i32 : i32, i32, i32
  }
  func.func @transform_1(%arg0: i32, %arg1: i32) -> (i32, i32, i32) {
    %c1_i32 = arith.constant 1 : i32
    %0 = arith.addi %arg1, %c1_i32 : i32
    %c8_i32 = arith.constant 8 : i32
    %1 = arith.muli %0, %c8_i32 : i32
    %c0_i32 = arith.constant 0 : i32
    %c0_i32_0 = arith.constant 0 : i32
    return %arg0, %1, %c0_i32 : i32, i32, i32
  }
  func.func @transform_2(%arg0: i32, %arg1: i32) -> (i32, i32, i32, i32) {
    %c0_i32 = arith.constant 0 : i32
    %c0_i32_0 = arith.constant 0 : i32
    %c0_i32_1 = arith.constant 0 : i32
    %c0_i32_2 = arith.constant 0 : i32
    %c0_i32_3 = arith.constant 0 : i32
    return %c0_i32, %c0_i32_0, %c0_i32_1, %c0_i32_2 : i32, i32, i32, i32
  }
  func.func @transform_3(%arg0: i32, %arg1: i32) -> (i32, i32) {
    %c0_i32 = arith.constant 0 : i32
    %c0_i32_0 = arith.constant 0 : i32
    %c0_i32_1 = arith.constant 0 : i32
    return %c0_i32, %c0_i32_0 : i32, i32
  }
  func.func @transform_4(%arg0: i32, %arg1: i32) -> (i32, i32, i32) {
    %c0_i32 = arith.constant 0 : i32
    %c0_i32_0 = arith.constant 0 : i32
    return %arg0, %arg1, %c0_i32 : i32, i32, i32
  }
}

module attributes {stable_mosaic.version = 11 : i64} {
  func.func @_conv_kernel(%arg0: i32, %arg1: i32, %arg2: memref<1x128x8xbf16, #tpu.memory_space<vmem>>, %arg3: memref<1x16x8xbf16, #tpu.memory_space<vmem>>, %arg4: memref<1x3x8x8xbf16, #tpu.memory_space<vmem>>, %arg5: memref<1x8xf32, #tpu.memory_space<vmem>>, %arg6: memref<1x128x8xbf16, #tpu.memory_space<vmem>>, %arg7: memref<1x128x8xbf16, #tpu.memory_space<vmem>>) attributes {dimension_semantics = [#tpu.dimension_semantics<parallel>, #tpu.dimension_semantics<parallel>], iteration_bounds = array<i64: 2, 1>, scalar_prefetch = 0 : i64, scratch_operands = 0 : i64, tpu.core_type = #tpu.core_type<tc>, window_params = [{transform_indices = @transform_0, window_bounds = array<i64: 1, 128, 8>}, {transform_indices = @transform_1, window_bounds = array<i64: 1, 16, 8>}, {pipeline_mode = #tpu.pipeline_mode<synchronous>, transform_indices = @transform_2, window_bounds = array<i64: 1, 3, 8, 8>}, {pipeline_mode = #tpu.pipeline_mode<synchronous>, transform_indices = @transform_3, window_bounds = array<i64: 1, 8>}, {transform_indices = @transform_4, window_bounds = array<i64: 1, 128, 8>}, {transform_indices = @transform_5, window_bounds = array<i64: 1, 128, 8>}]} {
    %c0 = arith.constant 0 : index
    %c0_0 = arith.constant 0 : index
    %c0_1 = arith.constant 0 : index
    %0 = vector.load %arg2[%c0, %c0_0, %c0_1] : memref<1x128x8xbf16, #tpu.memory_space<vmem>>, vector<1x128x8xbf16>
    %1 = vector.shape_cast %0 : vector<1x128x8xbf16> to vector<128x8xbf16>
    %2 = arith.extf %1 : vector<128x8xbf16> to vector<128x8xf32>
    %c0_2 = arith.constant 0 : index
    %c0_3 = arith.constant 0 : index
    %c0_4 = arith.constant 0 : index
    %3 = vector.load %arg3[%c0_2, %c0_3, %c0_4] : memref<1x16x8xbf16, #tpu.memory_space<vmem>>, vector<1x16x8xbf16>
    %4 = vector.shape_cast %3 : vector<1x16x8xbf16> to vector<16x8xbf16>
    %5 = arith.extf %4 : vector<16x8xbf16> to vector<16x8xf32>
    %6 = tpu.concatenate %2, %5 in 0 : vector<128x8xf32>, vector<16x8xf32> -> vector<144x8xf32>
    %cst = arith.constant 0.000000e+00 : f32
    %7 = vector.broadcast %cst : f32 to vector<144x8xf32>
    %8 = arith.cmpf oge, %6, %7 : vector<144x8xf32>
    %cst_5 = arith.constant 1.000000e-01 : f32
    %9 = vector.broadcast %cst_5 : f32 to vector<144x8xf32>
    %10 = arith.mulf %9, %6 : vector<144x8xf32>
    %11 = arith.select %8, %6, %10 : vector<144x8xi1>, vector<144x8xf32>
    %12 = arith.truncf %11 : vector<144x8xf32> to vector<144x8xbf16>
    %c0_6 = arith.constant 0 : index
    %c0_7 = arith.constant 0 : index
    %13 = vector.load %arg5[%c0_6, %c0_7] : memref<1x8xf32, #tpu.memory_space<vmem>>, vector<1x8xf32>
    %14 = vector.extract_strided_slice %12 {offsets = [0, 0], sizes = [128, 8], strides = [1, 1]} : vector<144x8xbf16> to vector<128x8xbf16>
    %c0_8 = arith.constant 0 : index
    %c0_9 = arith.constant 0 : index
    %c0_10 = arith.constant 0 : index
    %c0_11 = arith.constant 0 : index
    %15 = vector.load %arg4[%c0_8, %c0_9, %c0_10, %c0_11] : memref<1x3x8x8xbf16, #tpu.memory_space<vmem>>, vector<1x1x8x8xbf16>
    %16 = vector.shape_cast %15 : vector<1x1x8x8xbf16> to vector<8x8xbf16>
    %cst_12 = arith.constant dense<0.000000e+00> : vector<128x8xf32>
    %17 = tpu.matmul %14, %16, %cst_12 {dimension_numbers = #tpu.dot_dimension_numbers<[1], [0], [0], [1], [0, 0, 1, 1], [], []>} : vector<128x8xbf16>, vector<8x8xbf16>, vector<128x8xf32> -> vector<128x8xf32>
    %18 = vector.extract_strided_slice %12 {offsets = [1, 0], sizes = [128, 8], strides = [1, 1]} : vector<144x8xbf16> to vector<128x8xbf16>
    %c0_13 = arith.constant 0 : index
    %c1 = arith.constant 1 : index
    %c0_14 = arith.constant 0 : index
    %c0_15 = arith.constant 0 : index
    %19 = vector.load %arg4[%c0_13, %c1, %c0_14, %c0_15] : memref<1x3x8x8xbf16, #tpu.memory_space<vmem>>, vector<1x1x8x8xbf16>
    %20 = vector.shape_cast %19 : vector<1x1x8x8xbf16> to vector<8x8xbf16>
    %cst_16 = arith.constant dense<0.000000e+00> : vector<128x8xf32>
    %21 = tpu.matmul %18, %20, %cst_16 {dimension_numbers = #tpu.dot_dimension_numbers<[1], [0], [0], [1], [0, 0, 1, 1], [], []>} : vector<128x8xbf16>, vector<8x8xbf16>, vector<128x8xf32> -> vector<128x8xf32>
    %22 = arith.addf %17, %21 : vector<128x8xf32>
    %23 = vector.extract_strided_slice %12 {offsets = [2, 0], sizes = [128, 8], strides = [1, 1]} : vector<144x8xbf16> to vector<128x8xbf16>
    %c0_17 = arith.constant 0 : index
    %c2 = arith.constant 2 : index
    %c0_18 = arith.constant 0 : index
    %c0_19 = arith.constant 0 : index
    %24 = vector.load %arg4[%c0_17, %c2, %c0_18, %c0_19] : memref<1x3x8x8xbf16, #tpu.memory_space<vmem>>, vector<1x1x8x8xbf16>
    %25 = vector.shape_cast %24 : vector<1x1x8x8xbf16> to vector<8x8xbf16>
    %cst_20 = arith.constant dense<0.000000e+00> : vector<128x8xf32>
    %26 = tpu.matmul %23, %25, %cst_20 {dimension_numbers = #tpu.dot_dimension_numbers<[1], [0], [0], [1], [0, 0, 1, 1], [], []>} : vector<128x8xbf16>, vector<8x8xbf16>, vector<128x8xf32> -> vector<128x8xf32>
    %27 = arith.addf %22, %26 : vector<128x8xf32>
    %28 = vector.broadcast %13 : vector<1x8xf32> to vector<128x8xf32>
    %29 = arith.addf %27, %28 : vector<128x8xf32>
    %c0_21 = arith.constant 0 : index
    %c0_22 = arith.constant 0 : index
    %c0_23 = arith.constant 0 : index
    %30 = vector.load %arg6[%c0_21, %c0_22, %c0_23] : memref<1x128x8xbf16, #tpu.memory_space<vmem>>, vector<1x128x8xbf16>
    %31 = vector.shape_cast %30 : vector<1x128x8xbf16> to vector<128x8xbf16>
    %32 = arith.extf %31 : vector<128x8xbf16> to vector<128x8xf32>
    %33 = arith.addf %29, %32 : vector<128x8xf32>
    %34 = arith.truncf %33 : vector<128x8xf32> to vector<128x8xbf16>
    %c0_24 = arith.constant 0 : index
    %c0_25 = arith.constant 0 : index
    %c0_26 = arith.constant 0 : index
    %35 = vector.load %arg7[%c0_24, %c0_25, %c0_26] : memref<1x128x8xbf16, #tpu.memory_space<vmem>>, vector<1x128x8xbf16>
    %36 = vector.shape_cast %35 : vector<1x128x8xbf16> to vector<128x8xbf16>
    %37 = vector.shape_cast %34 : vector<128x8xbf16> to vector<1x128x8xbf16>
    tpu.vector_store %arg7[%c0_24, %c0_25, %c0_26], %37 {strides = array<i32>} : memref<1x128x8xbf16, #tpu.memory_space<vmem>>, vector<1x128x8xbf16>,
    return
  }
  func.func @transform_0(%arg0: i32, %arg1: i32) -> (i32, i32, i32) {
    %c0_i32 = arith.constant 0 : i32
    %c0_i32_0 = arith.constant 0 : i32
    return %arg0, %arg1, %c0_i32 : i32, i32, i32
  }
  func.func @transform_1(%arg0: i32, %arg1: i32) -> (i32, i32, i32) {
    %c1_i32 = arith.constant 1 : i32
    %0 = arith.addi %arg1, %c1_i32 : i32
    %c8_i32 = arith.constant 8 : i32
    %1 = arith.muli %0, %c8_i32 : i32
    %c0_i32 = arith.constant 0 : i32
    %c0_i32_0 = arith.constant 0 : i32
    return %arg0, %1, %c0_i32 : i32, i32, i32
  }
  func.func @transform_2(%arg0: i32, %arg1: i32) -> (i32, i32, i32, i32) {
    %c0_i32 = arith.constant 0 : i32
    %c0_i32_0 = arith.constant 0 : i32
    %c0_i32_1 = arith.constant 0 : i32
    %c0_i32_2 = arith.constant 0 : i32
    %c0_i32_3 = arith.constant 0 : i32
    return %c0_i32, %c0_i32_0, %c0_i32_1, %c0_i32_2 : i32, i32, i32, i32
  }
  func.func @transform_3(%arg0: i32, %arg1: i32) -> (i32, i32) {
    %c0_i32 = arith.constant 0 : i32
    %c0_i32_0 = arith.constant 0 : i32
    %c0_i32_1 = arith.constant 0 : i32
    return %c0_i32, %c0_i32_0 : i32, i32
  }
  func.func @transform_4(%arg0: i32, %arg1: i32) -> (i32, i32, i32) {
    %c0_i32 = arith.constant 0 : i32
    %c0_i32_0 = arith.constant 0 : i32
    return %arg0, %arg1, %c0_i32 : i32, i32, i32
  }
  func.func @transform_5(%arg0: i32, %arg1: i32) -> (i32, i32, i32) {
    %c0_i32 = arith.constant 0 : i32
    %c0_i32_0 = arith.constant 0 : i32
    return %arg0, %arg1, %c0_i32 : i32, i32, i32
  }
}

module attributes {stable_mosaic.version = 11 : i64} {
  func.func @_conv_kernel(%arg0: i32, %arg1: i32, %arg2: memref<1x128x8xbf16, #tpu.memory_space<vmem>>, %arg3: memref<1x16x8xbf16, #tpu.memory_space<vmem>>, %arg4: memref<1x3x8x8xbf16, #tpu.memory_space<vmem>>, %arg5: memref<1x8xf32, #tpu.memory_space<vmem>>, %arg6: memref<1x128x8xbf16, #tpu.memory_space<vmem>>) attributes {dimension_semantics = [#tpu.dimension_semantics<parallel>, #tpu.dimension_semantics<parallel>], iteration_bounds = array<i64: 2, 1>, scalar_prefetch = 0 : i64, scratch_operands = 0 : i64, tpu.core_type = #tpu.core_type<tc>, window_params = [{transform_indices = @transform_0, window_bounds = array<i64: 1, 128, 8>}, {transform_indices = @transform_1, window_bounds = array<i64: 1, 16, 8>}, {pipeline_mode = #tpu.pipeline_mode<synchronous>, transform_indices = @transform_2, window_bounds = array<i64: 1, 3, 8, 8>}, {pipeline_mode = #tpu.pipeline_mode<synchronous>, transform_indices = @transform_3, window_bounds = array<i64: 1, 8>}, {transform_indices = @transform_4, window_bounds = array<i64: 1, 128, 8>}]} {
    %c0 = arith.constant 0 : index
    %c0_0 = arith.constant 0 : index
    %c0_1 = arith.constant 0 : index
    %0 = vector.load %arg2[%c0, %c0_0, %c0_1] : memref<1x128x8xbf16, #tpu.memory_space<vmem>>, vector<1x128x8xbf16>
    %1 = vector.shape_cast %0 : vector<1x128x8xbf16> to vector<128x8xbf16>
    %2 = arith.extf %1 : vector<128x8xbf16> to vector<128x8xf32>
    %c0_2 = arith.constant 0 : index
    %c0_3 = arith.constant 0 : index
    %c0_4 = arith.constant 0 : index
    %3 = vector.load %arg3[%c0_2, %c0_3, %c0_4] : memref<1x16x8xbf16, #tpu.memory_space<vmem>>, vector<1x16x8xbf16>
    %4 = vector.shape_cast %3 : vector<1x16x8xbf16> to vector<16x8xbf16>
    %5 = arith.extf %4 : vector<16x8xbf16> to vector<16x8xf32>
    %6 = tpu.concatenate %2, %5 in 0 : vector<128x8xf32>, vector<16x8xf32> -> vector<144x8xf32>
    %cst = arith.constant 0.000000e+00 : f32
    %7 = vector.broadcast %cst : f32 to vector<144x8xf32>
    %8 = arith.cmpf oge, %6, %7 : vector<144x8xf32>
    %cst_5 = arith.constant 1.000000e-01 : f32
    %9 = vector.broadcast %cst_5 : f32 to vector<144x8xf32>
    %10 = arith.mulf %9, %6 : vector<144x8xf32>
    %11 = arith.select %8, %6, %10 : vector<144x8xi1>, vector<144x8xf32>
    %12 = arith.truncf %11 : vector<144x8xf32> to vector<144x8xbf16>
    %c0_6 = arith.constant 0 : index
    %c0_7 = arith.constant 0 : index
    %13 = vector.load %arg5[%c0_6, %c0_7] : memref<1x8xf32, #tpu.memory_space<vmem>>, vector<1x8xf32>
    %14 = vector.extract_strided_slice %12 {offsets = [0, 0], sizes = [128, 8], strides = [1, 1]} : vector<144x8xbf16> to vector<128x8xbf16>
    %c0_8 = arith.constant 0 : index
    %c0_9 = arith.constant 0 : index
    %c0_10 = arith.constant 0 : index
    %c0_11 = arith.constant 0 : index
    %15 = vector.load %arg4[%c0_8, %c0_9, %c0_10, %c0_11] : memref<1x3x8x8xbf16, #tpu.memory_space<vmem>>, vector<1x1x8x8xbf16>
    %16 = vector.shape_cast %15 : vector<1x1x8x8xbf16> to vector<8x8xbf16>
    %cst_12 = arith.constant dense<0.000000e+00> : vector<128x8xf32>
    %17 = tpu.matmul %14, %16, %cst_12 {dimension_numbers = #tpu.dot_dimension_numbers<[1], [0], [0], [1], [0, 0, 1, 1], [], []>} : vector<128x8xbf16>, vector<8x8xbf16>, vector<128x8xf32> -> vector<128x8xf32>
    %18 = vector.extract_strided_slice %12 {offsets = [3, 0], sizes = [128, 8], strides = [1, 1]} : vector<144x8xbf16> to vector<128x8xbf16>
    %c0_13 = arith.constant 0 : index
    %c1 = arith.constant 1 : index
    %c0_14 = arith.constant 0 : index
    %c0_15 = arith.constant 0 : index
    %19 = vector.load %arg4[%c0_13, %c1, %c0_14, %c0_15] : memref<1x3x8x8xbf16, #tpu.memory_space<vmem>>, vector<1x1x8x8xbf16>
    %20 = vector.shape_cast %19 : vector<1x1x8x8xbf16> to vector<8x8xbf16>
    %cst_16 = arith.constant dense<0.000000e+00> : vector<128x8xf32>
    %21 = tpu.matmul %18, %20, %cst_16 {dimension_numbers = #tpu.dot_dimension_numbers<[1], [0], [0], [1], [0, 0, 1, 1], [], []>} : vector<128x8xbf16>, vector<8x8xbf16>, vector<128x8xf32> -> vector<128x8xf32>
    %22 = arith.addf %17, %21 : vector<128x8xf32>
    %23 = vector.extract_strided_slice %12 {offsets = [6, 0], sizes = [128, 8], strides = [1, 1]} : vector<144x8xbf16> to vector<128x8xbf16>
    %c0_17 = arith.constant 0 : index
    %c2 = arith.constant 2 : index
    %c0_18 = arith.constant 0 : index
    %c0_19 = arith.constant 0 : index
    %24 = vector.load %arg4[%c0_17, %c2, %c0_18, %c0_19] : memref<1x3x8x8xbf16, #tpu.memory_space<vmem>>, vector<1x1x8x8xbf16>
    %25 = vector.shape_cast %24 : vector<1x1x8x8xbf16> to vector<8x8xbf16>
    %cst_20 = arith.constant dense<0.000000e+00> : vector<128x8xf32>
    %26 = tpu.matmul %23, %25, %cst_20 {dimension_numbers = #tpu.dot_dimension_numbers<[1], [0], [0], [1], [0, 0, 1, 1], [], []>} : vector<128x8xbf16>, vector<8x8xbf16>, vector<128x8xf32> -> vector<128x8xf32>
    %27 = arith.addf %22, %26 : vector<128x8xf32>
    %28 = vector.broadcast %13 : vector<1x8xf32> to vector<128x8xf32>
    %29 = arith.addf %27, %28 : vector<128x8xf32>
    %30 = arith.truncf %29 : vector<128x8xf32> to vector<128x8xbf16>
    %c0_21 = arith.constant 0 : index
    %c0_22 = arith.constant 0 : index
    %c0_23 = arith.constant 0 : index
    %31 = vector.load %arg6[%c0_21, %c0_22, %c0_23] : memref<1x128x8xbf16, #tpu.memory_space<vmem>>, vector<1x128x8xbf16>
    %32 = vector.shape_cast %31 : vector<1x128x8xbf16> to vector<128x8xbf16>
    %33 = vector.shape_cast %30 : vector<128x8xbf16> to vector<1x128x8xbf16>
    tpu.vector_store %arg6[%c0_21, %c0_22, %c0_23], %33 {strides = array<i32>} : memref<1x128x8xbf16, #tpu.memory_space<vmem>>, vector<1x128x8xbf16>,
    return
  }
  func.func @transform_0(%arg0: i32, %arg1: i32) -> (i32, i32, i32) {
    %c0_i32 = arith.constant 0 : i32
    %c0_i32_0 = arith.constant 0 : i32
    return %arg0, %arg1, %c0_i32 : i32, i32, i32
  }
  func.func @transform_1(%arg0: i32, %arg1: i32) -> (i32, i32, i32) {
    %c1_i32 = arith.constant 1 : i32
    %0 = arith.addi %arg1, %c1_i32 : i32
    %c8_i32 = arith.constant 8 : i32
    %1 = arith.muli %0, %c8_i32 : i32
    %c0_i32 = arith.constant 0 : i32
    %c0_i32_0 = arith.constant 0 : i32
    return %arg0, %1, %c0_i32 : i32, i32, i32
  }
  func.func @transform_2(%arg0: i32, %arg1: i32) -> (i32, i32, i32, i32) {
    %c0_i32 = arith.constant 0 : i32
    %c0_i32_0 = arith.constant 0 : i32
    %c0_i32_1 = arith.constant 0 : i32
    %c0_i32_2 = arith.constant 0 : i32
    %c0_i32_3 = arith.constant 0 : i32
    return %c0_i32, %c0_i32_0, %c0_i32_1, %c0_i32_2 : i32, i32, i32, i32
  }
  func.func @transform_3(%arg0: i32, %arg1: i32) -> (i32, i32) {
    %c0_i32 = arith.constant 0 : i32
    %c0_i32_0 = arith.constant 0 : i32
    %c0_i32_1 = arith.constant 0 : i32
    return %c0_i32, %c0_i32_0 : i32, i32
  }
  func.func @transform_4(%arg0: i32, %arg1: i32) -> (i32, i32, i32) {
    %c0_i32 = arith.constant 0 : i32
    %c0_i32_0 = arith.constant 0 : i32
    return %arg0, %arg1, %c0_i32 : i32, i32, i32
  }
}

module attributes {stable_mosaic.version = 11 : i64} {
  func.func @_conv_kernel(%arg0: i32, %arg1: i32, %arg2: memref<1x128x8xbf16, #tpu.memory_space<vmem>>, %arg3: memref<1x16x8xbf16, #tpu.memory_space<vmem>>, %arg4: memref<1x3x8x8xbf16, #tpu.memory_space<vmem>>, %arg5: memref<1x8xf32, #tpu.memory_space<vmem>>, %arg6: memref<1x128x8xbf16, #tpu.memory_space<vmem>>) attributes {dimension_semantics = [#tpu.dimension_semantics<parallel>, #tpu.dimension_semantics<parallel>], iteration_bounds = array<i64: 2, 1>, scalar_prefetch = 0 : i64, scratch_operands = 0 : i64, tpu.core_type = #tpu.core_type<tc>, window_params = [{transform_indices = @transform_0, window_bounds = array<i64: 1, 128, 8>}, {transform_indices = @transform_1, window_bounds = array<i64: 1, 16, 8>}, {pipeline_mode = #tpu.pipeline_mode<synchronous>, transform_indices = @transform_2, window_bounds = array<i64: 1, 3, 8, 8>}, {pipeline_mode = #tpu.pipeline_mode<synchronous>, transform_indices = @transform_3, window_bounds = array<i64: 1, 8>}, {transform_indices = @transform_4, window_bounds = array<i64: 1, 128, 8>}]} {
    %c0 = arith.constant 0 : index
    %c0_0 = arith.constant 0 : index
    %c0_1 = arith.constant 0 : index
    %0 = vector.load %arg2[%c0, %c0_0, %c0_1] : memref<1x128x8xbf16, #tpu.memory_space<vmem>>, vector<1x128x8xbf16>
    %1 = vector.shape_cast %0 : vector<1x128x8xbf16> to vector<128x8xbf16>
    %2 = arith.extf %1 : vector<128x8xbf16> to vector<128x8xf32>
    %c0_2 = arith.constant 0 : index
    %c0_3 = arith.constant 0 : index
    %c0_4 = arith.constant 0 : index
    %3 = vector.load %arg3[%c0_2, %c0_3, %c0_4] : memref<1x16x8xbf16, #tpu.memory_space<vmem>>, vector<1x16x8xbf16>
    %4 = vector.shape_cast %3 : vector<1x16x8xbf16> to vector<16x8xbf16>
    %5 = arith.extf %4 : vector<16x8xbf16> to vector<16x8xf32>
    %6 = tpu.concatenate %2, %5 in 0 : vector<128x8xf32>, vector<16x8xf32> -> vector<144x8xf32>
    %cst = arith.constant 0.000000e+00 : f32
    %7 = vector.broadcast %cst : f32 to vector<144x8xf32>
    %8 = arith.cmpf oge, %6, %7 : vector<144x8xf32>
    %cst_5 = arith.constant 1.000000e-01 : f32
    %9 = vector.broadcast %cst_5 : f32 to vector<144x8xf32>
    %10 = arith.mulf %9, %6 : vector<144x8xf32>
    %11 = arith.select %8, %6, %10 : vector<144x8xi1>, vector<144x8xf32>
    %12 = arith.truncf %11 : vector<144x8xf32> to vector<144x8xbf16>
    %c0_6 = arith.constant 0 : index
    %c0_7 = arith.constant 0 : index
    %13 = vector.load %arg5[%c0_6, %c0_7] : memref<1x8xf32, #tpu.memory_space<vmem>>, vector<1x8xf32>
    %14 = vector.extract_strided_slice %12 {offsets = [0, 0], sizes = [128, 8], strides = [1, 1]} : vector<144x8xbf16> to vector<128x8xbf16>
    %c0_8 = arith.constant 0 : index
    %c0_9 = arith.constant 0 : index
    %c0_10 = arith.constant 0 : index
    %c0_11 = arith.constant 0 : index
    %15 = vector.load %arg4[%c0_8, %c0_9, %c0_10, %c0_11] : memref<1x3x8x8xbf16, #tpu.memory_space<vmem>>, vector<1x1x8x8xbf16>
    %16 = vector.shape_cast %15 : vector<1x1x8x8xbf16> to vector<8x8xbf16>
    %cst_12 = arith.constant dense<0.000000e+00> : vector<128x8xf32>
    %17 = tpu.matmul %14, %16, %cst_12 {dimension_numbers = #tpu.dot_dimension_numbers<[1], [0], [0], [1], [0, 0, 1, 1], [], []>} : vector<128x8xbf16>, vector<8x8xbf16>, vector<128x8xf32> -> vector<128x8xf32>
    %18 = vector.extract_strided_slice %12 {offsets = [5, 0], sizes = [128, 8], strides = [1, 1]} : vector<144x8xbf16> to vector<128x8xbf16>
    %c0_13 = arith.constant 0 : index
    %c1 = arith.constant 1 : index
    %c0_14 = arith.constant 0 : index
    %c0_15 = arith.constant 0 : index
    %19 = vector.load %arg4[%c0_13, %c1, %c0_14, %c0_15] : memref<1x3x8x8xbf16, #tpu.memory_space<vmem>>, vector<1x1x8x8xbf16>
    %20 = vector.shape_cast %19 : vector<1x1x8x8xbf16> to vector<8x8xbf16>
    %cst_16 = arith.constant dense<0.000000e+00> : vector<128x8xf32>
    %21 = tpu.matmul %18, %20, %cst_16 {dimension_numbers = #tpu.dot_dimension_numbers<[1], [0], [0], [1], [0, 0, 1, 1], [], []>} : vector<128x8xbf16>, vector<8x8xbf16>, vector<128x8xf32> -> vector<128x8xf32>
    %22 = arith.addf %17, %21 : vector<128x8xf32>
    %23 = vector.extract_strided_slice %12 {offsets = [10, 0], sizes = [128, 8], strides = [1, 1]} : vector<144x8xbf16> to vector<128x8xbf16>
    %c0_17 = arith.constant 0 : index
    %c2 = arith.constant 2 : index
    %c0_18 = arith.constant 0 : index
    %c0_19 = arith.constant 0 : index
    %24 = vector.load %arg4[%c0_17, %c2, %c0_18, %c0_19] : memref<1x3x8x8xbf16, #tpu.memory_space<vmem>>, vector<1x1x8x8xbf16>
    %25 = vector.shape_cast %24 : vector<1x1x8x8xbf16> to vector<8x8xbf16>
    %cst_20 = arith.constant dense<0.000000e+00> : vector<128x8xf32>
    %26 = tpu.matmul %23, %25, %cst_20 {dimension_numbers = #tpu.dot_dimension_numbers<[1], [0], [0], [1], [0, 0, 1, 1], [], []>} : vector<128x8xbf16>, vector<8x8xbf16>, vector<128x8xf32> -> vector<128x8xf32>
    %27 = arith.addf %22, %26 : vector<128x8xf32>
    %28 = vector.broadcast %13 : vector<1x8xf32> to vector<128x8xf32>
    %29 = arith.addf %27, %28 : vector<128x8xf32>
    %30 = arith.truncf %29 : vector<128x8xf32> to vector<128x8xbf16>
    %c0_21 = arith.constant 0 : index
    %c0_22 = arith.constant 0 : index
    %c0_23 = arith.constant 0 : index
    %31 = vector.load %arg6[%c0_21, %c0_22, %c0_23] : memref<1x128x8xbf16, #tpu.memory_space<vmem>>, vector<1x128x8xbf16>
    %32 = vector.shape_cast %31 : vector<1x128x8xbf16> to vector<128x8xbf16>
    %33 = vector.shape_cast %30 : vector<128x8xbf16> to vector<1x128x8xbf16>
    tpu.vector_store %arg6[%c0_21, %c0_22, %c0_23], %33 {strides = array<i32>} : memref<1x128x8xbf16, #tpu.memory_space<vmem>>, vector<1x128x8xbf16>,
    return
  }
  func.func @transform_0(%arg0: i32, %arg1: i32) -> (i32, i32, i32) {
    %c0_i32 = arith.constant 0 : i32
    %c0_i32_0 = arith.constant 0 : i32
    return %arg0, %arg1, %c0_i32 : i32, i32, i32
  }
  func.func @transform_1(%arg0: i32, %arg1: i32) -> (i32, i32, i32) {
    %c1_i32 = arith.constant 1 : i32
    %0 = arith.addi %arg1, %c1_i32 : i32
    %c8_i32 = arith.constant 8 : i32
    %1 = arith.muli %0, %c8_i32 : i32
    %c0_i32 = arith.constant 0 : i32
    %c0_i32_0 = arith.constant 0 : i32
    return %arg0, %1, %c0_i32 : i32, i32, i32
  }
  func.func @transform_2(%arg0: i32, %arg1: i32) -> (i32, i32, i32, i32) {
    %c0_i32 = arith.constant 0 : i32
    %c0_i32_0 = arith.constant 0 : i32
    %c0_i32_1 = arith.constant 0 : i32
    %c0_i32_2 = arith.constant 0 : i32
    %c0_i32_3 = arith.constant 0 : i32
    return %c0_i32, %c0_i32_0, %c0_i32_1, %c0_i32_2 : i32, i32, i32, i32
  }
  func.func @transform_3(%arg0: i32, %arg1: i32) -> (i32, i32) {
    %c0_i32 = arith.constant 0 : i32
    %c0_i32_0 = arith.constant 0 : i32
    %c0_i32_1 = arith.constant 0 : i32
    return %c0_i32, %c0_i32_0 : i32, i32
  }
  func.func @transform_4(%arg0: i32, %arg1: i32) -> (i32, i32, i32) {
    %c0_i32 = arith.constant 0 : i32
    %c0_i32_0 = arith.constant 0 : i32
    return %arg0, %arg1, %c0_i32 : i32, i32, i32
  }
}

module attributes {stable_mosaic.version = 11 : i64} {
  func.func @_conv_kernel(%arg0: i32, %arg1: i32, %arg2: memref<1x128x8xbf16, #tpu.memory_space<vmem>>, %arg3: memref<1x16x8xbf16, #tpu.memory_space<vmem>>, %arg4: memref<1x7x8x1xf32, #tpu.memory_space<vmem>>, %arg5: memref<1x1xf32, #tpu.memory_space<vmem>>, %arg6: memref<1x128x1xf32, #tpu.memory_space<vmem>>) attributes {dimension_semantics = [#tpu.dimension_semantics<parallel>, #tpu.dimension_semantics<parallel>], iteration_bounds = array<i64: 2, 1>, scalar_prefetch = 0 : i64, scratch_operands = 0 : i64, tpu.core_type = #tpu.core_type<tc>, window_params = [{transform_indices = @transform_0, window_bounds = array<i64: 1, 128, 8>}, {transform_indices = @transform_1, window_bounds = array<i64: 1, 16, 8>}, {pipeline_mode = #tpu.pipeline_mode<synchronous>, transform_indices = @transform_2, window_bounds = array<i64: 1, 7, 8, 1>}, {pipeline_mode = #tpu.pipeline_mode<synchronous>, transform_indices = @transform_3, window_bounds = array<i64: 1, 1>}, {transform_indices = @transform_4, window_bounds = array<i64: 1, 128, 1>}]} {
    %c0 = arith.constant 0 : index
    %c0_0 = arith.constant 0 : index
    %c0_1 = arith.constant 0 : index
    %0 = vector.load %arg2[%c0, %c0_0, %c0_1] : memref<1x128x8xbf16, #tpu.memory_space<vmem>>, vector<1x128x8xbf16>
    %1 = vector.shape_cast %0 : vector<1x128x8xbf16> to vector<128x8xbf16>
    %2 = arith.extf %1 : vector<128x8xbf16> to vector<128x8xf32>
    %c0_2 = arith.constant 0 : index
    %c0_3 = arith.constant 0 : index
    %c0_4 = arith.constant 0 : index
    %3 = vector.load %arg3[%c0_2, %c0_3, %c0_4] : memref<1x16x8xbf16, #tpu.memory_space<vmem>>, vector<1x16x8xbf16>
    %4 = vector.shape_cast %3 : vector<1x16x8xbf16> to vector<16x8xbf16>
    %5 = arith.extf %4 : vector<16x8xbf16> to vector<16x8xf32>
    %6 = tpu.concatenate %2, %5 in 0 : vector<128x8xf32>, vector<16x8xf32> -> vector<144x8xf32>
    %cst = arith.constant 0.000000e+00 : f32
    %7 = vector.broadcast %cst : f32 to vector<144x8xf32>
    %8 = arith.cmpf oge, %6, %7 : vector<144x8xf32>
    %cst_5 = arith.constant 0.00999999977 : f32
    %9 = vector.broadcast %cst_5 : f32 to vector<144x8xf32>
    %10 = arith.mulf %9, %6 : vector<144x8xf32>
    %11 = arith.select %8, %6, %10 : vector<144x8xi1>, vector<144x8xf32>
    %c0_6 = arith.constant 0 : index
    %c0_7 = arith.constant 0 : index
    %12 = vector.load %arg5[%c0_6, %c0_7] : memref<1x1xf32, #tpu.memory_space<vmem>>, vector<1x1xf32>
    %13 = vector.extract_strided_slice %11 {offsets = [0, 0], sizes = [128, 8], strides = [1, 1]} : vector<144x8xf32> to vector<128x8xf32>
    %c0_8 = arith.constant 0 : index
    %c0_9 = arith.constant 0 : index
    %c0_10 = arith.constant 0 : index
    %c0_11 = arith.constant 0 : index
    %14 = vector.load %arg4[%c0_8, %c0_9, %c0_10, %c0_11] : memref<1x7x8x1xf32, #tpu.memory_space<vmem>>, vector<1x1x8x1xf32>
    %15 = vector.shape_cast %14 : vector<1x1x8x1xf32> to vector<8x1xf32>
    %16 = vector.shape_cast %15 : vector<8x1xf32> to vector<8xf32>
    %17 = vector.shape_cast %16 : vector<8xf32> to vector<1x8xf32>
    %18 = vector.broadcast %17 : vector<1x8xf32> to vector<128x8xf32>
    %19 = arith.mulf %13, %18 : vector<128x8xf32>
    %cst_12 = arith.constant dense<0.000000e+00> : vector<128xf32>
    %20 = vector.multi_reduction <add>, %19, %cst_12 [1] : vector<128x8xf32> to vector<128xf32>
    %21 = vector.shape_cast %20 : vector<128xf32> to vector<128x1xf32>
    %22 = vector.extract_strided_slice %11 {offsets = [1, 0], sizes = [128, 8], strides = [1, 1]} : vector<144x8xf32> to vector<128x8xf32>
    %c0_13 = arith.constant 0 : index
    %c1 = arith.constant 1 : index
    %c0_14 = arith.constant 0 : index
    %c0_15 = arith.constant 0 : index
    %23 = vector.load %arg4[%c0_13, %c1, %c0_14, %c0_15] : memref<1x7x8x1xf32, #tpu.memory_space<vmem>>, vector<1x1x8x1xf32>
    %24 = vector.shape_cast %23 : vector<1x1x8x1xf32> to vector<8x1xf32>
    %25 = vector.shape_cast %24 : vector<8x1xf32> to vector<8xf32>
    %26 = vector.shape_cast %25 : vector<8xf32> to vector<1x8xf32>
    %27 = vector.broadcast %26 : vector<1x8xf32> to vector<128x8xf32>
    %28 = arith.mulf %22, %27 : vector<128x8xf32>
    %cst_16 = arith.constant dense<0.000000e+00> : vector<128xf32>
    %29 = vector.multi_reduction <add>, %28, %cst_16 [1] : vector<128x8xf32> to vector<128xf32>
    %30 = vector.shape_cast %29 : vector<128xf32> to vector<128x1xf32>
    %31 = arith.addf %21, %30 : vector<128x1xf32>
    %32 = vector.extract_strided_slice %11 {offsets = [2, 0], sizes = [128, 8], strides = [1, 1]} : vector<144x8xf32> to vector<128x8xf32>
    %c0_17 = arith.constant 0 : index
    %c2 = arith.constant 2 : index
    %c0_18 = arith.constant 0 : index
    %c0_19 = arith.constant 0 : index
    %33 = vector.load %arg4[%c0_17, %c2, %c0_18, %c0_19] : memref<1x7x8x1xf32, #tpu.memory_space<vmem>>, vector<1x1x8x1xf32>
    %34 = vector.shape_cast %33 : vector<1x1x8x1xf32> to vector<8x1xf32>
    %35 = vector.shape_cast %34 : vector<8x1xf32> to vector<8xf32>
    %36 = vector.shape_cast %35 : vector<8xf32> to vector<1x8xf32>
    %37 = vector.broadcast %36 : vector<1x8xf32> to vector<128x8xf32>
    %38 = arith.mulf %32, %37 : vector<128x8xf32>
    %cst_20 = arith.constant dense<0.000000e+00> : vector<128xf32>
    %39 = vector.multi_reduction <add>, %38, %cst_20 [1] : vector<128x8xf32> to vector<128xf32>
    %40 = vector.shape_cast %39 : vector<128xf32> to vector<128x1xf32>
    %41 = arith.addf %31, %40 : vector<128x1xf32>
    %42 = vector.extract_strided_slice %11 {offsets = [3, 0], sizes = [128, 8], strides = [1, 1]} : vector<144x8xf32> to vector<128x8xf32>
    %c0_21 = arith.constant 0 : index
    %c3 = arith.constant 3 : index
    %c0_22 = arith.constant 0 : index
    %c0_23 = arith.constant 0 : index
    %43 = vector.load %arg4[%c0_21, %c3, %c0_22, %c0_23] : memref<1x7x8x1xf32, #tpu.memory_space<vmem>>, vector<1x1x8x1xf32>
    %44 = vector.shape_cast %43 : vector<1x1x8x1xf32> to vector<8x1xf32>
    %45 = vector.shape_cast %44 : vector<8x1xf32> to vector<8xf32>
    %46 = vector.shape_cast %45 : vector<8xf32> to vector<1x8xf32>
    %47 = vector.broadcast %46 : vector<1x8xf32> to vector<128x8xf32>
    %48 = arith.mulf %42, %47 : vector<128x8xf32>
    %cst_24 = arith.constant dense<0.000000e+00> : vector<128xf32>
    %49 = vector.multi_reduction <add>, %48, %cst_24 [1] : vector<128x8xf32> to vector<128xf32>
    %50 = vector.shape_cast %49 : vector<128xf32> to vector<128x1xf32>
    %51 = arith.addf %41, %50 : vector<128x1xf32>
    %52 = vector.extract_strided_slice %11 {offsets = [4, 0], sizes = [128, 8], strides = [1, 1]} : vector<144x8xf32> to vector<128x8xf32>
    %c0_25 = arith.constant 0 : index
    %c4 = arith.constant 4 : index
    %c0_26 = arith.constant 0 : index
    %c0_27 = arith.constant 0 : index
    %53 = vector.load %arg4[%c0_25, %c4, %c0_26, %c0_27] : memref<1x7x8x1xf32, #tpu.memory_space<vmem>>, vector<1x1x8x1xf32>
    %54 = vector.shape_cast %53 : vector<1x1x8x1xf32> to vector<8x1xf32>
    %55 = vector.shape_cast %54 : vector<8x1xf32> to vector<8xf32>
    %56 = vector.shape_cast %55 : vector<8xf32> to vector<1x8xf32>
    %57 = vector.broadcast %56 : vector<1x8xf32> to vector<128x8xf32>
    %58 = arith.mulf %52, %57 : vector<128x8xf32>
    %cst_28 = arith.constant dense<0.000000e+00> : vector<128xf32>
    %59 = vector.multi_reduction <add>, %58, %cst_28 [1] : vector<128x8xf32> to vector<128xf32>
    %60 = vector.shape_cast %59 : vector<128xf32> to vector<128x1xf32>
    %61 = arith.addf %51, %60 : vector<128x1xf32>
    %62 = vector.extract_strided_slice %11 {offsets = [5, 0], sizes = [128, 8], strides = [1, 1]} : vector<144x8xf32> to vector<128x8xf32>
    %c0_29 = arith.constant 0 : index
    %c5 = arith.constant 5 : index
    %c0_30 = arith.constant 0 : index
    %c0_31 = arith.constant 0 : index
    %63 = vector.load %arg4[%c0_29, %c5, %c0_30, %c0_31] : memref<1x7x8x1xf32, #tpu.memory_space<vmem>>, vector<1x1x8x1xf32>
    %64 = vector.shape_cast %63 : vector<1x1x8x1xf32> to vector<8x1xf32>
    %65 = vector.shape_cast %64 : vector<8x1xf32> to vector<8xf32>
    %66 = vector.shape_cast %65 : vector<8xf32> to vector<1x8xf32>
    %67 = vector.broadcast %66 : vector<1x8xf32> to vector<128x8xf32>
    %68 = arith.mulf %62, %67 : vector<128x8xf32>
    %cst_32 = arith.constant dense<0.000000e+00> : vector<128xf32>
    %69 = vector.multi_reduction <add>, %68, %cst_32 [1] : vector<128x8xf32> to vector<128xf32>
    %70 = vector.shape_cast %69 : vector<128xf32> to vector<128x1xf32>
    %71 = arith.addf %61, %70 : vector<128x1xf32>
    %72 = vector.extract_strided_slice %11 {offsets = [6, 0], sizes = [128, 8], strides = [1, 1]} : vector<144x8xf32> to vector<128x8xf32>
    %c0_33 = arith.constant 0 : index
    %c6 = arith.constant 6 : index
    %c0_34 = arith.constant 0 : index
    %c0_35 = arith.constant 0 : index
    %73 = vector.load %arg4[%c0_33, %c6, %c0_34, %c0_35] : memref<1x7x8x1xf32, #tpu.memory_space<vmem>>, vector<1x1x8x1xf32>
    %74 = vector.shape_cast %73 : vector<1x1x8x1xf32> to vector<8x1xf32>
    %75 = vector.shape_cast %74 : vector<8x1xf32> to vector<8xf32>
    %76 = vector.shape_cast %75 : vector<8xf32> to vector<1x8xf32>
    %77 = vector.broadcast %76 : vector<1x8xf32> to vector<128x8xf32>
    %78 = arith.mulf %72, %77 : vector<128x8xf32>
    %cst_36 = arith.constant dense<0.000000e+00> : vector<128xf32>
    %79 = vector.multi_reduction <add>, %78, %cst_36 [1] : vector<128x8xf32> to vector<128xf32>
    %80 = vector.shape_cast %79 : vector<128xf32> to vector<128x1xf32>
    %81 = arith.addf %71, %80 : vector<128x1xf32>
    %82 = vector.broadcast %12 : vector<1x1xf32> to vector<128x1xf32>
    %83 = arith.addf %81, %82 : vector<128x1xf32>
    %84 = math.tanh %83 : vector<128x1xf32>
    %c0_37 = arith.constant 0 : index
    %c0_38 = arith.constant 0 : index
    %c0_39 = arith.constant 0 : index
    %85 = vector.load %arg6[%c0_37, %c0_38, %c0_39] : memref<1x128x1xf32, #tpu.memory_space<vmem>>, vector<1x128x1xf32>
    %86 = vector.shape_cast %85 : vector<1x128x1xf32> to vector<128x1xf32>
    %87 = vector.shape_cast %84 : vector<128x1xf32> to vector<1x128x1xf32>
    tpu.vector_store %arg6[%c0_37, %c0_38, %c0_39], %87 {strides = array<i32>} : memref<1x128x1xf32, #tpu.memory_space<vmem>>, vector<1x128x1xf32>,
    return
  }
  func.func @transform_0(%arg0: i32, %arg1: i32) -> (i32, i32, i32) {
    %c0_i32 = arith.constant 0 : i32
    %c0_i32_0 = arith.constant 0 : i32
    return %arg0, %arg1, %c0_i32 : i32, i32, i32
  }
  func.func @transform_1(%arg0: i32, %arg1: i32) -> (i32, i32, i32) {
    %c1_i32 = arith.constant 1 : i32
    %0 = arith.addi %arg1, %c1_i32 : i32
    %c8_i32 = arith.constant 8 : i32
    %1 = arith.muli %0, %c8_i32 : i32
    %c0_i32 = arith.constant 0 : i32
    %c0_i32_0 = arith.constant 0 : i32
    return %arg0, %1, %c0_i32 : i32, i32, i32
  }
  func.func @transform_2(%arg0: i32, %arg1: i32) -> (i32, i32, i32, i32) {
    %c0_i32 = arith.constant 0 : i32
    %c0_i32_0 = arith.constant 0 : i32
    %c0_i32_1 = arith.constant 0 : i32
    %c0_i32_2 = arith.constant 0 : i32
    %c0_i32_3 = arith.constant 0 : i32
    return %c0_i32, %c0_i32_0, %c0_i32_1, %c0_i32_2 : i32, i32, i32, i32
  }
  func.func @transform_3(%arg0: i32, %arg1: i32) -> (i32, i32) {
    %c0_i32 = arith.constant 0 : i32
    %c0_i32_0 = arith.constant 0 : i32
    %c0_i32_1 = arith.constant 0 : i32
    return %c0_i32, %c0_i32_0 : i32, i32
  }
  func.func @transform_4(%arg0: i32, %arg1: i32) -> (i32, i32, i32) {
    %c0_i32 = arith.constant 0 : i32
    %c0_i32_0 = arith.constant 0 : i32
    return %arg0, %arg1, %c0_i32 : i32, i32, i32
  }
}

</mosaic_0001>

<bundles_post_ra>
// kernel: _lambda_.20
= control target key start
LH: loop header
LB: loop body
LE: loop exit
PB: predicated region body
PF: predicated region fallthrough
CT: control target
= control target key end

     0   :  { %s723_s15 = smov 0   ;;  %s725_s16 = smov 0   ;;  %s802_s0 = inlined_call_operand.vmem [shape: f32[2,32,8], index: 0, kind: input, shape index: {}, may-alias: {0,1}]   ;;  %s803_s1 = inlined_call_operand.vmem [shape: f32[2,32,8], index: 1, kind: input, shape index: {}, may-alias: {0,1}]   ;;  %s804_s2 = inlined_call_operand.vmem [shape: bf16[1,7,8,32], index: 2, kind: input, shape index: {}]   ;;  %s805_s3 = inlined_call_operand.vmem [shape: f32[1,32], index: 3, kind: input, shape index: {}]   ;;  %s806_s4 = inlined_call_operand.vmem [shape: bf16[2,16,32], index: 4, kind: output, shape index: {}]  }
   0x1   :  { %s727_s17 = smov 0  }
   0x2 LB: > { %s26_s18 = sadd.s32 1, %s692_s16  ;;  %p622_p0 = scmp.ge.s32.totalorder %s696_s17, 1  ;;  %s696_s17 = sphi %s727_s17, %s14_s17   ;;  %s692_s16 = sphi %s725_s16, %s808_s16   ;;  %s688_s15 = sphi %s723_s15, %s807_s15  }
   0x3   : > { %p28_p1 = scmp.ge.s32.totalorder %s26_s18, 2  ;;  %p204_p2 = scmp.lt.s32.totalorder %s696_s17, 3 }
   0x5   : > { %s810_s18 = smov (%p28_p1, %s26_s18), 0  ;;  %p205_p3 = pnand %p622_p0, %p204_p2 }
   0x6   : > { %p249_p4 = scmp.lt.s32.totalorder (!%p205_p3), %s688_s15, 1 }
   0x7   : > { %208 = sbr.rel (%p205_p3) target bundleno = 191 (0xbf), region = 36 }
   0xc   : > { %v288_v0 = vld [vmem:[%s804_s2] sm:$0xf]  ;;  %vm316_vm0 = vcmask 1043456   ;;  %v632_v2 = vld [vmem:[%s804_s2 + $0x8] sm:$0xf]  ;;  %s812_s15 = smov (!%p249_p4, %s688_s15), 1 }
   0xd   : > { %v337_v1 = vsel %vm316_vm0, %v288_v0, 0  ;;  %v629_v3 = vld [vmem:[%s804_s2 + $0x4] sm:$0xf]  ;;  %v363_v4 = vsel %vm316_vm0, %v632_v2, 0  ;;  %v634_v6 = vld [vmem:[%s804_s2 + $0xc] sm:$0xf] }
   0xe   : > { %346 = vmatpush.bf16.msra.mxu1 %v337_v1  ;;  %v318_v5 = vsel %vm316_vm0, %v629_v3, 0  ;;  %372 = vmatpush.bf16.msra.mxu2 %v363_v4  ;;  %v397_v7 = vsel %vm316_vm0, %v634_v6, 0  ;;  %v640_v8 = vld [vmem:[%s804_s2 + $0x18] sm:$0xf]  ;;  %s644_s29 = sshll.u32 %s812_s15, 5  ;;  %vm312_vm1 = vcmask 64512  }
   0xf   : > { %327 = vmatpush.bf16.msra.mxu0 %v318_v5  ;;  %406 = vmatpush.bf16.msra.mxu3 %v397_v7  ;;  %v485_v9 = vsel %vm316_vm0, %v640_v8, 0  ;;  %v636_v10 = vld [vmem:[%s804_s2 + $0x10] sm:$0xf]  ;;  %s256_s8 = scalar_lea.vmem %s802_s0, %s644_s29  ;;  %s646_s9 = sadd.s32 16, %s644_s29  ;;  %v638_v12 = vld [vmem:[%s804_s2 + $0x14] sm:$0xf] }
  0x10   : > { %v425_v11 = vsel %vm316_vm0, %v636_v10, 0  ;;  %v281_v13 = vld [vmem:[%s256_s8] sm:$0xff]  ;;  %v282_v14 = vld [vmem:[%s256_s8 + $0x8] sm:$0xff]  ;;  %s267_s14 = scalar_lea.vmem %s803_s1, %s646_s9  ;;  %v457_v15 = vsel %vm316_vm0, %v638_v12, 0  ;;  %vm355_vm2 = vcmask 1046528   ;;  %vm477_vm6 = vcmask 1044480  }
  0x11   : > { %v284_v16 = vpack.c.bf16 %v281_v13, %v281_v13  ;;  %v285_v17 = vpack.c.bf16 %v282_v14, %v282_v14  ;;  %v283_v18 = vld [vmem:[%s267_s14] sm:$0xff]  ;;  %vm299_vm3 = vsmask.f32 7424  ;;  %vm383_vm4 = vsmask.f32 6400  ;;  %s647_s21 = sshll.u32 %s812_s15, 3 }
  0x12   : > { %494 = vmatpush.bf16.msrb.mxu2 %v485_v9  ;;  %466 = vmatpush.bf16.msrb.mxu1 %v457_v15  ;;  %v286_v19 = vpack.c.bf16 %v283_v18, %v283_v18  ;;  %vm445_vm5 = vsmask.f32 5376  ;;  %vm417_vm7 = vcmask 1045504   ;;  %v673_v8 = vld [vmem:[%s805_s3] ss:$0 sm:$0xff]  ;;  %s278_s24 = scalar_lea.vmem %s806_s4, %s647_s21  ;;  %vm510_vm8 = vcmask 257024  }
  0x13   : > { %434 = vmatpush.bf16.msrb.mxu0 %v425_v11  ;;  %v294_v20 = vunpack.c.l.b16 %v284_v16  ;;  %v295_v21 = vunpack.c.l.b16 %v285_v17 }
  0x14   : > { %v296_v22 = vunpack.c.l.b16 %v286_v19 }
  0x15   : > { %v297_v23 = vpack.c.b16 %v295_v21, %v294_v20 }
  0x16   : > { %v298_v24 = vpack.c.b16 %v296_v22, %v296_v22 }
  0x17   : > { %631 = vmatmul.msk.bf16.vlgmr.msra.gmra.mxu1 %vm312_vm1, %v297_v23  ;;  %v356_v25 = vrot.slane %v297_v23, 1  ;;  %v301_v26 = vshrl.u32 %v297_v23, 16  ;;  %v303_v27 = vshll.u32 %v297_v23, 16  ;;  %v478_v50 = vrot.slane %v297_v23, 3 }
  0x18   : > { %v357_v28 = vrot.slane %v298_v24, 1  ;;  %v308_v29 = vshll.u32 %v298_v24, 16  ;;  %v387_v30 = vshrl.u32 %v298_v24, 16  ;;  %v479_v51 = vrot.slane %v298_v24, 3 }
  0x19   : > { %v305_v31 = vrot.slane %v303_v27, 1  ;;  %v384_v32 = vrot.slane %v301_v26, 1  ;;  %v385_v33 = vrot.slane %v303_v27, 2  ;;  %v446_v40 = vrot.slane %v301_v26, 2 }
  0x1a   : > { %v358_v34 = vsel %vm355_vm2, %v356_v25, %v357_v28  ;;  %v310_v35 = vrot.slane %v308_v29, 1  ;;  %v389_v36 = vrot.slane %v387_v30, 1  ;;  %v390_v37 = vrot.slane %v308_v29, 2 }
  0x1b   : > { %633 = vmatmul.msk.bf16.vlgmr.msra.gmra.mxu2 %vm312_vm1, %v358_v34  ;;  %v306_v38 = vor.u32 %v305_v31, %v301_v26  ;;  %v386_v39 = vor.u32 %v385_v33, %v384_v32  ;;  %v447_v42 = vrot.slane %v303_v27, 3  ;;  %v449_v43 = vrot.slane %v387_v30, 2 }
  0x1c   : > { %v391_v41 = vor.u32 %v390_v37, %v389_v36  ;;  %v450_v44 = vrot.slane %v308_v29, 3  ;;  %v418_v52 = vrot.slane %v297_v23, 2  ;;  %v419_v53 = vrot.slane %v298_v24, 2 }
  0x1d   : > { %v311_v45 = vsel %vm299_vm3, %v306_v38, %v310_v35  ;;  %v448_v47 = vor.u32 %v447_v42, %v446_v40  ;;  %v480_v54 = vsel %vm477_vm6, %v478_v50, %v479_v51 }
  0x1e   : > { %630 = vmatmul.msk.bf16.vlgmr.msra.gmra.mxu0 %vm312_vm1, %v311_v45  ;;  %v392_v46 = vsel %vm383_vm4, %v386_v39, %v391_v41  ;;  %v451_v48 = vor.u32 %v450_v44, %v449_v43  ;;  %v420_v55 = vsel %vm417_vm7, %v418_v52, %v419_v53 }
  0x1f   : > { %635 = vmatmul.msk.bf16.vlgmr.msra.gmra.mxu3 %vm312_vm1, %v392_v46 }
  0x20   : > { %v452_v49 = vsel %vm445_vm5, %v448_v47, %v451_v48 }
  0x27   : > { %639 = vmatmul.msk.bf16.vlgmr.msrb.gmra.mxu1 %vm312_vm1, %v452_v49 }
  0x2b   : > { %641 = vmatmul.msk.bf16.vlgmr.msrb.gmra.mxu2 %vm312_vm1, %v480_v54 }
  0x2e   : > { %637 = vmatmul.msk.bf16.vlgmr.msrb.gmra.mxu0 %vm312_vm1, %v420_v55 }
  0x94   : > { %v348_v56 = vpop.f32.mrf.mxu1 }
  0x9b   : > { %v329_v57 = vpop.f32.mrf.mxu0 }
  0x9c   : > { %v350_v59 = vpop.f32.mrf.mxu1  ;;  %v349_v61 = vadd.f32 %v348_v56, %v329_v57 }
  0x9e   : > { %v374_v58 = vpop.f32.mrf.mxu2 }
  0x9f   : > { %v379_v0 = vadd.f32 %v374_v58, %v349_v61 }
  0xa2   : > { %v408_v62 = vpop.f32.mrf.mxu3 }
  0xa3   : > { %v331_v60 = vpop.f32.mrf.mxu0  ;;  %v413_v1 = vadd.f32 %v408_v62, %v379_v0 }
  0xa4   : > { %v468_v2 = vpop.f32.mrf.mxu1  ;;  %v351_v4 = vadd.f32 %v350_v59, %v331_v60 }
  0xa6   : > { %v376_v63 = vpop.f32.mrf.mxu2 }
  0xa7   : > { %v380_v10 = vadd.f32 %v376_v63, %v351_v4 }
  0xaa   : > { %v410_v9 = vpop.f32.mrf.mxu3 }
  0xab   : > { %v436_v3 = vpop.f32.mrf.mxu0  ;;  %v414_v12 = vadd.f32 %v410_v9, %v380_v10 }
  0xac   : > { %v441_v5 = vadd.f32 %v436_v3, %v413_v1  ;;  %v470_v17 = vpop.f32.mrf.mxu1 }
  0xae   : > { %v473_v6 = vadd.f32 %v468_v2, %v441_v5  ;;  %v496_v7 = vpop.f32.mrf.mxu2 }
  0xb0   : > { %v501_v11 = vadd.f32 %v496_v7, %v473_v6 }
  0xb2   : > { %v506_v13 = vadd.f32 %v673_v8, %v501_v11 }
  0xb3   : > { %v438_v14 = vpop.f32.mrf.mxu0 }
  0xb4   : > { %v508_v15 = vpack.c.bf16 %v506_v13, %v506_v13  ;;  %v442_v16 = vadd.f32 %v438_v14, %v414_v12 }
  0xb6   : > { %511 = vst.msk [vmem:[%s278_s24] sm:$0xf] %vm510_vm8, %v508_v15  ;;  %v474_v18 = vadd.f32 %v470_v17, %v442_v16  ;;  %v498_v19 = vpop.f32.mrf.mxu2 }
  0xb8   : > { %v502_v20 = vadd.f32 %v498_v19, %v474_v18 }
  0xba   : > { %v507_v21 = vadd.f32 %v673_v8, %v502_v20 }
  0xbc   : > { %v509_v22 = vpack.c.bf16 %v507_v21, %v507_v21 }
  0xbe   : > { %512 = vst.msk [vmem:[%s278_s24 + $0x4] sm:$0xf] %vm510_vm8, %v509_v22 }
  0xbf PF: > { %s14_s17 = sadd.s32 1, %s696_s17   ;;  %s807_s15 = smov %s692_s16 }
  0xc0   : > { %p11_p5 = scmp.ge.s32.totalorder %s14_s17, 4   ;;  %s808_s16 = smov %s810_s18 }
  0xc2   :  { %13 = sbr.rel (!%p11_p5) target bundleno = 2 (0x2), region = 75 }

// kernel: _lambda_.19
= control target key start
LH: loop header
LB: loop body
LE: loop exit
PB: predicated region body
PF: predicated region fallthrough
CT: control target
= control target key end

     0   :  { %s583_s14 = smov 0   ;;  %s585_s15 = smov 0   ;;  %s715_s0 = inlined_call_operand.vmem [shape: f32[2,128,9], index: 0, kind: input, shape index: {}]   ;;  %s716_s1 = inlined_call_operand.vmem [shape: f32[1,1,9,1], index: 1, kind: input, shape index: {}]   ;;  %s717_s2 = inlined_call_operand.<no memory space> [shape: f32[1,1], index: 2, kind: input, shape index: {}]   ;;  %s718_s3 = inlined_call_operand.vmem [shape: f32[2,128,1], index: 3, kind: output, shape index: {}]  }
   0x1   :  { %v8_v0 = vstv %s717_s2  ;;  %s587_s16 = smov 0  }
   0x2   :  { %9 = vst [vmem:[#allocation2] sm:$0x1] %v8_v0 }
   0x3 LB: > { %s27_s2 = sadd.s32 1, %s553_s15  ;;  %p467_p0 = scmp.ge.s32.totalorder %s557_s16, 1  ;;  %s557_s16 = sphi %s587_s16, %s15_s16   ;;  %s553_s15 = sphi %s585_s15, %s720_s15   ;;  %s549_s14 = sphi %s583_s14, %s719_s14  }
   0x4   : > { %p29_p1 = scmp.ge.s32.totalorder %s27_s2, 2  ;;  %p160_p2 = scmp.lt.s32.totalorder %s557_s16, 3 }
   0x6   : > { %s722_s2 = smov (%p29_p1, %s27_s2), 0  ;;  %p161_p3 = pnand %p467_p0, %p160_p2 }
   0x7   : > { %p193_p4 = scmp.lt.s32.totalorder (!%p161_p3), %s549_s14, 1 }
   0x8   : > { %164 = sbr.rel (%p161_p3) target bundleno = 327 (0x147), region = 32 }
   0xd   : > { %v229_v1 = vld [vmem:[%s716_s1] sm:$0xff]  ;;  %v559_v2 = vmov 0   ;;  %v230_v3 = vld [vmem:[%s716_s1 + $0x8] sm:$0x1]  ;;  %v239_v4 = vlaneseq  ;;  %s724_s14 = smov (!%p193_p4, %s549_s14), 1  ;;  %vm244_vm0 = vcmask 130112  }
   0xe   : > { %501 = vset.pattern.permute.xlu0 %v559_v2  ;;  %s474_s21 = sshll.u32 %s724_s14, 7  ;;  %vm275_vm1 = vcmask 72704   ;;  %v649_v60 = vld [vmem:[#allocation2] ss:$0 sm:$0xff]  ;;  %vm359_vm2 = vcmask 7168  }
   0xf   : > { %234 = vperm.xlu0 %501, %v229_v1   ;;  %v240_v6 = vand.u32 127, %v239_v4  ;;  %s615_s24 = scalar_lea.vmem %s715_s0, %s474_s21  ;;  %s659_s27 = scalar_lea.vmem %s718_s3, %s474_s21 }
  0x10   : > { %v216_v11 = vld [vmem:[%s615_s24 + $0x20] sm:$0xff]  ;;  %v214_v12 = vld [vmem:[%s615_s24 + $0x10] sm:$0xff]  ;;  %v215_v21 = vld [vmem:[%s615_s24 + $0x18] sm:$0xff] }
  0x11   : > { %v242_v7 = vadd.s32 4294967288, %v240_v6  ;;  %v212_v13 = vld [vmem:[%s615_s24] sm:$0xff]  ;;  %v213_v22 = vld [vmem:[%s615_s24 + $0x8] sm:$0xff]  ;;  %v218_v27 = vld [vmem:[%s615_s24 + $0x30] sm:$0xff] }
  0x12   : > { %v217_v28 = vld [vmem:[%s615_s24 + $0x28] sm:$0xff]  ;;  %v220_v33 = vld [vmem:[%s615_s24 + $0x40] sm:$0xff]  ;;  %v219_v34 = vld [vmem:[%s615_s24 + $0x38] sm:$0xff] }
  0x13   : > { %v222_v39 = vld [vmem:[%s615_s24 + $0x50] sm:$0xff]  ;;  %v221_v40 = vld [vmem:[%s615_s24 + $0x48] sm:$0xff]  ;;  %v224_v45 = vld [vmem:[%s615_s24 + $0x60] sm:$0xff] }
  0x14   : > { %v223_v46 = vld [vmem:[%s615_s24 + $0x58] sm:$0xff]  ;;  %v226_v51 = vld [vmem:[%s615_s24 + $0x70] sm:$0xff]  ;;  %v225_v52 = vld [vmem:[%s615_s24 + $0x68] sm:$0xff] }
  0x15   : > { %v227_v57 = vld [vmem:[%s615_s24 + $0x78] sm:$0xff] }
  0x17   : > { %237 = vperm.xlu0 %501, %v230_v3  }
  0x81   : > { %v235_v5 = vpop.permute.xlu0 %234 }
  0x82   : > { %v241_v9 = vperm.slane %v235_v5, %v240_v6 }
  0x89   : > { %v238_v8 = vpop.permute.xlu0 %237 }
  0x8a   : > { %v243_v10 = vperm.slane %v238_v8, %v242_v7 }
  0x8c   : > { %v245_v14 = vsel %vm244_vm0, %v243_v10, %v241_v9 }
  0x8d   : > { %v263_v15 = vmul.f32 %v245_v14, %v216_v11  ;;  %v261_v16 = vmul.f32 %v245_v14, %v214_v12  ;;  %v259_v17 = vmul.f32 %v245_v14, %v212_v13  ;;  %v262_v23 = vmul.f32 %v245_v14, %v215_v21 }
  0x8e   : > { %v260_v24 = vmul.f32 %v245_v14, %v213_v22  ;;  %v265_v29 = vmul.f32 %v245_v14, %v218_v27  ;;  %v264_v30 = vmul.f32 %v245_v14, %v217_v28  ;;  %v267_v35 = vmul.f32 %v245_v14, %v220_v33 }
  0x8f   : > { %v288_v18 = vsel %vm275_vm1, %v263_v15, 0.0  ;;  %v282_v19 = vsel %vm275_vm1, %v261_v16, 0.0  ;;  %v276_v20 = vsel %vm275_vm1, %v259_v17, 0.0  ;;  %v285_v25 = vsel %vm275_vm1, %v262_v23, 0.0 }
  0x90   : > { %289 = vadd.xlane.f32.xlu0 %v288_v18  ;;  %283 = vadd.xlane.f32.xlu2 %v282_v19  ;;  %v279_v26 = vsel %vm275_vm1, %v260_v24, 0.0  ;;  %v294_v31 = vsel %vm275_vm1, %v265_v29, 0.0  ;;  %v291_v32 = vsel %vm275_vm1, %v264_v30, 0.0  ;;  %v266_v36 = vmul.f32 %v245_v14, %v219_v34 }
  0x91   : > { %277 = vadd.xlane.f32.xlu1 %v276_v20  ;;  %v300_v37 = vsel %vm275_vm1, %v267_v35, 0.0  ;;  %v269_v41 = vmul.f32 %v245_v14, %v222_v39  ;;  %v268_v42 = vmul.f32 %v245_v14, %v221_v40  ;;  %v271_v47 = vmul.f32 %v245_v14, %v224_v45 }
  0x92   : > { %v297_v38 = vsel %vm275_vm1, %v266_v36, 0.0  ;;  %v270_v48 = vmul.f32 %v245_v14, %v223_v46  ;;  %v273_v53 = vmul.f32 %v245_v14, %v226_v51  ;;  %v272_v54 = vmul.f32 %v245_v14, %v225_v52 }
  0x93   : > { %v306_v43 = vsel %vm275_vm1, %v269_v41, 0.0  ;;  %v303_v44 = vsel %vm275_vm1, %v268_v42, 0.0  ;;  %v312_v49 = vsel %vm275_vm1, %v271_v47, 0.0  ;;  %v274_v58 = vmul.f32 %v245_v14, %v227_v57 }
  0x94   : > { %v309_v50 = vsel %vm275_vm1, %v270_v48, 0.0  ;;  %v318_v55 = vsel %vm275_vm1, %v273_v53, 0.0  ;;  %v315_v56 = vsel %vm275_vm1, %v272_v54, 0.0 }
  0x95   : > { %v321_v59 = vsel %vm275_vm1, %v274_v58, 0.0 }
  0x98   : > { %286 = vadd.xlane.f32.xlu2 %v285_v25 }
  0x99   : > { %280 = vadd.xlane.f32.xlu1 %v279_v26 }
  0xa0   : > { %295 = vadd.xlane.f32.xlu2 %v294_v31 }
  0xa1   : > { %292 = vadd.xlane.f32.xlu1 %v291_v32 }
  0xa8   : > { %301 = vadd.xlane.f32.xlu2 %v300_v37 }
  0xa9   : > { %298 = vadd.xlane.f32.xlu1 %v297_v38 }
  0xb0   : > { %307 = vadd.xlane.f32.xlu2 %v306_v43 }
  0xb1   : > { %304 = vadd.xlane.f32.xlu1 %v303_v44 }
  0xb8   : > { %313 = vadd.xlane.f32.xlu2 %v312_v49 }
  0xb9   : > { %310 = vadd.xlane.f32.xlu1 %v309_v50 }
  0xc0   : > { %319 = vadd.xlane.f32.xlu2 %v318_v55 }
  0xc1   : > { %316 = vadd.xlane.f32.xlu1 %v315_v56 }
  0xc9   : > { %322 = vadd.xlane.f32.xlu1 %v321_v59 }
 0x103   : > { %v290_v61 = vpop.xlane.xlu0 %289  ;;  %v284_v62 = vpop.xlane.xlu2 %283 }
 0x104   : > { %v331_v63 = vadd.f32 %v649_v60, %v290_v61  ;;  %v329_v0 = vadd.f32 %v649_v60, %v284_v62  ;;  %v278_v1 = vpop.xlane.xlu1 %277 }
 0x105   : > { %v327_v2 = vadd.f32 %v649_v60, %v278_v1 }
 0x106   : > { %503 = vtanh.f32 %v331_v63 }
 0x107   : > { %505 = vtanh.f32 %v329_v0 }
 0x108   : > { %507 = vtanh.f32 %v327_v2 }
 0x10b   : > { %v287_v3 = vpop.xlane.xlu2 %286 }
 0x10c   : > { %v504_v4 = vpop.eup %503  ;;  %v330_v5 = vadd.f32 %v649_v60, %v287_v3  ;;  %v281_v6 = vpop.xlane.xlu1 %280 }
 0x10d   : > { %v506_v7 = vpop.eup %505  ;;  %364 = vst.msk [vmem:[%s659_s27 + $0x20] sm:$0xff] %vm359_vm2, %v504_v4  ;;  %v328_v8 = vadd.f32 %v649_v60, %v281_v6 }
 0x10e   : > { %v508_v9 = vpop.eup %507  ;;  %362 = vst.msk [vmem:[%s659_s27 + $0x10] sm:$0xff] %vm359_vm2, %v506_v7  ;;  %509 = vtanh.f32 %v330_v5 }
 0x10f   : > { %360 = vst.msk [vmem:[%s659_s27] sm:$0xff] %vm359_vm2, %v508_v9  ;;  %511 = vtanh.f32 %v328_v8 }
 0x113   : > { %v296_v10 = vpop.xlane.xlu2 %295 }
 0x114   : > { %v510_v11 = vpop.eup %509  ;;  %v333_v12 = vadd.f32 %v649_v60, %v296_v10  ;;  %v293_v13 = vpop.xlane.xlu1 %292 }
 0x115   : > { %v512_v14 = vpop.eup %511  ;;  %363 = vst.msk [vmem:[%s659_s27 + $0x18] sm:$0xff] %vm359_vm2, %v510_v11  ;;  %v332_v15 = vadd.f32 %v649_v60, %v293_v13 }
 0x116   : > { %361 = vst.msk [vmem:[%s659_s27 + $0x8] sm:$0xff] %vm359_vm2, %v512_v14  ;;  %513 = vtanh.f32 %v333_v12 }
 0x117   : > { %515 = vtanh.f32 %v332_v15 }
 0x11b   : > { %v302_v16 = vpop.xlane.xlu2 %301 }
 0x11c   : > { %v514_v17 = vpop.eup %513  ;;  %v335_v18 = vadd.f32 %v649_v60, %v302_v16  ;;  %v299_v19 = vpop.xlane.xlu1 %298 }
 0x11d   : > { %v516_v20 = vpop.eup %515  ;;  %366 = vst.msk [vmem:[%s659_s27 + $0x30] sm:$0xff] %vm359_vm2, %v514_v17  ;;  %v334_v21 = vadd.f32 %v649_v60, %v299_v19 }
 0x11e   : > { %365 = vst.msk [vmem:[%s659_s27 + $0x28] sm:$0xff] %vm359_vm2, %v516_v20  ;;  %517 = vtanh.f32 %v335_v18 }
 0x11f   : > { %519 = vtanh.f32 %v334_v21 }
 0x123   : > { %v308_v22 = vpop.xlane.xlu2 %307 }
 0x124   : > { %v518_v23 = vpop.eup %517  ;;  %v337_v24 = vadd.f32 %v649_v60, %v308_v22  ;;  %v305_v25 = vpop.xlane.xlu1 %304 }
 0x125   : > { %v520_v26 = vpop.eup %519  ;;  %368 = vst.msk [vmem:[%s659_s27 + $0x40] sm:$0xff] %vm359_vm2, %v518_v23  ;;  %v336_v27 = vadd.f32 %v649_v60, %v305_v25 }
 0x126   : > { %367 = vst.msk [vmem:[%s659_s27 + $0x38] sm:$0xff] %vm359_vm2, %v520_v26  ;;  %521 = vtanh.f32 %v337_v24 }
 0x127   : > { %523 = vtanh.f32 %v336_v27 }
 0x12b   : > { %v314_v28 = vpop.xlane.xlu2 %313 }
 0x12c   : > { %v522_v29 = vpop.eup %521  ;;  %v339_v30 = vadd.f32 %v649_v60, %v314_v28  ;;  %v311_v31 = vpop.xlane.xlu1 %310 }
 0x12d   : > { %v524_v32 = vpop.eup %523  ;;  %370 = vst.msk [vmem:[%s659_s27 + $0x50] sm:$0xff] %vm359_vm2, %v522_v29  ;;  %v338_v33 = vadd.f32 %v649_v60, %v311_v31 }
 0x12e   : > { %369 = vst.msk [vmem:[%s659_s27 + $0x48] sm:$0xff] %vm359_vm2, %v524_v32  ;;  %525 = vtanh.f32 %v339_v30 }
 0x12f   : > { %527 = vtanh.f32 %v338_v33 }
 0x133   : > { %v320_v34 = vpop.xlane.xlu2 %319 }
 0x134   : > { %v526_v35 = vpop.eup %525  ;;  %v341_v36 = vadd.f32 %v649_v60, %v320_v34  ;;  %v317_v37 = vpop.xlane.xlu1 %316 }
 0x135   : > { %v528_v38 = vpop.eup %527  ;;  %372 = vst.msk [vmem:[%s659_s27 + $0x60] sm:$0xff] %vm359_vm2, %v526_v35  ;;  %v340_v39 = vadd.f32 %v649_v60, %v317_v37 }
 0x136   : > { %371 = vst.msk [vmem:[%s659_s27 + $0x58] sm:$0xff] %vm359_vm2, %v528_v38  ;;  %529 = vtanh.f32 %v341_v36 }
 0x137   : > { %531 = vtanh.f32 %v340_v39 }
 0x13c   : > { %v530_v40 = vpop.eup %529  ;;  %v323_v41 = vpop.xlane.xlu1 %322 }
 0x13d   : > { %v532_v42 = vpop.eup %531  ;;  %374 = vst.msk [vmem:[%s659_s27 + $0x70] sm:$0xff] %vm359_vm2, %v530_v40  ;;  %v342_v43 = vadd.f32 %v649_v60, %v323_v41 }
 0x13e   : > { %373 = vst.msk [vmem:[%s659_s27 + $0x68] sm:$0xff] %vm359_vm2, %v532_v42 }
 0x13f   : > { %533 = vtanh.f32 %v342_v43 }
 0x145   : > { %v534_v44 = vpop.eup %533 }
 0x146   : > { %375 = vst.msk [vmem:[%s659_s27 + $0x78] sm:$0xff] %vm359_vm2, %v534_v44 }
 0x147 PF: > { %s15_s16 = sadd.s32 1, %s557_s16   ;;  %s719_s14 = smov %s553_s15 }
 0x148   : > { %p12_p5 = scmp.ge.s32.totalorder %s15_s16, 4   ;;  %s720_s15 = smov %s722_s2 }
 0x14a   :  { %14 = sbr.rel (!%p12_p5) target bundleno = 3 (0x3), region = 62 }

// kernel: _lambda_.22
= control target key start
LH: loop header
LB: loop body
LE: loop exit
PB: predicated region body
PF: predicated region fallthrough
CT: control target
= control target key end

     0   :  { %s599_s15 = smov 0   ;;  %s601_s16 = smov 0   ;;  %s663_s0 = inlined_call_operand.vmem [shape: f32[2,64,4], index: 0, kind: input, shape index: {}]   ;;  %s664_s1 = inlined_call_operand.vmem [shape: bf16[1,1,4,16], index: 1, kind: input, shape index: {}]   ;;  %s665_s2 = inlined_call_operand.vmem [shape: f32[1,16], index: 2, kind: input, shape index: {}]   ;;  %s666_s3 = inlined_call_operand.vmem [shape: bf16[2,64,16], index: 3, kind: input, shape index: {}]   ;;  %s667_s4 = inlined_call_operand.vmem [shape: bf16[2,64,16], index: 4, kind: output, shape index: {}]  }
   0x1   :  { %s603_s17 = smov 0  }
   0x2 LB: > { %s26_s18 = sadd.s32 1, %s568_s16  ;;  %p487_p0 = scmp.ge.s32.totalorder %s572_s17, 1  ;;  %s572_s17 = sphi %s603_s17, %s14_s17   ;;  %s568_s16 = sphi %s601_s16, %s669_s16   ;;  %s564_s15 = sphi %s599_s15, %s668_s15  }
   0x3   : > { %p28_p1 = scmp.ge.s32.totalorder %s26_s18, 2  ;;  %p200_p2 = scmp.lt.s32.totalorder %s572_s17, 3 }
   0x5   : > { %s671_s18 = smov (%p28_p1, %s26_s18), 0  ;;  %p201_p3 = pnand %p487_p0, %p200_p2 }
   0x6   : > { %p244_p4 = scmp.lt.s32.totalorder (!%p201_p3), %s564_s15, 1 }
   0x7   : > { %204 = sbr.rel (%p201_p3) target bundleno = 167 (0xa7), region = 36 }
   0xc   : > { %v287_v0 = vld [vmem:[%s664_s1] sm:$0x3]  ;;  %vm304_vm0 = vcmask 1041408   ;;  %s673_s15 = smov (!%p244_p4, %s564_s15), 1  ;;  %vm291_vm1 = vcmask 31744   ;;  %vm369_vm2 = vcmask 125952  }
   0xd   : > { %v306_v1 = vsel %vm304_vm0, %v287_v0, 0  ;;  %s500_s21 = sshll.u32 %s673_s15, 6  ;;  %s501_s25 = sshll.u32 %s673_s15, 5  ;;  %v549_v15 = vld [vmem:[%s665_s2] ss:$0 sm:$0xff] }
   0xe   : > { %315 = vmatpush.bf16.msra.mxu0 %v306_v1  ;;  %522 = vmatpush.bf16.msra.mxu1 %v306_v1  ;;  %s251_s24 = scalar_lea.vmem %s663_s0, %s500_s21  ;;  %s261_s28 = scalar_lea.vmem %s666_s3, %s501_s25 }
   0xf   : > { %523 = vmatpush.bf16.msra.mxu2 %v306_v1  ;;  %524 = vmatpush.bf16.msra.mxu3 %v306_v1  ;;  %v274_v2 = vld [vmem:[%s251_s24] sm:$0xff]  ;;  %v275_v3 = vld [vmem:[%s251_s24 + $0x8] sm:$0xff]  ;;  %v276_v4 = vld [vmem:[%s251_s24 + $0x10] sm:$0xff]  ;;  %s636_s7 = scalar_lea.vmem %s667_s4, %s501_s25 }
  0x10   : > { %v282_v5 = vpack.c.bf16 %v275_v3, %v274_v2  ;;  %v277_v6 = vld [vmem:[%s251_s24 + $0x18] sm:$0xff]  ;;  %v278_v7 = vld [vmem:[%s251_s24 + $0x20] sm:$0xff]  ;;  %v279_v8 = vld [vmem:[%s251_s24 + $0x28] sm:$0xff] }
  0x11   : > { %v283_v9 = vpack.c.bf16 %v277_v6, %v276_v4  ;;  %v284_v10 = vpack.c.bf16 %v279_v8, %v278_v7  ;;  %v280_v11 = vld [vmem:[%s251_s24 + $0x30] sm:$0xff]  ;;  %v281_v12 = vld [vmem:[%s251_s24 + $0x38] sm:$0xff]  ;;  %v504_v14 = vld [vmem:[%s261_s28] sm:$0xff]  }
  0x12   : > { %494 = vmatmul.msk.bf16.vlgmr.msra.gmra.mxu0 %vm291_vm1, %v282_v5  ;;  %v285_v13 = vpack.c.bf16 %v281_v12, %v280_v11  ;;  %v519_v16 = vld [vmem:[%s261_s28 + $0x8] sm:$0xff]   ;;  %v505_v17 = vunpack.c.l.bf16 %v504_v14  ;;  %v520_v24 = vld [vmem:[%s261_s28 + $0x10] sm:$0xff]   ;;  %v521_v26 = vld [vmem:[%s261_s28 + $0x18] sm:$0xff]   ;;  %v506_v32 = vunpack.c.h.bf16 %v504_v14 }
  0x13   : > { %495 = vmatmul.msk.bf16.vlgmr.msra.gmra.mxu1 %vm291_vm1, %v283_v9  ;;  %496 = vmatmul.msk.bf16.vlgmr.msra.gmra.mxu2 %vm291_vm1, %v284_v10  ;;  %v509_v19 = vunpack.c.l.bf16 %v519_v16  ;;  %v513_v29 = vunpack.c.l.bf16 %v520_v24  ;;  %v517_v31 = vunpack.c.l.bf16 %v521_v26  ;;  %v510_v36 = vunpack.c.h.bf16 %v519_v16 }
  0x14   : > { %497 = vmatmul.msk.bf16.vlgmr.msra.gmra.mxu3 %vm291_vm1, %v285_v13  ;;  %v514_v49 = vunpack.c.h.bf16 %v520_v24  ;;  %v518_v51 = vunpack.c.h.bf16 %v521_v26 }
  0x8f   : > { %v317_v18 = vpop.f32.mrf.mxu0 }
  0x90   : > { %v318_v20 = vadd.f32 %v549_v15, %v317_v18  ;;  %v322_v21 = vpop.f32.mrf.mxu1 }
  0x91   : > { %v323_v22 = vadd.f32 %v549_v15, %v322_v21 }
  0x92   : > { %v353_v23 = vadd.f32 %v505_v17, %v318_v20 }
  0x93   : > { %v355_v25 = vadd.f32 %v509_v19, %v323_v22 }
  0x94   : > { %v361_v27 = vpack.c.bf16 %v353_v23, %v353_v23 }
  0x95   : > { %v363_v28 = vpack.c.bf16 %v355_v25, %v355_v25 }
  0x96   : > { %370 = vst.msk [vmem:[%s636_s7] sm:$0xf] %vm369_vm2, %v361_v27  ;;  %v327_v30 = vpop.f32.mrf.mxu2 }
  0x97   : > { %372 = vst.msk [vmem:[%s636_s7 + $0x8] sm:$0xf] %vm369_vm2, %v363_v28  ;;  %v328_v33 = vadd.f32 %v549_v15, %v327_v30  ;;  %v332_v34 = vpop.f32.mrf.mxu3  ;;  %v319_v35 = vpop.f32.mrf.mxu0 }
  0x98   : > { %v333_v37 = vadd.f32 %v549_v15, %v332_v34  ;;  %v320_v38 = vadd.f32 %v549_v15, %v319_v35  ;;  %v324_v39 = vpop.f32.mrf.mxu1 }
  0x99   : > { %v357_v40 = vadd.f32 %v513_v29, %v328_v33  ;;  %v325_v41 = vadd.f32 %v549_v15, %v324_v39 }
  0x9a   : > { %v359_v42 = vadd.f32 %v517_v31, %v333_v37  ;;  %v354_v43 = vadd.f32 %v506_v32, %v320_v38 }
  0x9b   : > { %v365_v44 = vpack.c.bf16 %v357_v40, %v357_v40  ;;  %v356_v45 = vadd.f32 %v510_v36, %v325_v41 }
  0x9c   : > { %v367_v46 = vpack.c.bf16 %v359_v42, %v359_v42  ;;  %v362_v47 = vpack.c.bf16 %v354_v43, %v354_v43 }
  0x9d   : > { %374 = vst.msk [vmem:[%s636_s7 + $0x10] sm:$0xf] %vm369_vm2, %v365_v44  ;;  %v364_v48 = vpack.c.bf16 %v356_v45, %v356_v45 }
  0x9e   : > { %376 = vst.msk [vmem:[%s636_s7 + $0x18] sm:$0xf] %vm369_vm2, %v367_v46  ;;  %v329_v50 = vpop.f32.mrf.mxu2 }
  0x9f   : > { %371 = vst.msk [vmem:[%s636_s7 + $0x4] sm:$0xf] %vm369_vm2, %v362_v47  ;;  %v330_v52 = vadd.f32 %v549_v15, %v329_v50  ;;  %v334_v53 = vpop.f32.mrf.mxu3 }
  0xa0   : > { %373 = vst.msk [vmem:[%s636_s7 + $0xc] sm:$0xf] %vm369_vm2, %v364_v48  ;;  %v335_v54 = vadd.f32 %v549_v15, %v334_v53 }
  0xa1   : > { %v358_v55 = vadd.f32 %v514_v49, %v330_v52 }
  0xa2   : > { %v360_v56 = vadd.f32 %v518_v51, %v335_v54 }
  0xa3   : > { %v366_v57 = vpack.c.bf16 %v358_v55, %v358_v55 }
  0xa4   : > { %v368_v58 = vpack.c.bf16 %v360_v56, %v360_v56 }
  0xa5   : > { %375 = vst.msk [vmem:[%s636_s7 + $0x14] sm:$0xf] %vm369_vm2, %v366_v57 }
  0xa6   : > { %377 = vst.msk [vmem:[%s636_s7 + $0x1c] sm:$0xf] %vm369_vm2, %v368_v58 }
  0xa7 PF: > { %s14_s17 = sadd.s32 1, %s572_s17   ;;  %s668_s15 = smov %s568_s16 }
  0xa8   : > { %p11_p5 = scmp.ge.s32.totalorder %s14_s17, 4   ;;  %s669_s16 = smov %s671_s18 }
  0xaa   :  { %13 = sbr.rel (!%p11_p5) target bundleno = 2 (0x2), region = 69 }

// kernel: _lambda_.21
= control target key start
LH: loop header
LB: loop body
LE: loop exit
PB: predicated region body
PF: predicated region fallthrough
CT: control target
= control target key end

     0   :  { %s959_s15 = smov 0   ;;  %s961_s16 = smov 0   ;;  %s1070_s0 = inlined_call_operand.vmem [shape: bf16[2,32,32], index: 0, kind: input, shape index: {}, may-alias: {0,1}]   ;;  %s1071_s1 = inlined_call_operand.vmem [shape: bf16[2,32,32], index: 1, kind: input, shape index: {}, may-alias: {0,1}]   ;;  %s1072_s2 = inlined_call_operand.vmem [shape: bf16[4,2,32,16], index: 2, kind: input, shape index: {}]   ;;  %s1073_s3 = inlined_call_operand.vmem [shape: f32[1,16], index: 3, kind: input, shape index: {}]   ;;  %s1074_s4 = inlined_call_operand.vmem [shape: bf16[2,16,64], index: 4, kind: output, shape index: {}]  }
   0x1   :  { %s963_s17 = smov 0  }
   0x2 LB: > { %s26_s18 = sadd.s32 1, %s925_s16  ;;  %p745_p0 = scmp.ge.s32.totalorder %s929_s17, 1  ;;  %s929_s17 = sphi %s963_s17, %s14_s17   ;;  %s925_s16 = sphi %s961_s16, %s1076_s16   ;;  %s921_s15 = sphi %s959_s15, %s1075_s15  }
   0x3   : > { %p28_p1 = scmp.ge.s32.totalorder %s26_s18, 2  ;;  %p204_p2 = scmp.lt.s32.totalorder %s929_s17, 3 }
   0x5   : > { %s1078_s18 = smov (%p28_p1, %s26_s18), 0  ;;  %p205_p3 = pnand %p745_p0, %p204_p2 }
   0x6   : > { %p249_p4 = scmp.lt.s32.totalorder (!%p205_p3), %s921_s15, 1  ;;  %s933_s22 = smov (!%p205_p3), 48  }
   0x7   : > { %208 = sbr.rel (%p205_p3) target bundleno = 307 (0x133), region = 36 }
   0xc   : > { %v859_v0 = vld [vmem:[%s1072_s2 + $0x8] sm:$0xff]  ;;  %v861_v1 = vld [vmem:[%s1072_s2 + $0x18] sm:$0xff]  ;;  %v858_v4 = vld [vmem:[%s1072_s2] sm:$0xff]  ;;  %s1080_s15 = smov (!%p249_p4, %s921_s15), 1  ;;  %vm342_vm3 = vcmask 261120   ;;  %vm485_vm5 = vcmask 1046528  }
   0xd   : > { %v865_v2 = vld [vmem:[%s1072_s2 + $0x38] sm:$0xff]  ;;  %v863_v3 = vld [vmem:[%s1072_s2 + $0x28] sm:$0xff]  ;;  %380 = vmatpush.bf16.msra.mxu1 %v859_v0  ;;  %352 = vmatpush.bf16.msra.mxu0 %v861_v1  ;;  %v860_v5 = vld [vmem:[%s1072_s2 + $0x10] sm:$0xff]  ;;  %s854_s9 = sshll.u32 %s1080_s15, 4  ;;  %vm317_vm4 = vsmask.f32 7424 }
   0xe   : > { %426 = vmatpush.bf16.msra.mxu2 %v865_v2  ;;  %452 = vmatpush.bf16.msra.mxu3 %v863_v3  ;;  %v864_v6 = vld [vmem:[%s1072_s2 + $0x30] sm:$0xff]  ;;  %v862_v7 = vld [vmem:[%s1072_s2 + $0x20] sm:$0xff]  ;;  %v869_v8 = vld [vmem:[%s1072_s2 + $0x58] sm:$0xff]  ;;  %s256_s20 = scalar_lea.vmem %s1070_s0, %s854_s9  ;;  %s856_s21 = sadd.s32 8, %s854_s9  ;;  %vm395_vm6 = vcmask 125952   ;;  %vm472_vm7 = vcmask 257152  }
   0xf   : > { %v867_v9 = vld [vmem:[%s1072_s2 + $0x48] sm:$0xff]  ;;  %v875_v10 = vld [vmem:[%s256_s20] sm:$0xff]   ;;  %s267_s24 = scalar_lea.vmem %s1071_s1, %s856_s21  ;;  %v868_v16 = vld [vmem:[%s1072_s2 + $0x50] sm:$0xff]  ;;  %s857_s13 = sshll.u32 %s1080_s15, 3  ;;  %vm556_vm8 = vcmask 388352   ;;  %vm633_vm9 = vcmask 519552  }
  0x10   : > { %v876_v11 = vunpack.c.l.bf16 %v875_v10  ;;  %v877_v12 = vunpack.c.h.bf16 %v875_v10  ;;  %v285_v13 = vld [vmem:[%s267_s24] sm:$0xf]  ;;  %v873_v20 = vld [vmem:[%s1072_s2 + $0x78] sm:$0xff]  ;;  %v871_v21 = vld [vmem:[%s1072_s2 + $0x68] sm:$0xff]  ;;  %s1049_s20 = scalar_lea.vmem %s1074_s4, %s857_s13  ;;  %s931_s15 = smov 16  }
  0x11   : > { %381 = vmatpush.bf16.msra.mxu1 %v858_v4  ;;  %353 = vmatpush.bf16.msra.mxu0 %v860_v5  ;;  %v286_v14 = vunpack.c.l.bf16 %v285_v13  ;;  %v866_v15 = vld [vmem:[%s1072_s2 + $0x40] sm:$0xff]  ;;  %v872_v28 = vld [vmem:[%s1072_s2 + $0x70] sm:$0xff]  ;;  %s932_s21 = smov 32  }
  0x12   : > { %427 = vmatpush.bf16.msra.mxu2 %v864_v6  ;;  %453 = vmatpush.bf16.msra.mxu3 %v862_v7  ;;  %vm287_vm0 = vcmp.ge.f32.partialorder %v876_v11, 0.0  ;;  %vm288_vm1 = vcmp.ge.f32.partialorder %v877_v12, 0.0  ;;  %v290_v17 = vmul.f32 0.1, %v876_v11  ;;  %v291_v18 = vmul.f32 0.1, %v877_v12 }
  0x13   : > { %vm289_vm2 = vcmp.ge.f32.partialorder %v286_v14, 0.0  ;;  %v292_v19 = vmul.f32 0.1, %v286_v14  ;;  %v870_v29 = vld [vmem:[%s1072_s2 + $0x60] sm:$0xff] }
  0x14   : > { %v293_v22 = vsel %vm287_vm0, %v876_v11, %v290_v17  ;;  %v294_v23 = vsel %vm288_vm1, %v877_v12, %v291_v18  ;;  %v906_v46 = vld [vmem:[%s1073_s3] ss:$0 sm:$0xff] }
  0x15   : > { %510 = vmatpush.bf16.msrb.mxu0 %v869_v8  ;;  %536 = vmatpush.bf16.msrb.mxu1 %v867_v9  ;;  %v296_v24 = vpack.c.bf16 %v293_v22, %v293_v22  ;;  %v297_v25 = vpack.c.bf16 %v294_v23, %v294_v23  ;;  %v295_v26 = vsel %vm289_vm2, %v286_v14, %v292_v19 }
  0x16   : > { %v298_v27 = vpack.c.bf16 %v295_v26, %v295_v26  ;;  %587 = vmatpush.bf16.msrb.mxu2 %v873_v20  ;;  %613 = vmatpush.bf16.msrb.mxu3 %v871_v21 }
  0x17   : > { %v312_v30 = vunpack.c.l.b16 %v296_v24  ;;  %v313_v31 = vunpack.c.l.b16 %v297_v25 }
  0x18   : > { %v314_v32 = vunpack.c.l.b16 %v298_v27 }
  0x19   : > { %537 = vmatpush.bf16.msrb.mxu1 %v866_v15  ;;  %511 = vmatpush.bf16.msrb.mxu0 %v868_v16  ;;  %v315_v33 = vpack.c.b16 %v313_v31, %v312_v30 }
  0x1a   : > { %v316_v34 = vpack.c.b16 %v314_v32, %v314_v32  ;;  %588 = vmatpush.bf16.msrb.mxu2 %v872_v28  ;;  %614 = vmatpush.bf16.msrb.mxu3 %v870_v29 }
  0x1b   : > { %773 = vmatmul.msk.bf16.vlgmr.msra.gmra.mxu1 %vm342_vm3, %v315_v33  ;;  %v319_v35 = vshrl.u32 %v315_v33, 16  ;;  %v321_v36 = vshll.u32 %v315_v33, 16  ;;  %799 = vmatmul.msk.bf16.vlgmr.msra.gmra.mxu3 %vm342_vm3, %v315_v33  ;;  %v486_v42 = vrot.slane %v315_v33, 1 }
  0x1c   : > { %v326_v37 = vshll.u32 %v316_v34, 16  ;;  %v487_v43 = vrot.slane %v316_v34, 1 }
  0x1d   : > { %v323_v38 = vrot.slane %v321_v36, 1 }
  0x1e   : > { %v328_v39 = vrot.slane %v326_v37, 1  ;;  %v488_v44 = vsel %vm485_vm5, %v486_v42, %v487_v43 }
  0x1f   : > { %v324_v40 = vor.u32 %v323_v38, %v319_v35 }
  0x21   : > { %v329_v41 = vsel %vm317_vm4, %v324_v40, %v328_v39 }
  0x22   : > { %764 = vmatmul.msk.bf16.vlgmr.msra.gmra.mxu0 %vm342_vm3, %v329_v41  ;;  %790 = vmatmul.msk.bf16.vlgmr.msra.gmra.mxu2 %vm342_vm3, %v329_v41 }
  0x2b   : > { %825 = vmatmul.msk.bf16.vlgmr.msrb.gmra.mxu1 %vm342_vm3, %v329_v41  ;;  %851 = vmatmul.msk.bf16.vlgmr.msrb.gmra.mxu3 %vm342_vm3, %v329_v41 }
  0x32   : > { %816 = vmatmul.msk.bf16.vlgmr.msrb.gmra.mxu0 %vm342_vm3, %v488_v44  ;;  %842 = vmatmul.msk.bf16.vlgmr.msrb.gmra.mxu2 %vm342_vm3, %v488_v44 }
  0x98   : > { %v383_v45 = vpop.f32.mrf.mxu1 }
  0x9e   : > { %v455_v48 = vpop.f32.mrf.mxu3 }
  0x9f   : > { %v355_v47 = vpop.f32.mrf.mxu0 }
  0xa0   : > { %v384_v49 = vadd.f32 %v383_v45, %v355_v47  ;;  %v385_v51 = vpop.f32.mrf.mxu1 }
  0xa2   : > { %v391_v50 = vadd.f32 %v906_v46, %v384_v49 }
  0xa4   : > { %v393_v52 = vpack.c.bf16 %v391_v50, %v391_v50 }
  0xa5   : > { %v429_v53 = vpop.f32.mrf.mxu2 }
  0xa6   : > { %v456_v54 = vadd.f32 %v455_v48, %v429_v53  ;;  %396 = vst.msk [vmem:[%s1049_s20] sm:$0xf] %vm395_vm6, %v393_v52  ;;  %v457_v58 = vpop.f32.mrf.mxu3 }
  0xa7   : > { %v357_v55 = vpop.f32.mrf.mxu0 }
  0xa8   : > { %v386_v56 = vadd.f32 %v385_v51, %v357_v55  ;;  %v460_v57 = vadd.f32 %v906_v46, %v456_v54  ;;  %v539_v62 = vpop.f32.mrf.mxu1 }
  0xaa   : > { %v392_v59 = vadd.f32 %v906_v46, %v386_v56  ;;  %v462_v60 = vpack.c.bf16 %v460_v57, %v460_v57 }
  0xac   : > { %v394_v61 = vpack.c.bf16 %v392_v59, %v392_v59  ;;  %466 = vrot.lane.b32.xlu0 %v462_v60, %s931_s15 }
  0xad   : > { %v431_v63 = vpop.f32.mrf.mxu2 }
  0xae   : > { %v458_v0 = vadd.f32 %v457_v58, %v431_v63  ;;  %397 = vst.msk [vmem:[%s1049_s20 + $0x4] sm:$0xf] %vm395_vm6, %v394_v61  ;;  %v616_v4 = vpop.f32.mrf.mxu3 }
  0xaf   : > { %v513_v1 = vpop.f32.mrf.mxu0 }
  0xb0   : > { %v461_v2 = vadd.f32 %v906_v46, %v458_v0  ;;  %v540_v3 = vadd.f32 %v539_v62, %v513_v1  ;;  %v541_v10 = vpop.f32.mrf.mxu1 }
  0xb2   : > { %v463_v5 = vpack.c.bf16 %v461_v2, %v461_v2  ;;  %v544_v6 = vadd.f32 %v906_v46, %v540_v3 }
  0xb4   : > { %468 = vrot.lane.b32.xlu0 %v463_v5, %s931_s15  ;;  %v546_v7 = vpack.c.bf16 %v544_v6, %v544_v6 }
  0xb5   : > { %v590_v8 = vpop.f32.mrf.mxu2 }
  0xb6   : > { %550 = vrot.lane.b32.xlu1 %v546_v7, %s932_s21  ;;  %v617_v9 = vadd.f32 %v616_v4, %v590_v8  ;;  %v618_v16 = vpop.f32.mrf.mxu3 }
  0xb7   : > { %v515_v11 = vpop.f32.mrf.mxu0 }
  0xb8   : > { %v542_v12 = vadd.f32 %v541_v10, %v515_v11  ;;  %v621_v13 = vadd.f32 %v906_v46, %v617_v9 }
  0xba   : > { %v545_v14 = vadd.f32 %v906_v46, %v542_v12  ;;  %v623_v15 = vpack.c.bf16 %v621_v13, %v621_v13 }
  0xbc   : > { %v547_v17 = vpack.c.bf16 %v545_v14, %v545_v14  ;;  %627 = vrot.lane.b32.xlu2 %v623_v15, %s933_s22 }
  0xbd   : > { %v592_v18 = vpop.f32.mrf.mxu2 }
  0xbe   : > { %552 = vrot.lane.b32.xlu1 %v547_v17, %s932_s21  ;;  %v619_v19 = vadd.f32 %v618_v16, %v592_v18 }
  0xc0   : > { %v622_v20 = vadd.f32 %v906_v46, %v619_v19 }
  0xc2   : > { %v624_v21 = vpack.c.bf16 %v622_v20, %v622_v20 }
  0xc4   : > { %629 = vrot.lane.b32.xlu2 %v624_v21, %s933_s22 }
 0x116   : > { %v628_v24 = vpop.permute.xlu2 %627 }
 0x11e   : > { %v467_v22 = vpop.permute.xlu0 %466  ;;  %v630_v27 = vpop.permute.xlu2 %629 }
 0x11f   : > { %473 = vst.msk [vmem:[%s1049_s20] sm:$0xf] %vm472_vm7, %v467_v22 }
 0x126   : > { %v469_v23 = vpop.permute.xlu0 %468 }
 0x127   : > { %474 = vst.msk [vmem:[%s1049_s20 + $0x4] sm:$0xf] %vm472_vm7, %v469_v23 }
 0x128   : > { %v551_v25 = vpop.permute.xlu1 %550 }
 0x129   : > { %557 = vst.msk [vmem:[%s1049_s20] sm:$0xf] %vm556_vm8, %v551_v25 }
 0x12a   : > { %634 = vst.msk [vmem:[%s1049_s20] sm:$0xf] %vm633_vm9, %v628_v24 }
 0x130   : > { %v553_v26 = vpop.permute.xlu1 %552 }
 0x131   : > { %558 = vst.msk [vmem:[%s1049_s20 + $0x4] sm:$0xf] %vm556_vm8, %v553_v26 }
 0x132   : > { %635 = vst.msk [vmem:[%s1049_s20 + $0x4] sm:$0xf] %vm633_vm9, %v630_v27 }
 0x133 PF: > { %s14_s17 = sadd.s32 1, %s929_s17   ;;  %s1075_s15 = smov %s925_s16 }
 0x134   : > { %p11_p5 = scmp.ge.s32.totalorder %s14_s17, 4   ;;  %s1076_s16 = smov %s1078_s18 }
 0x136   :  { %13 = sbr.rel (!%p11_p5) target bundleno = 2 (0x2), region = 76 }

// kernel: _lambda_.23
= control target key start
LH: loop header
LB: loop body
LE: loop exit
PB: predicated region body
PF: predicated region fallthrough
CT: control target
= control target key end

     0   :  { %s864_s15 = smov 0   ;;  %s866_s16 = smov 0   ;;  %s969_s0 = inlined_call_operand.vmem [shape: bf16[2,80,16], index: 0, kind: input, shape index: {}, may-alias: {0,1}]   ;;  %s970_s1 = inlined_call_operand.vmem [shape: bf16[2,80,16], index: 1, kind: input, shape index: {}, may-alias: {0,1}]   ;;  %s971_s2 = inlined_call_operand.vmem [shape: bf16[1,3,16,16], index: 2, kind: input, shape index: {}]   ;;  %s972_s3 = inlined_call_operand.vmem [shape: f32[1,16], index: 3, kind: input, shape index: {}]   ;;  %s973_s4 = inlined_call_operand.vmem [shape: bf16[2,64,16], index: 4, kind: output, shape index: {}]  }
   0x1   :  { %s868_s17 = smov 0  }
   0x2 LB: > { %s26_s18 = sadd.s32 1, %s833_s16  ;;  %p724_p0 = scmp.ge.s32.totalorder %s837_s17, 1  ;;  %s837_s17 = sphi %s868_s17, %s14_s17   ;;  %s833_s16 = sphi %s866_s16, %s975_s16   ;;  %s829_s15 = sphi %s864_s15, %s974_s15  }
   0x3   : > { %p28_p1 = scmp.ge.s32.totalorder %s26_s18, 2  ;;  %p216_p2 = scmp.lt.s32.totalorder %s837_s17, 3 }
   0x5   : > { %s977_s18 = smov (%p28_p1, %s26_s18), 0  ;;  %p217_p3 = pnand %p724_p0, %p216_p2 }
   0x6   : > { %p270_p4 = scmp.lt.s32.totalorder (!%p217_p3), %s829_s15, 1 }
   0x7   : > { %220 = sbr.rel (%p217_p3) target bundleno = 217 (0xd9), region = 36 }
   0xc   : > { %v885_v0 = vld [vmem:[%s971_s2 + $0x10] sm:$0xff]  ;;  %v762_v1 = vld [vmem:[%s971_s2] sm:$0xff]  ;;  %v763_v2 = vld [vmem:[%s971_s2 + $0x8] sm:$0xff]  ;;  %s979_s15 = smov (!%p270_p4, %s829_s15), 1  ;;  %vm434_vm8 = vcmask 130048   ;;  %vm522_vm9 = vcmask 1046528  }
   0xd   : > { %786 = vmatpush.bf16.msra.mxu2 %v885_v0  ;;  %785 = vmatpush.bf16.msra.mxu1 %v762_v1  ;;  %s787_s25 = smul.u32 40, %s979_s15  ;;  %vm391_vm10 = vsmask.f32 7424  ;;  %s761_s9 = sshll.u32 %s979_s15, 5  ;;  %vm606_vm12 = vcmask 125952  }
   0xe   : > { %454 = vmatpush.bf16.msra.mxu0 %v763_v2  ;;  %784 = vmatpush.bf16.msra.mxu3 %v763_v2  ;;  %s942_s12 = scalar_lea.vmem %s973_s4, %s761_s9 }
   0xf   : > { %s277_s28 = scalar_lea.vmem %s969_s0, %s787_s25  ;;  %s760_s29 = sadd.s32 32, %s787_s25 }
  0x10   : > { %v781_v3 = vld [vmem:[%s277_s28 + $0x8] sm:$0xff]   ;;  %v782_v4 = vld [vmem:[%s277_s28 + $0x10] sm:$0xff]   ;;  %v766_v5 = vld [vmem:[%s277_s28] sm:$0xff]   ;;  %s293_s6 = scalar_lea.vmem %s970_s1, %s760_s29 }
  0x11   : > { %v771_v6 = vunpack.c.l.bf16 %v781_v3  ;;  %v772_v7 = vunpack.c.h.bf16 %v781_v3  ;;  %v775_v8 = vunpack.c.l.bf16 %v782_v4  ;;  %v776_v9 = vunpack.c.h.bf16 %v782_v4  ;;  %v783_v10 = vld [vmem:[%s277_s28 + $0x18] sm:$0xff]   ;;  %v324_v58 = vld [vmem:[%s293_s6] sm:$0xf] }
  0x12   : > { %497 = vmatpush.bf16.msrb.mxu0 %v762_v1  ;;  %v767_v11 = vunpack.c.l.bf16 %v766_v5  ;;  %v768_v12 = vunpack.c.h.bf16 %v766_v5  ;;  %v779_v13 = vunpack.c.l.bf16 %v783_v10  ;;  %v780_v17 = vunpack.c.h.bf16 %v783_v10 }
  0x13   : > { %vm328_vm0 = vcmp.ge.f32.partialorder %v771_v6, 0.0  ;;  %vm329_vm1 = vcmp.ge.f32.partialorder %v772_v7, 0.0  ;;  %vm330_vm2 = vcmp.ge.f32.partialorder %v775_v8, 0.0  ;;  %vm331_vm3 = vcmp.ge.f32.partialorder %v776_v9, 0.0 }
  0x14   : > { %v337_v14 = vmul.f32 0.1, %v771_v6  ;;  %v338_v15 = vmul.f32 0.1, %v772_v7  ;;  %v339_v16 = vmul.f32 0.1, %v775_v8  ;;  %v325_v1 = vunpack.c.l.bf16 %v324_v58 }
  0x15   : > { %v340_v18 = vmul.f32 0.1, %v776_v9  ;;  %vm326_vm4 = vcmp.ge.f32.partialorder %v767_v11, 0.0  ;;  %vm327_vm5 = vcmp.ge.f32.partialorder %v768_v12, 0.0  ;;  %v335_v19 = vmul.f32 0.1, %v767_v11 }
  0x16   : > { %v346_v20 = vsel %vm328_vm0, %v771_v6, %v337_v14  ;;  %v347_v21 = vsel %vm329_vm1, %v772_v7, %v338_v15  ;;  %v348_v22 = vsel %vm330_vm2, %v775_v8, %v339_v16  ;;  %v336_v23 = vmul.f32 0.1, %v768_v12 }
  0x17   : > { %v349_v24 = vsel %vm331_vm3, %v776_v9, %v340_v18  ;;  %v355_v25 = vpack.c.bf16 %v346_v20, %v346_v20  ;;  %v356_v26 = vpack.c.bf16 %v347_v21, %v347_v21  ;;  %v357_v27 = vpack.c.bf16 %v348_v22, %v348_v22 }
  0x18   : > { %v358_v28 = vpack.c.bf16 %v349_v24, %v349_v24  ;;  %v344_v29 = vsel %vm326_vm4, %v767_v11, %v335_v19  ;;  %v345_v30 = vsel %vm327_vm5, %v768_v12, %v336_v23  ;;  %vm332_vm6 = vcmp.ge.f32.partialorder %v779_v13, 0.0 }
  0x19   : > { %v379_v31 = vunpack.c.l.b16 %v355_v25  ;;  %v380_v32 = vunpack.c.l.b16 %v356_v26  ;;  %v381_v33 = vunpack.c.l.b16 %v357_v27  ;;  %v353_v34 = vpack.c.bf16 %v344_v29, %v344_v29 }
  0x1a   : > { %v382_v35 = vunpack.c.l.b16 %v358_v28  ;;  %v354_v36 = vpack.c.bf16 %v345_v30, %v345_v30  ;;  %vm333_vm7 = vcmp.ge.f32.partialorder %v780_v17, 0.0  ;;  %v341_v37 = vmul.f32 0.1, %v779_v13 }
  0x1b   : > { %v904_v38 = vpack.c.b16 %v380_v32, %v379_v31  ;;  %v377_v39 = vunpack.c.l.b16 %v353_v34  ;;  %v342_v40 = vmul.f32 0.1, %v780_v17  ;;  %v343_v5 = vmul.f32 0.1, %v325_v1  ;;  %v814_v31 = vld [vmem:[%s972_s3] ss:$0 sm:$0xff] }
  0x1c   : > { %v388_v41 = vpack.c.b16 %v382_v35, %v381_v33  ;;  %v378_v42 = vunpack.c.l.b16 %v354_v36  ;;  %v350_v43 = vsel %vm332_vm6, %v779_v13, %v341_v37  ;;  %vm334_vm11 = vcmp.ge.f32.partialorder %v325_v1, 0.0 }
  0x1d   : > { %v524_v44 = vrot.slane %v904_v38, 1  ;;  %744 = vmatmul.msk.bf16.vlgmr.msra.gmra.mxu1 %vm434_vm8, %v904_v38  ;;  %v400_v45 = vshll.u32 %v904_v38, 16  ;;  %v404_v46 = vshrl.u32 %v904_v38, 16  ;;  %v351_v47 = vsel %vm333_vm7, %v780_v17, %v342_v40 }
  0x1e   : > { %v526_v48 = vrot.slane %v388_v41, 1  ;;  %v386_v49 = vpack.c.b16 %v378_v42, %v377_v39  ;;  %v408_v50 = vshll.u32 %v388_v41, 16  ;;  %v359_v51 = vpack.c.bf16 %v350_v43, %v350_v43 }
  0x1f   : > { %v402_v52 = vrot.slane %v400_v45, 1  ;;  %v360_v53 = vpack.c.bf16 %v351_v47, %v351_v47  ;;  %v412_v6 = vshrl.u32 %v388_v41, 16  ;;  %v352_v9 = vsel %vm334_vm11, %v325_v1, %v343_v5 }
  0x20   : > { %v527_v54 = vsel %vm522_vm9, %v524_v44, %v526_v48  ;;  %v393_v55 = vshrl.u32 %v386_v49, 16  ;;  %v395_v56 = vshll.u32 %v386_v49, 16  ;;  %v410_v57 = vrot.slane %v408_v50, 1 }
  0x21   : > { %754 = vmatmul.msk.bf16.vlgmr.msra.gmra.mxu2 %vm434_vm8, %v527_v54  ;;  %v406_v59 = vor.u32 %v404_v46, %v402_v52  ;;  %v383_v61 = vunpack.c.l.b16 %v359_v51  ;;  %v384_v62 = vunpack.c.l.b16 %v360_v53  ;;  %v361_v13 = vpack.c.bf16 %v352_v9, %v352_v9 }
  0x22   : > { %v397_v60 = vrot.slane %v395_v56, 1  ;;  %v414_v10 = vor.u32 %v412_v6, %v410_v57  ;;  %v523_v22 = vrot.slane %v386_v49, 1 }
  0x23   : > { %v411_v63 = vsel %vm391_vm10, %v406_v59, %v410_v57  ;;  %v389_v4 = vpack.c.b16 %v384_v62, %v383_v61  ;;  %v385_v15 = vunpack.c.l.b16 %v361_v13 }
  0x24   : > { %v398_v2 = vor.u32 %v397_v60, %v393_v55  ;;  %736 = vmatmul.msk.bf16.vlgmr.msra.gmra.mxu3 %vm434_vm8, %v411_v63  ;;  %v525_v24 = vsel %vm522_vm9, %v523_v22, %v524_v44 }
  0x25   : > { %v416_v7 = vshll.u32 %v389_v4, 16  ;;  %v528_v8 = vrot.slane %v389_v4, 1  ;;  %v420_v16 = vshrl.u32 %v389_v4, 16 }
  0x26   : > { %v403_v3 = vsel %vm391_vm10, %v398_v2, %v402_v52 }
  0x27   : > { %735 = vmatmul.msk.bf16.vlgmr.msra.gmra.mxu0 %vm434_vm8, %v403_v3  ;;  %v418_v11 = vrot.slane %v416_v7, 1  ;;  %v529_v12 = vsel %vm522_vm9, %v526_v48, %v528_v8 }
  0x28   : > { %557 = vmatpush.bf16.msra.mxu0 %v885_v0  ;;  %v390_v0 = vpack.c.b16 %v385_v15, %v385_v15 }
  0x29   : > { %v419_v14 = vsel %vm391_vm10, %v414_v10, %v418_v11  ;;  %v422_v19 = vor.u32 %v420_v16, %v418_v11 }
  0x2a   : > { %v424_v17 = vshll.u32 %v390_v0, 16  ;;  %v530_v18 = vrot.slane %v390_v0, 1 }
  0x2c   : > { %v426_v20 = vrot.slane %v424_v17, 1  ;;  %v531_v21 = vsel %vm522_vm9, %v528_v8, %v530_v18 }
  0x2d   : > { %745 = vmatmul.msk.bf16.gmra.mxu1 %vm434_vm8, %v388_v41 }
  0x2e   : > { %v427_v23 = vsel %vm391_vm10, %v422_v19, %v426_v20 }
  0x31   : > { %755 = vmatmul.msk.bf16.gmra.mxu2 %vm434_vm8, %v529_v12 }
  0x34   : > { %737 = vmatmul.msk.bf16.gmra.mxu3 %vm434_vm8, %v419_v14 }
  0x37   : > { %743 = vmatmul.msk.bf16.vlgmr.msrb.gmra.mxu0 %vm434_vm8, %v386_v49 }
  0x3d   : > { %746 = vmatmul.msk.bf16.gmra.mxu1 %vm434_vm8, %v389_v4 }
  0x41   : > { %756 = vmatmul.msk.bf16.gmra.mxu2 %vm434_vm8, %v531_v21 }
  0x44   : > { %738 = vmatmul.msk.bf16.gmra.mxu3 %vm434_vm8, %v427_v23 }
  0x47   : > { %753 = vmatmul.msk.bf16.vlgmr.msra.gmra.mxu0 %vm434_vm8, %v525_v24 }
  0x9a   : > { %v504_v25 = vpop.f32.mrf.mxu1 }
  0xa2   : > { %v506_v29 = vpop.f32.mrf.mxu1 }
  0xa4   : > { %v456_v26 = vpop.f32.mrf.mxu0  ;;  %v564_v27 = vpop.f32.mrf.mxu2 }
  0xa7   : > { %v461_v28 = vpop.f32.mrf.mxu3 }
  0xa8   : > { %v505_v30 = vadd.f32 %v504_v25, %v461_v28 }
  0xaa   : > { %v581_v32 = vadd.f32 %v564_v27, %v505_v30  ;;  %v509_v39 = vpop.f32.mrf.mxu1 }
  0xac   : > { %v592_v33 = vadd.f32 %v814_v31, %v581_v32  ;;  %v458_v34 = vpop.f32.mrf.mxu0  ;;  %v566_v35 = vpop.f32.mrf.mxu2 }
  0xae   : > { %v600_v36 = vpack.c.bf16 %v592_v33, %v592_v33 }
  0xaf   : > { %v463_v37 = vpop.f32.mrf.mxu3 }
  0xb0   : > { %609 = vst.msk [vmem:[%s942_s12 + $0x8] sm:$0xf] %vm606_vm12, %v600_v36  ;;  %v507_v38 = vadd.f32 %v506_v29, %v463_v37 }
  0xb2   : > { %v582_v40 = vadd.f32 %v566_v35, %v507_v38  ;;  %v511_v48 = vpop.f32.mrf.mxu1 }
  0xb4   : > { %v593_v41 = vadd.f32 %v814_v31, %v582_v40  ;;  %v499_v42 = vpop.f32.mrf.mxu0  ;;  %v569_v43 = vpop.f32.mrf.mxu2 }
  0xb5   : > { %v500_v56 = vadd.f32 %v499_v42, %v456_v26 }
  0xb6   : > { %v601_v44 = vpack.c.bf16 %v593_v41, %v593_v41 }
  0xb7   : > { %v466_v45 = vpop.f32.mrf.mxu3 }
  0xb8   : > { %610 = vst.msk [vmem:[%s942_s12 + $0xc] sm:$0xf] %vm606_vm12, %v601_v44  ;;  %v510_v46 = vadd.f32 %v509_v39, %v466_v45 }
  0xba   : > { %v583_v47 = vadd.f32 %v569_v43, %v510_v46  ;;  %v514_v59 = vpop.f32.mrf.mxu1 }
  0xbc   : > { %v594_v49 = vadd.f32 %v814_v31, %v583_v47  ;;  %v501_v50 = vpop.f32.mrf.mxu0  ;;  %v571_v51 = vpop.f32.mrf.mxu2 }
  0xbd   : > { %v502_v5 = vadd.f32 %v501_v50, %v458_v34 }
  0xbe   : > { %v602_v52 = vpack.c.bf16 %v594_v49, %v594_v49 }
  0xbf   : > { %v468_v53 = vpop.f32.mrf.mxu3 }
  0xc0   : > { %611 = vst.msk [vmem:[%s942_s12 + $0x10] sm:$0xf] %vm606_vm12, %v602_v52  ;;  %v512_v54 = vadd.f32 %v511_v48, %v468_v53 }
  0xc2   : > { %v584_v55 = vadd.f32 %v571_v51, %v512_v54  ;;  %v516_v10 = vpop.f32.mrf.mxu1 }
  0xc4   : > { %v595_v57 = vadd.f32 %v814_v31, %v584_v55  ;;  %v559_v58 = vpop.f32.mrf.mxu0  ;;  %v574_v63 = vpop.f32.mrf.mxu2 }
  0xc5   : > { %v579_v60 = vadd.f32 %v559_v58, %v500_v56 }
  0xc6   : > { %v603_v61 = vpack.c.bf16 %v595_v57, %v595_v57 }
  0xc7   : > { %v590_v62 = vadd.f32 %v814_v31, %v579_v60  ;;  %v471_v1 = vpop.f32.mrf.mxu3 }
  0xc8   : > { %612 = vst.msk [vmem:[%s942_s12 + $0x14] sm:$0xf] %vm606_vm12, %v603_v61  ;;  %v515_v2 = vadd.f32 %v514_v59, %v471_v1 }
  0xc9   : > { %v598_v3 = vpack.c.bf16 %v590_v62, %v590_v62 }
  0xca   : > { %v585_v4 = vadd.f32 %v574_v63, %v515_v2 }
  0xcb   : > { %607 = vst.msk [vmem:[%s942_s12] sm:$0xf] %vm606_vm12, %v598_v3 }
  0xcc   : > { %v596_v6 = vadd.f32 %v814_v31, %v585_v4  ;;  %v561_v7 = vpop.f32.mrf.mxu0  ;;  %v576_v15 = vpop.f32.mrf.mxu2 }
  0xcd   : > { %v580_v8 = vadd.f32 %v561_v7, %v502_v5 }
  0xce   : > { %v604_v9 = vpack.c.bf16 %v596_v6, %v596_v6 }
  0xcf   : > { %v591_v11 = vadd.f32 %v814_v31, %v580_v8  ;;  %v473_v12 = vpop.f32.mrf.mxu3 }
  0xd0   : > { %613 = vst.msk [vmem:[%s942_s12 + $0x18] sm:$0xf] %vm606_vm12, %v604_v9  ;;  %v517_v13 = vadd.f32 %v516_v10, %v473_v12 }
  0xd1   : > { %v599_v14 = vpack.c.bf16 %v591_v11, %v591_v11 }
  0xd2   : > { %v586_v0 = vadd.f32 %v576_v15, %v517_v13 }
  0xd3   : > { %608 = vst.msk [vmem:[%s942_s12 + $0x4] sm:$0xf] %vm606_vm12, %v599_v14 }
  0xd4   : > { %v597_v16 = vadd.f32 %v814_v31, %v586_v0 }
  0xd6   : > { %v605_v17 = vpack.c.bf16 %v597_v16, %v597_v16 }
  0xd8   : > { %614 = vst.msk [vmem:[%s942_s12 + $0x1c] sm:$0xf] %vm606_vm12, %v605_v17 }
  0xd9 PF: > { %s14_s17 = sadd.s32 1, %s837_s17   ;;  %s974_s15 = smov %s833_s16 }
  0xda   : > { %p11_p5 = scmp.ge.s32.totalorder %s14_s17, 4   ;;  %s975_s16 = smov %s977_s18 }
  0xdc   :  { %13 = sbr.rel (!%p11_p5) target bundleno = 2 (0x2), region = 71 }

// kernel: _lambda_.24
= control target key start
LH: loop header
LB: loop body
LE: loop exit
PB: predicated region body
PF: predicated region fallthrough
CT: control target
= control target key end

     0   :  { %s996_s18 = smov 0   ;;  %s998_s19 = smov 0   ;;  %s1120_s0 = inlined_call_operand.vmem [shape: bf16[2,80,16], index: 0, kind: input, shape index: {}, may-alias: {0,1}]   ;;  %s1121_s1 = inlined_call_operand.vmem [shape: bf16[2,80,16], index: 1, kind: input, shape index: {}, may-alias: {0,1}]   ;;  %s1122_s2 = inlined_call_operand.vmem [shape: bf16[1,3,16,16], index: 2, kind: input, shape index: {}]   ;;  %s1123_s3 = inlined_call_operand.vmem [shape: f32[1,16], index: 3, kind: input, shape index: {}]   ;;  %s1124_s4 = inlined_call_operand.vmem [shape: bf16[2,64,16], index: 4, kind: input, shape index: {}]   ;;  %s1125_s5 = inlined_call_operand.vmem [shape: bf16[2,64,16], index: 5, kind: output, shape index: {}]  }
   0x1   :  { %s1000_s20 = smov 0  }
   0x2 LB: > { %s27_s21 = sadd.s32 1, %s960_s19  ;;  %p829_p0 = scmp.ge.s32.totalorder %s964_s20, 1  ;;  %s964_s20 = sphi %s1000_s20, %s15_s20   ;;  %s960_s19 = sphi %s998_s19, %s1127_s19   ;;  %s956_s18 = sphi %s996_s18, %s1126_s18  }
   0x3   : > { %p29_p1 = scmp.ge.s32.totalorder %s27_s21, 2  ;;  %p258_p2 = scmp.lt.s32.totalorder %s964_s20, 3 }
   0x5   : > { %s1129_s21 = smov (%p29_p1, %s27_s21), 0  ;;  %p259_p3 = pnand %p829_p0, %p258_p2 }
   0x6   : > { %p323_p4 = scmp.lt.s32.totalorder (!%p259_p3), %s956_s18, 1 }
   0x7   : > { %262 = sbr.rel (%p259_p3) target bundleno = 219 (0xdb), region = 40 }
   0xc   : > { %v1017_v0 = vld [vmem:[%s1122_s2 + $0x10] sm:$0xff]  ;;  %v870_v1 = vld [vmem:[%s1122_s2] sm:$0xff]  ;;  %v871_v2 = vld [vmem:[%s1122_s2 + $0x8] sm:$0xff]  ;;  %s1131_s18 = smov (!%p323_p4, %s956_s18), 1  ;;  %vm497_vm8 = vcmask 130048   ;;  %vm585_vm9 = vcmask 1046528  }
   0xd   : > { %913 = vmatpush.bf16.msra.mxu2 %v1017_v0  ;;  %912 = vmatpush.bf16.msra.mxu1 %v870_v1  ;;  %s914_s28 = smul.u32 40, %s1131_s18  ;;  %vm454_vm10 = vsmask.f32 7424  ;;  %s868_s11 = sshll.u32 %s1131_s18, 5  ;;  %vm693_vm12 = vcmask 125952  }
   0xe   : > { %517 = vmatpush.bf16.msra.mxu0 %v871_v2  ;;  %911 = vmatpush.bf16.msra.mxu3 %v871_v2  ;;  %s1071_s14 = scalar_lea.vmem %s1124_s4, %s868_s11  ;;  %s1083_s22 = scalar_lea.vmem %s1125_s5, %s868_s11 }
   0xf   : > { %s330_s6 = scalar_lea.vmem %s1120_s0, %s914_s28  ;;  %s867_s7 = sadd.s32 32, %s914_s28 }
  0x10   : > { %v905_v3 = vld [vmem:[%s330_s6 + $0x8] sm:$0xff]   ;;  %v906_v4 = vld [vmem:[%s330_s6 + $0x10] sm:$0xff]   ;;  %v874_v5 = vld [vmem:[%s330_s6] sm:$0xff]   ;;  %s346_s10 = scalar_lea.vmem %s1121_s1, %s867_s7 }
  0x11   : > { %v879_v6 = vunpack.c.l.bf16 %v905_v3  ;;  %v880_v7 = vunpack.c.h.bf16 %v905_v3  ;;  %v883_v8 = vunpack.c.l.bf16 %v906_v4  ;;  %v884_v9 = vunpack.c.h.bf16 %v906_v4  ;;  %v907_v10 = vld [vmem:[%s330_s6 + $0x18] sm:$0xff]   ;;  %v387_v58 = vld [vmem:[%s346_s10] sm:$0xf] }
  0x12   : > { %560 = vmatpush.bf16.msrb.mxu0 %v870_v1  ;;  %v875_v11 = vunpack.c.l.bf16 %v874_v5  ;;  %v876_v12 = vunpack.c.h.bf16 %v874_v5  ;;  %v887_v13 = vunpack.c.l.bf16 %v907_v10  ;;  %v888_v17 = vunpack.c.h.bf16 %v907_v10 }
  0x13   : > { %vm391_vm0 = vcmp.ge.f32.partialorder %v879_v6, 0.0  ;;  %vm392_vm1 = vcmp.ge.f32.partialorder %v880_v7, 0.0  ;;  %vm393_vm2 = vcmp.ge.f32.partialorder %v883_v8, 0.0  ;;  %vm394_vm3 = vcmp.ge.f32.partialorder %v884_v9, 0.0 }
  0x14   : > { %v400_v14 = vmul.f32 0.1, %v879_v6  ;;  %v401_v15 = vmul.f32 0.1, %v880_v7  ;;  %v402_v16 = vmul.f32 0.1, %v883_v8  ;;  %v388_v1 = vunpack.c.l.bf16 %v387_v58 }
  0x15   : > { %v403_v18 = vmul.f32 0.1, %v884_v9  ;;  %vm389_vm4 = vcmp.ge.f32.partialorder %v875_v11, 0.0  ;;  %vm390_vm5 = vcmp.ge.f32.partialorder %v876_v12, 0.0  ;;  %v398_v19 = vmul.f32 0.1, %v875_v11 }
  0x16   : > { %v409_v20 = vsel %vm391_vm0, %v879_v6, %v400_v14  ;;  %v410_v21 = vsel %vm392_vm1, %v880_v7, %v401_v15  ;;  %v411_v22 = vsel %vm393_vm2, %v883_v8, %v402_v16  ;;  %v399_v23 = vmul.f32 0.1, %v876_v12 }
  0x17   : > { %v412_v24 = vsel %vm394_vm3, %v884_v9, %v403_v18  ;;  %v418_v25 = vpack.c.bf16 %v409_v20, %v409_v20  ;;  %v419_v26 = vpack.c.bf16 %v410_v21, %v410_v21  ;;  %v420_v27 = vpack.c.bf16 %v411_v22, %v411_v22 }
  0x18   : > { %v421_v28 = vpack.c.bf16 %v412_v24, %v412_v24  ;;  %v407_v29 = vsel %vm389_vm4, %v875_v11, %v398_v19  ;;  %v408_v30 = vsel %vm390_vm5, %v876_v12, %v399_v23  ;;  %vm395_vm6 = vcmp.ge.f32.partialorder %v887_v13, 0.0 }
  0x19   : > { %v442_v31 = vunpack.c.l.b16 %v418_v25  ;;  %v443_v32 = vunpack.c.l.b16 %v419_v26  ;;  %v444_v33 = vunpack.c.l.b16 %v420_v27  ;;  %v416_v34 = vpack.c.bf16 %v407_v29, %v407_v29  ;;  %v908_v29 = vld [vmem:[%s1071_s14 + $0x8] sm:$0xff]  }
  0x1a   : > { %v445_v35 = vunpack.c.l.b16 %v421_v28  ;;  %v417_v36 = vpack.c.bf16 %v408_v30, %v408_v30  ;;  %vm396_vm7 = vcmp.ge.f32.partialorder %v888_v17, 0.0  ;;  %v404_v37 = vmul.f32 0.1, %v887_v13 }
  0x1b   : > { %v1036_v38 = vpack.c.b16 %v443_v32, %v442_v31  ;;  %v440_v39 = vunpack.c.l.b16 %v416_v34  ;;  %v405_v40 = vmul.f32 0.1, %v888_v17  ;;  %v406_v5 = vmul.f32 0.1, %v388_v1  ;;  %v1077_v32 = vld [vmem:[%s1123_s3] ss:$0 sm:$0xff] }
  0x1c   : > { %v451_v41 = vpack.c.b16 %v445_v35, %v444_v33  ;;  %v441_v42 = vunpack.c.l.b16 %v417_v36  ;;  %v413_v43 = vsel %vm395_vm6, %v887_v13, %v404_v37  ;;  %vm397_vm11 = vcmp.ge.f32.partialorder %v388_v1, 0.0 }
  0x1d   : > { %v587_v44 = vrot.slane %v1036_v38, 1  ;;  %851 = vmatmul.msk.bf16.vlgmr.msra.gmra.mxu1 %vm497_vm8, %v1036_v38  ;;  %v463_v45 = vshll.u32 %v1036_v38, 16  ;;  %v467_v46 = vshrl.u32 %v1036_v38, 16  ;;  %v414_v47 = vsel %vm396_vm7, %v888_v17, %v405_v40 }
  0x1e   : > { %v589_v48 = vrot.slane %v451_v41, 1  ;;  %v449_v49 = vpack.c.b16 %v441_v42, %v440_v39  ;;  %v471_v50 = vshll.u32 %v451_v41, 16  ;;  %v422_v51 = vpack.c.bf16 %v413_v43, %v413_v43 }
  0x1f   : > { %v465_v52 = vrot.slane %v463_v45, 1  ;;  %v423_v53 = vpack.c.bf16 %v414_v47, %v414_v47  ;;  %v475_v6 = vshrl.u32 %v451_v41, 16  ;;  %v415_v9 = vsel %vm397_vm11, %v388_v1, %v406_v5 }
  0x20   : > { %v590_v54 = vsel %vm585_vm9, %v587_v44, %v589_v48  ;;  %v456_v55 = vshrl.u32 %v449_v49, 16  ;;  %v458_v56 = vshll.u32 %v449_v49, 16  ;;  %v473_v57 = vrot.slane %v471_v50, 1  ;;  %v909_v50 = vld [vmem:[%s1071_s14 + $0x10] sm:$0xff]  }
  0x21   : > { %861 = vmatmul.msk.bf16.vlgmr.msra.gmra.mxu2 %vm497_vm8, %v590_v54  ;;  %v469_v59 = vor.u32 %v467_v46, %v465_v52  ;;  %v446_v61 = vunpack.c.l.b16 %v422_v51  ;;  %v447_v62 = vunpack.c.l.b16 %v423_v53  ;;  %v424_v13 = vpack.c.bf16 %v415_v9, %v415_v9 }
  0x22   : > { %v460_v60 = vrot.slane %v458_v56, 1  ;;  %v477_v10 = vor.u32 %v475_v6, %v473_v57  ;;  %v586_v22 = vrot.slane %v449_v49, 1  ;;  %v895_v34 = vunpack.c.l.bf16 %v908_v29 }
  0x23   : > { %v474_v63 = vsel %vm454_vm10, %v469_v59, %v473_v57  ;;  %v452_v4 = vpack.c.b16 %v447_v62, %v446_v61  ;;  %v448_v15 = vunpack.c.l.b16 %v424_v13  ;;  %v899_v54 = vunpack.c.l.bf16 %v909_v50  ;;  %v910_v13 = vld [vmem:[%s1071_s14 + $0x18] sm:$0xff]  }
  0x24   : > { %v461_v2 = vor.u32 %v460_v60, %v456_v55  ;;  %843 = vmatmul.msk.bf16.vlgmr.msra.gmra.mxu3 %vm497_vm8, %v474_v63  ;;  %v588_v24 = vsel %vm585_vm9, %v586_v22, %v587_v44  ;;  %v896_v44 = vunpack.c.h.bf16 %v908_v29  ;;  %v900_v1 = vunpack.c.h.bf16 %v909_v50 }
  0x25   : > { %v479_v7 = vshll.u32 %v452_v4, 16  ;;  %v591_v8 = vrot.slane %v452_v4, 1  ;;  %v483_v16 = vshrl.u32 %v452_v4, 16 }
  0x26   : > { %v466_v3 = vsel %vm454_vm10, %v461_v2, %v465_v52  ;;  %v890_v2 = vld [vmem:[%s1071_s14] sm:$0xff]  }
  0x27   : > { %842 = vmatmul.msk.bf16.vlgmr.msra.gmra.mxu0 %vm497_vm8, %v466_v3  ;;  %v481_v11 = vrot.slane %v479_v7, 1  ;;  %v592_v12 = vsel %vm585_vm9, %v589_v48, %v591_v8 }
  0x28   : > { %620 = vmatpush.bf16.msra.mxu0 %v1017_v0  ;;  %v453_v0 = vpack.c.b16 %v448_v15, %v448_v15 }
  0x29   : > { %v482_v14 = vsel %vm454_vm10, %v477_v10, %v481_v11  ;;  %v485_v19 = vor.u32 %v483_v16, %v481_v11 }
  0x2a   : > { %v487_v17 = vshll.u32 %v453_v0, 16  ;;  %v593_v18 = vrot.slane %v453_v0, 1 }
  0x2c   : > { %v489_v20 = vrot.slane %v487_v17, 1  ;;  %v594_v21 = vsel %vm585_vm9, %v591_v8, %v593_v18  ;;  %v891_v8 = vunpack.c.l.bf16 %v890_v2  ;;  %v903_v17 = vunpack.c.l.bf16 %v910_v13 }
  0x2d   : > { %852 = vmatmul.msk.bf16.gmra.mxu1 %vm497_vm8, %v451_v41 }
  0x2e   : > { %v490_v23 = vsel %vm454_vm10, %v485_v19, %v489_v20 }
  0x31   : > { %862 = vmatmul.msk.bf16.gmra.mxu2 %vm497_vm8, %v592_v12 }
  0x34   : > { %844 = vmatmul.msk.bf16.gmra.mxu3 %vm497_vm8, %v482_v14 }
  0x37   : > { %850 = vmatmul.msk.bf16.vlgmr.msrb.gmra.mxu0 %vm497_vm8, %v449_v49 }
  0x3d   : > { %853 = vmatmul.msk.bf16.gmra.mxu1 %vm497_vm8, %v452_v4 }
  0x41   : > { %863 = vmatmul.msk.bf16.gmra.mxu2 %vm497_vm8, %v594_v21 }
  0x44   : > { %845 = vmatmul.msk.bf16.gmra.mxu3 %vm497_vm8, %v490_v23  ;;  %v892_v23 = vunpack.c.h.bf16 %v890_v2 }
  0x47   : > { %860 = vmatmul.msk.bf16.vlgmr.msra.gmra.mxu0 %vm497_vm8, %v588_v24 }
  0x9a   : > { %v567_v25 = vpop.f32.mrf.mxu1 }
  0xa2   : > { %v569_v30 = vpop.f32.mrf.mxu1 }
  0xa4   : > { %v519_v26 = vpop.f32.mrf.mxu0  ;;  %v627_v27 = vpop.f32.mrf.mxu2 }
  0xa7   : > { %v524_v28 = vpop.f32.mrf.mxu3 }
  0xa8   : > { %v568_v31 = vadd.f32 %v567_v25, %v524_v28 }
  0xaa   : > { %v644_v33 = vadd.f32 %v627_v27, %v568_v31  ;;  %v572_v42 = vpop.f32.mrf.mxu1 }
  0xac   : > { %v655_v35 = vadd.f32 %v1077_v32, %v644_v33  ;;  %v521_v36 = vpop.f32.mrf.mxu0  ;;  %v629_v37 = vpop.f32.mrf.mxu2 }
  0xae   : > { %v679_v38 = vadd.f32 %v895_v34, %v655_v35  ;;  %v904_v34 = vunpack.c.h.bf16 %v910_v13 }
  0xaf   : > { %v526_v39 = vpop.f32.mrf.mxu3 }
  0xb0   : > { %v687_v40 = vpack.c.bf16 %v679_v38, %v679_v38  ;;  %v570_v41 = vadd.f32 %v569_v30, %v526_v39 }
  0xb2   : > { %696 = vst.msk [vmem:[%s1083_s22 + $0x8] sm:$0xf] %vm693_vm12, %v687_v40  ;;  %v645_v43 = vadd.f32 %v629_v37, %v570_v41  ;;  %v574_v55 = vpop.f32.mrf.mxu1 }
  0xb4   : > { %v656_v45 = vadd.f32 %v1077_v32, %v645_v43  ;;  %v562_v46 = vpop.f32.mrf.mxu0  ;;  %v632_v47 = vpop.f32.mrf.mxu2 }
  0xb5   : > { %v563_v3 = vadd.f32 %v562_v46, %v519_v26 }
  0xb6   : > { %v680_v48 = vadd.f32 %v896_v44, %v656_v45 }
  0xb7   : > { %v529_v49 = vpop.f32.mrf.mxu3 }
  0xb8   : > { %v688_v51 = vpack.c.bf16 %v680_v48, %v680_v48  ;;  %v573_v52 = vadd.f32 %v572_v42, %v529_v49 }
  0xba   : > { %697 = vst.msk [vmem:[%s1083_s22 + $0xc] sm:$0xf] %vm693_vm12, %v688_v51  ;;  %v646_v53 = vadd.f32 %v632_v47, %v573_v52  ;;  %v577_v6 = vpop.f32.mrf.mxu1 }
  0xbc   : > { %v657_v56 = vadd.f32 %v1077_v32, %v646_v53  ;;  %v564_v57 = vpop.f32.mrf.mxu0  ;;  %v634_v58 = vpop.f32.mrf.mxu2 }
  0xbd   : > { %v565_v18 = vadd.f32 %v564_v57, %v521_v36 }
  0xbe   : > { %v681_v59 = vadd.f32 %v899_v54, %v657_v56 }
  0xbf   : > { %v531_v60 = vpop.f32.mrf.mxu3 }
  0xc0   : > { %v689_v61 = vpack.c.bf16 %v681_v59, %v681_v59  ;;  %v575_v62 = vadd.f32 %v574_v55, %v531_v60 }
  0xc2   : > { %698 = vst.msk [vmem:[%s1083_s22 + $0x10] sm:$0xf] %vm693_vm12, %v689_v61  ;;  %v647_v63 = vadd.f32 %v634_v58, %v575_v62  ;;  %v579_v25 = vpop.f32.mrf.mxu1 }
  0xc4   : > { %v658_v4 = vadd.f32 %v1077_v32, %v647_v63  ;;  %v622_v5 = vpop.f32.mrf.mxu0  ;;  %v637_v11 = vpop.f32.mrf.mxu2 }
  0xc5   : > { %v642_v7 = vadd.f32 %v622_v5, %v563_v3 }
  0xc6   : > { %v682_v9 = vadd.f32 %v900_v1, %v658_v4 }
  0xc7   : > { %v653_v10 = vadd.f32 %v1077_v32, %v642_v7  ;;  %v534_v12 = vpop.f32.mrf.mxu3 }
  0xc8   : > { %v690_v14 = vpack.c.bf16 %v682_v9, %v682_v9  ;;  %v578_v15 = vadd.f32 %v577_v6, %v534_v12 }
  0xc9   : > { %v677_v0 = vadd.f32 %v891_v8, %v653_v10 }
  0xca   : > { %699 = vst.msk [vmem:[%s1083_s22 + $0x14] sm:$0xf] %vm693_vm12, %v690_v14  ;;  %v648_v16 = vadd.f32 %v637_v11, %v578_v15 }
  0xcb   : > { %v685_v19 = vpack.c.bf16 %v677_v0, %v677_v0 }
  0xcc   : > { %v659_v20 = vadd.f32 %v1077_v32, %v648_v16  ;;  %v624_v21 = vpop.f32.mrf.mxu0  ;;  %v639_v31 = vpop.f32.mrf.mxu2 }
  0xcd   : > { %694 = vst.msk [vmem:[%s1083_s22] sm:$0xf] %vm693_vm12, %v685_v19  ;;  %v643_v22 = vadd.f32 %v624_v21, %v565_v18 }
  0xce   : > { %v683_v24 = vadd.f32 %v903_v17, %v659_v20 }
  0xcf   : > { %v654_v26 = vadd.f32 %v1077_v32, %v643_v22  ;;  %v536_v27 = vpop.f32.mrf.mxu3 }
  0xd0   : > { %v691_v28 = vpack.c.bf16 %v683_v24, %v683_v24  ;;  %v580_v29 = vadd.f32 %v579_v25, %v536_v27 }
  0xd1   : > { %v678_v30 = vadd.f32 %v892_v23, %v654_v26 }
  0xd2   : > { %700 = vst.msk [vmem:[%s1083_s22 + $0x18] sm:$0xf] %vm693_vm12, %v691_v28  ;;  %v649_v33 = vadd.f32 %v639_v31, %v580_v29 }
  0xd3   : > { %v686_v35 = vpack.c.bf16 %v678_v30, %v678_v30 }
  0xd4   : > { %v660_v36 = vadd.f32 %v1077_v32, %v649_v33 }
  0xd5   : > { %695 = vst.msk [vmem:[%s1083_s22 + $0x4] sm:$0xf] %vm693_vm12, %v686_v35 }
  0xd6   : > { %v684_v37 = vadd.f32 %v904_v34, %v660_v36 }
  0xd8   : > { %v692_v38 = vpack.c.bf16 %v684_v37, %v684_v37 }
  0xda   : > { %701 = vst.msk [vmem:[%s1083_s22 + $0x1c] sm:$0xf] %vm693_vm12, %v692_v38 }
  0xdb PF: > { %s15_s20 = sadd.s32 1, %s964_s20   ;;  %s1126_s18 = smov %s960_s19 }
  0xdc   : > { %p12_p5 = scmp.ge.s32.totalorder %s15_s20, 4   ;;  %s1127_s19 = smov %s1129_s21 }
  0xde   :  { %14 = sbr.rel (!%p12_p5) target bundleno = 2 (0x2), region = 78 }

// kernel: _lambda_.25
= control target key start
LH: loop header
LB: loop body
LE: loop exit
PB: predicated region body
PF: predicated region fallthrough
CT: control target
= control target key end

     0   :  { %s872_s15 = smov 0   ;;  %s874_s16 = smov 0   ;;  %s978_s0 = inlined_call_operand.vmem [shape: bf16[2,80,16], index: 0, kind: input, shape index: {}, may-alias: {0,1}]   ;;  %s979_s1 = inlined_call_operand.vmem [shape: bf16[2,80,16], index: 1, kind: input, shape index: {}, may-alias: {0,1}]   ;;  %s980_s2 = inlined_call_operand.vmem [shape: bf16[1,3,16,16], index: 2, kind: input, shape index: {}]   ;;  %s981_s3 = inlined_call_operand.vmem [shape: f32[1,16], index: 3, kind: input, shape index: {}]   ;;  %s982_s4 = inlined_call_operand.vmem [shape: bf16[2,64,16], index: 4, kind: output, shape index: {}]  }
   0x1   :  { %s876_s17 = smov 0  }
   0x2 LB: > { %s26_s18 = sadd.s32 1, %s841_s16  ;;  %p732_p0 = scmp.ge.s32.totalorder %s845_s17, 1  ;;  %s845_s17 = sphi %s876_s17, %s14_s17   ;;  %s841_s16 = sphi %s874_s16, %s984_s16   ;;  %s837_s15 = sphi %s872_s15, %s983_s15  }
   0x3   : > { %p28_p1 = scmp.ge.s32.totalorder %s26_s18, 2  ;;  %p216_p2 = scmp.lt.s32.totalorder %s845_s17, 3 }
   0x5   : > { %s986_s18 = smov (%p28_p1, %s26_s18), 0  ;;  %p217_p3 = pnand %p732_p0, %p216_p2 }
   0x6   : > { %p270_p4 = scmp.lt.s32.totalorder (!%p217_p3), %s837_s15, 1 }
   0x7   : > { %220 = sbr.rel (%p217_p3) target bundleno = 219 (0xdb), region = 36 }
   0xc   : > { %v893_v0 = vld [vmem:[%s980_s2 + $0x10] sm:$0xff]  ;;  %v770_v1 = vld [vmem:[%s980_s2] sm:$0xff]  ;;  %v771_v2 = vld [vmem:[%s980_s2 + $0x8] sm:$0xff]  ;;  %s988_s15 = smov (!%p270_p4, %s837_s15), 1  ;;  %vm442_vm4 = vcmask 130048   ;;  %vm530_vm9 = vcmask 1044480  }
   0xd   : > { %794 = vmatpush.bf16.msra.mxu2 %v893_v0  ;;  %793 = vmatpush.bf16.msra.mxu1 %v770_v1  ;;  %s795_s25 = smul.u32 40, %s988_s15  ;;  %vm391_vm10 = vsmask.f32 6400  ;;  %s769_s9 = sshll.u32 %s988_s15, 5  ;;  %vm614_vm12 = vcmask 125952  }
   0xe   : > { %462 = vmatpush.bf16.msra.mxu0 %v771_v2  ;;  %792 = vmatpush.bf16.msra.mxu3 %v771_v2  ;;  %s951_s12 = scalar_lea.vmem %s982_s4, %s769_s9 }
   0xf   : > { %s277_s28 = scalar_lea.vmem %s978_s0, %s795_s25  ;;  %s768_s29 = sadd.s32 32, %s795_s25 }
  0x10   : > { %v789_v3 = vld [vmem:[%s277_s28 + $0x8] sm:$0xff]   ;;  %v790_v4 = vld [vmem:[%s277_s28 + $0x10] sm:$0xff]   ;;  %v774_v5 = vld [vmem:[%s277_s28] sm:$0xff]   ;;  %s293_s6 = scalar_lea.vmem %s979_s1, %s768_s29 }
  0x11   : > { %v779_v6 = vunpack.c.l.bf16 %v789_v3  ;;  %v780_v7 = vunpack.c.h.bf16 %v789_v3  ;;  %v783_v8 = vunpack.c.l.bf16 %v790_v4  ;;  %v784_v9 = vunpack.c.h.bf16 %v790_v4  ;;  %v791_v10 = vld [vmem:[%s277_s28 + $0x18] sm:$0xff]   ;;  %v324_v35 = vld [vmem:[%s293_s6] sm:$0xf] }
  0x12   : > { %505 = vmatpush.bf16.msrb.mxu0 %v770_v1  ;;  %v775_v11 = vunpack.c.l.bf16 %v774_v5  ;;  %v776_v12 = vunpack.c.h.bf16 %v774_v5  ;;  %v787_v13 = vunpack.c.l.bf16 %v791_v10  ;;  %v788_v17 = vunpack.c.h.bf16 %v791_v10 }
  0x13   : > { %vm328_vm0 = vcmp.ge.f32.partialorder %v779_v6, 0.0  ;;  %vm329_vm1 = vcmp.ge.f32.partialorder %v780_v7, 0.0  ;;  %vm330_vm2 = vcmp.ge.f32.partialorder %v783_v8, 0.0  ;;  %vm331_vm3 = vcmp.ge.f32.partialorder %v784_v9, 0.0 }
  0x14   : > { %v337_v14 = vmul.f32 0.1, %v779_v6  ;;  %v338_v15 = vmul.f32 0.1, %v780_v7  ;;  %v339_v16 = vmul.f32 0.1, %v783_v8  ;;  %v325_v45 = vunpack.c.l.bf16 %v324_v35 }
  0x15   : > { %v340_v18 = vmul.f32 0.1, %v784_v9  ;;  %vm326_vm5 = vcmp.ge.f32.partialorder %v775_v11, 0.0  ;;  %vm327_vm6 = vcmp.ge.f32.partialorder %v776_v12, 0.0  ;;  %v335_v19 = vmul.f32 0.1, %v775_v11 }
  0x16   : > { %v346_v20 = vsel %vm328_vm0, %v779_v6, %v337_v14  ;;  %v347_v21 = vsel %vm329_vm1, %v780_v7, %v338_v15  ;;  %v348_v22 = vsel %vm330_vm2, %v783_v8, %v339_v16  ;;  %v336_v23 = vmul.f32 0.1, %v776_v12 }
  0x17   : > { %v349_v24 = vsel %vm331_vm3, %v784_v9, %v340_v18  ;;  %v355_v25 = vpack.c.bf16 %v346_v20, %v346_v20  ;;  %v356_v26 = vpack.c.bf16 %v347_v21, %v347_v21  ;;  %v357_v27 = vpack.c.bf16 %v348_v22, %v348_v22 }
  0x18   : > { %v358_v28 = vpack.c.bf16 %v349_v24, %v349_v24  ;;  %v344_v29 = vsel %vm326_vm5, %v775_v11, %v335_v19  ;;  %v345_v30 = vsel %vm327_vm6, %v776_v12, %v336_v23  ;;  %vm332_vm7 = vcmp.ge.f32.partialorder %v787_v13, 0.0 }
  0x19   : > { %v379_v31 = vunpack.c.l.b16 %v355_v25  ;;  %v380_v32 = vunpack.c.l.b16 %v356_v26  ;;  %v381_v33 = vunpack.c.l.b16 %v357_v27  ;;  %v353_v34 = vpack.c.bf16 %v344_v29, %v344_v29 }
  0x1a   : > { %v382_v36 = vunpack.c.l.b16 %v358_v28  ;;  %v354_v37 = vpack.c.bf16 %v345_v30, %v345_v30  ;;  %vm333_vm8 = vcmp.ge.f32.partialorder %v788_v17, 0.0  ;;  %v341_v38 = vmul.f32 0.1, %v787_v13 }
  0x1b   : > { %v912_v39 = vpack.c.b16 %v380_v32, %v379_v31  ;;  %v377_v40 = vunpack.c.l.b16 %v353_v34  ;;  %v342_v41 = vmul.f32 0.1, %v788_v17  ;;  %v343_v8 = vmul.f32 0.1, %v325_v45 }
  0x1c   : > { %v388_v42 = vpack.c.b16 %v382_v36, %v381_v33  ;;  %v378_v43 = vunpack.c.l.b16 %v354_v37  ;;  %v350_v44 = vsel %vm332_vm7, %v787_v13, %v341_v38  ;;  %vm334_vm11 = vcmp.ge.f32.partialorder %v325_v45, 0.0  ;;  %v822_v38 = vld [vmem:[%s981_s3] ss:$0 sm:$0xff] }
  0x1d   : > { %v532_v46 = vrot.slane %v912_v39, 3  ;;  %752 = vmatmul.msk.bf16.vlgmr.msra.gmra.mxu1 %vm442_vm4, %v912_v39  ;;  %v401_v47 = vshrl.u32 %v912_v39, 16  ;;  %v404_v48 = vshll.u32 %v912_v39, 16  ;;  %v351_v49 = vsel %vm333_vm8, %v788_v17, %v342_v41 }
  0x1e   : > { %v534_v50 = vrot.slane %v388_v42, 3  ;;  %v386_v51 = vpack.c.b16 %v378_v43, %v377_v40  ;;  %v410_v52 = vshrl.u32 %v388_v42, 16  ;;  %v413_v53 = vshll.u32 %v388_v42, 16 }
  0x1f   : > { %v403_v54 = vrot.slane %v401_v47, 1  ;;  %v406_v55 = vrot.slane %v404_v48, 2  ;;  %v359_v56 = vpack.c.bf16 %v350_v44, %v350_v44  ;;  %v360_v57 = vpack.c.bf16 %v351_v49, %v351_v49 }
  0x20   : > { %v535_v58 = vsel %vm530_vm9, %v532_v46, %v534_v50  ;;  %v393_v59 = vshrl.u32 %v386_v51, 16  ;;  %v396_v60 = vshll.u32 %v386_v51, 16  ;;  %v412_v61 = vrot.slane %v410_v52, 1 }
  0x21   : > { %762 = vmatmul.msk.bf16.vlgmr.msra.gmra.mxu2 %vm442_vm4, %v535_v58  ;;  %v407_v62 = vor.u32 %v406_v55, %v403_v54  ;;  %v415_v63 = vrot.slane %v413_v53, 2  ;;  %v383_v1 = vunpack.c.l.b16 %v359_v56  ;;  %v384_v2 = vunpack.c.l.b16 %v360_v57 }
  0x22   : > { %v395_v3 = vrot.slane %v393_v59, 1  ;;  %v398_v4 = vrot.slane %v396_v60, 2  ;;  %v352_v13 = vsel %vm334_vm11, %v325_v45, %v343_v8  ;;  %v531_v29 = vrot.slane %v386_v51, 3 }
  0x23   : > { %v416_v5 = vor.u32 %v415_v63, %v412_v61  ;;  %v389_v6 = vpack.c.b16 %v384_v2, %v383_v1  ;;  %v361_v17 = vpack.c.bf16 %v352_v13, %v352_v13 }
  0x24   : > { %v399_v7 = vor.u32 %v398_v4, %v395_v3  ;;  %v533_v31 = vsel %vm530_vm9, %v531_v29, %v532_v46 }
  0x25   : > { %v417_v9 = vsel %vm391_vm10, %v407_v62, %v416_v5  ;;  %v419_v11 = vshrl.u32 %v389_v6, 16  ;;  %v422_v12 = vshll.u32 %v389_v6, 16  ;;  %v536_v14 = vrot.slane %v389_v6, 3 }
  0x26   : > { %v408_v10 = vsel %vm391_vm10, %v399_v7, %v407_v62  ;;  %744 = vmatmul.msk.bf16.vlgmr.msra.gmra.mxu3 %vm442_vm4, %v417_v9  ;;  %v385_v20 = vunpack.c.l.b16 %v361_v17 }
  0x27   : > { %743 = vmatmul.msk.bf16.vlgmr.msra.gmra.mxu0 %vm442_vm4, %v408_v10  ;;  %v421_v15 = vrot.slane %v419_v11, 1  ;;  %v424_v16 = vrot.slane %v422_v12, 2  ;;  %v537_v18 = vsel %vm530_vm9, %v534_v50, %v536_v14 }
  0x28   : > { %565 = vmatpush.bf16.msra.mxu0 %v893_v0  ;;  %v390_v22 = vpack.c.b16 %v385_v20, %v385_v20 }
  0x29   : > { %v425_v19 = vor.u32 %v424_v16, %v421_v15 }
  0x2a   : > { %v428_v0 = vshrl.u32 %v390_v22, 16  ;;  %v431_v23 = vshll.u32 %v390_v22, 16  ;;  %v538_v24 = vrot.slane %v390_v22, 3 }
  0x2b   : > { %v426_v21 = vsel %vm391_vm10, %v416_v5, %v425_v19 }
  0x2c   : > { %v430_v25 = vrot.slane %v428_v0, 1  ;;  %v433_v26 = vrot.slane %v431_v23, 2  ;;  %v539_v27 = vsel %vm530_vm9, %v536_v14, %v538_v24 }
  0x2d   : > { %753 = vmatmul.msk.bf16.gmra.mxu1 %vm442_vm4, %v388_v42 }
  0x2e   : > { %v434_v28 = vor.u32 %v433_v26, %v430_v25 }
  0x30   : > { %v435_v30 = vsel %vm391_vm10, %v425_v19, %v434_v28 }
  0x31   : > { %763 = vmatmul.msk.bf16.gmra.mxu2 %vm442_vm4, %v537_v18 }
  0x36   : > { %745 = vmatmul.msk.bf16.gmra.mxu3 %vm442_vm4, %v426_v21 }
  0x37   : > { %751 = vmatmul.msk.bf16.vlgmr.msrb.gmra.mxu0 %vm442_vm4, %v386_v51 }
  0x3d   : > { %754 = vmatmul.msk.bf16.gmra.mxu1 %vm442_vm4, %v389_v6 }
  0x41   : > { %764 = vmatmul.msk.bf16.gmra.mxu2 %vm442_vm4, %v539_v27 }
  0x46   : > { %746 = vmatmul.msk.bf16.gmra.mxu3 %vm442_vm4, %v435_v30 }
  0x47   : > { %761 = vmatmul.msk.bf16.vlgmr.msra.gmra.mxu0 %vm442_vm4, %v533_v31 }
  0x9a   : > { %v512_v32 = vpop.f32.mrf.mxu1 }
  0xa2   : > { %v514_v36 = vpop.f32.mrf.mxu1 }
  0xa4   : > { %v464_v33 = vpop.f32.mrf.mxu0  ;;  %v572_v34 = vpop.f32.mrf.mxu2 }
  0xa9   : > { %v469_v35 = vpop.f32.mrf.mxu3 }
  0xaa   : > { %v513_v37 = vadd.f32 %v512_v32, %v469_v35  ;;  %v517_v46 = vpop.f32.mrf.mxu1 }
  0xac   : > { %v589_v40 = vadd.f32 %v572_v34, %v513_v37  ;;  %v466_v41 = vpop.f32.mrf.mxu0  ;;  %v574_v39 = vpop.f32.mrf.mxu2 }
  0xae   : > { %v600_v42 = vadd.f32 %v822_v38, %v589_v40 }
  0xb0   : > { %v608_v43 = vpack.c.bf16 %v600_v42, %v600_v42 }
  0xb1   : > { %v471_v44 = vpop.f32.mrf.mxu3 }
  0xb2   : > { %617 = vst.msk [vmem:[%s951_s12 + $0x8] sm:$0xf] %vm614_vm12, %v608_v43  ;;  %v515_v45 = vadd.f32 %v514_v36, %v471_v44  ;;  %v519_v56 = vpop.f32.mrf.mxu1 }
  0xb4   : > { %v590_v47 = vadd.f32 %v574_v39, %v515_v45  ;;  %v507_v48 = vpop.f32.mrf.mxu0  ;;  %v577_v49 = vpop.f32.mrf.mxu2 }
  0xb5   : > { %v508_v62 = vadd.f32 %v507_v48, %v464_v33 }
  0xb6   : > { %v601_v50 = vadd.f32 %v822_v38, %v590_v47 }
  0xb8   : > { %v609_v51 = vpack.c.bf16 %v601_v50, %v601_v50 }
  0xb9   : > { %v474_v52 = vpop.f32.mrf.mxu3 }
  0xba   : > { %618 = vst.msk [vmem:[%s951_s12 + $0xc] sm:$0xf] %vm614_vm12, %v609_v51  ;;  %v518_v53 = vadd.f32 %v517_v46, %v474_v52  ;;  %v522_v4 = vpop.f32.mrf.mxu1 }
  0xbc   : > { %v591_v54 = vadd.f32 %v577_v49, %v518_v53  ;;  %v509_v55 = vpop.f32.mrf.mxu0  ;;  %v579_v58 = vpop.f32.mrf.mxu2 }
  0xbd   : > { %v510_v11 = vadd.f32 %v509_v55, %v466_v41 }
  0xbe   : > { %v602_v57 = vadd.f32 %v822_v38, %v591_v54 }
  0xc0   : > { %v610_v59 = vpack.c.bf16 %v602_v57, %v602_v57 }
  0xc1   : > { %v476_v60 = vpop.f32.mrf.mxu3 }
  0xc2   : > { %619 = vst.msk [vmem:[%s951_s12 + $0x10] sm:$0xf] %vm614_vm12, %v610_v59  ;;  %v520_v61 = vadd.f32 %v519_v56, %v476_v60  ;;  %v524_v18 = vpop.f32.mrf.mxu1 }
  0xc4   : > { %v592_v63 = vadd.f32 %v579_v58, %v520_v61  ;;  %v567_v1 = vpop.f32.mrf.mxu0  ;;  %v582_v8 = vpop.f32.mrf.mxu2 }
  0xc5   : > { %v587_v2 = vadd.f32 %v567_v1, %v508_v62 }
  0xc6   : > { %v603_v3 = vadd.f32 %v822_v38, %v592_v63 }
  0xc7   : > { %v598_v5 = vadd.f32 %v822_v38, %v587_v2 }
  0xc8   : > { %v611_v6 = vpack.c.bf16 %v603_v3, %v603_v3 }
  0xc9   : > { %v606_v7 = vpack.c.bf16 %v598_v5, %v598_v5  ;;  %v479_v9 = vpop.f32.mrf.mxu3 }
  0xca   : > { %620 = vst.msk [vmem:[%s951_s12 + $0x14] sm:$0xf] %vm614_vm12, %v611_v6  ;;  %v523_v10 = vadd.f32 %v522_v4, %v479_v9 }
  0xcb   : > { %615 = vst.msk [vmem:[%s951_s12] sm:$0xf] %vm614_vm12, %v606_v7 }
  0xcc   : > { %v593_v12 = vadd.f32 %v582_v8, %v523_v10  ;;  %v569_v13 = vpop.f32.mrf.mxu0  ;;  %v584_v22 = vpop.f32.mrf.mxu2 }
  0xcd   : > { %v588_v14 = vadd.f32 %v569_v13, %v510_v11 }
  0xce   : > { %v604_v15 = vadd.f32 %v822_v38, %v593_v12 }
  0xcf   : > { %v599_v16 = vadd.f32 %v822_v38, %v588_v14 }
  0xd0   : > { %v612_v17 = vpack.c.bf16 %v604_v15, %v604_v15 }
  0xd1   : > { %v607_v19 = vpack.c.bf16 %v599_v16, %v599_v16  ;;  %v481_v20 = vpop.f32.mrf.mxu3 }
  0xd2   : > { %621 = vst.msk [vmem:[%s951_s12 + $0x18] sm:$0xf] %vm614_vm12, %v612_v17  ;;  %v525_v21 = vadd.f32 %v524_v18, %v481_v20 }
  0xd3   : > { %616 = vst.msk [vmem:[%s951_s12 + $0x4] sm:$0xf] %vm614_vm12, %v607_v19 }
  0xd4   : > { %v594_v0 = vadd.f32 %v584_v22, %v525_v21 }
  0xd6   : > { %v605_v23 = vadd.f32 %v822_v38, %v594_v0 }
  0xd8   : > { %v613_v24 = vpack.c.bf16 %v605_v23, %v605_v23 }
  0xda   : > { %622 = vst.msk [vmem:[%s951_s12 + $0x1c] sm:$0xf] %vm614_vm12, %v613_v24 }
  0xdb PF: > { %s14_s17 = sadd.s32 1, %s845_s17   ;;  %s983_s15 = smov %s841_s16 }
  0xdc   : > { %p11_p5 = scmp.ge.s32.totalorder %s14_s17, 4   ;;  %s984_s16 = smov %s986_s18 }
  0xde   :  { %13 = sbr.rel (!%p11_p5) target bundleno = 2 (0x2), region = 71 }

// kernel: _lambda_.27
= control target key start
LH: loop header
LB: loop body
LE: loop exit
PB: predicated region body
PF: predicated region fallthrough
CT: control target
= control target key end

     0   :  { %s889_s15 = smov 0   ;;  %s891_s16 = smov 0   ;;  %s1002_s0 = inlined_call_operand.vmem [shape: bf16[2,80,16], index: 0, kind: input, shape index: {}, may-alias: {0,1}]   ;;  %s1003_s1 = inlined_call_operand.vmem [shape: bf16[2,80,16], index: 1, kind: input, shape index: {}, may-alias: {0,1}]   ;;  %s1004_s2 = inlined_call_operand.vmem [shape: bf16[1,3,16,16], index: 2, kind: input, shape index: {}]   ;;  %s1005_s3 = inlined_call_operand.vmem [shape: f32[1,16], index: 3, kind: input, shape index: {}]   ;;  %s1006_s4 = inlined_call_operand.vmem [shape: bf16[2,64,16], index: 4, kind: output, shape index: {}]  }
   0x1   :  { %s893_s17 = smov 0  }
   0x2 LB: > { %s26_s18 = sadd.s32 1, %s858_s16  ;;  %p745_p0 = scmp.ge.s32.totalorder %s862_s17, 1  ;;  %s862_s17 = sphi %s893_s17, %s14_s17   ;;  %s858_s16 = sphi %s891_s16, %s1008_s16   ;;  %s854_s15 = sphi %s889_s15, %s1007_s15  }
   0x3   : > { %p28_p1 = scmp.ge.s32.totalorder %s26_s18, 2  ;;  %p216_p2 = scmp.lt.s32.totalorder %s862_s17, 3 }
   0x5   : > { %s1010_s18 = smov (%p28_p1, %s26_s18), 0  ;;  %p217_p3 = pnand %p745_p0, %p216_p2 }
   0x6   : > { %p270_p4 = scmp.lt.s32.totalorder (!%p217_p3), %s854_s15, 1 }
   0x7   : > { %220 = sbr.rel (%p217_p3) target bundleno = 221 (0xdd), region = 36 }
   0xc   : > { %v910_v0 = vld [vmem:[%s1004_s2 + $0x10] sm:$0xff]  ;;  %v783_v1 = vld [vmem:[%s1004_s2] sm:$0xff]  ;;  %v784_v2 = vld [vmem:[%s1004_s2 + $0x8] sm:$0xff]  ;;  %s1012_s15 = smov (!%p270_p4, %s854_s15), 1  ;;  %vm543_vm4 = vcmask 1046528   ;;  %vm448_vm8 = vcmask 130048  }
   0xd   : > { %811 = vmatpush.bf16.msra.mxu2 %v910_v0  ;;  %810 = vmatpush.bf16.msra.mxu1 %v783_v1  ;;  %s812_s25 = smul.u32 40, %s1012_s15  ;;  %vm397_vm11 = vsmask.f32 5376  ;;  %s782_s9 = sshll.u32 %s1012_s15, 5  ;;  %vm627_vm13 = vcmask 125952  }
   0xe   : > { %468 = vmatpush.bf16.msra.mxu0 %v784_v2  ;;  %809 = vmatpush.bf16.msra.mxu3 %v784_v2  ;;  %s975_s12 = scalar_lea.vmem %s1006_s4, %s782_s9 }
   0xf   : > { %s277_s28 = scalar_lea.vmem %s1002_s0, %s812_s25  ;;  %s781_s29 = sadd.s32 32, %s812_s25 }
  0x10   : > { %v806_v3 = vld [vmem:[%s277_s28 + $0x8] sm:$0xff]   ;;  %v807_v4 = vld [vmem:[%s277_s28 + $0x10] sm:$0xff]   ;;  %v808_v5 = vld [vmem:[%s277_s28 + $0x18] sm:$0xff]   ;;  %s293_s6 = scalar_lea.vmem %s1003_s1, %s781_s29 }
  0x11   : > { %v793_v6 = vunpack.c.h.bf16 %v806_v3  ;;  %v796_v7 = vunpack.c.l.bf16 %v807_v4  ;;  %v797_v8 = vunpack.c.h.bf16 %v807_v4  ;;  %v800_v9 = vunpack.c.l.bf16 %v808_v5  ;;  %v787_v10 = vld [vmem:[%s277_s28] sm:$0xff]  }
  0x12   : > { %511 = vmatpush.bf16.msrb.mxu0 %v783_v1  ;;  %v928_v11 = vld [vmem:[%s293_s6] sm:$0xff]   ;;  %v788_v12 = vunpack.c.l.bf16 %v787_v10  ;;  %v789_v13 = vunpack.c.h.bf16 %v787_v10  ;;  %v792_v14 = vunpack.c.l.bf16 %v806_v3  ;;  %v801_v15 = vunpack.c.h.bf16 %v808_v5 }
  0x13   : > { %vm331_vm0 = vcmp.ge.f32.partialorder %v793_v6, 0.0  ;;  %vm332_vm1 = vcmp.ge.f32.partialorder %v796_v7, 0.0  ;;  %vm333_vm2 = vcmp.ge.f32.partialorder %v797_v8, 0.0  ;;  %vm334_vm3 = vcmp.ge.f32.partialorder %v800_v9, 0.0 }
  0x14   : > { %v341_v16 = vmul.f32 0.1, %v793_v6  ;;  %v342_v17 = vmul.f32 0.1, %v796_v7  ;;  %v343_v18 = vmul.f32 0.1, %v797_v8  ;;  %v804_v19 = vunpack.c.l.bf16 %v928_v11 }
  0x15   : > { %v344_v20 = vmul.f32 0.1, %v800_v9  ;;  %vm328_vm5 = vcmp.ge.f32.partialorder %v788_v12, 0.0  ;;  %vm329_vm6 = vcmp.ge.f32.partialorder %v789_v13, 0.0  ;;  %vm330_vm7 = vcmp.ge.f32.partialorder %v792_v14, 0.0 }
  0x16   : > { %v351_v21 = vsel %vm331_vm0, %v793_v6, %v341_v16  ;;  %v352_v22 = vsel %vm332_vm1, %v796_v7, %v342_v17  ;;  %v353_v23 = vsel %vm333_vm2, %v797_v8, %v343_v18  ;;  %v338_v24 = vmul.f32 0.1, %v788_v12 }
  0x17   : > { %v354_v25 = vsel %vm334_vm3, %v800_v9, %v344_v20  ;;  %v361_v26 = vpack.c.bf16 %v351_v21, %v351_v21  ;;  %v362_v27 = vpack.c.bf16 %v352_v22, %v352_v22  ;;  %v363_v28 = vpack.c.bf16 %v353_v23, %v353_v23 }
  0x18   : > { %v364_v29 = vpack.c.bf16 %v354_v25, %v354_v25  ;;  %v339_v30 = vmul.f32 0.1, %v789_v13  ;;  %v340_v31 = vmul.f32 0.1, %v792_v14  ;;  %v348_v32 = vsel %vm328_vm5, %v788_v12, %v338_v24 }
  0x19   : > { %v386_v33 = vunpack.c.l.b16 %v361_v26  ;;  %v387_v34 = vunpack.c.l.b16 %v362_v27  ;;  %v388_v35 = vunpack.c.l.b16 %v363_v28  ;;  %v358_v36 = vpack.c.bf16 %v348_v32, %v348_v32 }
  0x1a   : > { %v389_v37 = vunpack.c.l.b16 %v364_v29  ;;  %v349_v38 = vsel %vm329_vm6, %v789_v13, %v339_v30  ;;  %v350_v39 = vsel %vm330_vm7, %v792_v14, %v340_v31  ;;  %vm335_vm9 = vcmp.ge.f32.partialorder %v801_v15, 0.0 }
  0x1b   : > { %v394_v40 = vpack.c.b16 %v388_v35, %v387_v34  ;;  %v539_v41 = vpack.c.b16 %v387_v34, %v386_v33  ;;  %v359_v42 = vpack.c.bf16 %v349_v38, %v349_v38  ;;  %v360_v43 = vpack.c.bf16 %v350_v39, %v350_v39 }
  0x1c   : > { %v540_v44 = vpack.c.b16 %v389_v37, %v388_v35  ;;  %v383_v45 = vunpack.c.l.b16 %v358_v36  ;;  %vm336_vm10 = vcmp.ge.f32.partialorder %v804_v19, 0.0  ;;  %v345_v46 = vmul.f32 0.1, %v801_v15 }
  0x1d   : > { %v933_v47 = vrot.slane %v539_v41, 1  ;;  %v935_v48 = vunpack.c.l.b16 %v359_v42  ;;  %v937_v49 = vunpack.c.l.b16 %v360_v43  ;;  %v416_v50 = vshrl.u32 %v394_v40, 16 }
  0x1e   : > { %v547_v51 = vrot.slane %v540_v44, 1  ;;  %v419_v52 = vshll.u32 %v394_v40, 16  ;;  %v346_v53 = vmul.f32 0.1, %v804_v19  ;;  %v355_v54 = vsel %vm335_vm9, %v801_v15, %v345_v46 }
  0x1f   : > { %v392_v55 = vpack.c.b16 %v935_v48, %v383_v45  ;;  %v393_v56 = vpack.c.b16 %v386_v33, %v937_v49  ;;  %v418_v57 = vrot.slane %v416_v50, 2  ;;  %v365_v61 = vpack.c.bf16 %v355_v54, %v355_v54 }
  0x20   : > { %v548_v58 = vsel %vm543_vm4, %v933_v47, %v547_v51  ;;  %v421_v59 = vrot.slane %v419_v52, 3  ;;  %v356_v60 = vsel %vm336_vm10, %v804_v19, %v346_v53  ;;  %v805_v9 = vunpack.c.h.bf16 %v928_v11 }
  0x21   : > { %775 = vmatmul.msk.bf16.vlgmr.msra.gmra.mxu2 %vm448_vm8, %v548_v58  ;;  %v407_v62 = vshrl.u32 %v393_v56, 16  ;;  %v410_v63 = vshll.u32 %v393_v56, 16  ;;  %765 = vmatmul.msk.bf16.vlgmr.msra.gmra.mxu1 %vm448_vm8, %v393_v56  ;;  %v399_v1 = vshrl.u32 %v392_v55, 16  ;;  %v402_v2 = vshll.u32 %v392_v55, 16 }
  0x22   : > { %v422_v3 = vor.u32 %v421_v59, %v418_v57  ;;  %v366_v4 = vpack.c.bf16 %v356_v60, %v356_v60  ;;  %v390_v5 = vunpack.c.l.b16 %v365_v61  ;;  %v347_v18 = vmul.f32 0.1, %v805_v9 }
  0x23   : > { %v401_v6 = vrot.slane %v399_v1, 2  ;;  %v409_v7 = vrot.slane %v407_v62, 2  ;;  %v412_v8 = vrot.slane %v410_v63, 3  ;;  %v404_v10 = vrot.slane %v402_v2, 3 }
  0x24   : > { %v391_v12 = vunpack.c.l.b16 %v366_v4  ;;  %v395_v14 = vpack.c.b16 %v390_v5, %v389_v37  ;;  %vm337_vm12 = vcmp.ge.f32.partialorder %v805_v9, 0.0  ;;  %v538_v36 = vpack.c.b16 %v937_v49, %v935_v48  ;;  %v839_v49 = vld [vmem:[%s1005_s3] ss:$0 sm:$0xff] }
  0x25   : > { %v413_v13 = vor.u32 %v412_v8, %v409_v7  ;;  %v405_v15 = vor.u32 %v404_v10, %v401_v6  ;;  %v357_v22 = vsel %vm337_vm12, %v805_v9, %v347_v18 }
  0x26   : > { %v541_v16 = vpack.c.b16 %v391_v12, %v390_v5  ;;  %v425_v20 = vshrl.u32 %v395_v14, 16  ;;  %v428_v21 = vshll.u32 %v395_v14, 16  ;;  %v367_v26 = vpack.c.bf16 %v357_v22, %v357_v22 }
  0x27   : > { %v423_v17 = vsel %vm397_vm11, %v413_v13, %v422_v3  ;;  %v414_v19 = vsel %vm397_vm11, %v405_v15, %v413_v13  ;;  %v396_v30 = vpack.c.b16 %v391_v12, %v391_v12  ;;  %v544_v39 = vrot.slane %v538_v36, 1 }
  0x28   : > { %757 = vmatmul.msk.bf16.vlgmr.msra.gmra.mxu3 %vm448_vm8, %v423_v17  ;;  %756 = vmatmul.msk.bf16.vlgmr.msra.gmra.mxu0 %vm448_vm8, %v414_v19  ;;  %v549_v11 = vrot.slane %v541_v16, 1  ;;  %v427_v23 = vrot.slane %v425_v20, 2  ;;  %v430_v24 = vrot.slane %v428_v21, 3  ;;  %v537_v28 = vunpack.c.l.b16 %v367_v26 }
  0x29   : > { %578 = vmatpush.bf16.msra.mxu0 %v910_v0  ;;  %v434_v0 = vshrl.u32 %v396_v30, 16  ;;  %v437_v32 = vshll.u32 %v396_v30, 16  ;;  %v546_v41 = vsel %vm543_vm4, %v544_v39, %v933_v47 }
  0x2a   : > { %v550_v25 = vsel %vm543_vm4, %v547_v51, %v549_v11  ;;  %v431_v27 = vor.u32 %v430_v24, %v427_v23  ;;  %v542_v31 = vpack.c.b16 %v537_v28, %v537_v28 }
  0x2b   : > { %v436_v34 = vrot.slane %v434_v0, 2  ;;  %v439_v35 = vrot.slane %v437_v32, 3 }
  0x2c   : > { %v432_v29 = vsel %vm397_vm11, %v422_v3, %v431_v27  ;;  %v551_v33 = vrot.slane %v542_v31, 1 }
  0x2d   : > { %v440_v38 = vor.u32 %v439_v35, %v436_v34 }
  0x2e   : > { %v552_v37 = vsel %vm543_vm4, %v549_v11, %v551_v33 }
  0x31   : > { %776 = vmatmul.msk.bf16.gmra.mxu2 %vm448_vm8, %v550_v25  ;;  %766 = vmatmul.msk.bf16.gmra.mxu1 %vm448_vm8, %v394_v40  ;;  %v441_v40 = vsel %vm397_vm11, %v431_v27, %v440_v38 }
  0x38   : > { %758 = vmatmul.msk.bf16.gmra.mxu3 %vm448_vm8, %v432_v29  ;;  %764 = vmatmul.msk.bf16.vlgmr.msrb.gmra.mxu0 %vm448_vm8, %v392_v55 }
  0x41   : > { %777 = vmatmul.msk.bf16.gmra.mxu2 %vm448_vm8, %v552_v37  ;;  %767 = vmatmul.msk.bf16.gmra.mxu1 %vm448_vm8, %v395_v14 }
  0x48   : > { %759 = vmatmul.msk.bf16.gmra.mxu3 %vm448_vm8, %v441_v40  ;;  %774 = vmatmul.msk.bf16.vlgmr.msra.gmra.mxu0 %vm448_vm8, %v546_v41 }
  0x9e   : > { %v518_v42 = vpop.f32.mrf.mxu1 }
  0xa4   : > { %v585_v43 = vpop.f32.mrf.mxu2 }
  0xa5   : > { %v470_v44 = vpop.f32.mrf.mxu0 }
  0xa6   : > { %v520_v46 = vpop.f32.mrf.mxu1 }
  0xab   : > { %v475_v45 = vpop.f32.mrf.mxu3 }
  0xac   : > { %v519_v48 = vadd.f32 %v518_v42, %v475_v45  ;;  %v587_v50 = vpop.f32.mrf.mxu2 }
  0xad   : > { %v472_v52 = vpop.f32.mrf.mxu0 }
  0xae   : > { %v602_v51 = vadd.f32 %v585_v43, %v519_v48  ;;  %v523_v56 = vpop.f32.mrf.mxu1 }
  0xb0   : > { %v613_v53 = vadd.f32 %v839_v49, %v602_v51 }
  0xb2   : > { %v621_v47 = vpack.c.bf16 %v613_v53, %v613_v53 }
  0xb3   : > { %v477_v54 = vpop.f32.mrf.mxu3 }
  0xb4   : > { %630 = vst.msk [vmem:[%s975_s12 + $0x8] sm:$0xf] %vm627_vm13, %v621_v47  ;;  %v521_v55 = vadd.f32 %v520_v46, %v477_v54  ;;  %v590_v59 = vpop.f32.mrf.mxu2 }
  0xb5   : > { %v513_v58 = vpop.f32.mrf.mxu0 }
  0xb6   : > { %v603_v57 = vadd.f32 %v587_v50, %v521_v55  ;;  %v525_v3 = vpop.f32.mrf.mxu1  ;;  %v514_v9 = vadd.f32 %v513_v58, %v470_v44 }
  0xb8   : > { %v614_v60 = vadd.f32 %v839_v49, %v603_v57 }
  0xba   : > { %v622_v61 = vpack.c.bf16 %v614_v60, %v614_v60 }
  0xbb   : > { %v480_v62 = vpop.f32.mrf.mxu3 }
  0xbc   : > { %631 = vst.msk [vmem:[%s975_s12 + $0xc] sm:$0xf] %vm627_vm13, %v622_v61  ;;  %v524_v63 = vadd.f32 %v523_v56, %v480_v62  ;;  %v592_v5 = vpop.f32.mrf.mxu2 }
  0xbd   : > { %v515_v2 = vpop.f32.mrf.mxu0 }
  0xbe   : > { %v604_v1 = vadd.f32 %v590_v59, %v524_v63  ;;  %v528_v15 = vpop.f32.mrf.mxu1  ;;  %v516_v11 = vadd.f32 %v515_v2, %v472_v52 }
  0xc0   : > { %v615_v4 = vadd.f32 %v839_v49, %v604_v1 }
  0xc2   : > { %v623_v6 = vpack.c.bf16 %v615_v4, %v615_v4 }
  0xc3   : > { %v482_v7 = vpop.f32.mrf.mxu3 }
  0xc4   : > { %632 = vst.msk [vmem:[%s975_s12 + $0x10] sm:$0xf] %vm627_vm13, %v623_v6  ;;  %v526_v8 = vadd.f32 %v525_v3, %v482_v7  ;;  %v595_v19 = vpop.f32.mrf.mxu2 }
  0xc5   : > { %v580_v12 = vpop.f32.mrf.mxu0 }
  0xc6   : > { %v605_v10 = vadd.f32 %v592_v5, %v526_v8  ;;  %v600_v13 = vadd.f32 %v580_v12, %v514_v9  ;;  %v530_v28 = vpop.f32.mrf.mxu1 }
  0xc8   : > { %v616_v14 = vadd.f32 %v839_v49, %v605_v10  ;;  %v611_v16 = vadd.f32 %v839_v49, %v600_v13 }
  0xca   : > { %v624_v17 = vpack.c.bf16 %v616_v14, %v616_v14  ;;  %v619_v18 = vpack.c.bf16 %v611_v16, %v611_v16 }
  0xcb   : > { %v485_v20 = vpop.f32.mrf.mxu3 }
  0xcc   : > { %633 = vst.msk [vmem:[%s975_s12 + $0x14] sm:$0xf] %vm627_vm13, %v624_v17  ;;  %v529_v21 = vadd.f32 %v528_v15, %v485_v20  ;;  %v597_v0 = vpop.f32.mrf.mxu2 }
  0xcd   : > { %628 = vst.msk [vmem:[%s975_s12] sm:$0xf] %vm627_vm13, %v619_v18  ;;  %v582_v23 = vpop.f32.mrf.mxu0 }
  0xce   : > { %v606_v22 = vadd.f32 %v595_v19, %v529_v21  ;;  %v601_v24 = vadd.f32 %v582_v23, %v516_v11 }
  0xd0   : > { %v617_v25 = vadd.f32 %v839_v49, %v606_v22  ;;  %v612_v26 = vadd.f32 %v839_v49, %v601_v24 }
  0xd2   : > { %v625_v27 = vpack.c.bf16 %v617_v25, %v617_v25  ;;  %v620_v29 = vpack.c.bf16 %v612_v26, %v612_v26 }
  0xd3   : > { %v487_v30 = vpop.f32.mrf.mxu3 }
  0xd4   : > { %634 = vst.msk [vmem:[%s975_s12 + $0x18] sm:$0xf] %vm627_vm13, %v625_v27  ;;  %v531_v31 = vadd.f32 %v530_v28, %v487_v30 }
  0xd5   : > { %629 = vst.msk [vmem:[%s975_s12 + $0x4] sm:$0xf] %vm627_vm13, %v620_v29 }
  0xd6   : > { %v607_v32 = vadd.f32 %v597_v0, %v531_v31 }
  0xd8   : > { %v618_v33 = vadd.f32 %v839_v49, %v607_v32 }
  0xda   : > { %v626_v34 = vpack.c.bf16 %v618_v33, %v618_v33 }
  0xdc   : > { %635 = vst.msk [vmem:[%s975_s12 + $0x1c] sm:$0xf] %vm627_vm13, %v626_v34 }
  0xdd PF: > { %s14_s17 = sadd.s32 1, %s862_s17   ;;  %s1007_s15 = smov %s858_s16 }
  0xde   : > { %p11_p5 = scmp.ge.s32.totalorder %s14_s17, 4   ;;  %s1008_s16 = smov %s1010_s18 }
  0xe0   :  { %13 = sbr.rel (!%p11_p5) target bundleno = 2 (0x2), region = 71 }

// kernel: _lambda_.29
= control target key start
LH: loop header
LB: loop body
LE: loop exit
PB: predicated region body
PF: predicated region fallthrough
CT: control target
= control target key end

     0   :  { %s961_s15 = smov 0   ;;  %s963_s16 = smov 0   ;;  %s1116_s0 = inlined_call_operand.vmem [shape: bf16[2,80,16], index: 0, kind: input, shape index: {}, may-alias: {0,1}]   ;;  %s1117_s1 = inlined_call_operand.vmem [shape: bf16[2,80,16], index: 1, kind: input, shape index: {}, may-alias: {0,1}]   ;;  %s1118_s2 = inlined_call_operand.vmem [shape: bf16[2,2,16,8], index: 2, kind: input, shape index: {}]   ;;  %s1119_s3 = inlined_call_operand.vmem [shape: f32[1,8], index: 3, kind: input, shape index: {}]   ;;  %s1120_s4 = inlined_call_operand.vmem [shape: bf16[2,64,16], index: 4, kind: output, shape index: {}]  }
   0x1   :  { %s965_s17 = smov 0  }
   0x2 LB: > { %s26_s18 = sadd.s32 1, %s929_s16  ;;  %p811_p0 = scmp.ge.s32.totalorder %s933_s17, 1  ;;  %s933_s17 = sphi %s965_s17, %s14_s17   ;;  %s929_s16 = sphi %s963_s16, %s1122_s16   ;;  %s925_s15 = sphi %s961_s15, %s1121_s15  }
   0x3   : > { %p28_p1 = scmp.ge.s32.totalorder %s26_s18, 2  ;;  %p216_p2 = scmp.lt.s32.totalorder %s933_s17, 3 }
   0x5   : > { %s1124_s18 = smov (%p28_p1, %s26_s18), 0  ;;  %p217_p3 = pnand %p811_p0, %p216_p2 }
   0x6   : > { %p270_p4 = scmp.lt.s32.totalorder (!%p217_p3), %s925_s15, 1  ;;  %s935_s11 = smov (!%p217_p3), 8  }
   0x7   : > { %220 = sbr.rel (%p217_p3) target bundleno = 346 (0x15a), region = 36 }
   0xc   : > { %v862_v0 = vld [vmem:[%s1118_s2 + $0x18] sm:$0xff]  ;;  %v861_v1 = vld [vmem:[%s1118_s2 + $0x10] sm:$0xff]  ;;  %s1126_s15 = smov (!%p270_p4, %s925_s15), 1  ;;  %vm434_vm6 = vcmask 130048   ;;  %vm553_vm7 = vcmask 1046528   ;;  %vm538_vm12 = vcmask 60416  }
   0xd   : > { %588 = vmatpush.bf16.msra.mxu2 %v862_v0  ;;  %623 = vmatpush.bf16.msra.mxu3 %v861_v1  ;;  %s882_s23 = smul.u32 40, %s1126_s15  ;;  %vm391_vm8 = vsmask.f32 7424  ;;  %s858_s12 = sshll.u32 %s1126_s15, 5  ;;  %vm693_vm13 = vcmask 126016  }
   0xe   : > { %s1058_s19 = scalar_lea.vmem %s1120_s4, %s858_s12 }
   0xf   : > { %s993_s26 = scalar_lea.vmem %s1116_s0, %s882_s23  ;;  %s857_s27 = sadd.s32 32, %s882_s23 }
  0x10   : > { %v864_v2 = vld [vmem:[%s993_s26] sm:$0xff]   ;;  %v879_v3 = vld [vmem:[%s993_s26 + $0x8] sm:$0xff]   ;;  %v880_v4 = vld [vmem:[%s993_s26 + $0x10] sm:$0xff]   ;;  %s293_s30 = scalar_lea.vmem %s1117_s1, %s857_s27 }
  0x11   : > { %v865_v5 = vunpack.c.l.bf16 %v864_v2  ;;  %v866_v6 = vunpack.c.h.bf16 %v864_v2  ;;  %v869_v7 = vunpack.c.l.bf16 %v879_v3  ;;  %v870_v8 = vunpack.c.h.bf16 %v879_v3  ;;  %v881_v43 = vld [vmem:[%s993_s26 + $0x18] sm:$0xff]   ;;  %v324_v63 = vld [vmem:[%s293_s30] sm:$0xf] }
  0x12   : > { %v873_v9 = vunpack.c.l.bf16 %v880_v4  ;;  %v874_v10 = vunpack.c.h.bf16 %v880_v4  ;;  %v877_v48 = vunpack.c.l.bf16 %v881_v43  ;;  %v878_v49 = vunpack.c.h.bf16 %v881_v43  ;;  %v860_v4 = vld [vmem:[%s1118_s2 + $0x8] sm:$0xff] }
  0x13   : > { %vm326_vm0 = vcmp.ge.f32.partialorder %v865_v5, 0.0  ;;  %vm327_vm1 = vcmp.ge.f32.partialorder %v866_v6, 0.0  ;;  %vm328_vm2 = vcmp.ge.f32.partialorder %v869_v7, 0.0  ;;  %vm329_vm3 = vcmp.ge.f32.partialorder %v870_v8, 0.0  ;;  %454 = vmatpush.bf16.msra.mxu0 %v860_v4 }
  0x14   : > { %v335_v11 = vmul.f32 0.1, %v865_v5  ;;  %v336_v12 = vmul.f32 0.1, %v866_v6  ;;  %v337_v13 = vmul.f32 0.1, %v869_v7  ;;  %v325_v3 = vunpack.c.l.bf16 %v324_v63 }
  0x15   : > { %v338_v14 = vmul.f32 0.1, %v870_v8  ;;  %v339_v15 = vmul.f32 0.1, %v873_v9  ;;  %v340_v19 = vmul.f32 0.1, %v874_v10 }
  0x16   : > { %v344_v16 = vsel %vm326_vm0, %v865_v5, %v335_v11  ;;  %v345_v17 = vsel %vm327_vm1, %v866_v6, %v336_v12  ;;  %v346_v18 = vsel %vm328_vm2, %v869_v7, %v337_v13  ;;  %vm330_vm4 = vcmp.ge.f32.partialorder %v873_v9, 0.0  ;;  %v859_v5 = vld [vmem:[%s1118_s2] sm:$0xff] }
  0x17   : > { %v347_v20 = vsel %vm329_vm3, %v870_v8, %v338_v14  ;;  %v353_v21 = vpack.c.bf16 %v344_v16, %v344_v16  ;;  %v354_v22 = vpack.c.bf16 %v345_v17, %v345_v17  ;;  %v355_v23 = vpack.c.bf16 %v346_v18, %v346_v18  ;;  %497 = vmatpush.bf16.msra.mxu1 %v859_v5 }
  0x18   : > { %v356_v24 = vpack.c.bf16 %v347_v20, %v347_v20  ;;  %vm331_vm5 = vcmp.ge.f32.partialorder %v874_v10, 0.0  ;;  %v348_v30 = vsel %vm330_vm4, %v873_v9, %v339_v15  ;;  %v341_v51 = vmul.f32 0.1, %v877_v48 }
  0x19   : > { %v377_v25 = vunpack.c.l.b16 %v353_v21  ;;  %v378_v26 = vunpack.c.l.b16 %v354_v22  ;;  %v379_v27 = vunpack.c.l.b16 %v355_v23  ;;  %v349_v31 = vsel %vm331_vm5, %v874_v10, %v340_v19 }
  0x1a   : > { %v380_v28 = vunpack.c.l.b16 %v356_v24  ;;  %v357_v38 = vpack.c.bf16 %v348_v30, %v348_v30  ;;  %v358_v39 = vpack.c.bf16 %v349_v31, %v349_v31  ;;  %v342_v52 = vmul.f32 0.1, %v878_v49 }
  0x1b   : > { %v386_v29 = vpack.c.b16 %v378_v26, %v377_v25  ;;  %vm332_vm9 = vcmp.ge.f32.partialorder %v877_v48, 0.0  ;;  %vm333_vm10 = vcmp.ge.f32.partialorder %v878_v49, 0.0  ;;  %v343_v7 = vmul.f32 0.1, %v325_v3 }
  0x1c   : > { %v998_v32 = vpack.c.b16 %v380_v28, %v379_v27  ;;  %v381_v45 = vunpack.c.l.b16 %v357_v38  ;;  %v382_v46 = vunpack.c.l.b16 %v358_v39  ;;  %v350_v56 = vsel %vm332_vm9, %v877_v48, %v341_v51  ;;  %v1043_v27 = vld [vmem:[%s1119_s3] ss:$0 sm:$0xff] }
  0x1d   : > { %v554_v33 = vrot.slane %v386_v29, 1  ;;  %v393_v34 = vshrl.u32 %v386_v29, 16  ;;  %v395_v35 = vshll.u32 %v386_v29, 16  ;;  %v351_v57 = vsel %vm333_vm10, %v878_v49, %v342_v52  ;;  %830 = vmatmul.msk.bf16.vlgmr.msra.gmra.mxu1 %vm434_vm6, %v386_v29 }
  0x1e   : > { %v555_v36 = vrot.slane %v998_v32, 1  ;;  %v400_v37 = vshll.u32 %v998_v32, 16  ;;  %v388_v50 = vpack.c.b16 %v382_v46, %v381_v45  ;;  %v404_v53 = vshrl.u32 %v998_v32, 16 }
  0x1f   : > { %v397_v40 = vrot.slane %v395_v35, 1  ;;  %v359_v61 = vpack.c.bf16 %v350_v56, %v350_v56  ;;  %v360_v62 = vpack.c.bf16 %v351_v57, %v351_v57  ;;  %vm334_vm11 = vcmp.ge.f32.partialorder %v325_v3, 0.0 }
  0x20   : > { %v556_v41 = vsel %vm553_vm7, %v554_v33, %v555_v36  ;;  %v402_v42 = vrot.slane %v400_v37, 1  ;;  %v408_v54 = vshll.u32 %v388_v50, 16  ;;  %v557_v55 = vrot.slane %v388_v50, 1 }
  0x21   : > { %842 = vmatmul.msk.bf16.vlgmr.msra.gmra.mxu2 %vm434_vm6, %v556_v41  ;;  %v398_v44 = vor.u32 %v397_v40, %v393_v34  ;;  %v383_v1 = vunpack.c.l.b16 %v359_v61  ;;  %v384_v2 = vunpack.c.l.b16 %v360_v62  ;;  %v412_v8 = vshrl.u32 %v388_v50, 16 }
  0x22   : > { %v406_v58 = vor.u32 %v404_v53, %v402_v42  ;;  %v410_v59 = vrot.slane %v408_v54, 1  ;;  %v558_v60 = vsel %vm553_vm7, %v555_v36, %v557_v55  ;;  %v352_v11 = vsel %vm334_vm11, %v325_v3, %v343_v7 }
  0x23   : > { %v403_v47 = vsel %vm391_vm8, %v398_v44, %v402_v42  ;;  %v389_v6 = vpack.c.b16 %v384_v2, %v383_v1  ;;  %v361_v15 = vpack.c.bf16 %v352_v11, %v352_v11 }
  0x24   : > { %850 = vmatmul.msk.bf16.vlgmr.msra.gmra.mxu3 %vm434_vm6, %v403_v47  ;;  %v411_v0 = vsel %vm391_vm8, %v406_v58, %v410_v59  ;;  %822 = vmatmul.msk.bf16.vlgmr.msra.gmra.mxu0 %vm434_vm6, %v403_v47  ;;  %v414_v12 = vor.u32 %v412_v8, %v410_v59 }
  0x25   : > { %v416_v9 = vshll.u32 %v389_v6, 16  ;;  %v559_v10 = vrot.slane %v389_v6, 1  ;;  %v385_v17 = vunpack.c.l.b16 %v361_v15  ;;  %v420_v19 = vshrl.u32 %v389_v6, 16 }
  0x27   : > { %v418_v13 = vrot.slane %v416_v9, 1  ;;  %v560_v14 = vsel %vm553_vm7, %v557_v55, %v559_v10  ;;  %v390_v18 = vpack.c.b16 %v385_v17, %v385_v17 }
  0x29   : > { %v419_v16 = vsel %vm391_vm8, %v414_v12, %v418_v13  ;;  %v424_v20 = vshll.u32 %v390_v18, 16  ;;  %v561_v21 = vrot.slane %v390_v18, 1  ;;  %v422_v22 = vor.u32 %v420_v19, %v418_v13 }
  0x2b   : > { %v426_v23 = vrot.slane %v424_v20, 1  ;;  %v562_v24 = vsel %vm553_vm7, %v559_v10, %v561_v21 }
  0x2d   : > { %831 = vmatmul.msk.bf16.gmra.mxu1 %vm434_vm6, %v998_v32  ;;  %v427_v25 = vsel %vm391_vm8, %v422_v22, %v426_v23 }
  0x31   : > { %843 = vmatmul.msk.bf16.gmra.mxu2 %vm434_vm6, %v558_v60 }
  0x34   : > { %851 = vmatmul.msk.bf16.gmra.mxu3 %vm434_vm6, %v411_v0  ;;  %823 = vmatmul.msk.bf16.gmra.mxu0 %vm434_vm6, %v411_v0 }
  0x3d   : > { %832 = vmatmul.msk.bf16.gmra.mxu1 %vm434_vm6, %v388_v50 }
  0x41   : > { %844 = vmatmul.msk.bf16.gmra.mxu2 %vm434_vm6, %v560_v14 }
  0x44   : > { %852 = vmatmul.msk.bf16.gmra.mxu3 %vm434_vm6, %v419_v16  ;;  %824 = vmatmul.msk.bf16.gmra.mxu0 %vm434_vm6, %v419_v16 }
  0x4d   : > { %833 = vmatmul.msk.bf16.gmra.mxu1 %vm434_vm6, %v389_v6 }
  0x51   : > { %845 = vmatmul.msk.bf16.gmra.mxu2 %vm434_vm6, %v562_v24 }
  0x54   : > { %853 = vmatmul.msk.bf16.gmra.mxu3 %vm434_vm6, %v427_v25  ;;  %825 = vmatmul.msk.bf16.gmra.mxu0 %vm434_vm6, %v427_v25 }
  0x9a   : > { %v499_v49 = vpop.f32.mrf.mxu1 }
  0xa1   : > { %v456_v48 = vpop.f32.mrf.mxu0 }
  0xa2   : > { %v500_v51 = vadd.f32 %v499_v49, %v456_v48  ;;  %v501_v59 = vpop.f32.mrf.mxu1 }
  0xa4   : > { %v590_v26 = vpop.f32.mrf.mxu2  ;;  %v522_v53 = vadd.f32 %v1043_v27, %v500_v51 }
  0xa6   : > { %v530_v55 = vpack.c.bf16 %v522_v53, %v522_v53 }
  0xa7   : > { %v625_v28 = vpop.f32.mrf.mxu3 }
  0xa8   : > { %v626_v29 = vadd.f32 %v625_v28, %v590_v26  ;;  %539 = vst.msk [vmem:[%s1058_s19] sm:$0xf] %vm538_vm12, %v530_v55 }
  0xa9   : > { %v458_v58 = vpop.f32.mrf.mxu0 }
  0xaa   : > { %v645_v30 = vadd.f32 %v1043_v27, %v626_v29  ;;  %v502_v61 = vadd.f32 %v501_v59, %v458_v58  ;;  %v504_v5 = vpop.f32.mrf.mxu1 }
  0xac   : > { %v592_v31 = vpop.f32.mrf.mxu2  ;;  %v653_v32 = vpack.c.bf16 %v645_v30, %v645_v30  ;;  %v523_v63 = vadd.f32 %v1043_v27, %v502_v61 }
  0xae   : > { %669 = vrot.lane.b32.xlu0 %v653_v32, %s935_s11  ;;  %v531_v1 = vpack.c.bf16 %v523_v63, %v523_v63 }
  0xaf   : > { %v627_v33 = vpop.f32.mrf.mxu3 }
  0xb0   : > { %v628_v34 = vadd.f32 %v627_v33, %v592_v31  ;;  %540 = vst.msk [vmem:[%s1058_s19 + $0x4] sm:$0xf] %vm538_vm12, %v531_v1 }
  0xb1   : > { %v461_v4 = vpop.f32.mrf.mxu0 }
  0xb2   : > { %v646_v35 = vadd.f32 %v1043_v27, %v628_v34  ;;  %v505_v7 = vadd.f32 %v504_v5, %v461_v4  ;;  %v506_v14 = vpop.f32.mrf.mxu1 }
  0xb4   : > { %v654_v36 = vpack.c.bf16 %v646_v35, %v646_v35  ;;  %v595_v37 = vpop.f32.mrf.mxu2  ;;  %v524_v9 = vadd.f32 %v1043_v27, %v505_v7 }
  0xb6   : > { %671 = vrot.lane.b32.xlu0 %v654_v36, %s935_s11  ;;  %v532_v11 = vpack.c.bf16 %v524_v9, %v524_v9 }
  0xb7   : > { %v630_v38 = vpop.f32.mrf.mxu3 }
  0xb8   : > { %v631_v39 = vadd.f32 %v630_v38, %v595_v37  ;;  %541 = vst.msk [vmem:[%s1058_s19 + $0x8] sm:$0xf] %vm538_vm12, %v532_v11 }
  0xb9   : > { %v463_v13 = vpop.f32.mrf.mxu0 }
  0xba   : > { %v647_v40 = vadd.f32 %v1043_v27, %v631_v39  ;;  %v507_v17 = vadd.f32 %v506_v14, %v463_v13  ;;  %v509_v24 = vpop.f32.mrf.mxu1 }
  0xbc   : > { %v597_v41 = vpop.f32.mrf.mxu2  ;;  %v655_v42 = vpack.c.bf16 %v647_v40, %v647_v40  ;;  %v525_v19 = vadd.f32 %v1043_v27, %v507_v17 }
  0xbe   : > { %673 = vrot.lane.b32.xlu1 %v655_v42, %s935_s11  ;;  %v533_v21 = vpack.c.bf16 %v525_v19, %v525_v19 }
  0xbf   : > { %v632_v43 = vpop.f32.mrf.mxu3 }
  0xc0   : > { %v633_v44 = vadd.f32 %v632_v43, %v597_v41  ;;  %542 = vst.msk [vmem:[%s1058_s19 + $0xc] sm:$0xf] %vm538_vm12, %v533_v21 }
  0xc1   : > { %v466_v23 = vpop.f32.mrf.mxu0 }
  0xc2   : > { %v648_v45 = vadd.f32 %v1043_v27, %v633_v44  ;;  %v510_v25 = vadd.f32 %v509_v24, %v466_v23  ;;  %v511_v30 = vpop.f32.mrf.mxu1 }
  0xc4   : > { %v656_v46 = vpack.c.bf16 %v648_v45, %v648_v45  ;;  %v600_v47 = vpop.f32.mrf.mxu2  ;;  %v526_v26 = vadd.f32 %v1043_v27, %v510_v25 }
  0xc6   : > { %675 = vrot.lane.b32.xlu1 %v656_v46, %s935_s11  ;;  %v534_v28 = vpack.c.bf16 %v526_v26, %v526_v26 }
  0xc7   : > { %v635_v50 = vpop.f32.mrf.mxu3 }
  0xc8   : > { %v636_v52 = vadd.f32 %v635_v50, %v600_v47  ;;  %543 = vst.msk [vmem:[%s1058_s19 + $0x10] sm:$0xf] %vm538_vm12, %v534_v28 }
  0xc9   : > { %v468_v29 = vpop.f32.mrf.mxu0 }
  0xca   : > { %v649_v54 = vadd.f32 %v1043_v27, %v636_v52  ;;  %v512_v31 = vadd.f32 %v511_v30, %v468_v29  ;;  %v514_v35 = vpop.f32.mrf.mxu1 }
  0xcc   : > { %v602_v56 = vpop.f32.mrf.mxu2  ;;  %v657_v57 = vpack.c.bf16 %v649_v54, %v649_v54  ;;  %v527_v32 = vadd.f32 %v1043_v27, %v512_v31 }
  0xce   : > { %677 = vrot.lane.b32.xlu2 %v657_v57, %s935_s11  ;;  %v535_v33 = vpack.c.bf16 %v527_v32, %v527_v32 }
  0xcf   : > { %v637_v60 = vpop.f32.mrf.mxu3 }
  0xd0   : > { %v638_v62 = vadd.f32 %v637_v60, %v602_v56  ;;  %544 = vst.msk [vmem:[%s1058_s19 + $0x14] sm:$0xf] %vm538_vm12, %v535_v33 }
  0xd1   : > { %v471_v34 = vpop.f32.mrf.mxu0 }
  0xd2   : > { %v650_v0 = vadd.f32 %v1043_v27, %v638_v62  ;;  %v515_v36 = vadd.f32 %v514_v35, %v471_v34  ;;  %v516_v41 = vpop.f32.mrf.mxu1 }
  0xd4   : > { %v658_v2 = vpack.c.bf16 %v650_v0, %v650_v0  ;;  %v605_v3 = vpop.f32.mrf.mxu2  ;;  %v528_v37 = vadd.f32 %v1043_v27, %v515_v36 }
  0xd6   : > { %679 = vrot.lane.b32.xlu2 %v658_v2, %s935_s11  ;;  %v536_v38 = vpack.c.bf16 %v528_v37, %v528_v37 }
  0xd7   : > { %v640_v6 = vpop.f32.mrf.mxu3 }
  0xd8   : > { %v641_v8 = vadd.f32 %v640_v6, %v605_v3  ;;  %545 = vst.msk [vmem:[%s1058_s19 + $0x18] sm:$0xf] %vm538_vm12, %v536_v38 }
  0xd9   : > { %v473_v40 = vpop.f32.mrf.mxu0 }
  0xda   : > { %v651_v10 = vadd.f32 %v1043_v27, %v641_v8  ;;  %v517_v42 = vadd.f32 %v516_v41, %v473_v40 }
  0xdc   : > { %v659_v12 = vpack.c.bf16 %v651_v10, %v651_v10  ;;  %v607_v15 = vpop.f32.mrf.mxu2  ;;  %v529_v43 = vadd.f32 %v1043_v27, %v517_v42 }
  0xde   : > { %681 = vrot.lane.b32.xlu0 %v659_v12, %s935_s11  ;;  %v537_v44 = vpack.c.bf16 %v529_v43, %v529_v43 }
  0xdf   : > { %v642_v16 = vpop.f32.mrf.mxu3 }
  0xe0   : > { %v643_v18 = vadd.f32 %v642_v16, %v607_v15  ;;  %546 = vst.msk [vmem:[%s1058_s19 + $0x1c] sm:$0xf] %vm538_vm12, %v537_v44 }
  0xe2   : > { %v652_v20 = vadd.f32 %v1043_v27, %v643_v18 }
  0xe4   : > { %v660_v22 = vpack.c.bf16 %v652_v20, %v652_v20 }
  0xe6   : > { %683 = vrot.lane.b32.xlu1 %v660_v22, %s935_s11 }
 0x120   : > { %v670_v39 = vpop.permute.xlu0 %669 }
 0x121   : > { %694 = vst.msk [vmem:[%s1058_s19] sm:$0xf] %vm693_vm13, %v670_v39 }
 0x128   : > { %v678_v45 = vpop.permute.xlu2 %677  ;;  %v672_v46 = vpop.permute.xlu0 %671 }
 0x129   : > { %698 = vst.msk [vmem:[%s1058_s19 + $0x10] sm:$0xf] %vm693_vm13, %v678_v45 }
 0x12a   : > { %695 = vst.msk [vmem:[%s1058_s19 + $0x4] sm:$0xf] %vm693_vm13, %v672_v46 }
 0x130   : > { %v680_v47 = vpop.permute.xlu2 %679  ;;  %v674_v48 = vpop.permute.xlu1 %673 }
 0x131   : > { %699 = vst.msk [vmem:[%s1058_s19 + $0x14] sm:$0xf] %vm693_vm13, %v680_v47 }
 0x132   : > { %696 = vst.msk [vmem:[%s1058_s19 + $0x8] sm:$0xf] %vm693_vm13, %v674_v48 }
 0x138   : > { %v676_v49 = vpop.permute.xlu1 %675 }
 0x139   : > { %697 = vst.msk [vmem:[%s1058_s19 + $0xc] sm:$0xf] %vm693_vm13, %v676_v49 }
 0x150   : > { %v682_v27 = vpop.permute.xlu0 %681 }
 0x151   : > { %700 = vst.msk [vmem:[%s1058_s19 + $0x18] sm:$0xf] %vm693_vm13, %v682_v27 }
 0x158   : > { %v684_v50 = vpop.permute.xlu1 %683 }
 0x159   : > { %701 = vst.msk [vmem:[%s1058_s19 + $0x1c] sm:$0xf] %vm693_vm13, %v684_v50 }
 0x15a PF: > { %s14_s17 = sadd.s32 1, %s933_s17   ;;  %s1121_s15 = smov %s929_s16 }
 0x15b   : > { %p11_p5 = scmp.ge.s32.totalorder %s14_s17, 4   ;;  %s1122_s16 = smov %s1124_s18 }
 0x15d   :  { %13 = sbr.rel (!%p11_p5) target bundleno = 2 (0x2), region = 72 }

// kernel: _lambda_.30
= control target key start
LH: loop header
LB: loop body
LE: loop exit
PB: predicated region body
PF: predicated region fallthrough
CT: control target
= control target key end

     0   :  { %s730_s15 = smov 0   ;;  %s732_s16 = smov 0   ;;  %s886_s0 = inlined_call_operand.vmem [shape: f32[2,128,1], index: 0, kind: input, shape index: {}]   ;;  %s887_s1 = inlined_call_operand.vmem [shape: f32[1,1,1,8], index: 1, kind: input, shape index: {}]   ;;  %s888_s2 = inlined_call_operand.vmem [shape: f32[1,8], index: 2, kind: input, shape index: {}]   ;;  %s889_s3 = inlined_call_operand.vmem [shape: bf16[2,128,8], index: 3, kind: input, shape index: {}]   ;;  %s890_s4 = inlined_call_operand.vmem [shape: bf16[2,128,8], index: 4, kind: output, shape index: {}]  }
   0x1   :  { %s734_s17 = smov 0  }
   0x2 LB: > { %s26_s18 = sadd.s32 1, %s698_s16  ;;  %p599_p0 = scmp.ge.s32.totalorder %s702_s17, 1  ;;  %s702_s17 = sphi %s734_s17, %s14_s17   ;;  %s698_s16 = sphi %s732_s16, %s892_s16   ;;  %s694_s15 = sphi %s730_s15, %s891_s15  }
   0x3   : > { %p28_p1 = scmp.ge.s32.totalorder %s26_s18, 2  ;;  %p200_p2 = scmp.lt.s32.totalorder %s702_s17, 3 }
   0x5   : > { %s894_s18 = smov (%p28_p1, %s26_s18), 0  ;;  %p201_p3 = pnand %p599_p0, %p200_p2 }
   0x6   : > { %p244_p4 = scmp.lt.s32.totalorder (!%p201_p3), %s694_s15, 1 }
   0x7   : > { %204 = sbr.rel (%p201_p3) target bundleno = 181 (0xb5), region = 36 }
   0xc   : > { %v704_v0 = vmov 0   ;;  %s896_s15 = smov (!%p244_p4, %s694_s15), 1  ;;  %v782_v18 = vld [vmem:[%s887_s1] ss:$0 sm:$0xff]  ;;  %vm473_vm0 = vcmask 60416  }
   0xd   : > { %677 = vset.pattern.permute.xlu2 %v704_v0  ;;  %676 = vset.pattern.permute.xlu1 %v704_v0  ;;  %s608_s19 = sshll.u32 %s896_s15, 7  ;;  %s609_s23 = sshll.u32 %s896_s15, 6  ;;  %v787_v20 = vld [vmem:[%s888_s2] ss:$0 sm:$0xff] }
   0xe   : > { %675 = vset.pattern.permute.xlu0 %v704_v0  ;;  %s754_s22 = scalar_lea.vmem %s886_s0, %s608_s19  ;;  %s776_s26 = scalar_lea.vmem %s889_s3, %s609_s23 }
   0xf   : > { %v277_v1 = vld [vmem:[%s754_s22 + $0x20] sm:$0xff]  ;;  %v275_v2 = vld [vmem:[%s754_s22 + $0x10] sm:$0xff]  ;;  %v278_v4 = vld [vmem:[%s754_s22 + $0x28] sm:$0xff]  ;;  %s794_s7 = scalar_lea.vmem %s890_s4, %s609_s23 }
  0x10   : > { %v273_v3 = vld [vmem:[%s754_s22] sm:$0xff]  ;;  %313 = vperm.xlu2 %677, %v277_v1   ;;  %303 = vperm.xlu1 %676, %v275_v2   ;;  %v276_v5 = vld [vmem:[%s754_s22 + $0x18] sm:$0xff]  ;;  %v274_v6 = vld [vmem:[%s754_s22 + $0x8] sm:$0xff] }
  0x11   : > { %293 = vperm.xlu0 %675, %v273_v3   ;;  %v281_v7 = vld [vmem:[%s754_s22 + $0x40] sm:$0xff]  ;;  %v280_v8 = vld [vmem:[%s754_s22 + $0x38] sm:$0xff]  ;;  %v279_v9 = vld [vmem:[%s754_s22 + $0x30] sm:$0xff] }
  0x12   : > { %v284_v10 = vld [vmem:[%s754_s22 + $0x58] sm:$0xff]  ;;  %v283_v11 = vld [vmem:[%s754_s22 + $0x50] sm:$0xff]  ;;  %v282_v12 = vld [vmem:[%s754_s22 + $0x48] sm:$0xff] }
  0x13   : > { %v287_v13 = vld [vmem:[%s754_s22 + $0x70] sm:$0xff]  ;;  %v286_v14 = vld [vmem:[%s754_s22 + $0x68] sm:$0xff]  ;;  %v285_v15 = vld [vmem:[%s754_s22 + $0x60] sm:$0xff] }
  0x14   : > { %v288_v16 = vld [vmem:[%s754_s22 + $0x78] sm:$0xff]  ;;  %v644_v17 = vld [vmem:[%s776_s26 + $0x10] sm:$0xff]   ;;  %v801_v31 = vld [vmem:[%s776_s26 + $0x20] sm:$0xff]  }
  0x15   : > { %v621_v21 = vunpack.c.l.bf16 %v644_v17  ;;  %v622_v27 = vunpack.c.h.bf16 %v644_v17  ;;  %v629_v34 = vunpack.c.l.bf16 %v801_v31  ;;  %v809_v38 = vld [vmem:[%s776_s26 + $0x28] sm:$0xff]   ;;  %v612_v41 = vld [vmem:[%s776_s26] sm:$0xff]   ;;  %v823_v57 = vld [vmem:[%s776_s26 + $0x38] sm:$0xff]  }
  0x16   : > { %v643_v39 = vld [vmem:[%s776_s26 + $0x8] sm:$0xff]   ;;  %v634_v44 = vunpack.c.h.bf16 %v809_v38  ;;  %v613_v49 = vunpack.c.l.bf16 %v612_v41  ;;  %v641_v63 = vunpack.c.l.bf16 %v823_v57 }
  0x17   : > { %v617_v46 = vunpack.c.l.bf16 %v643_v39  ;;  %v618_v1 = vunpack.c.h.bf16 %v643_v39 }
  0x18   : > { %318 = vperm.xlu2 %677, %v278_v4   ;;  %308 = vperm.xlu1 %676, %v276_v5   ;;  %v614_v4 = vunpack.c.h.bf16 %v612_v41 }
  0x19   : > { %298 = vperm.xlu0 %675, %v274_v6  }
  0x20   : > { %333 = vperm.xlu2 %677, %v281_v7   ;;  %328 = vperm.xlu1 %676, %v280_v8  }
  0x21   : > { %323 = vperm.xlu0 %675, %v279_v9  }
  0x28   : > { %348 = vperm.xlu2 %677, %v284_v10   ;;  %343 = vperm.xlu1 %676, %v283_v11  }
  0x29   : > { %338 = vperm.xlu0 %675, %v282_v12   ;;  %v645_v12 = vld [vmem:[%s776_s26 + $0x18] sm:$0xff]  }
  0x2a   : > { %v626_v17 = vunpack.c.h.bf16 %v645_v12 }
  0x30   : > { %363 = vperm.xlu2 %677, %v287_v13   ;;  %358 = vperm.xlu1 %676, %v286_v14  }
  0x31   : > { %353 = vperm.xlu0 %675, %v285_v15  }
  0x39   : > { %368 = vperm.xlu0 %675, %v288_v16  }
  0x6a   : > { %v314_v19 = vpop.permute.xlu2 %313 }
  0x6b   : > { %v378_v22 = vmul.f32 %v782_v18, %v314_v19 }
  0x6d   : > { %v397_v23 = vadd.f32 %v787_v20, %v378_v22  ;;  %v625_v22 = vunpack.c.l.bf16 %v645_v12 }
  0x6f   : > { %v445_v24 = vadd.f32 %v621_v21, %v397_v23 }
  0x71   : > { %v461_v25 = vpack.c.bf16 %v445_v24, %v445_v24 }
  0x72   : > { %v319_v26 = vpop.permute.xlu2 %318 }
  0x73   : > { %478 = vst.msk [vmem:[%s794_s7 + $0x10] sm:$0xf] %vm473_vm0, %v461_v25  ;;  %v379_v28 = vmul.f32 %v782_v18, %v319_v26 }
  0x75   : > { %v398_v29 = vadd.f32 %v787_v20, %v379_v28 }
  0x77   : > { %v446_v30 = vadd.f32 %v622_v27, %v398_v29 }
  0x79   : > { %v462_v32 = vpack.c.bf16 %v446_v30, %v446_v30 }
  0x7a   : > { %v334_v33 = vpop.permute.xlu2 %333 }
  0x7b   : > { %479 = vst.msk [vmem:[%s794_s7 + $0x14] sm:$0xf] %vm473_vm0, %v462_v32  ;;  %v382_v35 = vmul.f32 %v782_v18, %v334_v33  ;;  %v633_v32 = vunpack.c.l.bf16 %v809_v38 }
  0x7d   : > { %v401_v36 = vadd.f32 %v787_v20, %v382_v35  ;;  %v630_v35 = vunpack.c.h.bf16 %v801_v31 }
  0x7f   : > { %v449_v37 = vadd.f32 %v629_v34, %v401_v36 }
  0x81   : > { %v465_v40 = vpack.c.bf16 %v449_v37, %v449_v37 }
  0x82   : > { %v349_v42 = vpop.permute.xlu2 %348  ;;  %v304_v43 = vpop.permute.xlu1 %303 }
  0x83   : > { %482 = vst.msk [vmem:[%s794_s7 + $0x20] sm:$0xf] %vm473_vm0, %v465_v40  ;;  %v385_v45 = vmul.f32 %v782_v18, %v349_v42  ;;  %v376_v47 = vmul.f32 %v782_v18, %v304_v43  ;;  %v294_v48 = vpop.permute.xlu0 %293  ;;  %v648_v42 = vld [vmem:[%s776_s26 + $0x30] sm:$0xff]  }
  0x84   : > { %v374_v50 = vmul.f32 %v782_v18, %v294_v48 }
  0x85   : > { %v404_v51 = vadd.f32 %v787_v20, %v385_v45  ;;  %v395_v52 = vadd.f32 %v787_v20, %v376_v47  ;;  %v638_v45 = vunpack.c.h.bf16 %v648_v42  ;;  %v637_v47 = vunpack.c.l.bf16 %v648_v42 }
  0x86   : > { %v393_v53 = vadd.f32 %v787_v20, %v374_v50 }
  0x87   : > { %v452_v54 = vadd.f32 %v634_v44, %v404_v51  ;;  %v443_v55 = vadd.f32 %v617_v46, %v395_v52 }
  0x88   : > { %v441_v56 = vadd.f32 %v613_v49, %v393_v53 }
  0x89   : > { %v468_v58 = vpack.c.bf16 %v452_v54, %v452_v54  ;;  %v459_v59 = vpack.c.bf16 %v443_v55, %v443_v55 }
  0x8a   : > { %v457_v60 = vpack.c.bf16 %v441_v56, %v441_v56  ;;  %v364_v61 = vpop.permute.xlu2 %363  ;;  %v309_v62 = vpop.permute.xlu1 %308  ;;  %v642_v56 = vunpack.c.h.bf16 %v823_v57 }
  0x8b   : > { %485 = vst.msk [vmem:[%s794_s7 + $0x2c] sm:$0xf] %vm473_vm0, %v468_v58  ;;  %v388_v0 = vmul.f32 %v782_v18, %v364_v61  ;;  %v377_v2 = vmul.f32 %v782_v18, %v309_v62  ;;  %v299_v3 = vpop.permute.xlu0 %298 }
  0x8c   : > { %476 = vst.msk [vmem:[%s794_s7 + $0x8] sm:$0xf] %vm473_vm0, %v459_v59  ;;  %v375_v5 = vmul.f32 %v782_v18, %v299_v3 }
  0x8d   : > { %474 = vst.msk [vmem:[%s794_s7] sm:$0xf] %vm473_vm0, %v457_v60  ;;  %v407_v6 = vadd.f32 %v787_v20, %v388_v0  ;;  %v396_v7 = vadd.f32 %v787_v20, %v377_v2 }
  0x8e   : > { %v394_v8 = vadd.f32 %v787_v20, %v375_v5 }
  0x8f   : > { %v455_v9 = vadd.f32 %v641_v63, %v407_v6  ;;  %v444_v10 = vadd.f32 %v618_v1, %v396_v7 }
  0x90   : > { %v442_v11 = vadd.f32 %v614_v4, %v394_v8 }
  0x91   : > { %v471_v13 = vpack.c.bf16 %v455_v9, %v455_v9  ;;  %v460_v14 = vpack.c.bf16 %v444_v10, %v444_v10 }
  0x92   : > { %v458_v15 = vpack.c.bf16 %v442_v11, %v442_v11  ;;  %v329_v16 = vpop.permute.xlu1 %328 }
  0x93   : > { %488 = vst.msk [vmem:[%s794_s7 + $0x38] sm:$0xf] %vm473_vm0, %v471_v13  ;;  %v381_v19 = vmul.f32 %v782_v18, %v329_v16  ;;  %v324_v21 = vpop.permute.xlu0 %323 }
  0x94   : > { %477 = vst.msk [vmem:[%s794_s7 + $0xc] sm:$0xf] %vm473_vm0, %v460_v14  ;;  %v380_v23 = vmul.f32 %v782_v18, %v324_v21 }
  0x95   : > { %475 = vst.msk [vmem:[%s794_s7 + $0x4] sm:$0xf] %vm473_vm0, %v458_v15  ;;  %v400_v24 = vadd.f32 %v787_v20, %v381_v19 }
  0x96   : > { %v399_v25 = vadd.f32 %v787_v20, %v380_v23 }
  0x97   : > { %v448_v26 = vadd.f32 %v626_v17, %v400_v24 }
  0x98   : > { %v447_v27 = vadd.f32 %v625_v22, %v399_v25 }
  0x99   : > { %v464_v28 = vpack.c.bf16 %v448_v26, %v448_v26 }
  0x9a   : > { %v463_v29 = vpack.c.bf16 %v447_v27, %v447_v27  ;;  %v344_v30 = vpop.permute.xlu1 %343 }
  0x9b   : > { %481 = vst.msk [vmem:[%s794_s7 + $0x1c] sm:$0xf] %vm473_vm0, %v464_v28  ;;  %v384_v33 = vmul.f32 %v782_v18, %v344_v30  ;;  %v339_v34 = vpop.permute.xlu0 %338 }
  0x9c   : > { %480 = vst.msk [vmem:[%s794_s7 + $0x18] sm:$0xf] %vm473_vm0, %v463_v29  ;;  %v383_v36 = vmul.f32 %v782_v18, %v339_v34 }
  0x9d   : > { %v403_v37 = vadd.f32 %v787_v20, %v384_v33 }
  0x9e   : > { %v402_v39 = vadd.f32 %v787_v20, %v383_v36 }
  0x9f   : > { %v451_v40 = vadd.f32 %v633_v32, %v403_v37 }
  0xa0   : > { %v450_v41 = vadd.f32 %v630_v35, %v402_v39 }
  0xa1   : > { %v467_v43 = vpack.c.bf16 %v451_v40, %v451_v40 }
  0xa2   : > { %v466_v38 = vpack.c.bf16 %v450_v41, %v450_v41  ;;  %v359_v44 = vpop.permute.xlu1 %358 }
  0xa3   : > { %484 = vst.msk [vmem:[%s794_s7 + $0x28] sm:$0xf] %vm473_vm0, %v467_v43  ;;  %v387_v46 = vmul.f32 %v782_v18, %v359_v44  ;;  %v354_v31 = vpop.permute.xlu0 %353 }
  0xa4   : > { %483 = vst.msk [vmem:[%s794_s7 + $0x24] sm:$0xf] %vm473_vm0, %v466_v38  ;;  %v386_v48 = vmul.f32 %v782_v18, %v354_v31 }
  0xa5   : > { %v406_v49 = vadd.f32 %v787_v20, %v387_v46 }
  0xa6   : > { %v405_v50 = vadd.f32 %v787_v20, %v386_v48 }
  0xa7   : > { %v454_v51 = vadd.f32 %v638_v45, %v406_v49 }
  0xa8   : > { %v453_v52 = vadd.f32 %v637_v47, %v405_v50 }
  0xa9   : > { %v470_v53 = vpack.c.bf16 %v454_v51, %v454_v51 }
  0xaa   : > { %v469_v54 = vpack.c.bf16 %v453_v52, %v453_v52 }
  0xab   : > { %487 = vst.msk [vmem:[%s794_s7 + $0x34] sm:$0xf] %vm473_vm0, %v470_v53  ;;  %v369_v55 = vpop.permute.xlu0 %368 }
  0xac   : > { %486 = vst.msk [vmem:[%s794_s7 + $0x30] sm:$0xf] %vm473_vm0, %v469_v54  ;;  %v389_v58 = vmul.f32 %v782_v18, %v369_v55 }
  0xae   : > { %v408_v59 = vadd.f32 %v787_v20, %v389_v58 }
  0xb0   : > { %v456_v60 = vadd.f32 %v642_v56, %v408_v59 }
  0xb2   : > { %v472_v61 = vpack.c.bf16 %v456_v60, %v456_v60 }
  0xb4   : > { %489 = vst.msk [vmem:[%s794_s7 + $0x3c] sm:$0xf] %vm473_vm0, %v472_v61 }
  0xb5 PF: > { %s14_s17 = sadd.s32 1, %s702_s17   ;;  %s891_s15 = smov %s698_s16 }
  0xb6   : > { %p11_p5 = scmp.ge.s32.totalorder %s14_s17, 4   ;;  %s892_s16 = smov %s894_s18 }
  0xb8   :  { %13 = sbr.rel (!%p11_p5) target bundleno = 2 (0x2), region = 69 }

// kernel: _lambda_.31
= control target key start
LH: loop header
LB: loop body
LE: loop exit
PB: predicated region body
PF: predicated region fallthrough
CT: control target
= control target key end

     0   :  { %s1100_s15 = smov 0   ;;  %s1102_s16 = smov 0   ;;  %s1314_s0 = inlined_call_operand.vmem [shape: bf16[2,144,8], index: 0, kind: input, shape index: {}, may-alias: {0,1}]   ;;  %s1315_s1 = inlined_call_operand.vmem [shape: bf16[2,144,8], index: 1, kind: input, shape index: {}, may-alias: {0,1}]   ;;  %s1316_s2 = inlined_call_operand.vmem [shape: bf16[1,3,8,8], index: 2, kind: input, shape index: {}]   ;;  %s1317_s3 = inlined_call_operand.vmem [shape: f32[1,8], index: 3, kind: input, shape index: {}]   ;;  %s1318_s4 = inlined_call_operand.vmem [shape: bf16[2,128,8], index: 4, kind: output, shape index: {}]  }
   0x1   :  { %s1104_s17 = smov 0  }
   0x2 LB: > { %s26_s18 = sadd.s32 1, %s1069_s16  ;;  %p945_p0 = scmp.ge.s32.totalorder %s1073_s17, 1  ;;  %s1073_s17 = sphi %s1104_s17, %s14_s17   ;;  %s1069_s16 = sphi %s1102_s16, %s1320_s16   ;;  %s1065_s15 = sphi %s1100_s15, %s1319_s15  }
   0x3   : > { %p28_p1 = scmp.ge.s32.totalorder %s26_s18, 2  ;;  %p216_p2 = scmp.lt.s32.totalorder %s1073_s17, 3 }
   0x5   : > { %s1322_s18 = smov (%p28_p1, %s26_s18), 0  ;;  %p217_p3 = pnand %p945_p0, %p216_p2 }
   0x6   : > { %p270_p4 = scmp.lt.s32.totalorder (!%p217_p3), %s1065_s15, 1 }
   0x7   : > { %220 = sbr.rel (%p217_p3) target bundleno = 268 (0x10c), region = 36 }
   0xc   : > { %v411_v0 = vld [vmem:[%s1316_s2] sm:$0xf]  ;;  %vm551_vm0 = vcmask 1043456   ;;  %v967_v1 = vld [vmem:[%s1316_s2 + $0x8] sm:$0xf]  ;;  %s1324_s15 = smov (!%p270_p4, %s1065_s15), 1 }
   0xd   : > { %v621_v2 = vsel %vm551_vm0, %v411_v0, 0  ;;  %v1124_v3 = vsel %vm551_vm0, %v967_v1, 0  ;;  %v950_v4 = vld [vmem:[%s1316_s2 + $0x4] sm:$0xf]  ;;  %s1023_s25 = smul.u32 72, %s1324_s15  ;;  %vm526_vm1 = vcmask 64512  }
   0xe   : > { %630 = vmatpush.bf16.msra.mxu1 %v621_v2  ;;  %726 = vmatpush.bf16.msra.mxu2 %v1124_v3  ;;  %v553_v5 = vsel %vm551_vm0, %v950_v4, 0  ;;  %vm674_vm6 = vcmask 1046528   ;;  %vm457_vm9 = vsmask.f32 7424  ;;  %s980_s9 = sshll.u32 %s1324_s15, 6 }
   0xf   : > { %562 = vmatpush.bf16.msra.mxu0 %v553_v5  ;;  %1020 = vmatpush.bf16.msra.mxu3 %v553_v5  ;;  %s1138_s28 = scalar_lea.vmem %s1314_s0, %s1023_s25  ;;  %s979_s29 = sadd.s32 64, %s1023_s25 }
  0x10   : > { %v982_v6 = vld [vmem:[%s1138_s28] sm:$0xff]   ;;  %v1013_v7 = vld [vmem:[%s1138_s28 + $0x8] sm:$0xff]   ;;  %v1018_v8 = vld [vmem:[%s1138_s28 + $0x30] sm:$0xff]   ;;  %s293_s6 = scalar_lea.vmem %s1315_s1, %s979_s29  ;;  %s1244_s12 = scalar_lea.vmem %s1318_s4, %s980_s9 }
  0x11   : > { %v983_v9 = vunpack.c.l.bf16 %v982_v6  ;;  %v984_v10 = vunpack.c.h.bf16 %v982_v6  ;;  %v987_v11 = vunpack.c.l.bf16 %v1013_v7  ;;  %v988_v12 = vunpack.c.h.bf16 %v1013_v7  ;;  %v1019_v13 = vld [vmem:[%s1138_s28 + $0x38] sm:$0xff]   ;;  %v1014_v30 = vld [vmem:[%s1138_s28 + $0x10] sm:$0xff]   ;;  %v340_v63 = vld [vmem:[%s293_s6] sm:$0xf] }
  0x12   : > { %v1007_v14 = vunpack.c.l.bf16 %v1018_v8  ;;  %v1008_v15 = vunpack.c.h.bf16 %v1018_v8  ;;  %v1011_v16 = vunpack.c.l.bf16 %v1019_v13  ;;  %v1012_v17 = vunpack.c.h.bf16 %v1019_v13 }
  0x13   : > { %1021 = vmatpush.bf16.msrb.mxu3 %v621_v2  ;;  %vm342_vm2 = vcmp.ge.f32.partialorder %v983_v9, 0.0  ;;  %vm343_vm3 = vcmp.ge.f32.partialorder %v984_v10, 0.0  ;;  %v359_v18 = vmul.f32 0.1, %v983_v9  ;;  %v360_v19 = vmul.f32 0.1, %v984_v10 }
  0x14   : > { %vm344_vm4 = vcmp.ge.f32.partialorder %v987_v11, 0.0  ;;  %vm345_vm5 = vcmp.ge.f32.partialorder %v988_v12, 0.0  ;;  %v361_v20 = vmul.f32 0.1, %v987_v11  ;;  %v362_v21 = vmul.f32 0.1, %v988_v12 }
  0x15   : > { %v376_v22 = vsel %vm342_vm2, %v983_v9, %v359_v18  ;;  %v377_v23 = vsel %vm343_vm3, %v984_v10, %v360_v19  ;;  %vm354_vm7 = vcmp.ge.f32.partialorder %v1007_v14, 0.0  ;;  %vm355_vm8 = vcmp.ge.f32.partialorder %v1008_v15, 0.0  ;;  %v1015_v10 = vld [vmem:[%s1138_s28 + $0x18] sm:$0xff]  }
  0x16   : > { %v393_v24 = vpack.c.bf16 %v376_v22, %v376_v22  ;;  %v394_v25 = vpack.c.bf16 %v377_v23, %v377_v23  ;;  %v378_v26 = vsel %vm344_vm4, %v987_v11, %v361_v20  ;;  %v379_v27 = vsel %vm345_vm5, %v988_v12, %v362_v21 }
  0x17   : > { %v395_v28 = vpack.c.bf16 %v378_v26, %v378_v26  ;;  %v396_v29 = vpack.c.bf16 %v379_v27, %v379_v27  ;;  %vm356_vm10 = vcmp.ge.f32.partialorder %v1011_v16, 0.0  ;;  %vm357_vm11 = vcmp.ge.f32.partialorder %v1012_v17, 0.0 }
  0x18   : > { %v431_v31 = vunpack.c.l.b16 %v393_v24  ;;  %v432_v32 = vunpack.c.l.b16 %v394_v25  ;;  %v371_v33 = vmul.f32 0.1, %v1007_v14  ;;  %v372_v34 = vmul.f32 0.1, %v1008_v15  ;;  %v1016_v24 = vld [vmem:[%s1138_s28 + $0x20] sm:$0xff]  }
  0x19   : > { %v433_v35 = vunpack.c.l.b16 %v395_v28  ;;  %v434_v36 = vunpack.c.l.b16 %v396_v29  ;;  %v373_v37 = vmul.f32 0.1, %v1011_v16  ;;  %v374_v38 = vmul.f32 0.1, %v1012_v17 }
  0x1a   : > { %v448_v39 = vpack.c.b16 %v432_v32, %v431_v31  ;;  %v388_v40 = vsel %vm354_vm7, %v1007_v14, %v371_v33  ;;  %v389_v41 = vsel %vm355_vm8, %v1008_v15, %v372_v34  ;;  %v991_v42 = vunpack.c.l.bf16 %v1014_v30 }
  0x1b   : > { %v1149_v43 = vpack.c.b16 %v434_v36, %v433_v35  ;;  %v390_v44 = vsel %vm356_vm10, %v1011_v16, %v373_v37  ;;  %v391_v45 = vsel %vm357_vm11, %v1012_v17, %v374_v38  ;;  %v405_v46 = vpack.c.bf16 %v388_v40, %v388_v40 }
  0x1c   : > { %959 = vmatmul.msk.bf16.vlgmr.msra.gmra.mxu1 %vm526_vm1, %v448_v39  ;;  %v675_v47 = vrot.slane %v448_v39, 1  ;;  %v459_v48 = vshrl.u32 %v448_v39, 16  ;;  %v461_v49 = vshll.u32 %v448_v39, 16  ;;  %v406_v50 = vpack.c.bf16 %v389_v41, %v389_v41 }
  0x1d   : > { %v676_v51 = vrot.slane %v1149_v43, 1  ;;  %v466_v52 = vshll.u32 %v1149_v43, 16  ;;  %v407_v53 = vpack.c.bf16 %v390_v44, %v390_v44  ;;  %v408_v54 = vpack.c.bf16 %v391_v45, %v391_v45 }
  0x1e   : > { %v463_v55 = vrot.slane %v461_v49, 1  ;;  %v443_v56 = vunpack.c.l.b16 %v405_v46  ;;  %v444_v57 = vunpack.c.l.b16 %v406_v50  ;;  %v992_v58 = vunpack.c.h.bf16 %v1014_v30 }
  0x1f   : > { %v677_v59 = vsel %vm674_vm6, %v675_v47, %v676_v51  ;;  %v468_v60 = vrot.slane %v466_v52, 1  ;;  %v445_v61 = vunpack.c.l.b16 %v407_v53  ;;  %v446_v62 = vunpack.c.l.b16 %v408_v54 }
  0x20   : > { %968 = vmatmul.msk.bf16.vlgmr.msra.gmra.mxu2 %vm526_vm1, %v677_v59  ;;  %v464_v0 = vor.u32 %v463_v55, %v459_v48  ;;  %v1163_v1 = vpack.c.b16 %v444_v57, %v443_v56  ;;  %vm346_vm12 = vcmp.ge.f32.partialorder %v991_v42, 0.0  ;;  %vm347_vm13 = vcmp.ge.f32.partialorder %v992_v58, 0.0 }
  0x21   : > { %v1165_v2 = vpack.c.b16 %v446_v62, %v445_v61  ;;  %v363_v4 = vmul.f32 0.1, %v991_v42  ;;  %v364_v5 = vmul.f32 0.1, %v992_v58  ;;  %v341_v9 = vunpack.c.l.bf16 %v340_v63  ;;  %v1017_v61 = vld [vmem:[%s1138_s28 + $0x28] sm:$0xff]  }
  0x22   : > { %v469_v6 = vsel %vm457_vm9, %v464_v0, %v468_v60  ;;  %v506_v7 = vshll.u32 %v1163_v1, 16  ;;  %v510_v8 = vshrl.u32 %v1163_v1, 16  ;;  %v995_v19 = vunpack.c.l.bf16 %v1015_v10 }
  0x23   : > { %951 = vmatmul.msk.bf16.vlgmr.msra.gmra.mxu0 %vm526_vm1, %v469_v6  ;;  %v514_v11 = vshll.u32 %v1165_v2, 16  ;;  %v380_v12 = vsel %vm346_vm12, %v991_v42, %v363_v4  ;;  %v381_v13 = vsel %vm347_vm13, %v992_v58, %v364_v5  ;;  %vm358_vm14 = vcmp.ge.f32.partialorder %v341_v9, 0.0 }
  0x24   : > { %v1173_v14 = vrot.slane %v506_v7, 1  ;;  %v397_v15 = vpack.c.bf16 %v380_v12, %v380_v12  ;;  %v398_v16 = vpack.c.bf16 %v381_v13, %v381_v13  ;;  %v375_v18 = vmul.f32 0.1, %v341_v9 }
  0x25   : > { %v516_v17 = vrot.slane %v514_v11, 1  ;;  %v996_v23 = vunpack.c.h.bf16 %v1015_v10  ;;  %v470_v25 = vshrl.u32 %v1149_v43, 16  ;;  %vm348_vm15 = vcmp.ge.f32.partialorder %v995_v19, 0.0 }
  0x26   : > { %v512_v20 = vor.u32 %v510_v8, %v1173_v14  ;;  %v435_v21 = vunpack.c.l.b16 %v397_v15  ;;  %v436_v22 = vunpack.c.l.b16 %v398_v16  ;;  %v392_v26 = vsel %vm358_vm14, %v341_v9, %v375_v18 }
  0x27   : > { %v365_v27 = vmul.f32 0.1, %v995_v19  ;;  %v409_v30 = vpack.c.bf16 %v392_v26, %v392_v26  ;;  %vm349_vm0 = vcmp.ge.f32.partialorder %v996_v23, 0.0  ;;  %v366_v31 = vmul.f32 0.1, %v996_v23 }
  0x28   : > { %v517_v28 = vsel %vm457_vm9, %v512_v20, %v516_v17  ;;  %v1179_v29 = vpack.c.b16 %v436_v22, %v435_v21  ;;  %v999_v33 = vunpack.c.l.bf16 %v1016_v24  ;;  %v1000_v34 = vunpack.c.h.bf16 %v1016_v24 }
  0x29   : > { %957 = vmatmul.msk.bf16.vlgmr.msra.gmra.mxu3 %vm526_vm1, %v517_v28  ;;  %v382_v32 = vsel %vm348_vm15, %v995_v19, %v365_v27  ;;  %v447_v37 = vunpack.c.l.b16 %v409_v30  ;;  %v472_v38 = vor.u32 %v470_v25, %v468_v60  ;;  %v383_v39 = vsel %vm349_vm0, %v996_v23, %v366_v31 }
  0x2a   : > { %v678_v35 = vrot.slane %v1179_v29, 1  ;;  %v474_v36 = vshll.u32 %v1179_v29, 16  ;;  %1022 = vmatpush.bf16.msra.mxu3 %v1124_v3  ;;  %v399_v40 = vpack.c.bf16 %v382_v32, %v382_v32  ;;  %vm350_vm2 = vcmp.ge.f32.partialorder %v999_v33, 0.0 }
  0x2b   : > { %v1187_v42 = vpack.c.b16 %v447_v37, %v447_v37  ;;  %vm351_vm3 = vcmp.ge.f32.partialorder %v1000_v34, 0.0  ;;  %v400_v45 = vpack.c.bf16 %v383_v39, %v383_v39  ;;  %v367_v46 = vmul.f32 0.1, %v999_v33 }
  0x2c   : > { %960 = vmatmul.msk.bf16.gmra.mxu1 %vm526_vm1, %v1149_v43  ;;  %v476_v41 = vrot.slane %v474_v36, 1  ;;  %v679_v44 = vsel %vm674_vm6, %v676_v51, %v678_v35  ;;  %v368_v47 = vmul.f32 0.1, %v1000_v34  ;;  %v518_v3 = vshrl.u32 %v1165_v2, 16 }
  0x2d   : > { %v522_v48 = vshll.u32 %v1187_v42, 16  ;;  %v384_v49 = vsel %vm350_vm2, %v999_v33, %v367_v46  ;;  %v437_v53 = vunpack.c.l.b16 %v399_v40  ;;  %v438_v54 = vunpack.c.l.b16 %v400_v45  ;;  %v1237_v46 = vld [vmem:[%s1317_s3] ss:$0 sm:$0xff] }
  0x2e   : > { %v385_v50 = vsel %vm351_vm3, %v1000_v34, %v368_v47  ;;  %v477_v52 = vsel %vm457_vm9, %v472_v38, %v476_v41  ;;  %v520_v55 = vor.u32 %v518_v3, %v516_v17  ;;  %v401_v56 = vpack.c.bf16 %v384_v49, %v384_v49 }
  0x2f   : > { %v524_v43 = vrot.slane %v522_v48, 1  ;;  %v402_v51 = vpack.c.bf16 %v385_v50, %v385_v50  ;;  %v451_v57 = vpack.c.b16 %v438_v54, %v437_v53  ;;  %v478_v62 = vshrl.u32 %v1179_v29, 16 }
  0x30   : > { %969 = vmatmul.msk.bf16.gmra.mxu2 %vm526_vm1, %v679_v44  ;;  %v439_v59 = vunpack.c.l.b16 %v401_v56  ;;  %v1003_v63 = vunpack.c.l.bf16 %v1017_v61  ;;  %v1004_v0 = vunpack.c.h.bf16 %v1017_v61  ;;  %v686_v28 = vrot.slane %v1163_v1, 1 }
  0x31   : > { %v525_v58 = vsel %vm457_vm9, %v520_v55, %v524_v43  ;;  %v440_v60 = vunpack.c.l.b16 %v402_v51  ;;  %v482_v4 = vshll.u32 %v451_v57, 16  ;;  %v680_v5 = vrot.slane %v451_v57, 1 }
  0x32   : > { %v369_v6 = vmul.f32 0.1, %v1003_v63  ;;  %v370_v7 = vmul.f32 0.1, %v1004_v0  ;;  %vm352_vm4 = vcmp.ge.f32.partialorder %v1003_v63, 0.0  ;;  %vm353_vm5 = vcmp.ge.f32.partialorder %v1004_v0, 0.0 }
  0x33   : > { %952 = vmatmul.msk.bf16.gmra.mxu0 %vm526_vm1, %v477_v52  ;;  %v452_v8 = vpack.c.b16 %v440_v60, %v439_v59  ;;  %v480_v9 = vor.u32 %v478_v62, %v476_v41  ;;  %v484_v12 = vrot.slane %v482_v4, 1  ;;  %v681_v17 = vsel %vm674_vm6, %v678_v35, %v680_v5 }
  0x34   : > { %v386_v10 = vsel %vm352_vm4, %v1003_v63, %v369_v6  ;;  %v387_v11 = vsel %vm353_vm5, %v1004_v0, %v370_v7  ;;  %v486_v34 = vshrl.u32 %v451_v57, 16  ;;  %v690_v41 = vrot.slane %v1187_v42, 1 }
  0x35   : > { %v490_v13 = vshll.u32 %v452_v8, 16  ;;  %v403_v15 = vpack.c.bf16 %v386_v10, %v386_v10  ;;  %v404_v16 = vpack.c.bf16 %v387_v11, %v387_v11  ;;  %v485_v20 = vsel %vm457_vm9, %v480_v9, %v484_v12 }
  0x36   : > { %v494_v23 = vshrl.u32 %v452_v8, 16  ;;  %v682_v24 = vrot.slane %v452_v8, 1  ;;  %v488_v35 = vor.u32 %v486_v34, %v484_v12 }
  0x37   : > { %v441_v18 = vunpack.c.l.b16 %v403_v15  ;;  %v442_v19 = vunpack.c.l.b16 %v404_v16  ;;  %v492_v21 = vrot.slane %v490_v13, 1 }
  0x38   : > { %v683_v37 = vsel %vm674_vm6, %v680_v5, %v682_v24 }
  0x39   : > { %958 = vmatmul.msk.bf16.gmra.mxu3 %vm526_vm1, %v525_v58  ;;  %v453_v22 = vpack.c.b16 %v442_v19, %v441_v18  ;;  %v496_v26 = vor.u32 %v494_v23, %v492_v21  ;;  %v493_v38 = vsel %vm457_vm9, %v488_v35, %v492_v21 }
  0x3b   : > { %v684_v25 = vrot.slane %v453_v22, 1  ;;  %v498_v27 = vshll.u32 %v453_v22, 16  ;;  %v502_v39 = vshrl.u32 %v453_v22, 16 }
  0x3c   : > { %961 = vmatmul.msk.bf16.gmra.mxu1 %vm526_vm1, %v1179_v29  ;;  %v688_v29 = vrot.slane %v1165_v2, 1 }
  0x3d   : > { %v685_v30 = vsel %vm674_vm6, %v682_v24, %v684_v25  ;;  %v500_v31 = vrot.slane %v498_v27, 1  ;;  %v687_v36 = vsel %vm674_vm6, %v684_v25, %v686_v28 }
  0x3e   : > { %v689_v32 = vsel %vm674_vm6, %v686_v28, %v688_v29  ;;  %v691_v44 = vsel %vm674_vm6, %v688_v29, %v690_v41 }
  0x3f   : > { %v501_v33 = vsel %vm457_vm9, %v496_v26, %v500_v31  ;;  %v504_v40 = vor.u32 %v502_v39, %v500_v31 }
  0x40   : > { %970 = vmatmul.msk.bf16.gmra.mxu2 %vm526_vm1, %v681_v17 }
  0x43   : > { %953 = vmatmul.msk.bf16.gmra.mxu0 %vm526_vm1, %v485_v20 }
  0x49   : > { %965 = vmatmul.msk.bf16.vlgmr.msrb.gmra.mxu3 %vm526_vm1, %v1163_v1  ;;  %v509_v1 = vsel %vm457_vm9, %v504_v40, %v1173_v14 }
  0x4c   : > { %962 = vmatmul.msk.bf16.gmra.mxu1 %vm526_vm1, %v451_v57 }
  0x50   : > { %971 = vmatmul.msk.bf16.gmra.mxu2 %vm526_vm1, %v683_v37 }
  0x53   : > { %954 = vmatmul.msk.bf16.gmra.mxu0 %vm526_vm1, %v493_v38 }
  0x59   : > { %966 = vmatmul.msk.bf16.gmra.mxu3 %vm526_vm1, %v1165_v2 }
  0x5c   : > { %963 = vmatmul.msk.bf16.gmra.mxu1 %vm526_vm1, %v452_v8 }
  0x60   : > { %972 = vmatmul.msk.bf16.gmra.mxu2 %vm526_vm1, %v685_v30 }
  0x63   : > { %955 = vmatmul.msk.bf16.gmra.mxu0 %vm526_vm1, %v501_v33 }
  0x69   : > { %974 = vmatmul.msk.bf16.vlgmr.msra.gmra.mxu3 %vm526_vm1, %v689_v32 }
  0x6c   : > { %964 = vmatmul.msk.bf16.gmra.mxu1 %vm526_vm1, %v453_v22 }
  0x70   : > { %973 = vmatmul.msk.bf16.gmra.mxu2 %vm526_vm1, %v687_v36 }
  0x73   : > { %956 = vmatmul.msk.bf16.gmra.mxu0 %vm526_vm1, %v509_v1 }
  0x79   : > { %975 = vmatmul.msk.bf16.gmra.mxu3 %vm526_vm1, %v691_v44  ;;  %vm819_vm1 = vcmask 60416  }
  0x99   : > { %v632_v14 = vpop.f32.mrf.mxu1 }
  0xa0   : > { %v564_v42 = vpop.f32.mrf.mxu0 }
  0xa1   : > { %v633_v45 = vadd.f32 %v632_v14, %v564_v42  ;;  %v634_v2 = vpop.f32.mrf.mxu1 }
  0xa3   : > { %v728_v47 = vpop.f32.mrf.mxu2 }
  0xa4   : > { %v768_v3 = vadd.f32 %v728_v47, %v633_v45 }
  0xa6   : > { %v787_v48 = vadd.f32 %v1237_v46, %v768_v3 }
  0xa8   : > { %v803_v49 = vpack.c.bf16 %v787_v48, %v787_v48  ;;  %v566_v50 = vpop.f32.mrf.mxu0 }
  0xa9   : > { %v635_v52 = vadd.f32 %v634_v2, %v566_v50  ;;  %v637_v53 = vpop.f32.mrf.mxu1 }
  0xaa   : > { %820 = vst.msk [vmem:[%s1244_s12] sm:$0xf] %vm819_vm1, %v803_v49 }
  0xab   : > { %v730_v54 = vpop.f32.mrf.mxu2 }
  0xac   : > { %v1248_v55 = vpop.f32.mrf.mxu3  ;;  %v769_v43 = vadd.f32 %v730_v54, %v635_v52 }
  0xae   : > { %v788_v56 = vadd.f32 %v1237_v46, %v769_v43 }
  0xb0   : > { %v804_v51 = vpack.c.bf16 %v788_v56, %v788_v56  ;;  %v569_v57 = vpop.f32.mrf.mxu0 }
  0xb1   : > { %v638_v58 = vadd.f32 %v637_v53, %v569_v57  ;;  %v639_v59 = vpop.f32.mrf.mxu1 }
  0xb2   : > { %821 = vst.msk [vmem:[%s1244_s12 + $0x4] sm:$0xf] %vm819_vm1, %v804_v51 }
  0xb3   : > { %v733_v60 = vpop.f32.mrf.mxu2 }
  0xb4   : > { %v1253_v61 = vpop.f32.mrf.mxu3  ;;  %v770_v62 = vadd.f32 %v733_v60, %v638_v58 }
  0xb6   : > { %v789_v63 = vadd.f32 %v1237_v46, %v770_v62 }
  0xb8   : > { %v805_v0 = vpack.c.bf16 %v789_v63, %v789_v63  ;;  %v571_v4 = vpop.f32.mrf.mxu0 }
  0xb9   : > { %v640_v5 = vadd.f32 %v639_v59, %v571_v4  ;;  %v642_v6 = vpop.f32.mrf.mxu1 }
  0xba   : > { %822 = vst.msk [vmem:[%s1244_s12 + $0x8] sm:$0xf] %vm819_vm1, %v805_v0 }
  0xbb   : > { %v735_v7 = vpop.f32.mrf.mxu2 }
  0xbc   : > { %v1258_v8 = vpop.f32.mrf.mxu3  ;;  %v771_v9 = vadd.f32 %v735_v7, %v640_v5 }
  0xbe   : > { %v790_v10 = vadd.f32 %v1237_v46, %v771_v9 }
  0xc0   : > { %v806_v11 = vpack.c.bf16 %v790_v10, %v790_v10  ;;  %v574_v12 = vpop.f32.mrf.mxu0 }
  0xc1   : > { %v643_v13 = vadd.f32 %v642_v6, %v574_v12  ;;  %v644_v15 = vpop.f32.mrf.mxu1 }
  0xc2   : > { %823 = vst.msk [vmem:[%s1244_s12 + $0xc] sm:$0xf] %vm819_vm1, %v806_v11 }
  0xc3   : > { %v738_v16 = vpop.f32.mrf.mxu2 }
  0xc4   : > { %v1263_v17 = vpop.f32.mrf.mxu3  ;;  %v772_v18 = vadd.f32 %v738_v16, %v643_v13 }
  0xc6   : > { %v791_v19 = vadd.f32 %v1237_v46, %v772_v18 }
  0xc8   : > { %v807_v20 = vpack.c.bf16 %v791_v19, %v791_v19  ;;  %v576_v21 = vpop.f32.mrf.mxu0 }
  0xc9   : > { %v645_v22 = vadd.f32 %v644_v15, %v576_v21  ;;  %v647_v23 = vpop.f32.mrf.mxu1 }
  0xca   : > { %824 = vst.msk [vmem:[%s1244_s12 + $0x10] sm:$0xf] %vm819_vm1, %v807_v20 }
  0xcb   : > { %v740_v24 = vpop.f32.mrf.mxu2 }
  0xcc   : > { %v662_v25 = vpop.f32.mrf.mxu3  ;;  %v773_v26 = vadd.f32 %v740_v24, %v645_v22 }
  0xcd   : > { %v663_v54 = vadd.f32 %v662_v25, %v1248_v55 }
  0xce   : > { %v792_v27 = vadd.f32 %v1237_v46, %v773_v26 }
  0xd0   : > { %v808_v28 = vpack.c.bf16 %v792_v27, %v792_v27  ;;  %v579_v29 = vpop.f32.mrf.mxu0 }
  0xd1   : > { %v648_v30 = vadd.f32 %v647_v23, %v579_v29  ;;  %v649_v31 = vpop.f32.mrf.mxu1 }
  0xd2   : > { %825 = vst.msk [vmem:[%s1244_s12 + $0x14] sm:$0xf] %vm819_vm1, %v808_v28 }
  0xd3   : > { %v743_v32 = vpop.f32.mrf.mxu2 }
  0xd4   : > { %v664_v33 = vpop.f32.mrf.mxu3  ;;  %v774_v34 = vadd.f32 %v743_v32, %v648_v30 }
  0xd5   : > { %v665_v5 = vadd.f32 %v664_v33, %v1253_v61 }
  0xd6   : > { %v793_v35 = vadd.f32 %v1237_v46, %v774_v34 }
  0xd8   : > { %v809_v36 = vpack.c.bf16 %v793_v35, %v793_v35  ;;  %v581_v37 = vpop.f32.mrf.mxu0 }
  0xd9   : > { %v650_v38 = vadd.f32 %v649_v31, %v581_v37  ;;  %v652_v39 = vpop.f32.mrf.mxu1 }
  0xda   : > { %826 = vst.msk [vmem:[%s1244_s12 + $0x18] sm:$0xf] %vm819_vm1, %v809_v36 }
  0xdb   : > { %v745_v40 = vpop.f32.mrf.mxu2 }
  0xdc   : > { %v667_v41 = vpop.f32.mrf.mxu3  ;;  %v775_v1 = vadd.f32 %v745_v40, %v650_v38 }
  0xdd   : > { %v668_v61 = vadd.f32 %v667_v41, %v1258_v8 }
  0xde   : > { %v794_v44 = vadd.f32 %v1237_v46, %v775_v1 }
  0xe0   : > { %v810_v14 = vpack.c.bf16 %v794_v44, %v794_v44  ;;  %v584_v42 = vpop.f32.mrf.mxu0 }
  0xe1   : > { %v653_v45 = vadd.f32 %v652_v39, %v584_v42  ;;  %v654_v48 = vpop.f32.mrf.mxu1 }
  0xe2   : > { %827 = vst.msk [vmem:[%s1244_s12 + $0x1c] sm:$0xf] %vm819_vm1, %v810_v14 }
  0xe3   : > { %v748_v2 = vpop.f32.mrf.mxu2 }
  0xe4   : > { %v669_v47 = vpop.f32.mrf.mxu3  ;;  %v776_v3 = vadd.f32 %v748_v2, %v653_v45 }
  0xe5   : > { %v670_v27 = vadd.f32 %v669_v47, %v1263_v17 }
  0xe6   : > { %v795_v49 = vadd.f32 %v1237_v46, %v776_v3 }
  0xe8   : > { %v811_v50 = vpack.c.bf16 %v795_v49, %v795_v49  ;;  %v586_v52 = vpop.f32.mrf.mxu0 }
  0xe9   : > { %v655_v53 = vadd.f32 %v654_v48, %v586_v52  ;;  %v657_v59 = vpop.f32.mrf.mxu1 }
  0xea   : > { %828 = vst.msk [vmem:[%s1244_s12 + $0x20] sm:$0xf] %vm819_vm1, %v811_v50 }
  0xeb   : > { %v750_v43 = vpop.f32.mrf.mxu2 }
  0xec   : > { %v758_v56 = vpop.f32.mrf.mxu3  ;;  %v777_v51 = vadd.f32 %v750_v43, %v655_v53 }
  0xed   : > { %v780_v57 = vadd.f32 %v758_v56, %v663_v54 }
  0xee   : > { %v796_v58 = vadd.f32 %v1237_v46, %v777_v51 }
  0xef   : > { %v799_v60 = vadd.f32 %v1237_v46, %v780_v57 }
  0xf0   : > { %v812_v62 = vpack.c.bf16 %v796_v58, %v796_v58  ;;  %v589_v63 = vpop.f32.mrf.mxu0 }
  0xf1   : > { %v815_v0 = vpack.c.bf16 %v799_v60, %v799_v60  ;;  %v658_v4 = vadd.f32 %v657_v59, %v589_v63  ;;  %v659_v13 = vpop.f32.mrf.mxu1 }
  0xf2   : > { %829 = vst.msk [vmem:[%s1244_s12 + $0x24] sm:$0xf] %vm819_vm1, %v812_v62 }
  0xf3   : > { %832 = vst.msk [vmem:[%s1244_s12 + $0x30] sm:$0xf] %vm819_vm1, %v815_v0  ;;  %v753_v55 = vpop.f32.mrf.mxu2 }
  0xf4   : > { %v760_v6 = vpop.f32.mrf.mxu3  ;;  %v778_v7 = vadd.f32 %v753_v55, %v658_v4 }
  0xf5   : > { %v781_v9 = vadd.f32 %v760_v6, %v665_v5 }
  0xf6   : > { %v797_v10 = vadd.f32 %v1237_v46, %v778_v7 }
  0xf7   : > { %v800_v11 = vadd.f32 %v1237_v46, %v781_v9 }
  0xf8   : > { %v813_v12 = vpack.c.bf16 %v797_v10, %v797_v10  ;;  %v591_v15 = vpop.f32.mrf.mxu0 }
  0xf9   : > { %v816_v16 = vpack.c.bf16 %v800_v11, %v800_v11  ;;  %v660_v18 = vadd.f32 %v659_v13, %v591_v15 }
  0xfa   : > { %830 = vst.msk [vmem:[%s1244_s12 + $0x28] sm:$0xf] %vm819_vm1, %v813_v12 }
  0xfb   : > { %833 = vst.msk [vmem:[%s1244_s12 + $0x34] sm:$0xf] %vm819_vm1, %v816_v16  ;;  %v755_v19 = vpop.f32.mrf.mxu2 }
  0xfc   : > { %v763_v20 = vpop.f32.mrf.mxu3  ;;  %v779_v21 = vadd.f32 %v755_v19, %v660_v18 }
  0xfd   : > { %v782_v22 = vadd.f32 %v763_v20, %v668_v61 }
  0xfe   : > { %v798_v23 = vadd.f32 %v1237_v46, %v779_v21 }
  0xff   : > { %v801_v24 = vadd.f32 %v1237_v46, %v782_v22 }
 0x100   : > { %v814_v25 = vpack.c.bf16 %v798_v23, %v798_v23 }
 0x101   : > { %v817_v26 = vpack.c.bf16 %v801_v24, %v801_v24 }
 0x102   : > { %831 = vst.msk [vmem:[%s1244_s12 + $0x2c] sm:$0xf] %vm819_vm1, %v814_v25 }
 0x103   : > { %834 = vst.msk [vmem:[%s1244_s12 + $0x38] sm:$0xf] %vm819_vm1, %v817_v26 }
 0x104   : > { %v765_v8 = vpop.f32.mrf.mxu3 }
 0x105   : > { %v783_v28 = vadd.f32 %v765_v8, %v670_v27 }
 0x107   : > { %v802_v29 = vadd.f32 %v1237_v46, %v783_v28 }
 0x109   : > { %v818_v30 = vpack.c.bf16 %v802_v29, %v802_v29 }
 0x10b   : > { %835 = vst.msk [vmem:[%s1244_s12 + $0x3c] sm:$0xf] %vm819_vm1, %v818_v30 }
 0x10c PF: > { %s14_s17 = sadd.s32 1, %s1073_s17   ;;  %s1319_s15 = smov %s1069_s16 }
 0x10d   : > { %p11_p5 = scmp.ge.s32.totalorder %s14_s17, 4   ;;  %s1320_s16 = smov %s1322_s18 }
 0x10f   :  { %13 = sbr.rel (!%p11_p5) target bundleno = 2 (0x2), region = 71 }

// kernel: _lambda_.32
= control target key start
LH: loop header
LB: loop body
LE: loop exit
PB: predicated region body
PF: predicated region fallthrough
CT: control target
= control target key end

     0   :  { %s1276_s18 = smov 0   ;;  %s1278_s19 = smov 0   ;;  %s1503_s0 = inlined_call_operand.vmem [shape: bf16[2,144,8], index: 0, kind: input, shape index: {}, may-alias: {0,1}]   ;;  %s1504_s1 = inlined_call_operand.vmem [shape: bf16[2,144,8], index: 1, kind: input, shape index: {}, may-alias: {0,1}]   ;;  %s1505_s2 = inlined_call_operand.vmem [shape: bf16[1,3,8,8], index: 2, kind: input, shape index: {}]   ;;  %s1506_s3 = inlined_call_operand.vmem [shape: f32[1,8], index: 3, kind: input, shape index: {}]   ;;  %s1507_s4 = inlined_call_operand.vmem [shape: bf16[2,128,8], index: 4, kind: input, shape index: {}]   ;;  %s1508_s5 = inlined_call_operand.vmem [shape: bf16[2,128,8], index: 5, kind: output, shape index: {}]  }
   0x1   :  { %s1280_s20 = smov 0  }
   0x2 LB: > { %s27_s21 = sadd.s32 1, %s1240_s19  ;;  %p1074_p0 = scmp.ge.s32.totalorder %s1244_s20, 1  ;;  %s1244_s20 = sphi %s1280_s20, %s15_s20   ;;  %s1240_s19 = sphi %s1278_s19, %s1510_s19   ;;  %s1236_s18 = sphi %s1276_s18, %s1509_s18  }
   0x3   : > { %p29_p1 = scmp.ge.s32.totalorder %s27_s21, 2  ;;  %p258_p2 = scmp.lt.s32.totalorder %s1244_s20, 3 }
   0x5   : > { %s1512_s21 = smov (%p29_p1, %s27_s21), 0  ;;  %p259_p3 = pnand %p1074_p0, %p258_p2 }
   0x6   : > { %p323_p4 = scmp.lt.s32.totalorder (!%p259_p3), %s1236_s18, 1 }
   0x7   : > { %262 = sbr.rel (%p259_p3) target bundleno = 270 (0x10e), region = 40 }
   0xc   : > { %v474_v0 = vld [vmem:[%s1505_s2] sm:$0xf]  ;;  %vm614_vm0 = vcmask 1043456   ;;  %v1098_v1 = vld [vmem:[%s1505_s2 + $0x8] sm:$0xf]  ;;  %s1514_s18 = smov (!%p323_p4, %s1236_s18), 1 }
   0xd   : > { %v684_v2 = vsel %vm614_vm0, %v474_v0, 0  ;;  %v1300_v3 = vsel %vm614_vm0, %v1098_v1, 0  ;;  %v1081_v4 = vld [vmem:[%s1505_s2 + $0x4] sm:$0xf]  ;;  %s1194_s28 = smul.u32 72, %s1514_s18  ;;  %vm589_vm1 = vcmask 64512  }
   0xe   : > { %693 = vmatpush.bf16.msra.mxu1 %v684_v2  ;;  %789 = vmatpush.bf16.msra.mxu2 %v1300_v3  ;;  %v616_v5 = vsel %vm614_vm0, %v1081_v4, 0  ;;  %vm737_vm6 = vcmask 1046528   ;;  %vm520_vm9 = vsmask.f32 7424  ;;  %s1111_s11 = sshll.u32 %s1514_s18, 6 }
   0xf   : > { %625 = vmatpush.bf16.msra.mxu0 %v616_v5  ;;  %1191 = vmatpush.bf16.msra.mxu3 %v616_v5  ;;  %s1314_s6 = scalar_lea.vmem %s1503_s0, %s1194_s28  ;;  %s1110_s7 = sadd.s32 64, %s1194_s28 }
  0x10   : > { %v1114_v6 = vld [vmem:[%s1314_s6] sm:$0xff]   ;;  %v1177_v7 = vld [vmem:[%s1314_s6 + $0x8] sm:$0xff]   ;;  %v1182_v8 = vld [vmem:[%s1314_s6 + $0x30] sm:$0xff]   ;;  %s346_s10 = scalar_lea.vmem %s1504_s1, %s1110_s7  ;;  %s1414_s14 = scalar_lea.vmem %s1507_s4, %s1111_s11 }
  0x11   : > { %v1115_v9 = vunpack.c.l.bf16 %v1114_v6  ;;  %v1116_v10 = vunpack.c.h.bf16 %v1114_v6  ;;  %v1119_v11 = vunpack.c.l.bf16 %v1177_v7  ;;  %v1120_v12 = vunpack.c.h.bf16 %v1177_v7  ;;  %v1183_v13 = vld [vmem:[%s1314_s6 + $0x38] sm:$0xff]   ;;  %v1178_v30 = vld [vmem:[%s1314_s6 + $0x10] sm:$0xff]   ;;  %v403_v63 = vld [vmem:[%s346_s10] sm:$0xf]  ;;  %s1426_s22 = scalar_lea.vmem %s1508_s5, %s1111_s11 }
  0x12   : > { %v1139_v14 = vunpack.c.l.bf16 %v1182_v8  ;;  %v1140_v15 = vunpack.c.h.bf16 %v1182_v8  ;;  %v1143_v16 = vunpack.c.l.bf16 %v1183_v13  ;;  %v1144_v17 = vunpack.c.h.bf16 %v1183_v13 }
  0x13   : > { %1192 = vmatpush.bf16.msrb.mxu3 %v684_v2  ;;  %vm405_vm2 = vcmp.ge.f32.partialorder %v1115_v9, 0.0  ;;  %vm406_vm3 = vcmp.ge.f32.partialorder %v1116_v10, 0.0  ;;  %v422_v18 = vmul.f32 0.1, %v1115_v9  ;;  %v423_v19 = vmul.f32 0.1, %v1116_v10 }
  0x14   : > { %vm407_vm4 = vcmp.ge.f32.partialorder %v1119_v11, 0.0  ;;  %vm408_vm5 = vcmp.ge.f32.partialorder %v1120_v12, 0.0  ;;  %v424_v20 = vmul.f32 0.1, %v1119_v11  ;;  %v425_v21 = vmul.f32 0.1, %v1120_v12 }
  0x15   : > { %v439_v22 = vsel %vm405_vm2, %v1115_v9, %v422_v18  ;;  %v440_v23 = vsel %vm406_vm3, %v1116_v10, %v423_v19  ;;  %vm417_vm7 = vcmp.ge.f32.partialorder %v1139_v14, 0.0  ;;  %vm418_vm8 = vcmp.ge.f32.partialorder %v1140_v15, 0.0  ;;  %v1179_v10 = vld [vmem:[%s1314_s6 + $0x18] sm:$0xff]  }
  0x16   : > { %v456_v24 = vpack.c.bf16 %v439_v22, %v439_v22  ;;  %v457_v25 = vpack.c.bf16 %v440_v23, %v440_v23  ;;  %v441_v26 = vsel %vm407_vm4, %v1119_v11, %v424_v20  ;;  %v442_v27 = vsel %vm408_vm5, %v1120_v12, %v425_v21 }
  0x17   : > { %v458_v28 = vpack.c.bf16 %v441_v26, %v441_v26  ;;  %v459_v29 = vpack.c.bf16 %v442_v27, %v442_v27  ;;  %vm419_vm10 = vcmp.ge.f32.partialorder %v1143_v16, 0.0  ;;  %vm420_vm11 = vcmp.ge.f32.partialorder %v1144_v17, 0.0 }
  0x18   : > { %v494_v31 = vunpack.c.l.b16 %v456_v24  ;;  %v495_v32 = vunpack.c.l.b16 %v457_v25  ;;  %v434_v33 = vmul.f32 0.1, %v1139_v14  ;;  %v435_v34 = vmul.f32 0.1, %v1140_v15  ;;  %v1180_v24 = vld [vmem:[%s1314_s6 + $0x20] sm:$0xff]  }
  0x19   : > { %v496_v35 = vunpack.c.l.b16 %v458_v28  ;;  %v497_v36 = vunpack.c.l.b16 %v459_v29  ;;  %v436_v37 = vmul.f32 0.1, %v1143_v16  ;;  %v437_v38 = vmul.f32 0.1, %v1144_v17 }
  0x1a   : > { %v511_v39 = vpack.c.b16 %v495_v32, %v494_v31  ;;  %v451_v40 = vsel %vm417_vm7, %v1139_v14, %v434_v33  ;;  %v452_v41 = vsel %vm418_vm8, %v1140_v15, %v435_v34  ;;  %v1123_v42 = vunpack.c.l.bf16 %v1178_v30 }
  0x1b   : > { %v1325_v43 = vpack.c.b16 %v497_v36, %v496_v35  ;;  %v453_v44 = vsel %vm419_vm10, %v1143_v16, %v436_v37  ;;  %v454_v45 = vsel %vm420_vm11, %v1144_v17, %v437_v38  ;;  %v468_v46 = vpack.c.bf16 %v451_v40, %v451_v40 }
  0x1c   : > { %1090 = vmatmul.msk.bf16.vlgmr.msra.gmra.mxu1 %vm589_vm1, %v511_v39  ;;  %v738_v47 = vrot.slane %v511_v39, 1  ;;  %v522_v48 = vshrl.u32 %v511_v39, 16  ;;  %v524_v49 = vshll.u32 %v511_v39, 16  ;;  %v469_v50 = vpack.c.bf16 %v452_v41, %v452_v41 }
  0x1d   : > { %v739_v51 = vrot.slane %v1325_v43, 1  ;;  %v529_v52 = vshll.u32 %v1325_v43, 16  ;;  %v470_v53 = vpack.c.bf16 %v453_v44, %v453_v44  ;;  %v471_v54 = vpack.c.bf16 %v454_v45, %v454_v45 }
  0x1e   : > { %v526_v55 = vrot.slane %v524_v49, 1  ;;  %v506_v56 = vunpack.c.l.b16 %v468_v46  ;;  %v507_v57 = vunpack.c.l.b16 %v469_v50  ;;  %v1124_v58 = vunpack.c.h.bf16 %v1178_v30 }
  0x1f   : > { %v740_v59 = vsel %vm737_vm6, %v738_v47, %v739_v51  ;;  %v531_v60 = vrot.slane %v529_v52, 1  ;;  %v508_v61 = vunpack.c.l.b16 %v470_v53  ;;  %v509_v62 = vunpack.c.l.b16 %v471_v54 }
  0x20   : > { %1099 = vmatmul.msk.bf16.vlgmr.msra.gmra.mxu2 %vm589_vm1, %v740_v59  ;;  %v527_v0 = vor.u32 %v526_v55, %v522_v48  ;;  %v1339_v1 = vpack.c.b16 %v507_v57, %v506_v56  ;;  %vm409_vm12 = vcmp.ge.f32.partialorder %v1123_v42, 0.0  ;;  %vm410_vm13 = vcmp.ge.f32.partialorder %v1124_v58, 0.0 }
  0x21   : > { %v1341_v2 = vpack.c.b16 %v509_v62, %v508_v61  ;;  %v426_v4 = vmul.f32 0.1, %v1123_v42  ;;  %v427_v5 = vmul.f32 0.1, %v1124_v58  ;;  %v404_v9 = vunpack.c.l.bf16 %v403_v63  ;;  %v1181_v61 = vld [vmem:[%s1314_s6 + $0x28] sm:$0xff]  }
  0x22   : > { %v532_v6 = vsel %vm520_vm9, %v527_v0, %v531_v60  ;;  %v569_v7 = vshll.u32 %v1339_v1, 16  ;;  %v573_v8 = vshrl.u32 %v1339_v1, 16  ;;  %v1127_v19 = vunpack.c.l.bf16 %v1179_v10 }
  0x23   : > { %1082 = vmatmul.msk.bf16.vlgmr.msra.gmra.mxu0 %vm589_vm1, %v532_v6  ;;  %v577_v11 = vshll.u32 %v1341_v2, 16  ;;  %v443_v12 = vsel %vm409_vm12, %v1123_v42, %v426_v4  ;;  %v444_v13 = vsel %vm410_vm13, %v1124_v58, %v427_v5  ;;  %vm421_vm14 = vcmp.ge.f32.partialorder %v404_v9, 0.0 }
  0x24   : > { %v1349_v14 = vrot.slane %v569_v7, 1  ;;  %v460_v15 = vpack.c.bf16 %v443_v12, %v443_v12  ;;  %v461_v16 = vpack.c.bf16 %v444_v13, %v444_v13  ;;  %v438_v18 = vmul.f32 0.1, %v404_v9 }
  0x25   : > { %v579_v17 = vrot.slane %v577_v11, 1  ;;  %v1128_v23 = vunpack.c.h.bf16 %v1179_v10  ;;  %v533_v25 = vshrl.u32 %v1325_v43, 16  ;;  %vm411_vm15 = vcmp.ge.f32.partialorder %v1127_v19, 0.0 }
  0x26   : > { %v575_v20 = vor.u32 %v573_v8, %v1349_v14  ;;  %v498_v21 = vunpack.c.l.b16 %v460_v15  ;;  %v499_v22 = vunpack.c.l.b16 %v461_v16  ;;  %v455_v26 = vsel %vm421_vm14, %v404_v9, %v438_v18 }
  0x27   : > { %v428_v27 = vmul.f32 0.1, %v1127_v19  ;;  %v472_v30 = vpack.c.bf16 %v455_v26, %v455_v26  ;;  %vm412_vm0 = vcmp.ge.f32.partialorder %v1128_v23, 0.0  ;;  %v429_v31 = vmul.f32 0.1, %v1128_v23 }
  0x28   : > { %v580_v28 = vsel %vm520_vm9, %v575_v20, %v579_v17  ;;  %v1355_v29 = vpack.c.b16 %v499_v22, %v498_v21  ;;  %v1131_v33 = vunpack.c.l.bf16 %v1180_v24  ;;  %v1132_v34 = vunpack.c.h.bf16 %v1180_v24 }
  0x29   : > { %1088 = vmatmul.msk.bf16.vlgmr.msra.gmra.mxu3 %vm589_vm1, %v580_v28  ;;  %v445_v32 = vsel %vm411_vm15, %v1127_v19, %v428_v27  ;;  %v510_v37 = vunpack.c.l.b16 %v472_v30  ;;  %v535_v38 = vor.u32 %v533_v25, %v531_v60  ;;  %v446_v39 = vsel %vm412_vm0, %v1128_v23, %v429_v31 }
  0x2a   : > { %v741_v35 = vrot.slane %v1355_v29, 1  ;;  %v537_v36 = vshll.u32 %v1355_v29, 16  ;;  %1193 = vmatpush.bf16.msra.mxu3 %v1300_v3  ;;  %v462_v40 = vpack.c.bf16 %v445_v32, %v445_v32  ;;  %vm413_vm2 = vcmp.ge.f32.partialorder %v1131_v33, 0.0 }
  0x2b   : > { %v1363_v42 = vpack.c.b16 %v510_v37, %v510_v37  ;;  %vm414_vm3 = vcmp.ge.f32.partialorder %v1132_v34, 0.0  ;;  %v463_v45 = vpack.c.bf16 %v446_v39, %v446_v39  ;;  %v430_v46 = vmul.f32 0.1, %v1131_v33 }
  0x2c   : > { %1091 = vmatmul.msk.bf16.gmra.mxu1 %vm589_vm1, %v1325_v43  ;;  %v539_v41 = vrot.slane %v537_v36, 1  ;;  %v742_v44 = vsel %vm737_vm6, %v739_v51, %v741_v35  ;;  %v431_v47 = vmul.f32 0.1, %v1132_v34  ;;  %v581_v3 = vshrl.u32 %v1341_v2, 16 }
  0x2d   : > { %v585_v48 = vshll.u32 %v1363_v42, 16  ;;  %v447_v49 = vsel %vm413_vm2, %v1131_v33, %v430_v46  ;;  %v500_v53 = vunpack.c.l.b16 %v462_v40  ;;  %v501_v54 = vunpack.c.l.b16 %v463_v45  ;;  %v1146_v45 = vld [vmem:[%s1414_s14] sm:$0xff]  }
  0x2e   : > { %v448_v50 = vsel %vm414_vm3, %v1132_v34, %v431_v47  ;;  %v540_v52 = vsel %vm520_vm9, %v535_v38, %v539_v41  ;;  %v583_v55 = vor.u32 %v581_v3, %v579_v17  ;;  %v464_v56 = vpack.c.bf16 %v447_v49, %v447_v49  ;;  %v1420_v47 = vld [vmem:[%s1506_s3] ss:$0 sm:$0xff] }
  0x2f   : > { %v587_v43 = vrot.slane %v585_v48, 1  ;;  %v465_v51 = vpack.c.bf16 %v448_v50, %v448_v50  ;;  %v514_v57 = vpack.c.b16 %v501_v54, %v500_v53  ;;  %v541_v62 = vshrl.u32 %v1355_v29, 16 }
  0x30   : > { %1100 = vmatmul.msk.bf16.gmra.mxu2 %vm589_vm1, %v742_v44  ;;  %v502_v59 = vunpack.c.l.b16 %v464_v56  ;;  %v1135_v63 = vunpack.c.l.bf16 %v1181_v61  ;;  %v1136_v0 = vunpack.c.h.bf16 %v1181_v61  ;;  %v749_v28 = vrot.slane %v1339_v1, 1 }
  0x31   : > { %v588_v58 = vsel %vm520_vm9, %v583_v55, %v587_v43  ;;  %v503_v60 = vunpack.c.l.b16 %v465_v51  ;;  %v545_v4 = vshll.u32 %v514_v57, 16  ;;  %v743_v5 = vrot.slane %v514_v57, 1 }
  0x32   : > { %v432_v6 = vmul.f32 0.1, %v1135_v63  ;;  %v433_v7 = vmul.f32 0.1, %v1136_v0  ;;  %vm415_vm4 = vcmp.ge.f32.partialorder %v1135_v63, 0.0  ;;  %vm416_vm5 = vcmp.ge.f32.partialorder %v1136_v0, 0.0 }
  0x33   : > { %1083 = vmatmul.msk.bf16.gmra.mxu0 %vm589_vm1, %v540_v52  ;;  %v515_v8 = vpack.c.b16 %v503_v60, %v502_v59  ;;  %v543_v9 = vor.u32 %v541_v62, %v539_v41  ;;  %v547_v12 = vrot.slane %v545_v4, 1  ;;  %v744_v17 = vsel %vm737_vm6, %v741_v35, %v743_v5 }
  0x34   : > { %v449_v10 = vsel %vm415_vm4, %v1135_v63, %v432_v6  ;;  %v450_v11 = vsel %vm416_vm5, %v1136_v0, %v433_v7  ;;  %v549_v34 = vshrl.u32 %v514_v57, 16  ;;  %v753_v41 = vrot.slane %v1363_v42, 1  ;;  %v1184_v63 = vld [vmem:[%s1414_s14 + $0x8] sm:$0xff]  }
  0x35   : > { %v553_v13 = vshll.u32 %v515_v8, 16  ;;  %v466_v15 = vpack.c.bf16 %v449_v10, %v449_v10  ;;  %v467_v16 = vpack.c.bf16 %v450_v11, %v450_v11  ;;  %v548_v20 = vsel %vm520_vm9, %v543_v9, %v547_v12 }
  0x36   : > { %v557_v23 = vshrl.u32 %v515_v8, 16  ;;  %v745_v24 = vrot.slane %v515_v8, 1  ;;  %v551_v35 = vor.u32 %v549_v34, %v547_v12  ;;  %v1147_v49 = vunpack.c.l.bf16 %v1146_v45 }
  0x37   : > { %v504_v18 = vunpack.c.l.b16 %v466_v15  ;;  %v505_v19 = vunpack.c.l.b16 %v467_v16  ;;  %v555_v21 = vrot.slane %v553_v13, 1 }
  0x38   : > { %v746_v37 = vsel %vm737_vm6, %v743_v5, %v745_v24 }
  0x39   : > { %1089 = vmatmul.msk.bf16.gmra.mxu3 %vm589_vm1, %v588_v58  ;;  %v516_v22 = vpack.c.b16 %v505_v19, %v504_v18  ;;  %v559_v26 = vor.u32 %v557_v23, %v555_v21  ;;  %v556_v38 = vsel %vm520_vm9, %v551_v35, %v555_v21  ;;  %v1148_v58 = vunpack.c.h.bf16 %v1146_v45 }
  0x3a   : > { %v1152_v19 = vunpack.c.h.bf16 %v1184_v63 }
  0x3b   : > { %v747_v25 = vrot.slane %v516_v22, 1  ;;  %v561_v27 = vshll.u32 %v516_v22, 16  ;;  %v565_v39 = vshrl.u32 %v516_v22, 16 }
  0x3c   : > { %1092 = vmatmul.msk.bf16.gmra.mxu1 %vm589_vm1, %v1355_v29  ;;  %v751_v29 = vrot.slane %v1341_v2, 1 }
  0x3d   : > { %v748_v30 = vsel %vm737_vm6, %v745_v24, %v747_v25  ;;  %v563_v31 = vrot.slane %v561_v27, 1  ;;  %v750_v36 = vsel %vm737_vm6, %v747_v25, %v749_v28  ;;  %v1185_v24 = vld [vmem:[%s1414_s14 + $0x10] sm:$0xff]  }
  0x3e   : > { %v752_v32 = vsel %vm737_vm6, %v749_v28, %v751_v29  ;;  %v754_v44 = vsel %vm737_vm6, %v751_v29, %v753_v41 }
  0x3f   : > { %v564_v33 = vsel %vm520_vm9, %v559_v26, %v563_v31  ;;  %v567_v40 = vor.u32 %v565_v39, %v563_v31 }
  0x40   : > { %1101 = vmatmul.msk.bf16.gmra.mxu2 %vm589_vm1, %v744_v17 }
  0x43   : > { %1084 = vmatmul.msk.bf16.gmra.mxu0 %vm589_vm1, %v548_v20 }
  0x49   : > { %1096 = vmatmul.msk.bf16.vlgmr.msrb.gmra.mxu3 %vm589_vm1, %v1339_v1  ;;  %v572_v1 = vsel %vm520_vm9, %v567_v40, %v1349_v14  ;;  %v1156_v40 = vunpack.c.h.bf16 %v1185_v24 }
  0x4c   : > { %1093 = vmatmul.msk.bf16.gmra.mxu1 %vm589_vm1, %v514_v57 }
  0x50   : > { %1102 = vmatmul.msk.bf16.gmra.mxu2 %vm589_vm1, %v746_v37 }
  0x53   : > { %1085 = vmatmul.msk.bf16.gmra.mxu0 %vm589_vm1, %v556_v38 }
  0x59   : > { %1097 = vmatmul.msk.bf16.gmra.mxu3 %vm589_vm1, %v1341_v2 }
  0x5c   : > { %1094 = vmatmul.msk.bf16.gmra.mxu1 %vm589_vm1, %v515_v8  ;;  %v1151_v8 = vunpack.c.l.bf16 %v1184_v63 }
  0x60   : > { %1103 = vmatmul.msk.bf16.gmra.mxu2 %vm589_vm1, %v748_v30  ;;  %v1155_v30 = vunpack.c.l.bf16 %v1185_v24 }
  0x63   : > { %1086 = vmatmul.msk.bf16.gmra.mxu0 %vm589_vm1, %v564_v33 }
  0x69   : > { %1105 = vmatmul.msk.bf16.vlgmr.msra.gmra.mxu3 %vm589_vm1, %v752_v32 }
  0x6c   : > { %1095 = vmatmul.msk.bf16.gmra.mxu1 %vm589_vm1, %v516_v22 }
  0x70   : > { %1104 = vmatmul.msk.bf16.gmra.mxu2 %vm589_vm1, %v750_v36 }
  0x73   : > { %1087 = vmatmul.msk.bf16.gmra.mxu0 %vm589_vm1, %v572_v1 }
  0x79   : > { %1106 = vmatmul.msk.bf16.gmra.mxu3 %vm589_vm1, %v754_v44  ;;  %vm930_vm1 = vcmask 60416  }
  0x99   : > { %v695_v14 = vpop.f32.mrf.mxu1 }
  0xa0   : > { %v627_v2 = vpop.f32.mrf.mxu0 }
  0xa1   : > { %v696_v42 = vadd.f32 %v695_v14, %v627_v2  ;;  %v697_v46 = vpop.f32.mrf.mxu1  ;;  %v1186_v2 = vld [vmem:[%s1414_s14 + $0x18] sm:$0xff]  }
  0xa3   : > { %v791_v3 = vpop.f32.mrf.mxu2 }
  0xa4   : > { %v831_v48 = vadd.f32 %v791_v3, %v696_v42 }
  0xa6   : > { %v850_v50 = vadd.f32 %v1420_v47, %v831_v48 }
  0xa8   : > { %v898_v52 = vadd.f32 %v1147_v49, %v850_v50  ;;  %v629_v53 = vpop.f32.mrf.mxu0  ;;  %v1159_v49 = vunpack.c.l.bf16 %v1186_v2 }
  0xa9   : > { %v698_v54 = vadd.f32 %v697_v46, %v629_v53  ;;  %v700_v55 = vpop.f32.mrf.mxu1 }
  0xaa   : > { %v914_v43 = vpack.c.bf16 %v898_v52, %v898_v52 }
  0xab   : > { %v793_v56 = vpop.f32.mrf.mxu2 }
  0xac   : > { %931 = vst.msk [vmem:[%s1426_s22] sm:$0xf] %vm930_vm1, %v914_v43  ;;  %v1430_v51 = vpop.f32.mrf.mxu3  ;;  %v832_v57 = vadd.f32 %v793_v56, %v698_v54 }
  0xae   : > { %v851_v59 = vadd.f32 %v1420_v47, %v832_v57 }
  0xb0   : > { %v899_v60 = vadd.f32 %v1148_v58, %v851_v59  ;;  %v632_v61 = vpop.f32.mrf.mxu0  ;;  %v1160_v59 = vunpack.c.h.bf16 %v1186_v2 }
  0xb1   : > { %v701_v62 = vadd.f32 %v700_v55, %v632_v61  ;;  %v702_v0 = vpop.f32.mrf.mxu1 }
  0xb2   : > { %v915_v4 = vpack.c.bf16 %v899_v60, %v899_v60 }
  0xb3   : > { %v796_v5 = vpop.f32.mrf.mxu2 }
  0xb4   : > { %932 = vst.msk [vmem:[%s1426_s22 + $0x4] sm:$0xf] %vm930_vm1, %v915_v4  ;;  %v1436_v6 = vpop.f32.mrf.mxu3  ;;  %v833_v7 = vadd.f32 %v796_v5, %v701_v62 }
  0xb6   : > { %v852_v9 = vadd.f32 %v1420_v47, %v833_v7 }
  0xb8   : > { %v900_v10 = vadd.f32 %v1151_v8, %v852_v9  ;;  %v634_v11 = vpop.f32.mrf.mxu0 }
  0xb9   : > { %v703_v12 = vadd.f32 %v702_v0, %v634_v11  ;;  %v705_v13 = vpop.f32.mrf.mxu1  ;;  %v1187_v0 = vld [vmem:[%s1414_s14 + $0x20] sm:$0xff]  }
  0xba   : > { %v916_v15 = vpack.c.bf16 %v900_v10, %v900_v10  ;;  %v1163_v9 = vunpack.c.l.bf16 %v1187_v0 }
  0xbb   : > { %v798_v16 = vpop.f32.mrf.mxu2 }
  0xbc   : > { %933 = vst.msk [vmem:[%s1426_s22 + $0x8] sm:$0xf] %vm930_vm1, %v916_v15  ;;  %v1441_v17 = vpop.f32.mrf.mxu3  ;;  %v834_v18 = vadd.f32 %v798_v16, %v703_v12 }
  0xbe   : > { %v853_v20 = vadd.f32 %v1420_v47, %v834_v18  ;;  %v1189_v18 = vld [vmem:[%s1414_s14 + $0x30] sm:$0xff]  }
  0xc0   : > { %v901_v21 = vadd.f32 %v1152_v19, %v853_v20  ;;  %v637_v22 = vpop.f32.mrf.mxu0 }
  0xc1   : > { %v706_v23 = vadd.f32 %v705_v13, %v637_v22  ;;  %v707_v25 = vpop.f32.mrf.mxu1 }
  0xc2   : > { %v917_v26 = vpack.c.bf16 %v901_v21, %v901_v21 }
  0xc3   : > { %v801_v27 = vpop.f32.mrf.mxu2 }
  0xc4   : > { %934 = vst.msk [vmem:[%s1426_s22 + $0xc] sm:$0xf] %vm930_vm1, %v917_v26  ;;  %v1447_v28 = vpop.f32.mrf.mxu3  ;;  %v835_v29 = vadd.f32 %v801_v27, %v706_v23  ;;  %v1164_v23 = vunpack.c.h.bf16 %v1187_v0 }
  0xc6   : > { %v854_v31 = vadd.f32 %v1420_v47, %v835_v29 }
  0xc8   : > { %v902_v32 = vadd.f32 %v1155_v30, %v854_v31  ;;  %v639_v33 = vpop.f32.mrf.mxu0 }
  0xc9   : > { %v708_v34 = vadd.f32 %v707_v25, %v639_v33  ;;  %v710_v35 = vpop.f32.mrf.mxu1  ;;  %v1171_v25 = vunpack.c.l.bf16 %v1189_v18 }
  0xca   : > { %v918_v36 = vpack.c.bf16 %v902_v32, %v902_v32 }
  0xcb   : > { %v803_v37 = vpop.f32.mrf.mxu2 }
  0xcc   : > { %935 = vst.msk [vmem:[%s1426_s22 + $0x10] sm:$0xf] %vm930_vm1, %v918_v36  ;;  %v725_v38 = vpop.f32.mrf.mxu3  ;;  %v836_v39 = vadd.f32 %v803_v37, %v708_v34 }
  0xcd   : > { %v726_v19 = vadd.f32 %v725_v38, %v1430_v51  ;;  %v1188_v51 = vld [vmem:[%s1414_s14 + $0x28] sm:$0xff]  }
  0xce   : > { %v855_v41 = vadd.f32 %v1420_v47, %v836_v39 }
  0xd0   : > { %v903_v1 = vadd.f32 %v1156_v40, %v855_v41  ;;  %v642_v44 = vpop.f32.mrf.mxu0  ;;  %v1167_v40 = vunpack.c.l.bf16 %v1188_v51 }
  0xd1   : > { %v711_v14 = vadd.f32 %v710_v35, %v642_v44  ;;  %v712_v42 = vpop.f32.mrf.mxu1 }
  0xd2   : > { %v919_v45 = vpack.c.bf16 %v903_v1, %v903_v1  ;;  %v1172_v1 = vunpack.c.h.bf16 %v1189_v18 }
  0xd3   : > { %v806_v46 = vpop.f32.mrf.mxu2 }
  0xd4   : > { %936 = vst.msk [vmem:[%s1426_s22 + $0x14] sm:$0xf] %vm930_vm1, %v919_v45  ;;  %v727_v3 = vpop.f32.mrf.mxu3  ;;  %v837_v48 = vadd.f32 %v806_v46, %v711_v14 }
  0xd5   : > { %v728_v35 = vadd.f32 %v727_v3, %v1436_v6 }
  0xd6   : > { %v856_v50 = vadd.f32 %v1420_v47, %v837_v48  ;;  %v1190_v48 = vld [vmem:[%s1414_s14 + $0x38] sm:$0xff]  }
  0xd8   : > { %v904_v52 = vadd.f32 %v1159_v49, %v856_v50  ;;  %v644_v53 = vpop.f32.mrf.mxu0 }
  0xd9   : > { %v713_v54 = vadd.f32 %v712_v42, %v644_v53  ;;  %v715_v43 = vpop.f32.mrf.mxu1 }
  0xda   : > { %v920_v55 = vpack.c.bf16 %v904_v52, %v904_v52 }
  0xdb   : > { %v808_v56 = vpop.f32.mrf.mxu2 }
  0xdc   : > { %937 = vst.msk [vmem:[%s1426_s22 + $0x18] sm:$0xf] %vm930_vm1, %v920_v55  ;;  %v730_v57 = vpop.f32.mrf.mxu3  ;;  %v838_v58 = vadd.f32 %v808_v56, %v713_v54  ;;  %v1168_v55 = vunpack.c.h.bf16 %v1188_v51  ;;  %v1175_v56 = vunpack.c.l.bf16 %v1190_v48 }
  0xdd   : > { %v731_v49 = vadd.f32 %v730_v57, %v1441_v17 }
  0xde   : > { %v857_v60 = vadd.f32 %v1420_v47, %v838_v58 }
  0xe0   : > { %v905_v61 = vadd.f32 %v1160_v59, %v857_v60  ;;  %v647_v62 = vpop.f32.mrf.mxu0 }
  0xe1   : > { %v716_v63 = vadd.f32 %v715_v43, %v647_v62  ;;  %v717_v10 = vpop.f32.mrf.mxu1 }
  0xe2   : > { %v921_v4 = vpack.c.bf16 %v905_v61, %v905_v61 }
  0xe3   : > { %v811_v5 = vpop.f32.mrf.mxu2 }
  0xe4   : > { %938 = vst.msk [vmem:[%s1426_s22 + $0x1c] sm:$0xf] %vm930_vm1, %v921_v4  ;;  %v732_v7 = vpop.f32.mrf.mxu3  ;;  %v839_v8 = vadd.f32 %v811_v5, %v716_v63  ;;  %v1176_v4 = vunpack.c.h.bf16 %v1190_v48 }
  0xe5   : > { %v733_v61 = vadd.f32 %v732_v7, %v1447_v28 }
  0xe6   : > { %v858_v11 = vadd.f32 %v1420_v47, %v839_v8 }
  0xe8   : > { %v906_v12 = vadd.f32 %v1163_v9, %v858_v11  ;;  %v649_v13 = vpop.f32.mrf.mxu0 }
  0xe9   : > { %v718_v15 = vadd.f32 %v717_v10, %v649_v13  ;;  %v720_v27 = vpop.f32.mrf.mxu1 }
  0xea   : > { %v922_v16 = vpack.c.bf16 %v906_v12, %v906_v12 }
  0xeb   : > { %v813_v20 = vpop.f32.mrf.mxu2 }
  0xec   : > { %939 = vst.msk [vmem:[%s1426_s22 + $0x20] sm:$0xf] %vm930_vm1, %v922_v16  ;;  %v821_v21 = vpop.f32.mrf.mxu3  ;;  %v840_v22 = vadd.f32 %v813_v20, %v718_v15 }
  0xed   : > { %v843_v24 = vadd.f32 %v821_v21, %v726_v19 }
  0xee   : > { %v859_v26 = vadd.f32 %v1420_v47, %v840_v22 }
  0xef   : > { %v862_v29 = vadd.f32 %v1420_v47, %v843_v24 }
  0xf0   : > { %v907_v30 = vadd.f32 %v1164_v23, %v859_v26  ;;  %v652_v31 = vpop.f32.mrf.mxu0 }
  0xf1   : > { %v910_v32 = vadd.f32 %v1171_v25, %v862_v29  ;;  %v721_v33 = vadd.f32 %v720_v27, %v652_v31  ;;  %v722_v6 = vpop.f32.mrf.mxu1 }
  0xf2   : > { %v923_v34 = vpack.c.bf16 %v907_v30, %v907_v30 }
  0xf3   : > { %v926_v36 = vpack.c.bf16 %v910_v32, %v910_v32  ;;  %v816_v37 = vpop.f32.mrf.mxu2 }
  0xf4   : > { %940 = vst.msk [vmem:[%s1426_s22 + $0x24] sm:$0xf] %vm930_vm1, %v923_v34  ;;  %v823_v38 = vpop.f32.mrf.mxu3  ;;  %v841_v39 = vadd.f32 %v816_v37, %v721_v33 }
  0xf5   : > { %943 = vst.msk [vmem:[%s1426_s22 + $0x30] sm:$0xf] %vm930_vm1, %v926_v36  ;;  %v844_v41 = vadd.f32 %v823_v38, %v728_v35 }
  0xf6   : > { %v860_v44 = vadd.f32 %v1420_v47, %v841_v39 }
  0xf7   : > { %v863_v14 = vadd.f32 %v1420_v47, %v844_v41 }
  0xf8   : > { %v908_v2 = vadd.f32 %v1167_v40, %v860_v44  ;;  %v654_v42 = vpop.f32.mrf.mxu0 }
  0xf9   : > { %v911_v45 = vadd.f32 %v1172_v1, %v863_v14  ;;  %v723_v46 = vadd.f32 %v722_v6, %v654_v42 }
  0xfa   : > { %v924_v3 = vpack.c.bf16 %v908_v2, %v908_v2 }
  0xfb   : > { %v927_v50 = vpack.c.bf16 %v911_v45, %v911_v45  ;;  %v818_v52 = vpop.f32.mrf.mxu2 }
  0xfc   : > { %941 = vst.msk [vmem:[%s1426_s22 + $0x28] sm:$0xf] %vm930_vm1, %v924_v3  ;;  %v826_v53 = vpop.f32.mrf.mxu3  ;;  %v842_v54 = vadd.f32 %v818_v52, %v723_v46 }
  0xfd   : > { %944 = vst.msk [vmem:[%s1426_s22 + $0x34] sm:$0xf] %vm930_vm1, %v927_v50  ;;  %v845_v43 = vadd.f32 %v826_v53, %v731_v49 }
  0xfe   : > { %v861_v58 = vadd.f32 %v1420_v47, %v842_v54 }
  0xff   : > { %v864_v59 = vadd.f32 %v1420_v47, %v845_v43 }
 0x100   : > { %v909_v60 = vadd.f32 %v1168_v55, %v861_v58 }
 0x101   : > { %v912_v17 = vadd.f32 %v1175_v56, %v864_v59 }
 0x102   : > { %v925_v57 = vpack.c.bf16 %v909_v60, %v909_v60 }
 0x103   : > { %v928_v62 = vpack.c.bf16 %v912_v17, %v912_v17 }
 0x104   : > { %942 = vst.msk [vmem:[%s1426_s22 + $0x2c] sm:$0xf] %vm930_vm1, %v925_v57  ;;  %v828_v63 = vpop.f32.mrf.mxu3 }
 0x105   : > { %945 = vst.msk [vmem:[%s1426_s22 + $0x38] sm:$0xf] %vm930_vm1, %v928_v62  ;;  %v846_v0 = vadd.f32 %v828_v63, %v733_v61 }
 0x107   : > { %v865_v5 = vadd.f32 %v1420_v47, %v846_v0 }
 0x109   : > { %v913_v8 = vadd.f32 %v1176_v4, %v865_v5 }
 0x10b   : > { %v929_v9 = vpack.c.bf16 %v913_v8, %v913_v8 }
 0x10d   : > { %946 = vst.msk [vmem:[%s1426_s22 + $0x3c] sm:$0xf] %vm930_vm1, %v929_v9 }
 0x10e PF: > { %s15_s20 = sadd.s32 1, %s1244_s20   ;;  %s1509_s18 = smov %s1240_s19 }
 0x10f   : > { %p12_p5 = scmp.ge.s32.totalorder %s15_s20, 4   ;;  %s1510_s19 = smov %s1512_s21 }
 0x111   :  { %14 = sbr.rel (!%p12_p5) target bundleno = 2 (0x2), region = 78 }

// kernel: _lambda_.33
= control target key start
LH: loop header
LB: loop body
LE: loop exit
PB: predicated region body
PF: predicated region fallthrough
CT: control target
= control target key end

     0   :  { %s1112_s15 = smov 0   ;;  %s1114_s16 = smov 0   ;;  %s1332_s0 = inlined_call_operand.vmem [shape: bf16[2,144,8], index: 0, kind: input, shape index: {}, may-alias: {0,1}]   ;;  %s1333_s1 = inlined_call_operand.vmem [shape: bf16[2,144,8], index: 1, kind: input, shape index: {}, may-alias: {0,1}]   ;;  %s1334_s2 = inlined_call_operand.vmem [shape: bf16[1,3,8,8], index: 2, kind: input, shape index: {}]   ;;  %s1335_s3 = inlined_call_operand.vmem [shape: f32[1,8], index: 3, kind: input, shape index: {}]   ;;  %s1336_s4 = inlined_call_operand.vmem [shape: bf16[2,128,8], index: 4, kind: output, shape index: {}]  }
   0x1   :  { %s1116_s17 = smov 0  }
   0x2 LB: > { %s26_s18 = sadd.s32 1, %s1081_s16  ;;  %p957_p0 = scmp.ge.s32.totalorder %s1085_s17, 1  ;;  %s1085_s17 = sphi %s1116_s17, %s14_s17   ;;  %s1081_s16 = sphi %s1114_s16, %s1338_s16   ;;  %s1077_s15 = sphi %s1112_s15, %s1337_s15  }
   0x3   : > { %p28_p1 = scmp.ge.s32.totalorder %s26_s18, 2  ;;  %p216_p2 = scmp.lt.s32.totalorder %s1085_s17, 3 }
   0x5   : > { %s1340_s18 = smov (%p28_p1, %s26_s18), 0  ;;  %p217_p3 = pnand %p957_p0, %p216_p2 }
   0x6   : > { %p270_p4 = scmp.lt.s32.totalorder (!%p217_p3), %s1077_s15, 1 }
   0x7   : > { %220 = sbr.rel (%p217_p3) target bundleno = 270 (0x10e), region = 36 }
   0xc   : > { %v411_v0 = vld [vmem:[%s1334_s2] sm:$0xf]  ;;  %vm563_vm0 = vcmask 1043456   ;;  %v979_v1 = vld [vmem:[%s1334_s2 + $0x8] sm:$0xf]  ;;  %s1342_s15 = smov (!%p270_p4, %s1077_s15), 1 }
   0xd   : > { %v633_v2 = vsel %vm563_vm0, %v411_v0, 0  ;;  %v1136_v3 = vsel %vm563_vm0, %v979_v1, 0  ;;  %v962_v4 = vld [vmem:[%s1334_s2 + $0x4] sm:$0xf]  ;;  %s1035_s25 = smul.u32 72, %s1342_s15  ;;  %vm538_vm1 = vcmask 64512  }
   0xe   : > { %642 = vmatpush.bf16.msra.mxu1 %v633_v2  ;;  %738 = vmatpush.bf16.msra.mxu2 %v1136_v3  ;;  %v565_v5 = vsel %vm563_vm0, %v962_v4, 0  ;;  %vm686_vm6 = vcmask 1044480   ;;  %vm457_vm11 = vsmask.f32 6400  ;;  %s992_s9 = sshll.u32 %s1342_s15, 6 }
   0xf   : > { %574 = vmatpush.bf16.msra.mxu0 %v565_v5  ;;  %1032 = vmatpush.bf16.msra.mxu3 %v565_v5  ;;  %s1150_s28 = scalar_lea.vmem %s1332_s0, %s1035_s25  ;;  %s991_s29 = sadd.s32 64, %s1035_s25 }
  0x10   : > { %v994_v6 = vld [vmem:[%s1150_s28] sm:$0xff]   ;;  %v1025_v7 = vld [vmem:[%s1150_s28 + $0x8] sm:$0xff]   ;;  %v1030_v8 = vld [vmem:[%s1150_s28 + $0x30] sm:$0xff]   ;;  %s293_s6 = scalar_lea.vmem %s1333_s1, %s991_s29  ;;  %s1262_s12 = scalar_lea.vmem %s1336_s4, %s992_s9 }
  0x11   : > { %v995_v9 = vunpack.c.l.bf16 %v994_v6  ;;  %v996_v10 = vunpack.c.h.bf16 %v994_v6  ;;  %v999_v11 = vunpack.c.l.bf16 %v1025_v7  ;;  %v1000_v12 = vunpack.c.h.bf16 %v1025_v7  ;;  %v1031_v13 = vld [vmem:[%s1150_s28 + $0x38] sm:$0xff]   ;;  %v1026_v30 = vld [vmem:[%s1150_s28 + $0x10] sm:$0xff]   ;;  %v340_v63 = vld [vmem:[%s293_s6] sm:$0xf] }
  0x12   : > { %v1019_v14 = vunpack.c.l.bf16 %v1030_v8  ;;  %v1020_v15 = vunpack.c.h.bf16 %v1030_v8  ;;  %v1023_v16 = vunpack.c.l.bf16 %v1031_v13  ;;  %v1024_v17 = vunpack.c.h.bf16 %v1031_v13 }
  0x13   : > { %1033 = vmatpush.bf16.msrb.mxu3 %v633_v2  ;;  %vm342_vm2 = vcmp.ge.f32.partialorder %v995_v9, 0.0  ;;  %vm343_vm3 = vcmp.ge.f32.partialorder %v996_v10, 0.0  ;;  %v359_v18 = vmul.f32 0.1, %v995_v9  ;;  %v360_v19 = vmul.f32 0.1, %v996_v10 }
  0x14   : > { %vm344_vm4 = vcmp.ge.f32.partialorder %v999_v11, 0.0  ;;  %vm345_vm5 = vcmp.ge.f32.partialorder %v1000_v12, 0.0  ;;  %v361_v20 = vmul.f32 0.1, %v999_v11  ;;  %v362_v21 = vmul.f32 0.1, %v1000_v12 }
  0x15   : > { %v376_v22 = vsel %vm342_vm2, %v995_v9, %v359_v18  ;;  %v377_v23 = vsel %vm343_vm3, %v996_v10, %v360_v19  ;;  %vm354_vm7 = vcmp.ge.f32.partialorder %v1019_v14, 0.0  ;;  %vm355_vm8 = vcmp.ge.f32.partialorder %v1020_v15, 0.0  ;;  %v1027_v19 = vld [vmem:[%s1150_s28 + $0x18] sm:$0xff]  }
  0x16   : > { %v393_v24 = vpack.c.bf16 %v376_v22, %v376_v22  ;;  %v394_v25 = vpack.c.bf16 %v377_v23, %v377_v23  ;;  %v378_v26 = vsel %vm344_vm4, %v999_v11, %v361_v20  ;;  %v379_v27 = vsel %vm345_vm5, %v1000_v12, %v362_v21 }
  0x17   : > { %v395_v28 = vpack.c.bf16 %v378_v26, %v378_v26  ;;  %v396_v29 = vpack.c.bf16 %v379_v27, %v379_v27  ;;  %vm356_vm9 = vcmp.ge.f32.partialorder %v1023_v16, 0.0  ;;  %vm357_vm10 = vcmp.ge.f32.partialorder %v1024_v17, 0.0 }
  0x18   : > { %v431_v31 = vunpack.c.l.b16 %v393_v24  ;;  %v432_v32 = vunpack.c.l.b16 %v394_v25  ;;  %v371_v33 = vmul.f32 0.1, %v1019_v14  ;;  %v372_v34 = vmul.f32 0.1, %v1020_v15 }
  0x19   : > { %v433_v35 = vunpack.c.l.b16 %v395_v28  ;;  %v434_v36 = vunpack.c.l.b16 %v396_v29  ;;  %v373_v37 = vmul.f32 0.1, %v1023_v16  ;;  %v374_v38 = vmul.f32 0.1, %v1024_v17 }
  0x1a   : > { %v448_v39 = vpack.c.b16 %v432_v32, %v431_v31  ;;  %v388_v40 = vsel %vm354_vm7, %v1019_v14, %v371_v33  ;;  %v389_v41 = vsel %vm355_vm8, %v1020_v15, %v372_v34  ;;  %v1003_v42 = vunpack.c.l.bf16 %v1026_v30  ;;  %v1028_v33 = vld [vmem:[%s1150_s28 + $0x20] sm:$0xff]  }
  0x1b   : > { %v1161_v43 = vpack.c.b16 %v434_v36, %v433_v35  ;;  %v390_v44 = vsel %vm356_vm9, %v1023_v16, %v373_v37  ;;  %v391_v45 = vsel %vm357_vm10, %v1024_v17, %v374_v38  ;;  %v405_v46 = vpack.c.bf16 %v388_v40, %v388_v40 }
  0x1c   : > { %971 = vmatmul.msk.bf16.vlgmr.msra.gmra.mxu1 %vm538_vm1, %v448_v39  ;;  %v687_v47 = vrot.slane %v448_v39, 3  ;;  %v459_v48 = vshrl.u32 %v448_v39, 16  ;;  %v462_v49 = vshll.u32 %v448_v39, 16  ;;  %v406_v50 = vpack.c.bf16 %v389_v41, %v389_v41 }
  0x1d   : > { %v688_v51 = vrot.slane %v1161_v43, 3  ;;  %v467_v52 = vshrl.u32 %v1161_v43, 16  ;;  %v470_v53 = vshll.u32 %v1161_v43, 16  ;;  %v407_v54 = vpack.c.bf16 %v390_v44, %v390_v44 }
  0x1e   : > { %v461_v55 = vrot.slane %v459_v48, 1  ;;  %v464_v56 = vrot.slane %v462_v49, 2  ;;  %v408_v57 = vpack.c.bf16 %v391_v45, %v391_v45  ;;  %v443_v58 = vunpack.c.l.b16 %v405_v46 }
  0x1f   : > { %v689_v59 = vsel %vm686_vm6, %v687_v47, %v688_v51  ;;  %v469_v60 = vrot.slane %v467_v52, 1  ;;  %v472_v61 = vrot.slane %v470_v53, 2  ;;  %v444_v62 = vunpack.c.l.b16 %v406_v50 }
  0x20   : > { %980 = vmatmul.msk.bf16.vlgmr.msra.gmra.mxu2 %vm538_vm1, %v689_v59  ;;  %v465_v0 = vor.u32 %v464_v56, %v461_v55  ;;  %v445_v1 = vunpack.c.l.b16 %v407_v54  ;;  %v446_v2 = vunpack.c.l.b16 %v408_v57  ;;  %v1004_v4 = vunpack.c.h.bf16 %v1026_v30 }
  0x21   : > { %v1176_v5 = vor.u32 %v472_v61, %v469_v60  ;;  %v1178_v6 = vpack.c.b16 %v444_v62, %v443_v58  ;;  %vm346_vm12 = vcmp.ge.f32.partialorder %v1003_v42, 0.0  ;;  %v363_v7 = vmul.f32 0.1, %v1003_v42 }
  0x22   : > { %v1180_v8 = vpack.c.b16 %v446_v2, %v445_v1  ;;  %vm347_vm13 = vcmp.ge.f32.partialorder %v1004_v4, 0.0  ;;  %v364_v9 = vmul.f32 0.1, %v1004_v4  ;;  %v341_v10 = vunpack.c.l.bf16 %v340_v63 }
  0x23   : > { %v474_v11 = vsel %vm457_vm11, %v465_v0, %v1176_v5  ;;  %v512_v12 = vshrl.u32 %v1178_v6, 16  ;;  %v515_v13 = vshll.u32 %v1178_v6, 16  ;;  %v380_v14 = vsel %vm346_vm12, %v1003_v42, %v363_v7 }
  0x24   : > { %963 = vmatmul.msk.bf16.vlgmr.msra.gmra.mxu0 %vm538_vm1, %v474_v11  ;;  %v521_v15 = vshrl.u32 %v1180_v8, 16  ;;  %v524_v16 = vshll.u32 %v1180_v8, 16  ;;  %v381_v17 = vsel %vm347_vm13, %v1004_v4, %v364_v9  ;;  %v397_v18 = vpack.c.bf16 %v380_v14, %v380_v14 }
  0x25   : > { %v514_v20 = vrot.slane %v512_v12, 1  ;;  %v517_v21 = vrot.slane %v515_v13, 2  ;;  %v398_v22 = vpack.c.bf16 %v381_v17, %v381_v17  ;;  %vm358_vm14 = vcmp.ge.f32.partialorder %v341_v10, 0.0  ;;  %v1029_v13 = vld [vmem:[%s1150_s28 + $0x28] sm:$0xff]  }
  0x26   : > { %v523_v23 = vrot.slane %v521_v15, 1  ;;  %v526_v24 = vrot.slane %v524_v16, 2  ;;  %v435_v25 = vunpack.c.l.b16 %v397_v18  ;;  %v375_v26 = vmul.f32 0.1, %v341_v10 }
  0x27   : > { %v1190_v27 = vor.u32 %v517_v21, %v514_v20  ;;  %v436_v28 = vunpack.c.l.b16 %v398_v22  ;;  %v1007_v29 = vunpack.c.l.bf16 %v1027_v19  ;;  %v1008_v30 = vunpack.c.h.bf16 %v1027_v19 }
  0x28   : > { %v527_v31 = vor.u32 %v526_v24, %v523_v23  ;;  %v392_v32 = vsel %vm358_vm14, %v341_v10, %v375_v26  ;;  %v1011_v39 = vunpack.c.l.bf16 %v1028_v33  ;;  %v1012_v47 = vunpack.c.h.bf16 %v1028_v33 }
  0x29   : > { %v1193_v34 = vpack.c.b16 %v436_v28, %v435_v25  ;;  %v409_v35 = vpack.c.bf16 %v392_v32, %v392_v32  ;;  %vm348_vm15 = vcmp.ge.f32.partialorder %v1007_v29, 0.0  ;;  %vm349_vm0 = vcmp.ge.f32.partialorder %v1008_v30, 0.0 }
  0x2a   : > { %v528_v36 = vsel %vm457_vm11, %v1190_v27, %v527_v31  ;;  %v365_v37 = vmul.f32 0.1, %v1007_v29  ;;  %v366_v38 = vmul.f32 0.1, %v1008_v30  ;;  %vm350_vm2 = vcmp.ge.f32.partialorder %v1011_v39, 0.0 }
  0x2b   : > { %969 = vmatmul.msk.bf16.vlgmr.msra.gmra.mxu3 %vm538_vm1, %v528_v36  ;;  %v690_v40 = vrot.slane %v1193_v34, 3  ;;  %v476_v41 = vshrl.u32 %v1193_v34, 16  ;;  %v479_v42 = vshll.u32 %v1193_v34, 16  ;;  %v447_v44 = vunpack.c.l.b16 %v409_v35 }
  0x2c   : > { %972 = vmatmul.msk.bf16.gmra.mxu1 %vm538_vm1, %v1161_v43  ;;  %v382_v45 = vsel %vm348_vm15, %v1007_v29, %v365_v37  ;;  %v383_v46 = vsel %vm349_vm0, %v1008_v30, %v366_v38  ;;  %1034 = vmatpush.bf16.msra.mxu3 %v1136_v3  ;;  %vm351_vm3 = vcmp.ge.f32.partialorder %v1012_v47, 0.0  ;;  %v367_v55 = vmul.f32 0.1, %v1011_v39 }
  0x2d   : > { %v691_v48 = vsel %vm686_vm6, %v688_v51, %v690_v40  ;;  %v478_v49 = vrot.slane %v476_v41, 1  ;;  %v481_v50 = vrot.slane %v479_v42, 2  ;;  %v1207_v52 = vpack.c.b16 %v447_v44, %v447_v44 }
  0x2e   : > { %v399_v53 = vpack.c.bf16 %v382_v45, %v382_v45  ;;  %v400_v54 = vpack.c.bf16 %v383_v46, %v383_v46  ;;  %v368_v3 = vmul.f32 0.1, %v1012_v47  ;;  %v384_v51 = vsel %vm350_vm2, %v1011_v39, %v367_v55 }
  0x2f   : > { %v482_v56 = vor.u32 %v481_v50, %v478_v49  ;;  %v530_v57 = vshrl.u32 %v1207_v52, 16  ;;  %v533_v58 = vshll.u32 %v1207_v52, 16  ;;  %v401_v2 = vpack.c.bf16 %v384_v51, %v384_v51 }
  0x30   : > { %981 = vmatmul.msk.bf16.gmra.mxu2 %vm538_vm1, %v691_v48  ;;  %v437_v59 = vunpack.c.l.b16 %v399_v53  ;;  %v438_v43 = vunpack.c.l.b16 %v400_v54  ;;  %v385_v63 = vsel %vm351_vm3, %v1012_v47, %v368_v3  ;;  %v1016_v17 = vunpack.c.h.bf16 %v1029_v13 }
  0x31   : > { %v483_v60 = vsel %vm457_vm11, %v1176_v5, %v482_v56  ;;  %v532_v61 = vrot.slane %v530_v57, 1  ;;  %v535_v62 = vrot.slane %v533_v58, 2  ;;  %v402_v4 = vpack.c.bf16 %v385_v63, %v385_v63  ;;  %v1255_v58 = vld [vmem:[%s1335_s3] ss:$0 sm:$0xff] }
  0x32   : > { %v451_v0 = vpack.c.b16 %v438_v43, %v437_v59  ;;  %v439_v11 = vunpack.c.l.b16 %v401_v2  ;;  %v1015_v5 = vunpack.c.l.bf16 %v1029_v13  ;;  %vm353_vm5 = vcmp.ge.f32.partialorder %v1016_v17, 0.0 }
  0x33   : > { %v536_v1 = vor.u32 %v535_v62, %v532_v61  ;;  %v440_v12 = vunpack.c.l.b16 %v402_v4  ;;  %v370_v20 = vmul.f32 0.1, %v1016_v17  ;;  %v698_v36 = vrot.slane %v1178_v6, 3 }
  0x34   : > { %964 = vmatmul.msk.bf16.gmra.mxu0 %vm538_vm1, %v483_v60  ;;  %v485_v7 = vshrl.u32 %v451_v0, 16  ;;  %v488_v9 = vshll.u32 %v451_v0, 16  ;;  %v692_v14 = vrot.slane %v451_v0, 3  ;;  %v369_v18 = vmul.f32 0.1, %v1015_v5 }
  0x35   : > { %v537_v10 = vsel %vm457_vm11, %v527_v31, %v536_v1  ;;  %v452_v19 = vpack.c.b16 %v440_v12, %v439_v11  ;;  %vm352_vm4 = vcmp.ge.f32.partialorder %v1015_v5, 0.0  ;;  %v387_v24 = vsel %vm353_vm5, %v1016_v17, %v370_v20 }
  0x36   : > { %v487_v15 = vrot.slane %v485_v7, 1  ;;  %v490_v16 = vrot.slane %v488_v9, 2  ;;  %v693_v21 = vsel %vm686_vm6, %v690_v40, %v692_v14  ;;  %v386_v23 = vsel %vm352_vm4, %v1015_v5, %v369_v18 }
  0x37   : > { %v403_v25 = vpack.c.bf16 %v386_v23, %v386_v23  ;;  %v404_v26 = vpack.c.bf16 %v387_v24, %v387_v24  ;;  %v494_v28 = vshrl.u32 %v452_v19, 16  ;;  %v497_v31 = vshll.u32 %v452_v19, 16 }
  0x38   : > { %v491_v22 = vor.u32 %v490_v16, %v487_v15  ;;  %v700_v37 = vrot.slane %v1180_v8, 3 }
  0x39   : > { %v441_v29 = vunpack.c.l.b16 %v403_v25  ;;  %v442_v32 = vunpack.c.l.b16 %v404_v26  ;;  %v496_v35 = vrot.slane %v494_v28, 1  ;;  %v499_v38 = vrot.slane %v497_v31, 2 }
  0x3a   : > { %v492_v30 = vsel %vm457_vm11, %v482_v56, %v491_v22  ;;  %v701_v42 = vsel %vm686_vm6, %v698_v36, %v700_v37  ;;  %v702_v56 = vrot.slane %v1207_v52, 3 }
  0x3b   : > { %970 = vmatmul.msk.bf16.gmra.mxu3 %vm538_vm1, %v537_v10  ;;  %v453_v33 = vpack.c.b16 %v442_v32, %v441_v29  ;;  %v500_v47 = vor.u32 %v499_v38, %v496_v35 }
  0x3c   : > { %973 = vmatmul.msk.bf16.gmra.mxu1 %vm538_vm1, %v1193_v34  ;;  %v694_v34 = vrot.slane %v452_v19, 3 }
  0x3d   : > { %v696_v39 = vrot.slane %v453_v33, 3  ;;  %v503_v40 = vshrl.u32 %v453_v33, 16  ;;  %v506_v41 = vshll.u32 %v453_v33, 16  ;;  %v501_v55 = vsel %vm457_vm11, %v491_v22, %v500_v47 }
  0x3e   : > { %v695_v53 = vsel %vm686_vm6, %v692_v14, %v694_v34 }
  0x3f   : > { %v697_v44 = vsel %vm686_vm6, %v694_v34, %v696_v39  ;;  %v505_v45 = vrot.slane %v503_v40, 1  ;;  %v508_v46 = vrot.slane %v506_v41, 2  ;;  %v699_v50 = vsel %vm686_vm6, %v696_v39, %v698_v36 }
  0x40   : > { %982 = vmatmul.msk.bf16.gmra.mxu2 %vm538_vm1, %v693_v21 }
  0x41   : > { %v509_v48 = vor.u32 %v508_v46, %v505_v45 }
  0x43   : > { %v510_v49 = vsel %vm457_vm11, %v500_v47, %v509_v48  ;;  %v519_v54 = vsel %vm457_vm11, %v509_v48, %v1190_v27 }
  0x44   : > { %965 = vmatmul.msk.bf16.gmra.mxu0 %vm538_vm1, %v492_v30 }
  0x4b   : > { %977 = vmatmul.msk.bf16.vlgmr.msrb.gmra.mxu3 %vm538_vm1, %v1178_v6  ;;  %v703_v6 = vsel %vm686_vm6, %v700_v37, %v702_v56 }
  0x4c   : > { %974 = vmatmul.msk.bf16.gmra.mxu1 %vm538_vm1, %v451_v0 }
  0x50   : > { %983 = vmatmul.msk.bf16.gmra.mxu2 %vm538_vm1, %v695_v53 }
  0x54   : > { %966 = vmatmul.msk.bf16.gmra.mxu0 %vm538_vm1, %v501_v55 }
  0x5b   : > { %978 = vmatmul.msk.bf16.gmra.mxu3 %vm538_vm1, %v1180_v8 }
  0x5c   : > { %975 = vmatmul.msk.bf16.gmra.mxu1 %vm538_vm1, %v452_v19 }
  0x60   : > { %984 = vmatmul.msk.bf16.gmra.mxu2 %vm538_vm1, %v697_v44 }
  0x64   : > { %967 = vmatmul.msk.bf16.gmra.mxu0 %vm538_vm1, %v510_v49 }
  0x6b   : > { %986 = vmatmul.msk.bf16.vlgmr.msra.gmra.mxu3 %vm538_vm1, %v701_v42 }
  0x6c   : > { %976 = vmatmul.msk.bf16.gmra.mxu1 %vm538_vm1, %v453_v33 }
  0x70   : > { %985 = vmatmul.msk.bf16.gmra.mxu2 %vm538_vm1, %v699_v50 }
  0x74   : > { %968 = vmatmul.msk.bf16.gmra.mxu0 %vm538_vm1, %v519_v54 }
  0x7b   : > { %987 = vmatmul.msk.bf16.gmra.mxu3 %vm538_vm1, %v703_v6  ;;  %vm831_vm1 = vcmask 60416  }
  0x99   : > { %v644_v27 = vpop.f32.mrf.mxu1 }
  0xa1   : > { %v576_v52 = vpop.f32.mrf.mxu0  ;;  %v646_v57 = vpop.f32.mrf.mxu1 }
  0xa2   : > { %v645_v8 = vadd.f32 %v644_v27, %v576_v52 }
  0xa3   : > { %v740_v3 = vpop.f32.mrf.mxu2 }
  0xa4   : > { %v780_v59 = vadd.f32 %v740_v3, %v645_v8 }
  0xa6   : > { %v799_v43 = vadd.f32 %v1255_v58, %v780_v59 }
  0xa8   : > { %v815_v51 = vpack.c.bf16 %v799_v43, %v799_v43 }
  0xa9   : > { %v578_v60 = vpop.f32.mrf.mxu0  ;;  %v649_v61 = vpop.f32.mrf.mxu1 }
  0xaa   : > { %832 = vst.msk [vmem:[%s1262_s12] sm:$0xf] %vm831_vm1, %v815_v51  ;;  %v647_v62 = vadd.f32 %v646_v57, %v578_v60 }
  0xab   : > { %v742_v63 = vpop.f32.mrf.mxu2 }
  0xac   : > { %v781_v0 = vadd.f32 %v742_v63, %v647_v62 }
  0xae   : > { %v1266_v1 = vpop.f32.mrf.mxu3  ;;  %v800_v2 = vadd.f32 %v1255_v58, %v781_v0 }
  0xb0   : > { %v816_v4 = vpack.c.bf16 %v800_v2, %v800_v2 }
  0xb1   : > { %v581_v7 = vpop.f32.mrf.mxu0  ;;  %v651_v9 = vpop.f32.mrf.mxu1 }
  0xb2   : > { %833 = vst.msk [vmem:[%s1262_s12 + $0x4] sm:$0xf] %vm831_vm1, %v816_v4  ;;  %v650_v10 = vadd.f32 %v649_v61, %v581_v7 }
  0xb3   : > { %v745_v11 = vpop.f32.mrf.mxu2 }
  0xb4   : > { %v782_v12 = vadd.f32 %v745_v11, %v650_v10 }
  0xb6   : > { %v1271_v13 = vpop.f32.mrf.mxu3  ;;  %v801_v14 = vadd.f32 %v1255_v58, %v782_v12 }
  0xb8   : > { %v817_v15 = vpack.c.bf16 %v801_v14, %v801_v14 }
  0xb9   : > { %v583_v16 = vpop.f32.mrf.mxu0  ;;  %v654_v5 = vpop.f32.mrf.mxu1 }
  0xba   : > { %834 = vst.msk [vmem:[%s1262_s12 + $0x8] sm:$0xf] %vm831_vm1, %v817_v15  ;;  %v652_v17 = vadd.f32 %v651_v9, %v583_v16 }
  0xbb   : > { %v747_v18 = vpop.f32.mrf.mxu2 }
  0xbc   : > { %v783_v19 = vadd.f32 %v747_v18, %v652_v17 }
  0xbe   : > { %v1276_v20 = vpop.f32.mrf.mxu3  ;;  %v802_v21 = vadd.f32 %v1255_v58, %v783_v19 }
  0xc0   : > { %v818_v22 = vpack.c.bf16 %v802_v21, %v802_v21 }
  0xc1   : > { %v586_v23 = vpop.f32.mrf.mxu0  ;;  %v656_v24 = vpop.f32.mrf.mxu1 }
  0xc2   : > { %835 = vst.msk [vmem:[%s1262_s12 + $0xc] sm:$0xf] %vm831_vm1, %v818_v22  ;;  %v655_v25 = vadd.f32 %v654_v5, %v586_v23 }
  0xc3   : > { %v750_v26 = vpop.f32.mrf.mxu2 }
  0xc4   : > { %v784_v28 = vadd.f32 %v750_v26, %v655_v25 }
  0xc6   : > { %v1281_v29 = vpop.f32.mrf.mxu3  ;;  %v803_v30 = vadd.f32 %v1255_v58, %v784_v28 }
  0xc8   : > { %v819_v31 = vpack.c.bf16 %v803_v30, %v803_v30 }
  0xc9   : > { %v588_v32 = vpop.f32.mrf.mxu0  ;;  %v659_v33 = vpop.f32.mrf.mxu1 }
  0xca   : > { %836 = vst.msk [vmem:[%s1262_s12 + $0x10] sm:$0xf] %vm831_vm1, %v819_v31  ;;  %v657_v34 = vadd.f32 %v656_v24, %v588_v32 }
  0xcb   : > { %v752_v35 = vpop.f32.mrf.mxu2 }
  0xcc   : > { %v785_v36 = vadd.f32 %v752_v35, %v657_v34 }
  0xce   : > { %v674_v37 = vpop.f32.mrf.mxu3  ;;  %v804_v38 = vadd.f32 %v1255_v58, %v785_v36 }
  0xcf   : > { %v675_v2 = vadd.f32 %v674_v37, %v1266_v1 }
  0xd0   : > { %v820_v39 = vpack.c.bf16 %v804_v38, %v804_v38 }
  0xd1   : > { %v591_v40 = vpop.f32.mrf.mxu0  ;;  %v661_v41 = vpop.f32.mrf.mxu1 }
  0xd2   : > { %837 = vst.msk [vmem:[%s1262_s12 + $0x14] sm:$0xf] %vm831_vm1, %v820_v39  ;;  %v660_v42 = vadd.f32 %v659_v33, %v591_v40 }
  0xd3   : > { %v755_v44 = vpop.f32.mrf.mxu2 }
  0xd4   : > { %v786_v45 = vadd.f32 %v755_v44, %v660_v42 }
  0xd6   : > { %v676_v46 = vpop.f32.mrf.mxu3  ;;  %v805_v47 = vadd.f32 %v1255_v58, %v786_v45 }
  0xd7   : > { %v677_v18 = vadd.f32 %v676_v46, %v1271_v13 }
  0xd8   : > { %v821_v48 = vpack.c.bf16 %v805_v47, %v805_v47 }
  0xd9   : > { %v593_v49 = vpop.f32.mrf.mxu0  ;;  %v664_v54 = vpop.f32.mrf.mxu1 }
  0xda   : > { %838 = vst.msk [vmem:[%s1262_s12 + $0x18] sm:$0xf] %vm831_vm1, %v821_v48  ;;  %v662_v50 = vadd.f32 %v661_v41, %v593_v49 }
  0xdb   : > { %v757_v53 = vpop.f32.mrf.mxu2 }
  0xdc   : > { %v787_v55 = vadd.f32 %v757_v53, %v662_v50 }
  0xde   : > { %v679_v56 = vpop.f32.mrf.mxu3  ;;  %v806_v6 = vadd.f32 %v1255_v58, %v787_v55 }
  0xdf   : > { %v680_v13 = vadd.f32 %v679_v56, %v1276_v20 }
  0xe0   : > { %v822_v27 = vpack.c.bf16 %v806_v6, %v806_v6 }
  0xe1   : > { %v596_v52 = vpop.f32.mrf.mxu0  ;;  %v666_v59 = vpop.f32.mrf.mxu1 }
  0xe2   : > { %839 = vst.msk [vmem:[%s1262_s12 + $0x1c] sm:$0xf] %vm831_vm1, %v822_v27  ;;  %v665_v57 = vadd.f32 %v664_v54, %v596_v52 }
  0xe3   : > { %v760_v8 = vpop.f32.mrf.mxu2 }
  0xe4   : > { %v788_v3 = vadd.f32 %v760_v8, %v665_v57 }
  0xe6   : > { %v681_v43 = vpop.f32.mrf.mxu3  ;;  %v807_v51 = vadd.f32 %v1255_v58, %v788_v3 }
  0xe7   : > { %v682_v38 = vadd.f32 %v681_v43, %v1281_v29 }
  0xe8   : > { %v823_v60 = vpack.c.bf16 %v807_v51, %v807_v51 }
  0xe9   : > { %v598_v61 = vpop.f32.mrf.mxu0  ;;  %v669_v10 = vpop.f32.mrf.mxu1 }
  0xea   : > { %840 = vst.msk [vmem:[%s1262_s12 + $0x20] sm:$0xf] %vm831_vm1, %v823_v60  ;;  %v667_v62 = vadd.f32 %v666_v59, %v598_v61 }
  0xeb   : > { %v762_v63 = vpop.f32.mrf.mxu2 }
  0xec   : > { %v789_v0 = vadd.f32 %v762_v63, %v667_v62 }
  0xee   : > { %v770_v4 = vpop.f32.mrf.mxu3  ;;  %v808_v7 = vadd.f32 %v1255_v58, %v789_v0 }
  0xef   : > { %v792_v9 = vadd.f32 %v770_v4, %v675_v2 }
  0xf0   : > { %v824_v11 = vpack.c.bf16 %v808_v7, %v808_v7 }
  0xf1   : > { %v811_v12 = vadd.f32 %v1255_v58, %v792_v9  ;;  %v601_v14 = vpop.f32.mrf.mxu0  ;;  %v671_v24 = vpop.f32.mrf.mxu1 }
  0xf2   : > { %841 = vst.msk [vmem:[%s1262_s12 + $0x24] sm:$0xf] %vm831_vm1, %v824_v11  ;;  %v670_v15 = vadd.f32 %v669_v10, %v601_v14 }
  0xf3   : > { %v827_v16 = vpack.c.bf16 %v811_v12, %v811_v12  ;;  %v765_v5 = vpop.f32.mrf.mxu2 }
  0xf4   : > { %v790_v17 = vadd.f32 %v765_v5, %v670_v15 }
  0xf5   : > { %844 = vst.msk [vmem:[%s1262_s12 + $0x30] sm:$0xf] %vm831_vm1, %v827_v16 }
  0xf6   : > { %v772_v1 = vpop.f32.mrf.mxu3  ;;  %v809_v19 = vadd.f32 %v1255_v58, %v790_v17 }
  0xf7   : > { %v793_v21 = vadd.f32 %v772_v1, %v677_v18 }
  0xf8   : > { %v825_v22 = vpack.c.bf16 %v809_v19, %v809_v19 }
  0xf9   : > { %v812_v23 = vadd.f32 %v1255_v58, %v793_v21  ;;  %v603_v25 = vpop.f32.mrf.mxu0 }
  0xfa   : > { %842 = vst.msk [vmem:[%s1262_s12 + $0x28] sm:$0xf] %vm831_vm1, %v825_v22  ;;  %v672_v26 = vadd.f32 %v671_v24, %v603_v25 }
  0xfb   : > { %v828_v28 = vpack.c.bf16 %v812_v23, %v812_v23  ;;  %v767_v30 = vpop.f32.mrf.mxu2 }
  0xfc   : > { %v791_v31 = vadd.f32 %v767_v30, %v672_v26 }
  0xfd   : > { %845 = vst.msk [vmem:[%s1262_s12 + $0x34] sm:$0xf] %vm831_vm1, %v828_v28 }
  0xfe   : > { %v775_v32 = vpop.f32.mrf.mxu3  ;;  %v810_v33 = vadd.f32 %v1255_v58, %v791_v31 }
  0xff   : > { %v794_v34 = vadd.f32 %v775_v32, %v680_v13 }
 0x100   : > { %v826_v35 = vpack.c.bf16 %v810_v33, %v810_v33 }
 0x101   : > { %v813_v36 = vadd.f32 %v1255_v58, %v794_v34 }
 0x102   : > { %843 = vst.msk [vmem:[%s1262_s12 + $0x2c] sm:$0xf] %vm831_vm1, %v826_v35 }
 0x103   : > { %v829_v37 = vpack.c.bf16 %v813_v36, %v813_v36 }
 0x105   : > { %846 = vst.msk [vmem:[%s1262_s12 + $0x38] sm:$0xf] %vm831_vm1, %v829_v37 }
 0x106   : > { %v777_v39 = vpop.f32.mrf.mxu3 }
 0x107   : > { %v795_v40 = vadd.f32 %v777_v39, %v682_v38 }
 0x109   : > { %v814_v20 = vadd.f32 %v1255_v58, %v795_v40 }
 0x10b   : > { %v830_v41 = vpack.c.bf16 %v814_v20, %v814_v20 }
 0x10d   : > { %847 = vst.msk [vmem:[%s1262_s12 + $0x3c] sm:$0xf] %vm831_vm1, %v830_v41 }
 0x10e PF: > { %s14_s17 = sadd.s32 1, %s1085_s17   ;;  %s1337_s15 = smov %s1081_s16 }
 0x10f   : > { %p11_p5 = scmp.ge.s32.totalorder %s14_s17, 4   ;;  %s1338_s16 = smov %s1340_s18 }
 0x111   :  { %13 = sbr.rel (!%p11_p5) target bundleno = 2 (0x2), region = 71 }

// kernel: _lambda_.35
= control target key start
LH: loop header
LB: loop body
LE: loop exit
PB: predicated region body
PF: predicated region fallthrough
CT: control target
= control target key end

     0   :  { %s1133_s15 = smov 0   ;;  %s1135_s16 = smov 0   ;;  %s1374_s0 = inlined_call_operand.vmem [shape: bf16[2,144,8], index: 0, kind: input, shape index: {}, may-alias: {0,1}]   ;;  %s1375_s1 = inlined_call_operand.vmem [shape: bf16[2,144,8], index: 1, kind: input, shape index: {}, may-alias: {0,1}]   ;;  %s1376_s2 = inlined_call_operand.vmem [shape: bf16[1,3,8,8], index: 2, kind: input, shape index: {}]   ;;  %s1377_s3 = inlined_call_operand.vmem [shape: f32[1,8], index: 3, kind: input, shape index: {}]   ;;  %s1378_s4 = inlined_call_operand.vmem [shape: bf16[2,128,8], index: 4, kind: output, shape index: {}]  }
   0x1   :  { %s1137_s17 = smov 0  }
   0x2 LB: > { %s26_s18 = sadd.s32 1, %s1102_s16  ;;  %p974_p0 = scmp.ge.s32.totalorder %s1106_s17, 1  ;;  %s1106_s17 = sphi %s1137_s17, %s14_s17   ;;  %s1102_s16 = sphi %s1135_s16, %s1380_s16   ;;  %s1098_s15 = sphi %s1133_s15, %s1379_s15  }
   0x3   : > { %p28_p1 = scmp.ge.s32.totalorder %s26_s18, 2  ;;  %p216_p2 = scmp.lt.s32.totalorder %s1106_s17, 3 }
   0x5   : > { %s1382_s18 = smov (%p28_p1, %s26_s18), 0  ;;  %p217_p3 = pnand %p974_p0, %p216_p2 }
   0x6   : > { %p270_p4 = scmp.lt.s32.totalorder (!%p217_p3), %s1098_s15, 1 }
   0x7   : > { %220 = sbr.rel (%p217_p3) target bundleno = 273 (0x111), region = 36 }
   0xc   : > { %v417_v0 = vld [vmem:[%s1376_s2] sm:$0xf]  ;;  %vm569_vm0 = vcmask 1043456   ;;  %v996_v1 = vld [vmem:[%s1376_s2 + $0x8] sm:$0xf]  ;;  %s1384_s15 = smov (!%p270_p4, %s1098_s15), 1 }
   0xd   : > { %v639_v2 = vsel %vm569_vm0, %v417_v0, 0  ;;  %v1157_v3 = vsel %vm569_vm0, %v996_v1, 0  ;;  %v979_v4 = vld [vmem:[%s1376_s2 + $0x4] sm:$0xf]  ;;  %s1056_s25 = smul.u32 72, %s1384_s15  ;;  %vm544_vm1 = vcmask 64512  }
   0xe   : > { %648 = vmatpush.bf16.msra.mxu1 %v639_v2  ;;  %755 = vmatpush.bf16.msra.mxu2 %v1157_v3  ;;  %v571_v5 = vsel %vm569_vm0, %v979_v4, 0  ;;  %vm703_vm7 = vcmask 1046528   ;;  %vm463_vm12 = vsmask.f32 5376  ;;  %s1009_s9 = sshll.u32 %s1384_s15, 6 }
   0xf   : > { %580 = vmatpush.bf16.msra.mxu0 %v571_v5  ;;  %1053 = vmatpush.bf16.msra.mxu3 %v571_v5  ;;  %s1171_s28 = scalar_lea.vmem %s1374_s0, %s1056_s25  ;;  %s1183_s29 = sadd.s32 64, %s1056_s25 }
  0x10   : > { %v1011_v6 = vld [vmem:[%s1171_s28] sm:$0xff]   ;;  %v1046_v7 = vld [vmem:[%s1171_s28 + $0x8] sm:$0xff]   ;;  %v1176_v8 = vld [vmem:[%s1171_s28 + $0x10] sm:$0xff]   ;;  %s293_s6 = scalar_lea.vmem %s1375_s1, %s1183_s29  ;;  %s1304_s12 = scalar_lea.vmem %s1378_s4, %s1009_s9 }
  0x11   : > { %v1012_v9 = vunpack.c.l.bf16 %v1011_v6  ;;  %v1013_v10 = vunpack.c.h.bf16 %v1011_v6  ;;  %v1016_v11 = vunpack.c.l.bf16 %v1046_v7  ;;  %v1017_v12 = vunpack.c.h.bf16 %v1046_v7  ;;  %v1051_v13 = vld [vmem:[%s1171_s28 + $0x30] sm:$0xff]   ;;  %v1052_v14 = vld [vmem:[%s1171_s28 + $0x38] sm:$0xff]   ;;  %v1204_v63 = vld [vmem:[%s293_s6] sm:$0xff]  }
  0x12   : > { %v1020_v15 = vunpack.c.l.bf16 %v1176_v8  ;;  %v1036_v16 = vunpack.c.l.bf16 %v1051_v13  ;;  %v1037_v17 = vunpack.c.h.bf16 %v1051_v13  ;;  %v1040_v18 = vunpack.c.l.bf16 %v1052_v14  ;;  %v1048_v62 = vld [vmem:[%s1171_s28 + $0x18] sm:$0xff]  }
  0x13   : > { %1054 = vmatpush.bf16.msrb.mxu3 %v639_v2  ;;  %vm344_vm2 = vcmp.ge.f32.partialorder %v1012_v9, 0.0  ;;  %vm345_vm3 = vcmp.ge.f32.partialorder %v1013_v10, 0.0  ;;  %v362_v19 = vmul.f32 0.1, %v1012_v9  ;;  %v363_v20 = vmul.f32 0.1, %v1013_v10 }
  0x14   : > { %vm346_vm4 = vcmp.ge.f32.partialorder %v1016_v11, 0.0  ;;  %vm347_vm5 = vcmp.ge.f32.partialorder %v1017_v12, 0.0  ;;  %vm348_vm6 = vcmp.ge.f32.partialorder %v1020_v15, 0.0  ;;  %v364_v21 = vmul.f32 0.1, %v1016_v11 }
  0x15   : > { %v380_v22 = vsel %vm344_vm2, %v1012_v9, %v362_v19  ;;  %v381_v23 = vsel %vm345_vm3, %v1013_v10, %v363_v20  ;;  %v365_v24 = vmul.f32 0.1, %v1017_v12  ;;  %v366_v25 = vmul.f32 0.1, %v1020_v15 }
  0x16   : > { %v398_v26 = vpack.c.bf16 %v380_v22, %v380_v22  ;;  %v399_v27 = vpack.c.bf16 %v381_v23, %v381_v23  ;;  %v382_v28 = vsel %vm346_vm4, %v1016_v11, %v364_v21  ;;  %v1041_v29 = vunpack.c.h.bf16 %v1052_v14  ;;  %v1049_v23 = vld [vmem:[%s1171_s28 + $0x20] sm:$0xff]  }
  0x17   : > { %v383_v30 = vsel %vm347_vm5, %v1017_v12, %v365_v24  ;;  %v384_v31 = vsel %vm348_vm6, %v1020_v15, %v366_v25  ;;  %v400_v32 = vpack.c.bf16 %v382_v28, %v382_v28  ;;  %vm356_vm8 = vcmp.ge.f32.partialorder %v1036_v16, 0.0 }
  0x18   : > { %v437_v33 = vunpack.c.l.b16 %v398_v26  ;;  %v438_v34 = vunpack.c.l.b16 %v399_v27  ;;  %v401_v35 = vpack.c.bf16 %v383_v30, %v383_v30  ;;  %v402_v36 = vpack.c.bf16 %v384_v31, %v384_v31 }
  0x19   : > { %v439_v37 = vunpack.c.l.b16 %v400_v32  ;;  %vm357_vm9 = vcmp.ge.f32.partialorder %v1037_v17, 0.0  ;;  %vm358_vm10 = vcmp.ge.f32.partialorder %v1040_v18, 0.0  ;;  %vm359_vm11 = vcmp.ge.f32.partialorder %v1041_v29, 0.0 }
  0x1a   : > { %v454_v38 = vpack.c.b16 %v438_v34, %v437_v33  ;;  %v440_v39 = vunpack.c.l.b16 %v401_v35  ;;  %v1185_v40 = vunpack.c.l.b16 %v402_v36  ;;  %v374_v41 = vmul.f32 0.1, %v1036_v16 }
  0x1b   : > { %v694_v42 = vpack.c.b16 %v439_v37, %v438_v34  ;;  %v375_v43 = vmul.f32 0.1, %v1037_v17  ;;  %v376_v44 = vmul.f32 0.1, %v1040_v18  ;;  %v377_v45 = vmul.f32 0.1, %v1041_v29 }
  0x1c   : > { %v465_v46 = vshrl.u32 %v454_v38, 16  ;;  %v468_v47 = vshll.u32 %v454_v38, 16  ;;  %988 = vmatmul.msk.bf16.vlgmr.msra.gmra.mxu1 %vm544_vm1, %v454_v38  ;;  %v1188_v48 = vpack.c.b16 %v440_v39, %v439_v37  ;;  %v695_v49 = vpack.c.b16 %v1185_v40, %v440_v39 }
  0x1d   : > { %v704_v50 = vrot.slane %v694_v42, 1  ;;  %v392_v51 = vsel %vm356_vm8, %v1036_v16, %v374_v41  ;;  %v393_v52 = vsel %vm357_vm9, %v1037_v17, %v375_v43  ;;  %v394_v53 = vsel %vm358_vm10, %v1040_v18, %v376_v44 }
  0x1e   : > { %v1198_v54 = vrot.slane %v695_v49, 1  ;;  %v467_v55 = vrot.slane %v465_v46, 2  ;;  %v470_v56 = vrot.slane %v468_v47, 3  ;;  %v473_v57 = vshrl.u32 %v1188_v48, 16 }
  0x1f   : > { %v476_v58 = vshll.u32 %v1188_v48, 16  ;;  %v395_v59 = vsel %vm359_vm11, %v1041_v29, %v377_v45  ;;  %v410_v60 = vpack.c.bf16 %v392_v51, %v392_v51  ;;  %v411_v61 = vpack.c.bf16 %v393_v52, %v393_v52 }
  0x20   : > { %v706_v0 = vsel %vm703_vm7, %v704_v50, %v1198_v54  ;;  %v471_v1 = vor.u32 %v470_v56, %v467_v55  ;;  %v475_v2 = vrot.slane %v473_v57, 2  ;;  %v412_v4 = vpack.c.bf16 %v394_v53, %v394_v53 }
  0x21   : > { %997 = vmatmul.msk.bf16.vlgmr.msra.gmra.mxu2 %vm544_vm1, %v706_v0  ;;  %v478_v5 = vrot.slane %v476_v58, 3  ;;  %v413_v6 = vpack.c.bf16 %v395_v59, %v395_v59  ;;  %v1209_v7 = vunpack.c.l.b16 %v410_v60  ;;  %v1211_v9 = vunpack.c.l.b16 %v411_v61 }
  0x22   : > { %v1213_v10 = vunpack.c.l.b16 %v412_v4  ;;  %v1021_v11 = vunpack.c.h.bf16 %v1176_v8  ;;  %v1024_v12 = vunpack.c.l.bf16 %v1048_v62  ;;  %v1044_v13 = vunpack.c.l.bf16 %v1204_v63 }
  0x23   : > { %v1217_v14 = vor.u32 %v478_v5, %v475_v2  ;;  %v1219_v15 = vunpack.c.l.b16 %v413_v6  ;;  %v1223_v16 = vpack.c.b16 %v1211_v9, %v1209_v7  ;;  %v1025_v17 = vunpack.c.h.bf16 %v1048_v62 }
  0x24   : > { %vm349_vm13 = vcmp.ge.f32.partialorder %v1021_v11, 0.0  ;;  %vm350_vm14 = vcmp.ge.f32.partialorder %v1024_v12, 0.0  ;;  %v367_v18 = vmul.f32 0.1, %v1021_v11  ;;  %v368_v19 = vmul.f32 0.1, %v1024_v12 }
  0x25   : > { %v480_v20 = vsel %vm463_vm12, %v471_v1, %v1217_v14  ;;  %v1229_v8 = vpack.c.b16 %v1219_v15, %v1213_v10  ;;  %v518_v21 = vshrl.u32 %v1223_v16, 16  ;;  %v521_v22 = vshll.u32 %v1223_v16, 16  ;;  %v1050_v1 = vld [vmem:[%s1171_s28 + $0x28] sm:$0xff]  }
  0x26   : > { %980 = vmatmul.msk.bf16.vlgmr.msra.gmra.mxu0 %vm544_vm1, %v480_v20  ;;  %v385_v24 = vsel %vm349_vm13, %v1021_v11, %v367_v18  ;;  %v386_v25 = vsel %vm350_vm14, %v1024_v12, %v368_v19  ;;  %vm360_vm15 = vcmp.ge.f32.partialorder %v1044_v13, 0.0  ;;  %v378_v26 = vmul.f32 0.1, %v1044_v13 }
  0x27   : > { %v520_v27 = vrot.slane %v518_v21, 2  ;;  %v523_v28 = vrot.slane %v521_v22, 3  ;;  %v527_v29 = vshrl.u32 %v1229_v8, 16  ;;  %v530_v30 = vshll.u32 %v1229_v8, 16 }
  0x28   : > { %v403_v31 = vpack.c.bf16 %v385_v24, %v385_v24  ;;  %v404_v32 = vpack.c.bf16 %v386_v25, %v386_v25  ;;  %v396_v33 = vsel %vm360_vm15, %v1044_v13, %v378_v26  ;;  %v1028_v34 = vunpack.c.l.bf16 %v1049_v23 }
  0x29   : > { %v1237_v35 = vor.u32 %v523_v28, %v520_v27  ;;  %v529_v36 = vrot.slane %v527_v29, 2  ;;  %v532_v37 = vrot.slane %v530_v30, 3  ;;  %v414_v38 = vpack.c.bf16 %v396_v33, %v396_v33 }
  0x2a   : > { %v442_v39 = vunpack.c.l.b16 %v403_v31  ;;  %v443_v41 = vunpack.c.l.b16 %v404_v32  ;;  %vm351_vm0 = vcmp.ge.f32.partialorder %v1025_v17, 0.0  ;;  %vm352_vm2 = vcmp.ge.f32.partialorder %v1028_v34, 0.0 }
  0x2b   : > { %v533_v42 = vor.u32 %v532_v37, %v529_v36  ;;  %v1239_v43 = vunpack.c.l.b16 %v414_v38  ;;  %v369_v44 = vmul.f32 0.1, %v1025_v17  ;;  %v370_v45 = vmul.f32 0.1, %v1028_v34 }
  0x2c   : > { %989 = vmatmul.msk.bf16.gmra.mxu1 %vm544_vm1, %v1188_v48  ;;  %v456_v46 = vpack.c.b16 %v442_v39, %v1185_v40  ;;  %v696_v47 = vpack.c.b16 %v443_v41, %v442_v39  ;;  %v1029_v40 = vunpack.c.h.bf16 %v1049_v23  ;;  %v1032_v12 = vunpack.c.l.bf16 %v1050_v1 }
  0x2d   : > { %v534_v49 = vsel %vm463_vm12, %v1237_v35, %v533_v42  ;;  %v462_v50 = vpack.c.b16 %v1239_v43, %v1239_v43  ;;  %v387_v51 = vsel %vm351_vm0, %v1025_v17, %v369_v44  ;;  %v388_v52 = vsel %vm352_vm2, %v1028_v34, %v370_v45 }
  0x2e   : > { %986 = vmatmul.msk.bf16.vlgmr.msra.gmra.mxu3 %vm544_vm1, %v534_v49  ;;  %v707_v53 = vrot.slane %v696_v47, 1  ;;  %v482_v55 = vshrl.u32 %v456_v46, 16  ;;  %v485_v56 = vshll.u32 %v456_v46, 16  ;;  %v405_v57 = vpack.c.bf16 %v387_v51, %v387_v51 }
  0x2f   : > { %v536_v58 = vshrl.u32 %v462_v50, 16  ;;  %v539_v48 = vshll.u32 %v462_v50, 16  ;;  %v406_v59 = vpack.c.bf16 %v388_v52, %v388_v52  ;;  %1055 = vmatpush.bf16.msra.mxu3 %v1157_v3  ;;  %v371_v3 = vmul.f32 0.1, %v1029_v40 }
  0x30   : > { %v708_v60 = vsel %vm703_vm7, %v1198_v54, %v707_v53  ;;  %v484_v61 = vrot.slane %v482_v55, 2  ;;  %v487_v62 = vrot.slane %v485_v56, 3  ;;  %v444_v0 = vunpack.c.l.b16 %v405_v57 }
  0x31   : > { %998 = vmatmul.msk.bf16.gmra.mxu2 %vm544_vm1, %v708_v60  ;;  %v538_v4 = vrot.slane %v536_v58, 2  ;;  %v541_v5 = vrot.slane %v539_v48, 3  ;;  %v445_v6 = vunpack.c.l.b16 %v406_v59  ;;  %vm353_vm3 = vcmp.ge.f32.partialorder %v1029_v40, 0.0 }
  0x32   : > { %v488_v2 = vor.u32 %v487_v62, %v484_v61  ;;  %v457_v11 = vpack.c.b16 %v444_v0, %v443_v41  ;;  %v372_v20 = vmul.f32 0.1, %v1032_v12  ;;  %vm354_vm4 = vcmp.ge.f32.partialorder %v1032_v12, 0.0 }
  0x33   : > { %v542_v54 = vor.u32 %v541_v5, %v538_v4  ;;  %v697_v17 = vpack.c.b16 %v445_v6, %v444_v0  ;;  %v389_v21 = vsel %vm353_vm3, %v1029_v40, %v371_v3  ;;  %v700_v44 = vpack.c.b16 %v1213_v10, %v1211_v9  ;;  %v1297_v3 = vld [vmem:[%s1377_s3] ss:$0 sm:$0xff] }
  0x34   : > { %v489_v13 = vsel %vm463_vm12, %v1217_v14, %v488_v2  ;;  %v491_v18 = vshrl.u32 %v457_v11, 16  ;;  %v494_v19 = vshll.u32 %v457_v11, 16  ;;  %v390_v26 = vsel %vm354_vm4, %v1032_v12, %v372_v20 }
  0x35   : > { %v543_v22 = vsel %vm463_vm12, %v533_v42, %v542_v54  ;;  %v709_v23 = vrot.slane %v697_v17, 1  ;;  %v407_v27 = vpack.c.bf16 %v389_v21, %v389_v21  ;;  %v1033_v14 = vunpack.c.h.bf16 %v1050_v1 }
  0x36   : > { %981 = vmatmul.msk.bf16.gmra.mxu0 %vm544_vm1, %v489_v13  ;;  %v493_v24 = vrot.slane %v491_v18, 2  ;;  %v496_v25 = vrot.slane %v494_v19, 3  ;;  %v408_v29 = vpack.c.bf16 %v390_v26, %v390_v26  ;;  %v701_v45 = vpack.c.b16 %v1239_v43, %v1219_v15 }
  0x37   : > { %v710_v28 = vsel %vm703_vm7, %v707_v53, %v709_v23  ;;  %vm355_vm5 = vcmp.ge.f32.partialorder %v1033_v14, 0.0  ;;  %v373_v30 = vmul.f32 0.1, %v1033_v14  ;;  %v446_v32 = vunpack.c.l.b16 %v407_v27 }
  0x38   : > { %v497_v31 = vor.u32 %v496_v25, %v493_v24  ;;  %v447_v36 = vunpack.c.l.b16 %v408_v29  ;;  %v715_v52 = vrot.slane %v700_v44, 1  ;;  %v717_v53 = vrot.slane %v701_v45, 1 }
  0x39   : > { %v391_v33 = vsel %vm355_vm5, %v1033_v14, %v373_v30  ;;  %v458_v38 = vpack.c.b16 %v446_v32, %v445_v6  ;;  %v1045_v40 = vunpack.c.h.bf16 %v1204_v63 }
  0x3a   : > { %v409_v34 = vpack.c.bf16 %v391_v33, %v391_v33  ;;  %v498_v37 = vsel %vm463_vm12, %v488_v2, %v497_v31  ;;  %v698_v42 = vpack.c.b16 %v447_v36, %v446_v32  ;;  %v718_v56 = vsel %vm703_vm7, %v715_v52, %v717_v53 }
  0x3b   : > { %v503_v47 = vshll.u32 %v458_v38, 16  ;;  %v379_v61 = vmul.f32 0.1, %v1045_v40  ;;  %vm361_vm6 = vcmp.ge.f32.partialorder %v1045_v40, 0.0 }
  0x3c   : > { %990 = vmatmul.msk.bf16.gmra.mxu1 %vm544_vm1, %v456_v46  ;;  %v448_v39 = vunpack.c.l.b16 %v409_v34  ;;  %v500_v46 = vshrl.u32 %v458_v38, 16  ;;  %v711_v55 = vrot.slane %v698_v42, 1 }
  0x3d   : > { %v505_v58 = vrot.slane %v503_v47, 3  ;;  %v397_v0 = vsel %vm361_vm6, %v1045_v40, %v379_v61 }
  0x3e   : > { %987 = vmatmul.msk.bf16.gmra.mxu3 %vm544_vm1, %v543_v22  ;;  %v459_v41 = vpack.c.b16 %v448_v39, %v447_v36  ;;  %v699_v51 = vpack.c.b16 %v1209_v7, %v448_v39  ;;  %v502_v57 = vrot.slane %v500_v46, 2  ;;  %v712_v10 = vsel %vm703_vm7, %v709_v23, %v711_v55 }
  0x3f   : > { %v415_v1 = vpack.c.bf16 %v397_v0, %v397_v0 }
  0x40   : > { %v509_v49 = vshrl.u32 %v459_v41, 16  ;;  %v512_v50 = vshll.u32 %v459_v41, 16  ;;  %v713_v9 = vrot.slane %v699_v51, 1  ;;  %v506_v7 = vor.u32 %v505_v58, %v502_v57 }
  0x41   : > { %999 = vmatmul.msk.bf16.gmra.mxu2 %vm544_vm1, %v710_v28 }
  0x42   : > { %v511_v48 = vrot.slane %v509_v49, 2  ;;  %v514_v59 = vrot.slane %v512_v50, 3  ;;  %v716_v15 = vsel %vm703_vm7, %v713_v9, %v715_v52  ;;  %v507_v62 = vsel %vm463_vm12, %v497_v31, %v506_v7 }
  0x44   : > { %v515_v43 = vor.u32 %v514_v59, %v511_v48 }
  0x46   : > { %982 = vmatmul.msk.bf16.gmra.mxu0 %vm544_vm1, %v498_v37  ;;  %v525_v60 = vsel %vm463_vm12, %v515_v43, %v1237_v35  ;;  %v714_v35 = vsel %vm703_vm7, %v711_v55, %v713_v9  ;;  %v516_v5 = vsel %vm463_vm12, %v506_v7, %v515_v43 }
  0x4c   : > { %991 = vmatmul.msk.bf16.gmra.mxu1 %vm544_vm1, %v457_v11 }
  0x4e   : > { %994 = vmatmul.msk.bf16.vlgmr.msrb.gmra.mxu3 %vm544_vm1, %v1223_v16  ;;  %v693_v16 = vunpack.c.l.b16 %v415_v1 }
  0x50   : > { %v702_v2 = vpack.c.b16 %v693_v16, %v693_v16 }
  0x51   : > { %1000 = vmatmul.msk.bf16.gmra.mxu2 %vm544_vm1, %v712_v10 }
  0x52   : > { %v719_v4 = vrot.slane %v702_v2, 1 }
  0x54   : > { %v720_v63 = vsel %vm703_vm7, %v717_v53, %v719_v4 }
  0x56   : > { %983 = vmatmul.msk.bf16.gmra.mxu0 %vm544_vm1, %v507_v62 }
  0x5c   : > { %992 = vmatmul.msk.bf16.gmra.mxu1 %vm544_vm1, %v458_v38 }
  0x5e   : > { %995 = vmatmul.msk.bf16.gmra.mxu3 %vm544_vm1, %v1229_v8 }
  0x61   : > { %1001 = vmatmul.msk.bf16.gmra.mxu2 %vm544_vm1, %v714_v35 }
  0x66   : > { %984 = vmatmul.msk.bf16.gmra.mxu0 %vm544_vm1, %v516_v5 }
  0x6c   : > { %993 = vmatmul.msk.bf16.gmra.mxu1 %vm544_vm1, %v459_v41 }
  0x6e   : > { %1003 = vmatmul.msk.bf16.vlgmr.msra.gmra.mxu3 %vm544_vm1, %v718_v56 }
  0x71   : > { %1002 = vmatmul.msk.bf16.gmra.mxu2 %vm544_vm1, %v716_v15 }
  0x76   : > { %985 = vmatmul.msk.bf16.gmra.mxu0 %vm544_vm1, %v525_v60 }
  0x7e   : > { %1004 = vmatmul.msk.bf16.gmra.mxu3 %vm544_vm1, %v720_v63  ;;  %vm848_vm1 = vcmask 60416  }
  0x99   : > { %v650_v8 = vpop.f32.mrf.mxu1 }
  0xa1   : > { %v652_v6 = vpop.f32.mrf.mxu1 }
  0xa3   : > { %v582_v11 = vpop.f32.mrf.mxu0 }
  0xa4   : > { %v651_v12 = vadd.f32 %v650_v8, %v582_v11  ;;  %v757_v13 = vpop.f32.mrf.mxu2 }
  0xa6   : > { %v797_v54 = vadd.f32 %v757_v13, %v651_v12 }
  0xa8   : > { %v816_v17 = vadd.f32 %v1297_v3, %v797_v54 }
  0xa9   : > { %v655_v18 = vpop.f32.mrf.mxu1 }
  0xaa   : > { %v832_v19 = vpack.c.bf16 %v816_v17, %v816_v17 }
  0xab   : > { %v584_v20 = vpop.f32.mrf.mxu0 }
  0xac   : > { %849 = vst.msk [vmem:[%s1304_s12] sm:$0xf] %vm848_vm1, %v832_v19  ;;  %v653_v21 = vadd.f32 %v652_v6, %v584_v20  ;;  %v759_v22 = vpop.f32.mrf.mxu2 }
  0xae   : > { %v798_v23 = vadd.f32 %v759_v22, %v653_v21 }
  0xb0   : > { %v817_v24 = vadd.f32 %v1297_v3, %v798_v23 }
  0xb1   : > { %v1309_v25 = vpop.f32.mrf.mxu3  ;;  %v657_v26 = vpop.f32.mrf.mxu1 }
  0xb2   : > { %v833_v27 = vpack.c.bf16 %v817_v24, %v817_v24 }
  0xb3   : > { %v587_v14 = vpop.f32.mrf.mxu0 }
  0xb4   : > { %850 = vst.msk [vmem:[%s1304_s12 + $0x4] sm:$0xf] %vm848_vm1, %v833_v27  ;;  %v656_v28 = vadd.f32 %v655_v18, %v587_v14  ;;  %v762_v29 = vpop.f32.mrf.mxu2 }
  0xb6   : > { %v799_v30 = vadd.f32 %v762_v29, %v656_v28 }
  0xb8   : > { %v818_v31 = vadd.f32 %v1297_v3, %v799_v30 }
  0xb9   : > { %v1314_v32 = vpop.f32.mrf.mxu3  ;;  %v660_v33 = vpop.f32.mrf.mxu1 }
  0xba   : > { %v834_v34 = vpack.c.bf16 %v818_v31, %v818_v31 }
  0xbb   : > { %v589_v36 = vpop.f32.mrf.mxu0 }
  0xbc   : > { %851 = vst.msk [vmem:[%s1304_s12 + $0x8] sm:$0xf] %vm848_vm1, %v834_v34  ;;  %v658_v37 = vadd.f32 %v657_v26, %v589_v36  ;;  %v764_v38 = vpop.f32.mrf.mxu2 }
  0xbe   : > { %v800_v39 = vadd.f32 %v764_v38, %v658_v37 }
  0xc0   : > { %v819_v41 = vadd.f32 %v1297_v3, %v800_v39 }
  0xc1   : > { %v1319_v42 = vpop.f32.mrf.mxu3  ;;  %v662_v44 = vpop.f32.mrf.mxu1 }
  0xc2   : > { %v835_v45 = vpack.c.bf16 %v819_v41, %v819_v41 }
  0xc3   : > { %v592_v46 = vpop.f32.mrf.mxu0 }
  0xc4   : > { %852 = vst.msk [vmem:[%s1304_s12 + $0xc] sm:$0xf] %vm848_vm1, %v835_v45  ;;  %v661_v47 = vadd.f32 %v660_v33, %v592_v46  ;;  %v767_v49 = vpop.f32.mrf.mxu2 }
  0xc6   : > { %v801_v50 = vadd.f32 %v767_v49, %v661_v47 }
  0xc8   : > { %v820_v51 = vadd.f32 %v1297_v3, %v801_v50 }
  0xc9   : > { %v1324_v52 = vpop.f32.mrf.mxu3  ;;  %v665_v53 = vpop.f32.mrf.mxu1 }
  0xca   : > { %v836_v55 = vpack.c.bf16 %v820_v51, %v820_v51 }
  0xcb   : > { %v594_v56 = vpop.f32.mrf.mxu0 }
  0xcc   : > { %853 = vst.msk [vmem:[%s1304_s12 + $0x10] sm:$0xf] %vm848_vm1, %v836_v55  ;;  %v663_v57 = vadd.f32 %v662_v44, %v594_v56  ;;  %v769_v58 = vpop.f32.mrf.mxu2 }
  0xce   : > { %v802_v48 = vadd.f32 %v769_v58, %v663_v57 }
  0xd0   : > { %v821_v59 = vadd.f32 %v1297_v3, %v802_v48 }
  0xd1   : > { %v680_v9 = vpop.f32.mrf.mxu3  ;;  %v667_v7 = vpop.f32.mrf.mxu1 }
  0xd2   : > { %v837_v10 = vpack.c.bf16 %v821_v59, %v821_v59  ;;  %v681_v24 = vadd.f32 %v680_v9, %v1309_v25 }
  0xd3   : > { %v597_v15 = vpop.f32.mrf.mxu0 }
  0xd4   : > { %854 = vst.msk [vmem:[%s1304_s12 + $0x14] sm:$0xf] %vm848_vm1, %v837_v10  ;;  %v666_v43 = vadd.f32 %v665_v53, %v597_v15  ;;  %v772_v40 = vpop.f32.mrf.mxu2 }
  0xd6   : > { %v803_v60 = vadd.f32 %v772_v40, %v666_v43 }
  0xd8   : > { %v822_v61 = vadd.f32 %v1297_v3, %v803_v60 }
  0xd9   : > { %v682_v62 = vpop.f32.mrf.mxu3  ;;  %v670_v4 = vpop.f32.mrf.mxu1 }
  0xda   : > { %v838_v0 = vpack.c.bf16 %v822_v61, %v822_v61  ;;  %v683_v38 = vadd.f32 %v682_v62, %v1314_v32 }
  0xdb   : > { %v599_v1 = vpop.f32.mrf.mxu0 }
  0xdc   : > { %855 = vst.msk [vmem:[%s1304_s12 + $0x18] sm:$0xf] %vm848_vm1, %v838_v0  ;;  %v668_v16 = vadd.f32 %v667_v7, %v599_v1  ;;  %v774_v2 = vpop.f32.mrf.mxu2 }
  0xde   : > { %v804_v63 = vadd.f32 %v774_v2, %v668_v16 }
  0xe0   : > { %v823_v35 = vadd.f32 %v1297_v3, %v804_v63 }
  0xe1   : > { %v685_v5 = vpop.f32.mrf.mxu3  ;;  %v672_v54 = vpop.f32.mrf.mxu1 }
  0xe2   : > { %v839_v8 = vpack.c.bf16 %v823_v35, %v823_v35  ;;  %v686_v32 = vadd.f32 %v685_v5, %v1319_v42 }
  0xe3   : > { %v602_v6 = vpop.f32.mrf.mxu0 }
  0xe4   : > { %856 = vst.msk [vmem:[%s1304_s12 + $0x1c] sm:$0xf] %vm848_vm1, %v839_v8  ;;  %v671_v11 = vadd.f32 %v670_v4, %v602_v6  ;;  %v777_v12 = vpop.f32.mrf.mxu2 }
  0xe6   : > { %v805_v13 = vadd.f32 %v777_v12, %v671_v11 }
  0xe8   : > { %v824_v17 = vadd.f32 %v1297_v3, %v805_v13 }
  0xe9   : > { %v687_v18 = vpop.f32.mrf.mxu3  ;;  %v675_v14 = vpop.f32.mrf.mxu1 }
  0xea   : > { %v840_v19 = vpack.c.bf16 %v824_v17, %v824_v17  ;;  %v688_v9 = vadd.f32 %v687_v18, %v1324_v52 }
  0xeb   : > { %v604_v20 = vpop.f32.mrf.mxu0 }
  0xec   : > { %857 = vst.msk [vmem:[%s1304_s12 + $0x20] sm:$0xf] %vm848_vm1, %v840_v19  ;;  %v673_v21 = vadd.f32 %v672_v54, %v604_v20  ;;  %v779_v22 = vpop.f32.mrf.mxu2 }
  0xee   : > { %v806_v23 = vadd.f32 %v779_v22, %v673_v21 }
  0xf0   : > { %v825_v26 = vadd.f32 %v1297_v3, %v806_v23 }
  0xf1   : > { %v787_v27 = vpop.f32.mrf.mxu3  ;;  %v677_v45 = vpop.f32.mrf.mxu1 }
  0xf2   : > { %v809_v28 = vadd.f32 %v787_v27, %v681_v24  ;;  %v841_v29 = vpack.c.bf16 %v825_v26, %v825_v26 }
  0xf3   : > { %v607_v30 = vpop.f32.mrf.mxu0 }
  0xf4   : > { %v828_v31 = vadd.f32 %v1297_v3, %v809_v28  ;;  %858 = vst.msk [vmem:[%s1304_s12 + $0x24] sm:$0xf] %vm848_vm1, %v841_v29  ;;  %v676_v33 = vadd.f32 %v675_v14, %v607_v30  ;;  %v782_v34 = vpop.f32.mrf.mxu2 }
  0xf6   : > { %v844_v36 = vpack.c.bf16 %v828_v31, %v828_v31  ;;  %v807_v37 = vadd.f32 %v782_v34, %v676_v33 }
  0xf8   : > { %861 = vst.msk [vmem:[%s1304_s12 + $0x30] sm:$0xf] %vm848_vm1, %v844_v36  ;;  %v826_v25 = vadd.f32 %v1297_v3, %v807_v37 }
  0xf9   : > { %v789_v39 = vpop.f32.mrf.mxu3 }
  0xfa   : > { %v810_v41 = vadd.f32 %v789_v39, %v683_v38  ;;  %v842_v44 = vpack.c.bf16 %v826_v25, %v826_v25 }
  0xfb   : > { %v609_v46 = vpop.f32.mrf.mxu0 }
  0xfc   : > { %v829_v47 = vadd.f32 %v1297_v3, %v810_v41  ;;  %859 = vst.msk [vmem:[%s1304_s12 + $0x28] sm:$0xf] %vm848_vm1, %v842_v44  ;;  %v678_v49 = vadd.f32 %v677_v45, %v609_v46  ;;  %v784_v50 = vpop.f32.mrf.mxu2 }
  0xfe   : > { %v845_v51 = vpack.c.bf16 %v829_v47, %v829_v47  ;;  %v808_v53 = vadd.f32 %v784_v50, %v678_v49 }
 0x100   : > { %862 = vst.msk [vmem:[%s1304_s12 + $0x34] sm:$0xf] %vm848_vm1, %v845_v51  ;;  %v827_v55 = vadd.f32 %v1297_v3, %v808_v53 }
 0x101   : > { %v792_v56 = vpop.f32.mrf.mxu3 }
 0x102   : > { %v811_v57 = vadd.f32 %v792_v56, %v686_v32  ;;  %v843_v58 = vpack.c.bf16 %v827_v55, %v827_v55 }
 0x104   : > { %v830_v48 = vadd.f32 %v1297_v3, %v811_v57  ;;  %860 = vst.msk [vmem:[%s1304_s12 + $0x2c] sm:$0xf] %vm848_vm1, %v843_v58 }
 0x106   : > { %v846_v59 = vpack.c.bf16 %v830_v48, %v830_v48 }
 0x108   : > { %863 = vst.msk [vmem:[%s1304_s12 + $0x38] sm:$0xf] %vm848_vm1, %v846_v59 }
 0x109   : > { %v794_v10 = vpop.f32.mrf.mxu3 }
 0x10a   : > { %v812_v15 = vadd.f32 %v794_v10, %v688_v9 }
 0x10c   : > { %v831_v42 = vadd.f32 %v1297_v3, %v812_v15 }
 0x10e   : > { %v847_v7 = vpack.c.bf16 %v831_v42, %v831_v42 }
 0x110   : > { %864 = vst.msk [vmem:[%s1304_s12 + $0x3c] sm:$0xf] %vm848_vm1, %v847_v7 }
 0x111 PF: > { %s14_s17 = sadd.s32 1, %s1106_s17   ;;  %s1379_s15 = smov %s1102_s16 }
 0x112   : > { %p11_p5 = scmp.ge.s32.totalorder %s14_s17, 4   ;;  %s1380_s16 = smov %s1382_s18 }
 0x114   :  { %13 = sbr.rel (!%p11_p5) target bundleno = 2 (0x2), region = 71 }

// kernel: _lambda_.37
= control target key start
LH: loop header
LB: loop body
LE: loop exit
PB: predicated region body
PF: predicated region fallthrough
CT: control target
= control target key end

     0   :  { %s1843_s17 = smov 0   ;;  %s1845_s18 = smov 0   ;;  %s2686_s0 = inlined_call_operand.vmem [shape: bf16[2,144,8], index: 0, kind: input, shape index: {}, may-alias: {0,1}]   ;;  %s2687_s1 = inlined_call_operand.vmem [shape: bf16[2,144,8], index: 1, kind: input, shape index: {}, may-alias: {0,1}]   ;;  %s2688_s2 = inlined_call_operand.vmem [shape: f32[1,7,8,1], index: 2, kind: input, shape index: {}]   ;;  %s2689_s3 = inlined_call_operand.<no memory space> [shape: f32[1,1], index: 3, kind: input, shape index: {}]   ;;  %s2690_s4 = inlined_call_operand.vmem [shape: f32[2,128,1], index: 4, kind: output, shape index: {}]  }
   0x1   :  { %v9_v0 = vstv %s2689_s3  ;;  %s1847_s19 = smov 0  }
   0x2   :  { %10 = vst [vmem:[#allocation2] sm:$0x1] %v9_v0 }
   0x3 LB: > { %s28_s3 = sadd.s32 1, %s1808_s18  ;;  %p1671_p0 = scmp.ge.s32.totalorder %s1812_s19, 1  ;;  %s1812_s19 = sphi %s1847_s19, %s16_s19   ;;  %s1808_s18 = sphi %s1845_s18, %s2692_s18   ;;  %s1804_s17 = sphi %s1843_s17, %s2691_s17  }
   0x4   : > { %p30_p1 = scmp.ge.s32.totalorder %s28_s3, 2  ;;  %p218_p2 = scmp.lt.s32.totalorder %s1812_s19, 3 }
   0x6   : > { %s2694_s3 = smov (%p30_p1, %s28_s3), 0  ;;  %p219_p3 = pnand %p1671_p0, %p218_p2 }
   0x7   : > { %p272_p4 = scmp.lt.s32.totalorder (!%p219_p3), %s1804_s17, 1 }
   0x8   : > { %222 = sbr.rel (%p219_p3) target bundleno = 1192 (0x4a8), region = 36 }
   0xd   : > { %v395_v1 = vld [vmem:[%s2688_s2] sm:$0xff]  ;;  %v1676_v2 = vld [vmem:[%s2688_s2 + $0x8] sm:$0xff]  ;;  %v1814_v3 = vmov 0   ;;  %s2696_s17 = smov (!%p272_p4, %s1804_s17), 1  ;;  %v400_v6 = vlaneseq  ;;  %vm432_vm3 = vcmask 64512  }
   0xe   : > { %1754 = vset.pattern.permute.xlu0 %v1814_v3  ;;  %1755 = vset.pattern.permute.xlu1 %v1814_v3  ;;  %s1726_s24 = smul.u32 72, %s2696_s17  ;;  %s1686_s16 = sshll.u32 %s2696_s17, 7 }
   0xf   : > { %398 = vperm.xlu0 %1754, %v395_v1   ;;  %485 = vperm.xlu1 %1755, %v1676_v2   ;;  %v1880_v11 = vand.u32 127, %v400_v6  ;;  %s2582_s22 = scalar_lea.vmem %s2690_s4, %s1686_s16 }
  0x10   : > { %1756 = vset.pattern.permute.xlu2 %v1814_v3  ;;  %s1875_s27 = scalar_lea.vmem %s2686_s0, %s1726_s24  ;;  %s1685_s28 = sadd.s32 64, %s1726_s24 }
  0x11   : > { %v1719_v4 = vld [vmem:[%s1875_s27 + $0x8] sm:$0xff]   ;;  %v1688_v5 = vld [vmem:[%s1875_s27] sm:$0xff]   ;;  %v1720_v10 = vld [vmem:[%s1875_s27 + $0x10] sm:$0xff]   ;;  %s295_s5 = scalar_lea.vmem %s2687_s1, %s1685_s28 }
  0x12   : > { %v1694_v7 = vunpack.c.h.bf16 %v1719_v4  ;;  %v1690_v8 = vunpack.c.h.bf16 %v1688_v5  ;;  %v1689_v9 = vunpack.c.l.bf16 %v1688_v5  ;;  %v1883_v12 = vld [vmem:[%s1875_s27 + $0x38] sm:$0xff]   ;;  %v1697_v16 = vunpack.c.l.bf16 %v1720_v10  ;;  %v1722_v45 = vld [vmem:[%s1875_s27 + $0x20] sm:$0xff]   ;;  %v1723_v59 = vld [vmem:[%s1875_s27 + $0x28] sm:$0xff]  }
  0x13   : > { %v1693_v17 = vunpack.c.l.bf16 %v1719_v4  ;;  %v1718_v18 = vunpack.c.h.bf16 %v1883_v12  ;;  %v1721_v30 = vld [vmem:[%s1875_s27 + $0x18] sm:$0xff]   ;;  %v1698_v37 = vunpack.c.h.bf16 %v1720_v10  ;;  %v1705_v49 = vunpack.c.l.bf16 %v1722_v45 }
  0x14   : > { %v363_v13 = vmul.f32 0.01, %v1694_v7  ;;  %v361_v14 = vmul.f32 0.01, %v1690_v8  ;;  %v360_v15 = vmul.f32 0.01, %v1689_v9  ;;  %v1701_v36 = vunpack.c.l.bf16 %v1721_v30 }
  0x15   : > { %vm346_vm0 = vcmp.ge.f32.partialorder %v1694_v7, 0.0  ;;  %vm344_vm1 = vcmp.ge.f32.partialorder %v1690_v8, 0.0  ;;  %vm343_vm2 = vcmp.ge.f32.partialorder %v1689_v9, 0.0  ;;  %v364_v24 = vmul.f32 0.01, %v1697_v16 }
  0x16   : > { %v1886_v20 = vsel %vm346_vm0, %v1694_v7, %v363_v13  ;;  %v1888_v21 = vsel %vm344_vm1, %v1690_v8, %v361_v14  ;;  %v1890_v22 = vsel %vm343_vm2, %v1689_v9, %v360_v15  ;;  %vm347_vm4 = vcmp.ge.f32.partialorder %v1697_v16, 0.0  ;;  %v1724_v8 = vld [vmem:[%s1875_s27 + $0x30] sm:$0xff]  }
  0x17   : > { %vm345_vm5 = vcmp.ge.f32.partialorder %v1693_v17, 0.0  ;;  %v362_v25 = vmul.f32 0.01, %v1693_v17  ;;  %v375_v29 = vmul.f32 0.01, %v1718_v18  ;;  %vm358_vm6 = vcmp.ge.f32.partialorder %v1718_v18, 0.0 }
  0x18   : > { %v1905_v34 = vsel %vm347_vm4, %v1697_v16, %v364_v24  ;;  %v366_v43 = vmul.f32 0.01, %v1701_v36  ;;  %v365_v44 = vmul.f32 0.01, %v1698_v37  ;;  %vm349_vm7 = vcmp.ge.f32.partialorder %v1701_v36, 0.0 }
  0x19   : > { %v1907_v35 = vsel %vm345_vm5, %v1693_v17, %v362_v25  ;;  %v1909_v38 = vsel %vm358_vm6, %v1718_v18, %v375_v29  ;;  %vm348_vm8 = vcmp.ge.f32.partialorder %v1698_v37, 0.0  ;;  %v1702_v53 = vunpack.c.h.bf16 %v1721_v30 }
  0x1a   : > { %v1924_v51 = vsel %vm349_vm7, %v1701_v36, %v366_v43  ;;  %v1926_v52 = vsel %vm348_vm8, %v1698_v37, %v365_v44  ;;  %v368_v57 = vmul.f32 0.01, %v1705_v49  ;;  %vm351_vm9 = vcmp.ge.f32.partialorder %v1705_v49, 0.0 }
  0x1b   : > { %v367_v58 = vmul.f32 0.01, %v1702_v53  ;;  %vm350_vm10 = vcmp.ge.f32.partialorder %v1702_v53, 0.0  ;;  %v1709_v1 = vunpack.c.l.bf16 %v1723_v59  ;;  %v1706_v2 = vunpack.c.h.bf16 %v1722_v45 }
  0x1c   : > { %v1938_v63 = vsel %vm351_vm9, %v1705_v49, %v368_v57  ;;  %v1713_v16 = vunpack.c.l.bf16 %v1724_v8  ;;  %v1710_v17 = vunpack.c.h.bf16 %v1723_v59  ;;  %vm519_vm1 = vcmask 64513  }
  0x1d   : > { %v1940_v0 = vsel %vm350_vm10, %v1702_v53, %v367_v58  ;;  %v370_v6 = vmul.f32 0.01, %v1709_v1  ;;  %v369_v7 = vmul.f32 0.01, %v1706_v2  ;;  %vm353_vm11 = vcmp.ge.f32.partialorder %v1709_v1, 0.0 }
  0x1e   : > { %vm352_vm12 = vcmp.ge.f32.partialorder %v1706_v2, 0.0  ;;  %v372_v25 = vmul.f32 0.01, %v1713_v16  ;;  %vm355_vm13 = vcmp.ge.f32.partialorder %v1713_v16, 0.0  ;;  %vm354_vm14 = vcmp.ge.f32.partialorder %v1710_v17, 0.0 }
  0x1f   : > { %v1952_v14 = vsel %vm353_vm11, %v1709_v1, %v370_v6  ;;  %v1954_v15 = vsel %vm352_vm12, %v1706_v2, %v369_v7  ;;  %vm568_vm4 = vcmask 57344   ;;  %vm589_vm5 = vcmask 1046528  }
  0x20   : > { %v1965_v30 = vsel %vm355_vm13, %v1713_v16, %v372_v25  ;;  %vm692_vm6 = vcmask 64514   ;;  %vm741_vm7 = vcmask 58368   ;;  %vm762_vm8 = vcmask 1045504  }
  0x21   : > { %vm864_vm9 = vcmask 64515   ;;  %vm913_vm10 = vcmask 59392   ;;  %vm934_vm11 = vcmask 1044480   ;;  %vm1035_vm12 = vcmask 64516  }
  0x22   : > { %vm1084_vm13 = vcmask 60416  }
  0x81   : > { %v399_v19 = vpop.permute.xlu0 %398  ;;  %v486_v41 = vpop.permute.xlu1 %485 }
  0x82   : > { %v1893_v23 = vperm.slane %v399_v19, %v1880_v11  ;;  %v1919_v46 = vperm.slane %v486_v41, %v1880_v11 }
  0x84   : > { %v419_v26 = vmul.f32 %v1893_v23, %v1886_v20  ;;  %v417_v27 = vmul.f32 %v1893_v23, %v1888_v21  ;;  %v416_v28 = vmul.f32 %v1893_v23, %v1890_v22  ;;  %v420_v39 = vmul.f32 %v1893_v23, %v1905_v34 }
  0x85   : > { %v418_v40 = vmul.f32 %v1893_v23, %v1907_v35  ;;  %v431_v42 = vmul.f32 %v1893_v23, %v1909_v38  ;;  %v503_v54 = vmul.f32 %v1919_v46, %v1888_v21  ;;  %v422_v55 = vmul.f32 %v1893_v23, %v1924_v51 }
  0x86   : > { %v442_v31 = vsel %vm432_vm3, %v419_v26, 0.0  ;;  %v436_v32 = vsel %vm432_vm3, %v417_v27, 0.0  ;;  %v433_v33 = vsel %vm432_vm3, %v416_v28, 0.0  ;;  %v445_v47 = vsel %vm432_vm3, %v420_v39, 0.0 }
  0x87   : > { %443 = vadd.xlane.f32.xlu2 %v442_v31  ;;  %437 = vadd.xlane.f32.xlu1 %v436_v32  ;;  %v439_v48 = vsel %vm432_vm3, %v418_v40, 0.0  ;;  %v478_v50 = vsel %vm432_vm3, %v431_v42, 0.0  ;;  %v421_v56 = vmul.f32 %v1893_v23, %v1926_v52  ;;  %v523_v60 = vsel %vm432_vm3, %v503_v54, 0.0 }
  0x88   : > { %434 = vadd.xlane.f32.xlu0 %v433_v33  ;;  %v451_v61 = vsel %vm432_vm3, %v422_v55, 0.0  ;;  %v505_v3 = vmul.f32 %v1919_v46, %v1886_v20  ;;  %v424_v4 = vmul.f32 %v1893_v23, %v1938_v63  ;;  %v423_v5 = vmul.f32 %v1893_v23, %v1940_v0 }
  0x89   : > { %v448_v62 = vsel %vm432_vm3, %v421_v56, 0.0  ;;  %v507_v18 = vmul.f32 %v1919_v46, %v1926_v52  ;;  %v426_v19 = vmul.f32 %v1893_v23, %v1952_v14  ;;  %v425_v24 = vmul.f32 %v1893_v23, %v1954_v15 }
  0x8a   : > { %v529_v9 = vsel %vm432_vm3, %v505_v3, 0.0  ;;  %v457_v10 = vsel %vm432_vm3, %v424_v4, 0.0  ;;  %v454_v13 = vsel %vm432_vm3, %v423_v5, 0.0  ;;  %v371_v26 = vmul.f32 0.01, %v1710_v17 }
  0x8b   : > { %v535_v27 = vsel %vm432_vm3, %v507_v18, 0.0  ;;  %v463_v28 = vsel %vm432_vm3, %v426_v19, 0.0  ;;  %v460_v29 = vsel %vm432_vm3, %v425_v24, 0.0  ;;  %v1717_v32 = vunpack.c.l.bf16 %v1883_v12 }
  0x8c   : > { %v1967_v31 = vsel %vm354_vm14, %v1710_v17, %v371_v26  ;;  %v1714_v33 = vunpack.c.h.bf16 %v1724_v8  ;;  %v510_v36 = vmul.f32 %v1919_v46, %v1938_v63  ;;  %v428_v37 = vmul.f32 %v1893_v23, %v1965_v30 }
  0x8d   : > { %v427_v39 = vmul.f32 %v1893_v23, %v1967_v31  ;;  %v374_v40 = vmul.f32 0.01, %v1717_v32  ;;  %vm357_vm15 = vcmp.ge.f32.partialorder %v1717_v32, 0.0  ;;  %v509_v55 = vmul.f32 %v1919_v46, %v1940_v0 }
  0x8e   : > { %v373_v41 = vmul.f32 0.01, %v1714_v33  ;;  %vm356_vm0 = vcmp.ge.f32.partialorder %v1714_v33, 0.0  ;;  %v544_v42 = vsel %vm432_vm3, %v510_v36, 0.0  ;;  %v469_v12 = vsel %vm432_vm3, %v428_v37, 0.0 }
  0x8f   : > { %446 = vadd.xlane.f32.xlu2 %v445_v47  ;;  %440 = vadd.xlane.f32.xlu1 %v439_v48  ;;  %v466_v43 = vsel %vm432_vm3, %v427_v39, 0.0  ;;  %v1979_v44 = vsel %vm357_vm15, %v1717_v32, %v374_v40  ;;  %v512_v47 = vmul.f32 %v1919_v46, %v1952_v14  ;;  %v502_v56 = vmul.f32 %v1919_v46, %v1890_v22 }
  0x90   : > { %479 = vadd.xlane.f32.xlu0 %v478_v50  ;;  %v1981_v45 = vsel %vm356_vm0, %v1714_v33, %v373_v41  ;;  %v430_v48 = vmul.f32 %v1893_v23, %v1979_v44  ;;  %v541_v57 = vsel %vm432_vm3, %v509_v55, 0.0  ;;  %v516_v1 = vmul.f32 %v1919_v46, %v1979_v44  ;;  %v1677_v41 = vld [vmem:[%s2688_s2 + $0x10] sm:$0xff] }
  0x91   : > { %v429_v49 = vmul.f32 %v1893_v23, %v1981_v45  ;;  %v550_v50 = vsel %vm432_vm3, %v512_v47, 0.0  ;;  %v514_v23 = vmul.f32 %v1919_v46, %v1965_v30  ;;  %v520_v58 = vsel %vm519_vm1, %v502_v56, 0.0 }
  0x92   : > { %v475_v53 = vsel %vm432_vm3, %v430_v48, 0.0  ;;  %v562_v4 = vsel %vm432_vm3, %v516_v1, 0.0  ;;  %v506_v6 = vmul.f32 %v1919_v46, %v1905_v34  ;;  %v511_v16 = vmul.f32 %v1919_v46, %v1954_v15 }
  0x93   : > { %v472_v54 = vsel %vm432_vm3, %v429_v49, 0.0  ;;  %v556_v59 = vsel %vm432_vm3, %v514_v23, 0.0  ;;  %v513_v18 = vmul.f32 %v1919_v46, %v1967_v31  ;;  %v515_v24 = vmul.f32 %v1919_v46, %v1981_v45 }
  0x94   : > { %v532_v8 = vsel %vm432_vm3, %v506_v6, 0.0  ;;  %v547_v17 = vsel %vm432_vm3, %v511_v16, 0.0  ;;  %v517_v26 = vmul.f32 %v1919_v46, %v1909_v38  ;;  %vm1105_vm14 = vcmask 1043456  }
  0x95   : > { %v553_v19 = vsel %vm432_vm3, %v513_v18, 0.0  ;;  %v559_v25 = vsel %vm432_vm3, %v515_v24, 0.0  ;;  %vm1205_vm15 = vcmask 64517   ;;  %vm1254_vm0 = vcmask 61440  }
  0x96   : > { %vm1275_vm1 = vcmask 1042432  }
  0x97   : > { %452 = vadd.xlane.f32.xlu2 %v451_v61  ;;  %449 = vadd.xlane.f32.xlu1 %v448_v62  ;;  %v504_v62 = vmul.f32 %v1919_v46, %v1907_v35 }
  0x98   : > { %524 = vadd.xlane.f32.xlu0 %v523_v60  ;;  %v341_v60 = vld [vmem:[%s295_s5] sm:$0xf] }
  0x99   : > { %v342_v61 = vunpack.c.l.bf16 %v341_v60  ;;  %v526_v3 = vsel %vm432_vm3, %v504_v62, 0.0 }
  0x9b   : > { %v376_v2 = vmul.f32 0.01, %v342_v61  ;;  %vm359_vm2 = vcmp.ge.f32.partialorder %v342_v61, 0.0 }
  0x9d   : > { %v2011_v5 = vsel %vm359_vm2, %v342_v61, %v376_v2  ;;  %vm1374_vm2 = vcmask 64518  }
  0x9e   : > { %v518_v7 = vmul.f32 %v1919_v46, %v2011_v5 }
  0x9f   : > { %458 = vadd.xlane.f32.xlu2 %v457_v10  ;;  %455 = vadd.xlane.f32.xlu1 %v454_v13  ;;  %v508_v10 = vmul.f32 %v1919_v46, %v1924_v51 }
  0xa0   : > { %530 = vadd.xlane.f32.xlu0 %v529_v9  ;;  %v569_v9 = vsel %vm568_vm4, %v518_v7, 0.0  ;;  %vm1423_vm4 = vcmask 62464  }
  0xa1   : > { %v538_v13 = vsel %vm432_vm3, %v508_v10, 0.0 }
  0xa7   : > { %464 = vadd.xlane.f32.xlu2 %v463_v28  ;;  %461 = vadd.xlane.f32.xlu1 %v460_v29 }
  0xa8   : > { %536 = vadd.xlane.f32.xlu0 %v535_v27  ;;  %v565_v27 = vsel %vm432_vm3, %v517_v26, 0.0 }
  0xaf   : > { %470 = vadd.xlane.f32.xlu2 %v469_v12  ;;  %467 = vadd.xlane.f32.xlu1 %v466_v43 }
  0xb0   : > { %545 = vadd.xlane.f32.xlu0 %v544_v42 }
  0xb7   : > { %476 = vadd.xlane.f32.xlu2 %v475_v53  ;;  %473 = vadd.xlane.f32.xlu1 %v472_v54 }
  0xb8   : > { %551 = vadd.xlane.f32.xlu0 %v550_v50 }
  0xbf   : > { %542 = vadd.xlane.f32.xlu1 %v541_v57  ;;  %521 = vadd.xlane.f32.xlu2 %v520_v58 }
  0xc0   : > { %557 = vadd.xlane.f32.xlu0 %v556_v59 }
  0xc7   : > { %527 = vadd.xlane.f32.xlu2 %v526_v3 }
  0xc8   : > { %563 = vadd.xlane.f32.xlu0 %v562_v4 }
  0xcf   : > { %533 = vadd.xlane.f32.xlu2 %v532_v8 }
  0xd0   : > { %570 = vadd.xlane.f32.xlu0 %v569_v9 }
  0xd7   : > { %539 = vadd.xlane.f32.xlu2 %v538_v13 }
  0xdf   : > { %548 = vadd.xlane.f32.xlu2 %v547_v17 }
  0xe7   : > { %554 = vadd.xlane.f32.xlu2 %v553_v19 }
  0xef   : > { %560 = vadd.xlane.f32.xlu2 %v559_v25 }
  0xf7   : > { %566 = vadd.xlane.f32.xlu2 %v565_v27 }
  0xfa   : > { %v2033_v28 = vpop.xlane.xlu2 %443  ;;  %v438_v29 = vpop.xlane.xlu1 %437 }
  0xfb   : > { %v435_v32 = vpop.xlane.xlu0 %434 }
 0x102   : > { %v447_v33 = vpop.xlane.xlu2 %446  ;;  %v441_v36 = vpop.xlane.xlu1 %440 }
 0x103   : > { %v2035_v37 = vpop.xlane.xlu0 %479 }
 0x10a   : > { %v453_v39 = vpop.xlane.xlu2 %452  ;;  %v450_v40 = vpop.xlane.xlu1 %449 }
 0x10b   : > { %v525_v42 = vpop.xlane.xlu0 %524 }
 0x10c   : > { %v591_v23 = vrot.slane %v525_v42, 1 }
 0x10f   : > { %659 = vperm.xlu2 %1756, %v1677_v41  }
 0x112   : > { %v459_v46 = vpop.xlane.xlu2 %458  ;;  %v456_v12 = vpop.xlane.xlu1 %455 }
 0x113   : > { %v531_v48 = vpop.xlane.xlu0 %530 }
 0x114   : > { %v595_v6 = vrot.slane %v531_v48, 1 }
 0x11a   : > { %v465_v43 = vpop.xlane.xlu2 %464  ;;  %v462_v47 = vpop.xlane.xlu1 %461 }
 0x11b   : > { %v537_v53 = vpop.xlane.xlu0 %536 }
 0x11c   : > { %v599_v17 = vrot.slane %v537_v53, 1 }
 0x122   : > { %v471_v49 = vpop.xlane.xlu2 %470  ;;  %v468_v50 = vpop.xlane.xlu1 %467 }
 0x123   : > { %v546_v56 = vpop.xlane.xlu0 %545 }
 0x124   : > { %v605_v57 = vrot.slane %v546_v56, 1 }
 0x12a   : > { %v477_v54 = vpop.xlane.xlu2 %476  ;;  %v474_v55 = vpop.xlane.xlu1 %473 }
 0x132   : > { %v543_v58 = vpop.xlane.xlu1 %542  ;;  %v522_v59 = vpop.xlane.xlu2 %521 }
 0x133   : > { %v603_v60 = vrot.slane %v543_v58, 1  ;;  %v590_v61 = vrot.slane %v522_v59, 1 }
 0x135   : > { %v606_v62 = vsel %vm589_vm5, %v603_v60, %v605_v57  ;;  %v592_v1 = vsel %vm589_vm5, %v590_v61, %v591_v23 }
 0x136   : > { %v2042_v2 = vadd.f32 %v606_v62, %v456_v12  ;;  %v2044_v3 = vadd.f32 %v592_v1, %v435_v32  ;;  %v552_v32 = vpop.xlane.xlu0 %551 }
 0x137   : > { %v609_v48 = vrot.slane %v552_v32, 1 }
 0x13a   : > { %v528_v4 = vpop.xlane.xlu2 %527 }
 0x13b   : > { %v593_v7 = vrot.slane %v528_v4, 1 }
 0x13d   : > { %v594_v8 = vsel %vm589_vm5, %v591_v23, %v593_v7  ;;  %v596_v9 = vsel %vm589_vm5, %v593_v7, %v595_v6 }
 0x13e   : > { %v2048_v10 = vadd.f32 %v594_v8, %v438_v29  ;;  %v2050_v13 = vadd.f32 %v596_v9, %v441_v36 }
 0x142   : > { %v534_v16 = vpop.xlane.xlu2 %533 }
 0x143   : > { %v597_v18 = vrot.slane %v534_v16, 1 }
 0x145   : > { %v2053_v19 = vsel %vm589_vm5, %v595_v6, %v597_v18  ;;  %v600_v24 = vsel %vm589_vm5, %v597_v18, %v599_v17 }
 0x146   : > { %v2056_v25 = vadd.f32 %v600_v24, %v447_v33  ;;  %v558_v33 = vpop.xlane.xlu0 %557 }
 0x147   : > { %v613_v62 = vrot.slane %v558_v33, 1 }
 0x14a   : > { %v540_v26 = vpop.xlane.xlu2 %539 }
 0x14b   : > { %v601_v27 = vrot.slane %v540_v26, 1 }
 0x14d   : > { %v602_v41 = vsel %vm589_vm5, %v599_v17, %v601_v27  ;;  %v604_v29 = vsel %vm589_vm5, %v601_v27, %v603_v60 }
 0x14e   : > { %v2060_v42 = vadd.f32 %v602_v41, %v450_v40  ;;  %v2062_v36 = vadd.f32 %v604_v29, %v453_v39  ;;  %v564_v6 = vpop.xlane.xlu0 %563 }
 0x14f   : > { %v617_v7 = vrot.slane %v564_v6, 1 }
 0x152   : > { %v549_v12 = vpop.xlane.xlu2 %548 }
 0x153   : > { %v607_v53 = vrot.slane %v549_v12, 1 }
 0x155   : > { %v608_v56 = vsel %vm589_vm5, %v605_v57, %v607_v53  ;;  %v610_v23 = vsel %vm589_vm5, %v607_v53, %v609_v48 }
 0x156   : > { %v2066_v58 = vadd.f32 %v608_v56, %v459_v46  ;;  %v2068_v59 = vadd.f32 %v610_v23, %v462_v47 }
 0x15a   : > { %v555_v61 = vpop.xlane.xlu2 %554 }
 0x15b   : > { %v611_v1 = vrot.slane %v555_v61, 1 }
 0x15d   : > { %v612_v40 = vsel %vm589_vm5, %v609_v48, %v611_v1  ;;  %v614_v39 = vsel %vm589_vm5, %v611_v1, %v613_v62 }
 0x15e   : > { %v2072_v60 = vadd.f32 %v612_v40, %v465_v43  ;;  %v2074_v4 = vadd.f32 %v614_v39, %v468_v50  ;;  %v1678_v40 = vld [vmem:[%s2688_s2 + $0x18] sm:$0xff] }
 0x162   : > { %v561_v57 = vpop.xlane.xlu2 %560 }
 0x163   : > { %v615_v8 = vrot.slane %v561_v57, 1 }
 0x165   : > { %v616_v46 = vsel %vm589_vm5, %v613_v62, %v615_v8  ;;  %v618_v47 = vsel %vm589_vm5, %v615_v8, %v617_v7 }
 0x166   : > { %v2078_v9 = vadd.f32 %v616_v46, %v471_v49  ;;  %v2080_v16 = vadd.f32 %v618_v47, %v474_v55 }
 0x16a   : > { %v2082_v17 = vpop.xlane.xlu2 %566 }
 0x16b   : > { %v619_v18 = vrot.slane %v2082_v17, 1 }
 0x16d   : > { %v620_v43 = vsel %vm589_vm5, %v617_v7, %v619_v18 }
 0x16e   : > { %v2088_v50 = vadd.f32 %v620_v43, %v477_v54 }
 0x172   : > { %v660_v24 = vpop.permute.xlu2 %659 }
 0x173   : > { %v661_v26 = vperm.slane %v660_v24, %v1880_v11 }
 0x175   : > { %v681_v27 = vmul.f32 %v661_v26, %v1924_v51  ;;  %v676_v49 = vmul.f32 %v661_v26, %v1888_v21  ;;  %v675_v55 = vmul.f32 %v661_v26, %v1890_v22  ;;  %v678_v54 = vmul.f32 %v661_v26, %v1886_v20 }
 0x176   : > { %v677_v12 = vmul.f32 %v661_v26, %v1907_v35  ;;  %v680_v56 = vmul.f32 %v661_v26, %v1926_v52  ;;  %v679_v23 = vmul.f32 %v661_v26, %v1905_v34  ;;  %v683_v62 = vmul.f32 %v661_v26, %v1938_v63 }
 0x177   : > { %v711_v32 = vsel %vm432_vm3, %v681_v27, 0.0  ;;  %v696_v41 = vsel %vm432_vm3, %v676_v49, 0.0  ;;  %v693_v29 = vsel %vm692_vm6, %v675_v55, 0.0  ;;  %v702_v48 = vsel %vm432_vm3, %v678_v54, 0.0 }
 0x178   : > { %712 = vadd.xlane.f32.xlu2 %v711_v32  ;;  %697 = vadd.xlane.f32.xlu1 %v696_v41  ;;  %v699_v53 = vsel %vm432_vm3, %v677_v12, 0.0  ;;  %v708_v33 = vsel %vm432_vm3, %v680_v56, 0.0  ;;  %v705_v61 = vsel %vm432_vm3, %v679_v23, 0.0  ;;  %v682_v1 = vmul.f32 %v661_v26, %v1940_v0 }
 0x179   : > { %694 = vadd.xlane.f32.xlu0 %v693_v29  ;;  %v717_v39 = vsel %vm432_vm3, %v683_v62, 0.0  ;;  %v685_v57 = vmul.f32 %v661_v26, %v1952_v14  ;;  %v684_v7 = vmul.f32 %v661_v26, %v1954_v15  ;;  %v687_v47 = vmul.f32 %v661_v26, %v1965_v30 }
 0x17a   : > { %v714_v6 = vsel %vm432_vm3, %v682_v1, 0.0  ;;  %v686_v43 = vmul.f32 %v661_v26, %v1967_v31  ;;  %v689_v49 = vmul.f32 %v661_v26, %v1979_v44  ;;  %v688_v55 = vmul.f32 %v661_v26, %v1981_v45 }
 0x17b   : > { %v723_v8 = vsel %vm432_vm3, %v685_v57, 0.0  ;;  %v720_v46 = vsel %vm432_vm3, %v684_v7, 0.0  ;;  %v729_v24 = vsel %vm432_vm3, %v687_v47, 0.0  ;;  %v691_v29 = vmul.f32 %v661_v26, %v2011_v5 }
 0x17c   : > { %v726_v27 = vsel %vm432_vm3, %v686_v43, 0.0  ;;  %v735_v32 = vsel %vm432_vm3, %v689_v49, 0.0  ;;  %v732_v41 = vsel %vm432_vm3, %v688_v55, 0.0  ;;  %v690_v54 = vmul.f32 %v661_v26, %v1909_v38 }
 0x17d   : > { %v742_v12 = vsel %vm741_vm7, %v691_v29, 0.0 }
 0x180   : > { %703 = vadd.xlane.f32.xlu1 %v702_v48  ;;  %v738_v48 = vsel %vm432_vm3, %v690_v54, 0.0 }
 0x181   : > { %700 = vadd.xlane.f32.xlu0 %v699_v53  ;;  %v2126_v53 = vpop.xlane.xlu0 %570 }
 0x188   : > { %709 = vadd.xlane.f32.xlu1 %v708_v33 }
 0x189   : > { %706 = vadd.xlane.f32.xlu0 %v705_v61 }
 0x190   : > { %832 = vperm.xlu2 %1756, %v1678_v40   ;;  %718 = vadd.xlane.f32.xlu1 %v717_v39 }
 0x191   : > { %715 = vadd.xlane.f32.xlu0 %v714_v6 }
 0x198   : > { %724 = vadd.xlane.f32.xlu1 %v723_v8 }
 0x199   : > { %721 = vadd.xlane.f32.xlu0 %v720_v46 }
 0x1a0   : > { %730 = vadd.xlane.f32.xlu1 %v729_v24 }
 0x1a1   : > { %727 = vadd.xlane.f32.xlu0 %v726_v27 }
 0x1a8   : > { %736 = vadd.xlane.f32.xlu1 %v735_v32 }
 0x1a9   : > { %733 = vadd.xlane.f32.xlu0 %v732_v41 }
 0x1b0   : > { %743 = vadd.xlane.f32.xlu1 %v742_v12 }
 0x1b1   : > { %739 = vadd.xlane.f32.xlu0 %v738_v48 }
 0x1eb   : > { %v713_v56 = vpop.xlane.xlu2 %712  ;;  %v698_v23 = vpop.xlane.xlu1 %697 }
 0x1ec   : > { %v764_v33 = vrot.slane %v698_v23, 2  ;;  %v695_v61 = vpop.xlane.xlu0 %694  ;;  %v774_v54 = vrot.slane %v713_v56, 2 }
 0x1ed   : > { %v763_v62 = vrot.slane %v695_v61, 2 }
 0x1ef   : > { %v765_v1 = vsel %vm762_vm8, %v763_v62, %v764_v33 }
 0x1f0   : > { %v2130_v40 = vadd.f32 %v765_v1, %v2044_v3 }
 0x1f3   : > { %v833_v39 = vpop.permute.xlu2 %832  ;;  %v704_v26 = vpop.xlane.xlu1 %703 }
 0x1f4   : > { %v2133_v6 = vperm.slane %v833_v39, %v1880_v11  ;;  %v768_v57 = vrot.slane %v704_v26, 2  ;;  %v701_v7 = vpop.xlane.xlu0 %700 }
 0x1f5   : > { %v766_v8 = vrot.slane %v701_v7, 2 }
 0x1f6   : > { %v853_v46 = vmul.f32 %v2133_v6, %v1924_v51  ;;  %v848_v47 = vmul.f32 %v2133_v6, %v1888_v21  ;;  %v847_v43 = vmul.f32 %v2133_v6, %v1890_v22  ;;  %v850_v23 = vmul.f32 %v2133_v6, %v1886_v20 }
 0x1f7   : > { %v767_v3 = vsel %vm762_vm8, %v764_v33, %v766_v8  ;;  %v769_v24 = vsel %vm762_vm8, %v766_v8, %v768_v57  ;;  %v642_v33 = vadd.f32 %v2053_v19, %v2033_v28 }
 0x1f8   : > { %v2144_v27 = vadd.f32 %v767_v3, %v2048_v10  ;;  %v2147_v49 = vadd.f32 %v769_v24, %v2050_v13  ;;  %v883_v55 = vsel %vm432_vm3, %v853_v46, 0.0  ;;  %v868_v32 = vsel %vm432_vm3, %v848_v47, 0.0 }
 0x1f9   : > { %884 = vadd.xlane.f32.xlu2 %v883_v55  ;;  %869 = vadd.xlane.f32.xlu1 %v868_v32  ;;  %v865_v41 = vsel %vm864_vm9, %v847_v43, 0.0  ;;  %v849_v13 = vmul.f32 %v2133_v6, %v1907_v35  ;;  %v874_v7 = vsel %vm432_vm3, %v850_v23, 0.0  ;;  %v851_v47 = vmul.f32 %v2133_v6, %v1905_v34 }
 0x1fa   : > { %866 = vadd.xlane.f32.xlu0 %v865_v41 }
 0x1fb   : > { %v710_v29 = vpop.xlane.xlu1 %709  ;;  %v871_v8 = vsel %vm432_vm3, %v849_v13, 0.0  ;;  %v877_v32 = vsel %vm432_vm3, %v851_v47, 0.0 }
 0x1fc   : > { %v772_v12 = vrot.slane %v710_v29, 2  ;;  %v707_v48 = vpop.xlane.xlu0 %706 }
 0x1fd   : > { %v770_v10 = vrot.slane %v707_v48, 2 }
 0x1fe   : > { %v775_v61 = vsel %vm762_vm8, %v772_v12, %v774_v54 }
 0x1ff   : > { %v2159_v62 = vadd.f32 %v775_v61, %v2060_v42  ;;  %v771_v1 = vsel %vm762_vm8, %v768_v57, %v770_v10  ;;  %v773_v56 = vsel %vm762_vm8, %v770_v10, %v772_v12  ;;  %v852_v42 = vmul.f32 %v2133_v6, %v1926_v52 }
 0x200   : > { %v2163_v39 = vadd.f32 %v771_v1, %v642_v33  ;;  %v2166_v26 = vadd.f32 %v773_v56, %v2056_v25 }
 0x201   : > { %875 = vadd.xlane.f32.xlu1 %v874_v7  ;;  %v880_v55 = vsel %vm432_vm3, %v852_v42, 0.0 }
 0x202   : > { %872 = vadd.xlane.f32.xlu0 %v871_v8  ;;  %v857_v8 = vmul.f32 %v2133_v6, %v1952_v14 }
 0x203   : > { %v719_v28 = vpop.xlane.xlu1 %718 }
 0x204   : > { %v778_v19 = vrot.slane %v719_v28, 2  ;;  %v716_v46 = vpop.xlane.xlu0 %715 }
 0x205   : > { %v776_v57 = vrot.slane %v716_v46, 2 }
 0x207   : > { %v777_v43 = vsel %vm762_vm8, %v774_v54, %v776_v57  ;;  %v779_v25 = vsel %vm762_vm8, %v776_v57, %v778_v19  ;;  %v855_v54 = vmul.f32 %v2133_v6, %v1938_v63  ;;  %v895_v57 = vsel %vm432_vm3, %v857_v8, 0.0 }
 0x208   : > { %v2177_v3 = vadd.f32 %v777_v43, %v2062_v36  ;;  %v2180_v24 = vadd.f32 %v779_v25, %v2042_v2  ;;  %v854_v36 = vmul.f32 %v2133_v6, %v1940_v0  ;;  %v862_v8 = vmul.f32 %v2133_v6, %v1909_v38 }
 0x209   : > { %881 = vadd.xlane.f32.xlu1 %v880_v55  ;;  %v889_v33 = vsel %vm432_vm3, %v855_v54, 0.0 }
 0x20a   : > { %878 = vadd.xlane.f32.xlu0 %v877_v32  ;;  %v886_v61 = vsel %vm432_vm3, %v854_v36, 0.0  ;;  %v859_v32 = vmul.f32 %v2133_v6, %v1965_v30 }
 0x20b   : > { %v725_v41 = vpop.xlane.xlu1 %724 }
 0x20c   : > { %v782_v29 = vrot.slane %v725_v41, 2  ;;  %v722_v12 = vpop.xlane.xlu0 %721 }
 0x20d   : > { %v780_v48 = vrot.slane %v722_v12, 2 }
 0x20f   : > { %v781_v23 = vsel %vm762_vm8, %v778_v19, %v780_v48  ;;  %v783_v2 = vsel %vm762_vm8, %v780_v48, %v782_v29  ;;  %v901_v48 = vsel %vm432_vm3, %v859_v32, 0.0 }
 0x210   : > { %v2191_v10 = vadd.f32 %v781_v23, %v2066_v58  ;;  %v2194_v13 = vadd.f32 %v783_v2, %v2068_v59  ;;  %v856_v58 = vmul.f32 %v2133_v6, %v1954_v15  ;;  %v861_v2 = vmul.f32 %v2133_v6, %v1979_v44 }
 0x211   : > { %890 = vadd.xlane.f32.xlu1 %v889_v33 }
 0x212   : > { %887 = vadd.xlane.f32.xlu0 %v886_v61  ;;  %v892_v47 = vsel %vm432_vm3, %v856_v58, 0.0  ;;  %v910_v58 = vsel %vm432_vm3, %v862_v8, 0.0 }
 0x213   : > { %v731_v1 = vpop.xlane.xlu1 %730 }
 0x214   : > { %v786_v56 = vrot.slane %v731_v1, 2  ;;  %v728_v7 = vpop.xlane.xlu0 %727  ;;  %v907_v1 = vsel %vm432_vm3, %v861_v2, 0.0 }
 0x215   : > { %v784_v28 = vrot.slane %v728_v7, 2  ;;  %v863_v7 = vmul.f32 %v2133_v6, %v2011_v5 }
 0x217   : > { %v785_v19 = vsel %vm762_vm8, %v782_v29, %v784_v28  ;;  %v787_v59 = vsel %vm762_vm8, %v784_v28, %v786_v56  ;;  %v914_v28 = vsel %vm913_vm10, %v863_v7, 0.0 }
 0x218   : > { %v2205_v46 = vadd.f32 %v785_v19, %v2072_v60  ;;  %v2208_v42 = vadd.f32 %v787_v59, %v2074_v4  ;;  %v858_v60 = vmul.f32 %v2133_v6, %v1967_v31 }
 0x219   : > { %896 = vadd.xlane.f32.xlu1 %v895_v57 }
 0x21a   : > { %893 = vadd.xlane.f32.xlu0 %v892_v47  ;;  %v898_v36 = vsel %vm432_vm3, %v858_v60, 0.0 }
 0x21b   : > { %v737_v43 = vpop.xlane.xlu1 %736 }
 0x21c   : > { %v790_v25 = vrot.slane %v737_v43, 2  ;;  %v734_v55 = vpop.xlane.xlu0 %733 }
 0x21d   : > { %v788_v41 = vrot.slane %v734_v55, 2 }
 0x21f   : > { %v789_v29 = vsel %vm762_vm8, %v786_v56, %v788_v41  ;;  %v791_v4 = vsel %vm762_vm8, %v788_v41, %v790_v25 }
 0x220   : > { %v2219_v12 = vadd.f32 %v789_v29, %v2078_v9  ;;  %v2222_v54 = vadd.f32 %v791_v4, %v2080_v16  ;;  %v860_v9 = vmul.f32 %v2133_v6, %v1981_v45 }
 0x221   : > { %902 = vadd.xlane.f32.xlu1 %v901_v48 }
 0x222   : > { %899 = vadd.xlane.f32.xlu0 %v898_v36  ;;  %v904_v56 = vsel %vm432_vm3, %v860_v9, 0.0 }
 0x223   : > { %v2249_v19 = vpop.xlane.xlu1 %743 }
 0x224   : > { %v2226_v23 = vpop.xlane.xlu0 %739 }
 0x225   : > { %v792_v33 = vrot.slane %v2226_v23, 2 }
 0x227   : > { %v793_v16 = vsel %vm762_vm8, %v790_v25, %v792_v33 }
 0x228   : > { %v2237_v61 = vadd.f32 %v793_v16, %v2088_v50  ;;  %v1679_v50 = vld [vmem:[%s2688_s2 + $0x20] sm:$0xff] }
 0x229   : > { %908 = vadd.xlane.f32.xlu1 %v907_v1 }
 0x22a   : > { %905 = vadd.xlane.f32.xlu0 %v904_v56 }
 0x231   : > { %915 = vadd.xlane.f32.xlu1 %v914_v28 }
 0x232   : > { %911 = vadd.xlane.f32.xlu0 %v910_v58 }
 0x246   : > { %1004 = vperm.xlu0 %1754, %v1679_v50  }
 0x26c   : > { %v870_v59 = vpop.xlane.xlu1 %869  ;;  %v885_v2 = vpop.xlane.xlu2 %884 }
 0x26d   : > { %v936_v57 = vrot.slane %v870_v59, 3  ;;  %v867_v47 = vpop.xlane.xlu0 %866  ;;  %v946_v16 = vrot.slane %v885_v2, 3 }
 0x26e   : > { %v935_v43 = vrot.slane %v867_v47, 3 }
 0x270   : > { %v937_v25 = vsel %vm934_vm11, %v935_v43, %v936_v57 }
 0x271   : > { %v2253_v6 = vadd.f32 %v937_v25, %v2130_v40 }
 0x274   : > { %v876_v55 = vpop.xlane.xlu1 %875 }
 0x275   : > { %v940_v32 = vrot.slane %v876_v55, 3  ;;  %v873_v41 = vpop.xlane.xlu0 %872 }
 0x276   : > { %v938_v60 = vrot.slane %v873_v41, 3 }
 0x278   : > { %v939_v29 = vsel %vm934_vm11, %v936_v57, %v938_v60  ;;  %v941_v4 = vsel %vm934_vm11, %v938_v60, %v940_v32 }
 0x279   : > { %v2258_v48 = vadd.f32 %v939_v29, %v2144_v27  ;;  %v2261_v36 = vadd.f32 %v941_v4, %v2147_v49 }
 0x27c   : > { %v882_v9 = vpop.xlane.xlu1 %881 }
 0x27d   : > { %v944_v1 = vrot.slane %v882_v9, 3  ;;  %v879_v40 = vpop.xlane.xlu0 %878 }
 0x27e   : > { %v942_v56 = vrot.slane %v879_v40, 3 }
 0x27f   : > { %v947_v7 = vsel %vm934_vm11, %v944_v1, %v946_v16 }
 0x280   : > { %v2265_v8 = vadd.f32 %v947_v7, %v2159_v62  ;;  %v943_v28 = vsel %vm934_vm11, %v940_v32, %v942_v56  ;;  %v945_v58 = vsel %vm934_vm11, %v942_v56, %v944_v1 }
 0x281   : > { %v2270_v27 = vadd.f32 %v943_v28, %v2163_v39  ;;  %v2273_v49 = vadd.f32 %v945_v58, %v2166_v26 }
 0x284   : > { %v891_v50 = vpop.xlane.xlu1 %890 }
 0x285   : > { %v950_v59 = vrot.slane %v891_v50, 3  ;;  %v888_v57 = vpop.xlane.xlu0 %887 }
 0x286   : > { %v948_v47 = vrot.slane %v888_v57, 3 }
 0x288   : > { %v949_v43 = vsel %vm934_vm11, %v946_v16, %v948_v47  ;;  %v951_v25 = vsel %vm934_vm11, %v948_v47, %v950_v59 }
 0x289   : > { %v2278_v62 = vadd.f32 %v949_v43, %v2177_v3  ;;  %v2281_v55 = vadd.f32 %v951_v25, %v2180_v24 }
 0x28c   : > { %v897_v32 = vpop.xlane.xlu1 %896 }
 0x28d   : > { %v954_v39 = vrot.slane %v897_v32, 3  ;;  %v894_v41 = vpop.xlane.xlu0 %893 }
 0x28e   : > { %v952_v60 = vrot.slane %v894_v41, 3 }
 0x290   : > { %v953_v26 = vsel %vm934_vm11, %v950_v59, %v952_v60  ;;  %v955_v29 = vsel %vm934_vm11, %v952_v60, %v954_v39  ;;  %v794_v59 = vrot.slane %v2249_v19, 2 }
 0x291   : > { %v2286_v4 = vadd.f32 %v953_v26, %v2191_v10  ;;  %v2289_v2 = vadd.f32 %v955_v29, %v2194_v13  ;;  %v621_v13 = vrot.slane %v2126_v53, 1 }
 0x292   : > { %v795_v53 = vsel %vm762_vm8, %v792_v33, %v794_v59 }
 0x294   : > { %v903_v9 = vpop.xlane.xlu1 %902 }
 0x295   : > { %v958_v3 = vrot.slane %v903_v9, 3  ;;  %v900_v16 = vpop.xlane.xlu0 %899 }
 0x296   : > { %v956_v1 = vrot.slane %v900_v16, 3 }
 0x298   : > { %v957_v24 = vsel %vm934_vm11, %v954_v39, %v956_v1  ;;  %v959_v40 = vsel %vm934_vm11, %v956_v1, %v958_v3 }
 0x299   : > { %v2294_v56 = vadd.f32 %v957_v24, %v2205_v46  ;;  %v2297_v7 = vadd.f32 %v959_v40, %v2208_v42  ;;  %v622_v42 = vsel %vm589_vm5, %v619_v18, %v621_v13  ;;  %v1680_v13 = vld [vmem:[%s2688_s2 + $0x28] sm:$0xff]  ;;  %vm1444_vm5 = vcmask 1041408  }
 0x29a   : > { %v654_v19 = vadd.f32 %v622_v42, %v2035_v37 }
 0x29c   : > { %v909_v28 = vpop.xlane.xlu1 %908  ;;  %v827_v60 = vadd.f32 %v795_v53, %v654_v19 }
 0x29d   : > { %v962_v10 = vrot.slane %v909_v28, 3  ;;  %v906_v58 = vpop.xlane.xlu0 %905 }
 0x29e   : > { %v960_v50 = vrot.slane %v906_v58, 3 }
 0x2a0   : > { %v961_v57 = vsel %vm934_vm11, %v958_v3, %v960_v50  ;;  %v963_v47 = vsel %vm934_vm11, %v960_v50, %v962_v10 }
 0x2a1   : > { %v2304_v43 = vadd.f32 %v961_v57, %v2219_v12  ;;  %v2307_v46 = vadd.f32 %v963_v47, %v2222_v54 }
 0x2a4   : > { %v916_v25 = vpop.xlane.xlu1 %915 }
 0x2a5   : > { %v966_v32 = vrot.slane %v916_v25, 3  ;;  %v912_v39 = vpop.xlane.xlu0 %911 }
 0x2a6   : > { %v964_v41 = vrot.slane %v912_v39, 3 }
 0x2a8   : > { %v965_v12 = vsel %vm934_vm11, %v962_v10, %v964_v41  ;;  %v967_v54 = vsel %vm934_vm11, %v964_v41, %v966_v32 }
 0x2a9   : > { %v2319_v26 = vadd.f32 %v965_v12, %v2237_v61  ;;  %v2321_v17 = vadd.f32 %v967_v54, %v827_v60 }
 0x2b8   : > { %v1005_v18 = vpop.permute.xlu0 %1004 }
 0x2b9   : > { %v1006_v23 = vperm.slane %v1005_v18, %v1880_v11 }
 0x2bb   : > { %v1024_v33 = vmul.f32 %v1006_v23, %v1924_v51  ;;  %v1019_v37 = vmul.f32 %v1006_v23, %v1888_v21  ;;  %v1018_v29 = vmul.f32 %v1006_v23, %v1890_v22  ;;  %v1021_v61 = vmul.f32 %v1006_v23, %v1886_v20 }
 0x2bc   : > { %v1020_v1 = vmul.f32 %v1006_v23, %v1907_v35  ;;  %v1023_v28 = vmul.f32 %v1006_v23, %v1926_v52  ;;  %v1022_v10 = vmul.f32 %v1006_v23, %v1905_v34  ;;  %v1026_v59 = vmul.f32 %v1006_v23, %v1938_v63 }
 0x2bd   : > { %v1054_v9 = vsel %vm432_vm3, %v1024_v33, 0.0  ;;  %v1039_v3 = vsel %vm432_vm3, %v1019_v37, 0.0  ;;  %v1036_v16 = vsel %vm1035_vm12, %v1018_v29, 0.0  ;;  %v1045_v24 = vsel %vm432_vm3, %v1021_v61, 0.0 }
 0x2be   : > { %1055 = vadd.xlane.f32.xlu0 %v1054_v9  ;;  %1040 = vadd.xlane.f32.xlu1 %v1039_v3  ;;  %v1042_v40 = vsel %vm432_vm3, %v1020_v1, 0.0  ;;  %v1051_v58 = vsel %vm432_vm3, %v1023_v28, 0.0  ;;  %v1048_v50 = vsel %vm432_vm3, %v1022_v10, 0.0  ;;  %v1025_v57 = vmul.f32 %v1006_v23, %v1940_v0 }
 0x2bf   : > { %1037 = vadd.xlane.f32.xlu2 %v1036_v16  ;;  %v1060_v47 = vsel %vm432_vm3, %v1026_v59, 0.0  ;;  %v1028_v53 = vmul.f32 %v1006_v23, %v1952_v14  ;;  %v1027_v25 = vmul.f32 %v1006_v23, %v1954_v15  ;;  %v1030_v39 = vmul.f32 %v1006_v23, %v1965_v30 }
 0x2c0   : > { %v1057_v42 = vsel %vm432_vm3, %v1025_v57, 0.0  ;;  %v1029_v41 = vmul.f32 %v1006_v23, %v1967_v31  ;;  %v1032_v54 = vmul.f32 %v1006_v23, %v1979_v44  ;;  %v1031_v18 = vmul.f32 %v1006_v23, %v1981_v45 }
 0x2c1   : > { %v1066_v19 = vsel %vm432_vm3, %v1028_v53, 0.0  ;;  %v1063_v32 = vsel %vm432_vm3, %v1027_v25, 0.0  ;;  %v1072_v60 = vsel %vm432_vm3, %v1030_v39, 0.0  ;;  %v1034_v29 = vmul.f32 %v1006_v23, %v2011_v5 }
 0x2c2   : > { %v1069_v12 = vsel %vm432_vm3, %v1029_v41, 0.0  ;;  %v1078_v33 = vsel %vm432_vm3, %v1032_v54, 0.0  ;;  %v1075_v37 = vsel %vm432_vm3, %v1031_v18, 0.0  ;;  %v1033_v9 = vmul.f32 %v1006_v23, %v1909_v38 }
 0x2c3   : > { %v1085_v3 = vsel %vm1084_vm13, %v1034_v29, 0.0 }
 0x2c4   : > { %v1081_v16 = vsel %vm432_vm3, %v1033_v9, 0.0 }
 0x2c6   : > { %1046 = vadd.xlane.f32.xlu1 %v1045_v24 }
 0x2c7   : > { %1043 = vadd.xlane.f32.xlu2 %v1042_v40 }
 0x2ce   : > { %1052 = vadd.xlane.f32.xlu1 %v1051_v58 }
 0x2cf   : > { %1049 = vadd.xlane.f32.xlu2 %v1048_v50 }
 0x2d2   : > { %1175 = vperm.xlu0 %1754, %v1680_v13  }
 0x2d6   : > { %1061 = vadd.xlane.f32.xlu1 %v1060_v47 }
 0x2d7   : > { %1058 = vadd.xlane.f32.xlu2 %v1057_v42 }
 0x2de   : > { %1067 = vadd.xlane.f32.xlu1 %v1066_v19 }
 0x2df   : > { %1064 = vadd.xlane.f32.xlu2 %v1063_v32 }
 0x2e6   : > { %1073 = vadd.xlane.f32.xlu1 %v1072_v60 }
 0x2e7   : > { %1070 = vadd.xlane.f32.xlu2 %v1069_v12 }
 0x2ee   : > { %1079 = vadd.xlane.f32.xlu1 %v1078_v33 }
 0x2ef   : > { %1076 = vadd.xlane.f32.xlu2 %v1075_v37 }
 0x2f6   : > { %1086 = vadd.xlane.f32.xlu1 %v1085_v3 }
 0x2f7   : > { %1082 = vadd.xlane.f32.xlu2 %v1081_v16 }
 0x331   : > { %v1041_v61 = vpop.xlane.xlu1 %1040  ;;  %v1056_v23 = vpop.xlane.xlu0 %1055 }
 0x332   : > { %v1107_v1 = vrot.slane %v1041_v61, 4  ;;  %v1038_v24 = vpop.xlane.xlu2 %1037  ;;  %v1117_v19 = vrot.slane %v1056_v23, 4 }
 0x333   : > { %v1106_v40 = vrot.slane %v1038_v24, 4 }
 0x335   : > { %v1108_v28 = vsel %vm1105_vm14, %v1106_v40, %v1107_v1 }
 0x336   : > { %v2361_v10 = vadd.f32 %v1108_v28, %v2253_v6 }
 0x339   : > { %v1047_v58 = vpop.xlane.xlu1 %1046 }
 0x33a   : > { %v1111_v50 = vrot.slane %v1047_v58, 4  ;;  %v1044_v13 = vpop.xlane.xlu2 %1043 }
 0x33b   : > { %v1109_v59 = vrot.slane %v1044_v13, 4 }
 0x33d   : > { %v1110_v57 = vsel %vm1105_vm14, %v1107_v1, %v1109_v59  ;;  %v1112_v47 = vsel %vm1105_vm14, %v1109_v59, %v1111_v50 }
 0x33e   : > { %v2366_v42 = vadd.f32 %v1110_v57, %v2258_v48  ;;  %v2369_v53 = vadd.f32 %v1112_v47, %v2261_v36 }
 0x341   : > { %v1053_v25 = vpop.xlane.xlu1 %1052 }
 0x342   : > { %v1115_v32 = vrot.slane %v1053_v25, 4  ;;  %v1050_v6 = vpop.xlane.xlu2 %1049 }
 0x343   : > { %v1113_v39 = vrot.slane %v1050_v6, 4 }
 0x344   : > { %v1118_v41 = vsel %vm1105_vm14, %v1115_v32, %v1117_v19  ;;  %v1176_v60 = vpop.permute.xlu0 %1175 }
 0x345   : > { %v2373_v12 = vadd.f32 %v1118_v41, %v2265_v8  ;;  %v1114_v54 = vsel %vm1105_vm14, %v1111_v50, %v1113_v39  ;;  %v1116_v18 = vsel %vm1105_vm14, %v1113_v39, %v1115_v32  ;;  %v2378_v48 = vperm.slane %v1176_v60, %v1880_v11 }
 0x346   : > { %v2381_v36 = vadd.f32 %v1114_v54, %v2270_v27  ;;  %v2384_v33 = vadd.f32 %v1116_v18, %v2273_v49 }
 0x347   : > { %v1194_v37 = vmul.f32 %v2378_v48, %v1924_v51  ;;  %v1189_v8 = vmul.f32 %v2378_v48, %v1888_v21  ;;  %v1188_v29 = vmul.f32 %v2378_v48, %v1890_v22  ;;  %v1202_v28 = vmul.f32 %v2378_v48, %v1979_v44 }
 0x348   : > { %v1191_v58 = vmul.f32 %v2378_v48, %v1886_v20  ;;  %v1190_v59 = vmul.f32 %v2378_v48, %v1907_v35  ;;  %v1204_v39 = vmul.f32 %v2378_v48, %v2011_v5  ;;  %v1193_v41 = vmul.f32 %v2378_v48, %v1926_v52 }
 0x349   : > { %v1062_v9 = vpop.xlane.xlu1 %1061  ;;  %v1224_v3 = vsel %vm432_vm3, %v1194_v37, 0.0  ;;  %v1209_v16 = vsel %vm432_vm3, %v1189_v8, 0.0  ;;  %v1206_v27 = vsel %vm1205_vm15, %v1188_v29, 0.0  ;;  %v1248_v57 = vsel %vm432_vm3, %v1202_v28, 0.0 }
 0x34a   : > { %v1121_v61 = vrot.slane %v1062_v9, 4  ;;  %v1059_v1 = vpop.xlane.xlu2 %1058  ;;  %1225 = vadd.xlane.f32.xlu0 %v1224_v3  ;;  %1210 = vadd.xlane.f32.xlu1 %v1209_v16  ;;  %v1215_v47 = vsel %vm432_vm3, %v1191_v58, 0.0  ;;  %v1212_v32 = vsel %vm432_vm3, %v1190_v59, 0.0  ;;  %v1192_v18 = vmul.f32 %v2378_v48, %v1905_v34 }
 0x34b   : > { %v1119_v49 = vrot.slane %v1059_v1, 4  ;;  %1207 = vadd.xlane.f32.xlu2 %v1206_v27  ;;  %v1255_v8 = vsel %vm1254_vm0, %v1204_v39, 0.0  ;;  %v1221_v29 = vsel %vm432_vm3, %v1193_v41, 0.0  ;;  %v1199_v41 = vmul.f32 %v2378_v48, %v1967_v31 }
 0x34c   : > { %v1218_v16 = vsel %vm432_vm3, %v1192_v18, 0.0  ;;  %v1681_v18 = vld [vmem:[%s2688_s2 + $0x30] sm:$0xff] }
 0x34d   : > { %v1120_v24 = vsel %vm1105_vm14, %v1117_v19, %v1119_v49  ;;  %v1122_v40 = vsel %vm1105_vm14, %v1119_v49, %v1121_v61 }
 0x34e   : > { %v2401_v50 = vadd.f32 %v1120_v24, %v2278_v62  ;;  %v2404_v13 = vadd.f32 %v1122_v40, %v2281_v55  ;;  %v1195_v24 = vmul.f32 %v2378_v48, %v1940_v0 }
 0x351   : > { %v1068_v23 = vpop.xlane.xlu1 %1067 }
 0x352   : > { %v1125_v25 = vrot.slane %v1068_v23, 4  ;;  %v1065_v19 = vpop.xlane.xlu2 %1064  ;;  %1249 = vadd.xlane.f32.xlu0 %v1248_v57  ;;  %1216 = vadd.xlane.f32.xlu1 %v1215_v47  ;;  %v1227_v23 = vsel %vm432_vm3, %v1195_v24, 0.0 }
 0x353   : > { %v1123_v6 = vrot.slane %v1065_v19, 4  ;;  %1213 = vadd.xlane.f32.xlu2 %v1212_v32  ;;  %v1197_v19 = vmul.f32 %v2378_v48, %v1954_v15 }
 0x355   : > { %v1124_v62 = vsel %vm1105_vm14, %v1121_v61, %v1123_v6  ;;  %v1126_v55 = vsel %vm1105_vm14, %v1123_v6, %v1125_v25  ;;  %v1196_v61 = vmul.f32 %v2378_v48, %v1938_v63  ;;  %v1233_v6 = vsel %vm432_vm3, %v1197_v19, 0.0 }
 0x356   : > { %v2418_v60 = vadd.f32 %v1124_v62, %v2286_v4  ;;  %v2421_v54 = vadd.f32 %v1126_v55, %v2289_v2 }
 0x357   : > { %v1230_v28 = vsel %vm432_vm3, %v1196_v61, 0.0 }
 0x359   : > { %v1074_v37 = vpop.xlane.xlu1 %1073 }
 0x35a   : > { %v1129_v9 = vrot.slane %v1074_v37, 4  ;;  %v1071_v3 = vpop.xlane.xlu2 %1070  ;;  %1256 = vadd.xlane.f32.xlu0 %v1255_v8  ;;  %1222 = vadd.xlane.f32.xlu1 %v1221_v29  ;;  %v1239_v37 = vsel %vm432_vm3, %v1199_v41, 0.0  ;;  %v1203_v29 = vmul.f32 %v2378_v48, %v1909_v38 }
 0x35b   : > { %v1127_v27 = vrot.slane %v1071_v3, 4  ;;  %1219 = vadd.xlane.f32.xlu2 %v1218_v16  ;;  %v1201_v3 = vmul.f32 %v2378_v48, %v1981_v45 }
 0x35d   : > { %v1128_v4 = vsel %vm1105_vm14, %v1125_v25, %v1127_v27  ;;  %v1130_v2 = vsel %vm1105_vm14, %v1127_v27, %v1129_v9  ;;  %v1245_v16 = vsel %vm432_vm3, %v1201_v3, 0.0 }
 0x35e   : > { %v2432_v1 = vadd.f32 %v1128_v4, %v2294_v56  ;;  %v2435_v49 = vadd.f32 %v1130_v2, %v2297_v7 }
 0x361   : > { %v1080_v40 = vpop.xlane.xlu1 %1079 }
 0x362   : > { %v1133_v58 = vrot.slane %v1080_v40, 4  ;;  %v1077_v59 = vpop.xlane.xlu2 %1076  ;;  %1231 = vadd.xlane.f32.xlu1 %v1230_v28 }
 0x363   : > { %v1131_v57 = vrot.slane %v1077_v59, 4  ;;  %1228 = vadd.xlane.f32.xlu2 %v1227_v23 }
 0x365   : > { %v1132_v47 = vsel %vm1105_vm14, %v1129_v9, %v1131_v57  ;;  %v1134_v56 = vsel %vm1105_vm14, %v1131_v57, %v1133_v58  ;;  %v1251_v9 = vsel %vm432_vm3, %v1203_v29, 0.0 }
 0x366   : > { %v2444_v7 = vadd.f32 %v1132_v47, %v2304_v43  ;;  %v2447_v25 = vadd.f32 %v1134_v56, %v2307_v46  ;;  %v1198_v46 = vmul.f32 %v2378_v48, %v1952_v14 }
 0x368   : > { %v1236_v39 = vsel %vm432_vm3, %v1198_v46, 0.0 }
 0x369   : > { %v2479_v27 = vpop.xlane.xlu1 %1086 }
 0x36a   : > { %v2451_v32 = vpop.xlane.xlu2 %1082 }
 0x36b   : > { %v1135_v62 = vrot.slane %v2451_v32, 4  ;;  %1234 = vadd.xlane.f32.xlu2 %v1233_v6 }
 0x36d   : > { %v1136_v55 = vsel %vm1105_vm14, %v1133_v58, %v1135_v62 }
 0x36e   : > { %v2459_v43 = vadd.f32 %v1136_v55, %v2319_v26  ;;  %v1200_v26 = vmul.f32 %v2378_v48, %v1965_v30 }
 0x370   : > { %v1242_v8 = vsel %vm432_vm3, %v1200_v26, 0.0 }
 0x373   : > { %1237 = vadd.xlane.f32.xlu2 %v1236_v39 }
 0x37b   : > { %1240 = vadd.xlane.f32.xlu2 %v1239_v37  ;;  %1345 = vperm.xlu1 %1755, %v1681_v18  }
 0x383   : > { %1243 = vadd.xlane.f32.xlu2 %v1242_v8 }
 0x38b   : > { %1252 = vadd.xlane.f32.xlu2 %v1251_v9 }
 0x3a5   : > { %1246 = vadd.xlane.f32.xlu1 %v1245_v16 }
 0x3bd   : > { %v1211_v4 = vpop.xlane.xlu1 %1210  ;;  %v1226_v6 = vpop.xlane.xlu0 %1225 }
 0x3be   : > { %v1277_v2 = vrot.slane %v1211_v4, 5  ;;  %v1208_v61 = vpop.xlane.xlu2 %1207  ;;  %v1287_v46 = vrot.slane %v1226_v6, 5 }
 0x3bf   : > { %v1276_v24 = vrot.slane %v1208_v61, 5 }
 0x3c1   : > { %v1278_v40 = vsel %vm1275_vm1, %v1276_v24, %v1277_v2 }
 0x3c2   : > { %v2483_v28 = vadd.f32 %v1278_v40, %v2361_v10 }
 0x3c5   : > { %v1217_v58 = vpop.xlane.xlu1 %1216 }
 0x3c6   : > { %v1281_v59 = vrot.slane %v1217_v58, 5  ;;  %v1214_v23 = vpop.xlane.xlu2 %1213 }
 0x3c7   : > { %v1279_v57 = vrot.slane %v1214_v23, 5 }
 0x3c9   : > { %v1280_v48 = vsel %vm1275_vm1, %v1277_v2, %v1279_v57  ;;  %v1282_v47 = vsel %vm1275_vm1, %v1279_v57, %v1281_v59 }
 0x3ca   : > { %v2488_v56 = vadd.f32 %v1280_v48, %v2366_v42  ;;  %v2491_v19 = vadd.f32 %v1282_v47, %v2369_v53 }
 0x3cd   : > { %v1223_v55 = vpop.xlane.xlu1 %1222 }
 0x3ce   : > { %v1285_v39 = vrot.slane %v1223_v55, 5  ;;  %v1220_v10 = vpop.xlane.xlu2 %1219 }
 0x3cf   : > { %v1283_v41 = vrot.slane %v1220_v10, 5 }
 0x3d0   : > { %v1288_v18 = vsel %vm1275_vm1, %v1285_v39, %v1287_v46 }
 0x3d1   : > { %v2495_v37 = vadd.f32 %v1288_v18, %v2373_v12  ;;  %v1284_v26 = vsel %vm1275_vm1, %v1281_v59, %v1283_v41  ;;  %v1286_v8 = vsel %vm1275_vm1, %v1283_v41, %v1285_v39 }
 0x3d2   : > { %v2500_v42 = vadd.f32 %v1284_v26, %v2381_v36  ;;  %v2503_v53 = vadd.f32 %v1286_v8, %v2384_v33 }
 0x3d5   : > { %v1232_v29 = vpop.xlane.xlu1 %1231 }
 0x3d6   : > { %v1291_v9 = vrot.slane %v1232_v29, 5  ;;  %v1229_v3 = vpop.xlane.xlu2 %1228 }
 0x3d7   : > { %v1289_v16 = vrot.slane %v1229_v3, 5 }
 0x3d9   : > { %v1290_v4 = vsel %vm1275_vm1, %v1287_v46, %v1289_v16  ;;  %v1292_v2 = vsel %vm1275_vm1, %v1289_v16, %v1291_v9 }
 0x3da   : > { %v2508_v12 = vadd.f32 %v1290_v4, %v2401_v50  ;;  %v2511_v61 = vadd.f32 %v1292_v2, %v2404_v13 }
 0x3de   : > { %v1235_v24 = vpop.xlane.xlu2 %1234 }
 0x3df   : > { %v1293_v36 = vrot.slane %v1235_v24, 5 }
 0x3e1   : > { %v1294_v40 = vsel %vm1275_vm1, %v1291_v9, %v1293_v36 }
 0x3e2   : > { %v2515_v33 = vadd.f32 %v1294_v40, %v2418_v60 }
 0x3e6   : > { %v2517_v58 = vpop.xlane.xlu2 %1237 }
 0x3e7   : > { %v1295_v59 = vrot.slane %v2517_v58, 5 }
 0x3e9   : > { %v1296_v23 = vsel %vm1275_vm1, %v1293_v36, %v1295_v59 }
 0x3ea   : > { %v2524_v50 = vadd.f32 %v1296_v23, %v2421_v54 }
 0x3ed   : > { %v1346_v13 = vpop.permute.xlu1 %1345 }
 0x3ee   : > { %v1347_v57 = vperm.slane %v1346_v13, %v1880_v11  ;;  %v2559_v36 = vpop.xlane.xlu2 %1240 }
 0x3f0   : > { %v1365_v48 = vmul.f32 %v1347_v57, %v1938_v63  ;;  %v1358_v60 = vmul.f32 %v1347_v57, %v1888_v21  ;;  %v1357_v47 = vmul.f32 %v1347_v57, %v1890_v22  ;;  %v1368_v54 = vmul.f32 %v1347_v57, %v1967_v31 }
 0x3f1   : > { %v1360_v39 = vmul.f32 %v1347_v57, %v1886_v20  ;;  %v1359_v11 = vmul.f32 %v1347_v57, %v1907_v35  ;;  %v1371_v10 = vmul.f32 %v1347_v57, %v1979_v44  ;;  %v1362_v41 = vmul.f32 %v1347_v57, %v1926_v52 }
 0x3f2   : > { %v1399_v6 = vsel %vm432_vm3, %v1365_v48, 0.0  ;;  %v1378_v55 = vsel %vm432_vm3, %v1358_v60, 0.0  ;;  %v1375_v46 = vsel %vm1374_vm2, %v1357_v47, 0.0  ;;  %v1408_v63 = vsel %vm432_vm3, %v1368_v54, 0.0  ;;  %v2569_v48 = vld [vmem:[#allocation2] ss:$0 sm:$0xff] }
 0x3f3   : > { %1400 = vadd.xlane.f32.xlu1 %v1399_v6  ;;  %1379 = vadd.xlane.f32.xlu0 %v1378_v55  ;;  %v1384_v21 = vsel %vm432_vm3, %v1360_v39, 0.0  ;;  %v1381_v22 = vsel %vm432_vm3, %v1359_v11, 0.0  ;;  %v1361_v18 = vmul.f32 %v1347_v57, %v1905_v34  ;;  %v1417_v31 = vsel %vm432_vm3, %v1371_v10, 0.0 }
 0x3f4   : > { %1376 = vadd.xlane.f32.xlu2 %v1375_v46  ;;  %v1390_v20 = vsel %vm432_vm3, %v1362_v41, 0.0  ;;  %v1364_v26 = vmul.f32 %v1347_v57, %v1940_v0  ;;  %v1363_v8 = vmul.f32 %v1347_v57, %v1924_v51  ;;  %v1367_v34 = vmul.f32 %v1347_v57, %v1952_v14 }
 0x3f5   : > { %v1387_v35 = vsel %vm432_vm3, %v1361_v18, 0.0  ;;  %v1366_v44 = vmul.f32 %v1347_v57, %v1954_v15  ;;  %v1370_v0 = vmul.f32 %v1347_v57, %v1981_v45  ;;  %v1369_v51 = vmul.f32 %v1347_v57, %v1965_v30  ;;  %v2561_v45 = vpop.xlane.xlu0 %1249 }
 0x3f6   : > { %v1396_v29 = vsel %vm432_vm3, %v1364_v26, 0.0  ;;  %v1393_v52 = vsel %vm432_vm3, %v1363_v8, 0.0  ;;  %v1405_v9 = vsel %vm432_vm3, %v1367_v34, 0.0  ;;  %v1373_v14 = vmul.f32 %v1347_v57, %v2011_v5  ;;  %v2563_v30 = vpop.xlane.xlu2 %1243 }
 0x3f7   : > { %v1402_v3 = vsel %vm432_vm3, %v1366_v44, 0.0  ;;  %v1414_v16 = vsel %vm432_vm3, %v1370_v0, 0.0  ;;  %v1411_v4 = vsel %vm432_vm3, %v1369_v51, 0.0  ;;  %v1372_v15 = vmul.f32 %v1347_v57, %v1909_v38 }
 0x3f8   : > { %v1424_v2 = vsel %vm1423_vm4, %v1373_v14, 0.0 }
 0x3f9   : > { %v1420_v24 = vsel %vm432_vm3, %v1372_v15, 0.0  ;;  %vm1545_vm3 = vcmask 7168  }
 0x3fb   : > { %1409 = vadd.xlane.f32.xlu1 %v1408_v63  ;;  %1385 = vadd.xlane.f32.xlu0 %v1384_v21 }
 0x3fc   : > { %1382 = vadd.xlane.f32.xlu2 %v1381_v22 }
 0x3fd   : > { %v2565_v40 = vpop.xlane.xlu0 %1256 }
 0x3fe   : > { %v2567_v23 = vpop.xlane.xlu2 %1252 }
 0x403   : > { %1418 = vadd.xlane.f32.xlu1 %v1417_v31  ;;  %1391 = vadd.xlane.f32.xlu0 %v1390_v20 }
 0x404   : > { %1388 = vadd.xlane.f32.xlu2 %v1387_v35 }
 0x40b   : > { %1397 = vadd.xlane.f32.xlu0 %v1396_v29 }
 0x40c   : > { %1394 = vadd.xlane.f32.xlu2 %v1393_v52 }
 0x413   : > { %1406 = vadd.xlane.f32.xlu0 %v1405_v9 }
 0x414   : > { %1403 = vadd.xlane.f32.xlu2 %v1402_v3 }
 0x418   : > { %v2575_v39 = vpop.xlane.xlu1 %1246 }
 0x41b   : > { %1415 = vadd.xlane.f32.xlu0 %v1414_v16 }
 0x41c   : > { %1412 = vadd.xlane.f32.xlu2 %v1411_v4 }
 0x423   : > { %1425 = vadd.xlane.f32.xlu0 %v1424_v2 }
 0x424   : > { %1421 = vadd.xlane.f32.xlu2 %v1420_v24 }
 0x466   : > { %v1380_v5 = vpop.xlane.xlu0 %1379  ;;  %v1401_v26 = vpop.xlane.xlu1 %1400 }
 0x467   : > { %v1446_v13 = vrot.slane %v1380_v5, 6  ;;  %v1377_v38 = vpop.xlane.xlu2 %1376  ;;  %v1460_v51 = vrot.slane %v1401_v26, 6 }
 0x468   : > { %v1445_v57 = vrot.slane %v1377_v38, 6 }
 0x46a   : > { %v1447_v60 = vsel %vm1444_vm5, %v1445_v57, %v1446_v13 }
 0x46b   : > { %v1494_v47 = vadd.f32 %v1447_v60, %v2483_v28 }
 0x46d   : > { %v1513_v6 = vadd.f32 %v2569_v48, %v1494_v47 }
 0x46e   : > { %v1386_v55 = vpop.xlane.xlu0 %1385  ;;  %v1410_v15 = vpop.xlane.xlu1 %1409 }
 0x46f   : > { %1758 = vtanh.f32 %v1513_v6  ;;  %v1450_v46 = vrot.slane %v1386_v55, 6  ;;  %v1383_v54 = vpop.xlane.xlu2 %1382 }
 0x470   : > { %v1448_v11 = vrot.slane %v1383_v54, 6 }
 0x472   : > { %v1449_v63 = vsel %vm1444_vm5, %v1446_v13, %v1448_v11  ;;  %v1451_v21 = vsel %vm1444_vm5, %v1448_v11, %v1450_v46 }
 0x473   : > { %v1495_v28 = vadd.f32 %v1449_v63, %v2488_v56  ;;  %v1496_v22 = vadd.f32 %v1451_v21, %v2491_v19  ;;  %v1299_v63 = vrot.slane %v2563_v30, 5 }
 0x475   : > { %v1759_v10 = vpop.eup %1758  ;;  %v1514_v41 = vadd.f32 %v2569_v48, %v1495_v28  ;;  %v1515_v18 = vadd.f32 %v2569_v48, %v1496_v22 }
 0x476   : > { %1546 = vst.msk [vmem:[%s2582_s22] sm:$0xff] %vm1545_vm3, %v1759_v10  ;;  %v1392_v31 = vpop.xlane.xlu0 %1391  ;;  %v1303_v10 = vrot.slane %v2561_v45, 5 }
 0x477   : > { %1760 = vtanh.f32 %v1514_v41  ;;  %v1454_v20 = vrot.slane %v1392_v31, 6  ;;  %v1389_v35 = vpop.xlane.xlu2 %1388  ;;  %v1419_v31 = vpop.xlane.xlu1 %1418 }
 0x478   : > { %1762 = vtanh.f32 %v1515_v18  ;;  %v1452_v8 = vrot.slane %v1389_v35, 6 }
 0x47a   : > { %v1453_v56 = vsel %vm1444_vm5, %v1450_v46, %v1452_v8  ;;  %v1455_v19 = vsel %vm1444_vm5, %v1452_v8, %v1454_v20  ;;  %v1466_v46 = vrot.slane %v1410_v15, 6 }
 0x47b   : > { %v1497_v29 = vadd.f32 %v1453_v56, %v2500_v42  ;;  %v1498_v52 = vadd.f32 %v1455_v19, %v2503_v53  ;;  %v1297_v53 = vrot.slane %v2559_v36, 5  ;;  %v1472_v56 = vrot.slane %v1419_v31, 6 }
 0x47d   : > { %v1761_v34 = vpop.eup %1760  ;;  %v1516_v44 = vadd.f32 %v2569_v48, %v1497_v29  ;;  %v1517_v9 = vadd.f32 %v2569_v48, %v1498_v52  ;;  %v1298_v36 = vsel %vm1275_vm1, %v1295_v59, %v1297_v53  ;;  %v1301_v59 = vrot.slane %v2575_v39, 5 }
 0x47e   : > { %v1763_v3 = vpop.eup %1762  ;;  %1547 = vst.msk [vmem:[%s2582_s22 + $0x8] sm:$0xff] %vm1545_vm3, %v1761_v34  ;;  %v1398_v0 = vpop.xlane.xlu0 %1397  ;;  %v1335_v54 = vadd.f32 %v1298_v36, %v2432_v1  ;;  %v1300_v45 = vsel %vm1275_vm1, %v1297_v53, %v1299_v63  ;;  %v1137_v52 = vrot.slane %v2479_v27, 4 }
 0x47f   : > { %1548 = vst.msk [vmem:[%s2582_s22 + $0x10] sm:$0xff] %vm1545_vm3, %v1763_v3  ;;  %1764 = vtanh.f32 %v1516_v44  ;;  %v1458_v16 = vrot.slane %v1398_v0, 6  ;;  %v1395_v4 = vpop.xlane.xlu2 %1394  ;;  %v1304_v30 = vsel %vm1275_vm1, %v1301_v59, %v1303_v10 }
 0x480   : > { %1766 = vtanh.f32 %v1517_v9  ;;  %v1456_v42 = vrot.slane %v1395_v4, 6  ;;  %v1338_v34 = vadd.f32 %v1304_v30, %v2447_v25  ;;  %v1336_v9 = vadd.f32 %v1300_v45, %v2435_v49 }
 0x481   : > { %v1461_v14 = vsel %vm1444_vm5, %v1458_v16, %v1460_v51  ;;  %v1138_v49 = vsel %vm1105_vm14, %v1135_v62, %v1137_v52 }
 0x482   : > { %v1501_v2 = vadd.f32 %v1461_v14, %v2511_v61  ;;  %v1457_v24 = vsel %vm1444_vm5, %v1454_v20, %v1456_v42  ;;  %v1459_v5 = vsel %vm1444_vm5, %v1456_v42, %v1458_v16  ;;  %v1170_v62 = vadd.f32 %v1138_v49, %v2321_v17 }
 0x483   : > { %v1499_v13 = vadd.f32 %v1457_v24, %v2495_v37  ;;  %v1500_v38 = vadd.f32 %v1459_v5, %v2508_v12 }
 0x484   : > { %v1520_v57 = vadd.f32 %v2569_v48, %v1501_v2 }
 0x485   : > { %v1765_v60 = vpop.eup %1764  ;;  %v1518_v47 = vadd.f32 %v2569_v48, %v1499_v13  ;;  %v1519_v6 = vadd.f32 %v2569_v48, %v1500_v38 }
 0x486   : > { %v1767_v61 = vpop.eup %1766  ;;  %1549 = vst.msk [vmem:[%s2582_s22 + $0x18] sm:$0xff] %vm1545_vm3, %v1765_v60  ;;  %1768 = vtanh.f32 %v1520_v57  ;;  %v1407_v55 = vpop.xlane.xlu0 %1406 }
 0x487   : > { %1550 = vst.msk [vmem:[%s2582_s22 + $0x20] sm:$0xff] %vm1545_vm3, %v1767_v61  ;;  %1770 = vtanh.f32 %v1518_v47  ;;  %v1464_v37 = vrot.slane %v1407_v55, 6  ;;  %v1404_v12 = vpop.xlane.xlu2 %1403 }
 0x488   : > { %1772 = vtanh.f32 %v1519_v6  ;;  %v1462_v58 = vrot.slane %v1404_v12, 6 }
 0x489   : > { %v1467_v11 = vsel %vm1444_vm5, %v1464_v37, %v1466_v46 }
 0x48a   : > { %v1504_v21 = vadd.f32 %v1467_v11, %v1335_v54  ;;  %v1463_v28 = vsel %vm1444_vm5, %v1460_v51, %v1462_v58  ;;  %v1465_v22 = vsel %vm1444_vm5, %v1462_v58, %v1464_v37  ;;  %v1305_v51 = vrot.slane %v2567_v23, 5 }
 0x48b   : > { %v1502_v41 = vadd.f32 %v1463_v28, %v2515_v33  ;;  %v1503_v1 = vadd.f32 %v1465_v22, %v2524_v50  ;;  %v1302_v33 = vsel %vm1275_vm1, %v1299_v63, %v1301_v59 }
 0x48c   : > { %v1769_v18 = vpop.eup %1768  ;;  %v1523_v39 = vadd.f32 %v2569_v48, %v1504_v21  ;;  %v1337_v3 = vadd.f32 %v1302_v33, %v2444_v7  ;;  %v1307_v7 = vrot.slane %v2565_v40, 5  ;;  %v1306_v5 = vsel %vm1275_vm1, %v1303_v10, %v1305_v51 }
 0x48d   : > { %v1771_v20 = vpop.eup %1770  ;;  %1553 = vst.msk [vmem:[%s2582_s22 + $0x38] sm:$0xff] %vm1545_vm3, %v1769_v18  ;;  %v1521_v35 = vadd.f32 %v2569_v48, %v1502_v41  ;;  %v1522_v26 = vadd.f32 %v2569_v48, %v1503_v1  ;;  %v1339_v60 = vadd.f32 %v1306_v5, %v2459_v43 }
 0x48e   : > { %v1773_v8 = vpop.eup %1772  ;;  %1551 = vst.msk [vmem:[%s2582_s22 + $0x28] sm:$0xff] %vm1545_vm3, %v1771_v20  ;;  %1774 = vtanh.f32 %v1523_v39  ;;  %v1416_v50 = vpop.xlane.xlu0 %1415  ;;  %v1308_v13 = vsel %vm1275_vm1, %v1305_v51, %v1307_v7 }
 0x48f   : > { %1552 = vst.msk [vmem:[%s2582_s22 + $0x30] sm:$0xff] %vm1545_vm3, %v1773_v8  ;;  %1776 = vtanh.f32 %v1521_v35  ;;  %v1470_v19 = vrot.slane %v1416_v50, 6  ;;  %v1413_v29 = vpop.xlane.xlu2 %1412  ;;  %v1340_v36 = vadd.f32 %v1308_v13, %v1170_v62 }
 0x490   : > { %1778 = vtanh.f32 %v1522_v26  ;;  %v1468_v44 = vrot.slane %v1413_v29, 6 }
 0x491   : > { %v1473_v0 = vsel %vm1444_vm5, %v1470_v19, %v1472_v56 }
 0x492   : > { %v1507_v16 = vadd.f32 %v1473_v0, %v1338_v34  ;;  %v1469_v4 = vsel %vm1444_vm5, %v1466_v46, %v1468_v44  ;;  %v1471_v42 = vsel %vm1444_vm5, %v1468_v44, %v1470_v19 }
 0x493   : > { %v1505_v27 = vadd.f32 %v1469_v4, %v1336_v9  ;;  %v1506_v53 = vadd.f32 %v1471_v42, %v1337_v3 }
 0x494   : > { %v1775_v25 = vpop.eup %1774  ;;  %v1526_v14 = vadd.f32 %v2569_v48, %v1507_v16 }
 0x495   : > { %v1777_v15 = vpop.eup %1776  ;;  %1556 = vst.msk [vmem:[%s2582_s22 + $0x50] sm:$0xff] %vm1545_vm3, %v1775_v25  ;;  %v1524_v23 = vadd.f32 %v2569_v48, %v1505_v27  ;;  %v1525_v2 = vadd.f32 %v2569_v48, %v1506_v53 }
 0x496   : > { %v1779_v24 = vpop.eup %1778  ;;  %1554 = vst.msk [vmem:[%s2582_s22 + $0x40] sm:$0xff] %vm1545_vm3, %v1777_v15  ;;  %1780 = vtanh.f32 %v1526_v14  ;;  %v1426_v32 = vpop.xlane.xlu0 %1425 }
 0x497   : > { %1555 = vst.msk [vmem:[%s2582_s22 + $0x48] sm:$0xff] %vm1545_vm3, %v1779_v24  ;;  %1782 = vtanh.f32 %v1524_v23  ;;  %v1476_v40 = vrot.slane %v1426_v32, 6  ;;  %v1422_v38 = vpop.xlane.xlu2 %1421 }
 0x498   : > { %1784 = vtanh.f32 %v1525_v2  ;;  %v1474_v57 = vrot.slane %v1422_v38, 6 }
 0x49a   : > { %v1475_v47 = vsel %vm1444_vm5, %v1472_v56, %v1474_v57  ;;  %v1477_v6 = vsel %vm1444_vm5, %v1474_v57, %v1476_v40 }
 0x49b   : > { %v1508_v61 = vadd.f32 %v1475_v47, %v1339_v60  ;;  %v1509_v17 = vadd.f32 %v1477_v6, %v1340_v36 }
 0x49c   : > { %v1781_v55 = vpop.eup %1780 }
 0x49d   : > { %v1783_v46 = vpop.eup %1782  ;;  %1559 = vst.msk [vmem:[%s2582_s22 + $0x68] sm:$0xff] %vm1545_vm3, %v1781_v55  ;;  %v1527_v37 = vadd.f32 %v2569_v48, %v1508_v61  ;;  %v1528_v12 = vadd.f32 %v2569_v48, %v1509_v17 }
 0x49e   : > { %v1785_v54 = vpop.eup %1784  ;;  %1557 = vst.msk [vmem:[%s2582_s22 + $0x58] sm:$0xff] %vm1545_vm3, %v1783_v46 }
 0x49f   : > { %1558 = vst.msk [vmem:[%s2582_s22 + $0x60] sm:$0xff] %vm1545_vm3, %v1785_v54  ;;  %1786 = vtanh.f32 %v1527_v37 }
 0x4a0   : > { %1788 = vtanh.f32 %v1528_v12 }
 0x4a5   : > { %v1787_v43 = vpop.eup %1786 }
 0x4a6   : > { %v1789_v58 = vpop.eup %1788  ;;  %1560 = vst.msk [vmem:[%s2582_s22 + $0x70] sm:$0xff] %vm1545_vm3, %v1787_v43 }
 0x4a7   : > { %1561 = vst.msk [vmem:[%s2582_s22 + $0x78] sm:$0xff] %vm1545_vm3, %v1789_v58 }
 0x4a8 PF: > { %s16_s19 = sadd.s32 1, %s1812_s19   ;;  %s2691_s17 = smov %s1808_s18 }
 0x4a9   : > { %p13_p5 = scmp.ge.s32.totalorder %s16_s19, 4   ;;  %s2692_s18 = smov %s2694_s3 }
 0x4ab   :  { %15 = sbr.rel (!%p13_p5) target bundleno = 3 (0x3), region = 75 }

</bundles_post_ra>
